<compile_context>
chip_gen: v7x
topology: tpu7x:2x2x1
jax: 0.10.0
libtpu: 0.0.40
codegen_flags: <defaults>
</compile_context>

<pallas_src>
import functools
import math

import jax
import jax.numpy as jnp
from jax import lax
from jax.experimental import pallas as pl
from jax.experimental.pallas import tpu as pltpu

# ----------------------------- hyper-parameters ------------------------------
VOCAB    = 16
D_MODEL  = 32
N_HEADS  = 4
D_HEAD   = D_MODEL // N_HEADS
D_FF     = 64
N_LAYERS = 2
EPS      = 1e-6
LANES    = 128
NEG_INF  = -1e9


# ------------------------------ fused kernel ---------------------------------
def _fused_kernel(ids_ref, slab_ref, out_ref, attn_ref, *, layout, n_tok,
                  use_bd_bias, use_dec_bias):
    """One program = one fold-group of batch elements; everything VMEM resident.

    ids_ref : (1, n_tok, 2) int32   -- col 0 = src ids, col 1 = tgt ids
    slab_ref: (R, 128)      float32 -- all weights / PE / masks, row-packed
    out_ref : (1, n_tok, 128) f32   -- lane-padded log-probs (cols >= VOCAB are 0)
    attn_ref: (n_tok, D)    float32 -- scratch: per-head outputs merged here
    """
    def W(name):
        off, r, c = layout[name]
        return slab_ref[off:off + r, :c]          # static slice -> cheap VMEM load

    emb_scale = math.sqrt(D_MODEL)
    att_scale = 1.0 / math.sqrt(D_HEAD)

    pe       = W("pe")                                     # (n_tok, D), batch-tiled
    bd_bias  = W("bd_mask")  if use_bd_bias  else None     # enc-self / cross-attn
    dec_bias = W("dec_mask") if use_dec_bias else None     # dec-self (block-diag+causal)

    ids  = ids_ref[0]                                      # (n_tok, 2) int32
    iota = lax.broadcasted_iota(jnp.int32, (n_tok, VOCAB), 1)

    def embed(col, emb_name):
        one_hot = (ids[:, col:col + 1] == iota).astype(jnp.float32)    # (n_tok, VOCAB)
        return jnp.dot(one_hot, W(emb_name),
                       preferred_element_type=jnp.float32) * emb_scale + pe

    def layer_norm(x, g, b):
        mean = jnp.mean(x, axis=-1, keepdims=True)
        var  = jnp.sum((x - mean) ** 2, axis=-1, keepdims=True) * (1.0 / (D_MODEL - 1))
        inv  = pl.reciprocal(jnp.sqrt(var) + EPS, approx=True)          # EUP, not VALU
        return g * (x - mean) * inv + b

    def softmax(s):
        m = jnp.max(s, axis=-1, keepdims=True)
        e = jnp.exp(s - m)
        return e * pl.reciprocal(jnp.sum(e, axis=-1, keepdims=True), approx=True)

    def mha(q, k, v, o_w, o_b, bias):
        # per-head attention; head outputs land in attn_ref lanes, then ONE o_w matmul.
        for h in range(N_HEADS):
            sl = slice(h * D_HEAD, (h + 1) * D_HEAD)
            s = lax.dot_general(q[:, sl], k[:, sl], (((1,), (1,)), ((), ())),
                                preferred_element_type=jnp.float32) * att_scale
            if bias is not None:
                s = s + bias
            attn_ref[:, sl] = jnp.dot(softmax(s), v[:, sl],
                                      preferred_element_type=jnp.float32)
        return jnp.dot(attn_ref[...], o_w, preferred_element_type=jnp.float32) + o_b

    def ffn(x, w1, b1, w2, b2):
        h = jnp.maximum(jnp.dot(x, w1, preferred_element_type=jnp.float32) + b1, 0.0)
        return jnp.dot(h, w2, preferred_element_type=jnp.float32) + b2

    # ---------------- encoder ----------------
    x = embed(0, "src_emb")
    for l in range(N_LAYERS):
        p = lambda n: W(f"e{l}.{n}")
        xn  = layer_norm(x, p("ln1_g"), p("ln1_b"))
        qkv = jnp.dot(xn, p("qkv_w"), preferred_element_type=jnp.float32) + p("qkv_b")
        q, k, v = qkv[:, :D_MODEL], qkv[:, D_MODEL:2 * D_MODEL], qkv[:, 2 * D_MODEL:]
        x  = x + mha(q, k, v, p("o_w"), p("o_b"), bd_bias)
        xn = layer_norm(x, p("ln2_g"), p("ln2_b"))
        x  = x + ffn(xn, p("w1"), p("b1"), p("w2"), p("b2"))
    memory = layer_norm(x, W("enc_norm_g"), W("enc_norm_b"))

    # ---------------- decoder ----------------
    y = embed(1, "tgt_emb")
    for l in range(N_LAYERS):
        p = lambda n: W(f"d{l}.{n}")
        yn  = layer_norm(y, p("ln1_g"), p("ln1_b"))
        qkv = jnp.dot(yn, p("sa_qkv_w"), preferred_element_type=jnp.float32) + p("sa_qkv_b")
        q, k, v = qkv[:, :D_MODEL], qkv[:, D_MODEL:2 * D_MODEL], qkv[:, 2 * D_MODEL:]
        y  = y + mha(q, k, v, p("sa_o_w"), p("sa_o_b"), dec_bias)

        yn = layer_norm(y, p("ln2_g"), p("ln2_b"))
        q  = jnp.dot(yn, p("ca_q_w"), preferred_element_type=jnp.float32) + p("ca_q_b")
        kv = jnp.dot(memory, p("ca_kv_w"), preferred_element_type=jnp.float32) + p("ca_kv_b")
        k, v = kv[:, :D_MODEL], kv[:, D_MODEL:]
        y  = y + mha(q, k, v, p("ca_o_w"), p("ca_o_b"), bd_bias)

        yn = layer_norm(y, p("ln3_g"), p("ln3_b"))
        y  = y + ffn(yn, p("w1"), p("b1"), p("w2"), p("b2"))
    y = layer_norm(y, W("dec_norm_g"), W("dec_norm_b"))

    # ------------- generator (log-softmax), lane-padded output -------------
    logits  = jnp.dot(y, W("gen_w"), preferred_element_type=jnp.float32) + W("gen_b")
    m       = jnp.max(logits, axis=-1, keepdims=True)
    shifted = logits - m
    logp    = shifted - jnp.log(jnp.sum(jnp.exp(shifted), axis=-1, keepdims=True))
    out_ref[...] = jnp.zeros_like(out_ref)          # lane-dense 128-wide block
    out_ref[0, :, :VOCAB] = logp


# ----------------------- host-side slab packing -------------------------------
def _pad_chunk(a):
    """Pad a (possibly 1-D) tensor to (8k, 128) f32 rows for the slab."""
    a = jnp.asarray(a, jnp.float32)
    if a.ndim == 1:
        a = a.reshape(1, -1)
    r, c = a.shape
    assert c <= LANES, f"tensor too wide for 128-lane slab: {a.shape}"
    rp = ((r + 7) // 8) * 8
    out = jnp.zeros((rp, LANES), jnp.float32).at[:r, :c].set(a)
    return out, (r, c)


def build_slab(params, pe_fold, bd_mask, dec_mask):
    """Pack every weight / PE / mask into one (R, 128) f32 slab + static layout map."""
    named = []
    add = lambda name, a: named.append((name, a))

    qkv_w = lambda ab: jnp.concatenate([ab["q"]["w"], ab["k"]["w"], ab["v"]["w"]], axis=1)
    qkv_b = lambda ab: jnp.concatenate([ab["q"]["b"], ab["k"]["b"], ab["v"]["b"]])
    kv_w  = lambda ab: jnp.concatenate([ab["k"]["w"], ab["v"]["w"]], axis=1)
    kv_b  = lambda ab: jnp.concatenate([ab["k"]["b"], ab["v"]["b"]])

    add("pe", pe_fold)
    add("bd_mask", bd_mask)
    add("dec_mask", dec_mask)
    add("src_emb", params["src_emb"])
    add("tgt_emb", params["tgt_emb"])
    add("enc_norm_g", params["enc_norm"]["g"]); add("enc_norm_b", params["enc_norm"]["b"])
    add("dec_norm_g", params["dec_norm"]["g"]); add("dec_norm_b", params["dec_norm"]["b"])
    add("gen_w", params["gen"]["w"]);           add("gen_b", params["gen"]["b"])

    for l, lp in enumerate(params["enc_layers"]):
        add(f"e{l}.ln1_g", lp["ln1"]["g"]);      add(f"e{l}.ln1_b", lp["ln1"]["b"])
        add(f"e{l}.qkv_w", qkv_w(lp["self"]));   add(f"e{l}.qkv_b", qkv_b(lp["self"]))
        add(f"e{l}.o_w", lp["self"]["o"]["w"]);  add(f"e{l}.o_b", lp["self"]["o"]["b"])
        add(f"e{l}.ln2_g", lp["ln2"]["g"]);      add(f"e{l}.ln2_b", lp["ln2"]["b"])
        add(f"e{l}.w1", lp["ffn"]["w1"]["w"]);   add(f"e{l}.b1", lp["ffn"]["w1"]["b"])
        add(f"e{l}.w2", lp["ffn"]["w2"]["w"]);   add(f"e{l}.b2", lp["ffn"]["w2"]["b"])

    for l, lp in enumerate(params["dec_layers"]):
        add(f"d{l}.ln1_g", lp["ln1"]["g"]);          add(f"d{l}.ln1_b", lp["ln1"]["b"])
        add(f"d{l}.sa_qkv_w", qkv_w(lp["self"]));    add(f"d{l}.sa_qkv_b", qkv_b(lp["self"]))
        add(f"d{l}.sa_o_w", lp["self"]["o"]["w"]);   add(f"d{l}.sa_o_b", lp["self"]["o"]["b"])
        add(f"d{l}.ln2_g", lp["ln2"]["g"]);          add(f"d{l}.ln2_b", lp["ln2"]["b"])
        add(f"d{l}.ca_q_w", lp["cross"]["q"]["w"]);  add(f"d{l}.ca_q_b", lp["cross"]["q"]["b"])
        add(f"d{l}.ca_kv_w", kv_w(lp["cross"]));     add(f"d{l}.ca_kv_b", kv_b(lp["cross"]))
        add(f"d{l}.ca_o_w", lp["cross"]["o"]["w"]);  add(f"d{l}.ca_o_b", lp["cross"]["o"]["b"])
        add(f"d{l}.ln3_g", lp["ln3"]["g"]);          add(f"d{l}.ln3_b", lp["ln3"]["b"])
        add(f"d{l}.w1", lp["ffn"]["w1"]["w"]);       add(f"d{l}.b1", lp["ffn"]["w1"]["b"])
        add(f"d{l}.w2", lp["ffn"]["w2"]["w"]);       add(f"d{l}.b2", lp["ffn"]["w2"]["b"])

    layout, chunks, off = {}, [], 0
    for name, a in named:
        padded, (r, c) = _pad_chunk(a)
        layout[name] = (off, r, c)
        chunks.append(padded)
        off += padded.shape[0]
    return jnp.concatenate(chunks, axis=0), layout


# ------------------------------ forward wrapper --------------------------------
def encoder_decoder_forward(params, src, tgt, tgt_mask=None, pe=None, num_groups=1):
    """forward(src, tgt, tgt_mask) = generator(decode(encode(src), tgt, tgt_mask)).

    num_groups=1 folds the whole batch into one program (best on v5e/v6e, 1 TC);
    num_groups=2 shards the folded batch across both TCs on v7x.
    """
    B, S = src.shape
    assert tgt.shape == (B, S), "src and tgt must share (batch, seq) shape"
    G = num_groups
    assert B % G == 0, "batch must divide num_groups"
    Bg = B // G
    n_tok = Bg * S
    assert n_tok <= LANES, "folded group length must fit in 128 lanes for the masks"

    if pe is None:
        pe = positional_encoding(S, D_MODEL)
    pe_fold = jnp.tile(pe[:S].astype(jnp.float32), (Bg, 1))               # (n_tok, D)

    # Block-diagonal additive bias: batch elements folded into one sequence must not
    # attend across each other (used for encoder-self and cross attention).
    batch_id = jnp.arange(n_tok) // S
    same = batch_id[:, None] == batch_id[None, :]
    bd_mask = jnp.where(same, 0.0, NEG_INF).astype(jnp.float32)

    # Decoder self-attention bias: block-diagonal AND tgt_mask within each element.
    if tgt_mask is None:
        vis = same
    else:
        pos = jnp.arange(n_tok) % S
        vis = same & (tgt_mask.astype(jnp.float32)[pos[:, None], pos[None, :]] > 0)
    dec_mask = jnp.where(vis, 0.0, NEG_INF).astype(jnp.float32)

    slab, layout = build_slab(params, pe_fold, bd_mask, dec_mask)

    ids = jnp.stack([src.astype(jnp.int32), tgt.astype(jnp.int32)], axis=-1)  # (B,S,2)
    ids = ids.reshape(G, n_tok, 2)

    kernel = functools.partial(
        _fused_kernel, layout=layout, n_tok=n_tok,
        use_bd_bias=(Bg > 1),
        use_dec_bias=(Bg > 1) or (tgt_mask is not None))

    out = pl.pallas_call(
        kernel,
        out_shape=jax.ShapeDtypeStruct((G, n_tok, LANES), jnp.float32),
        grid=(G,),
        in_specs=[
            pl.BlockSpec((1, n_tok, 2), lambda g: (g, 0, 0)),   # token ids (per group)
            pl.BlockSpec(slab.shape, lambda g: (0, 0)),         # one packed weight slab
        ],
        out_specs=pl.BlockSpec((1, n_tok, LANES), lambda g: (g, 0, 0)),
        scratch_shapes=[pltpu.VMEM((n_tok, D_MODEL), jnp.float32)],   # head-merge scratch
        compiler_params=pltpu.CompilerParams(
            dimension_semantics=("parallel",)),                 # v7x: groups across TCs
    )(ids, slab)

    return out[..., :VOCAB].reshape(B, S, VOCAB)


# --------------------------- deterministic parameters -------------------------
def positional_encoding(max_len, d_model):
    pos = jnp.arange(max_len, dtype=jnp.float32)[:, None]
    div = jnp.exp(jnp.arange(0, d_model, 2, dtype=jnp.float32)
                  * (-math.log(10000.0) / d_model))
    pe = jnp.zeros((max_len, d_model), jnp.float32)
    pe = pe.at[:, 0::2].set(jnp.sin(pos * div))
    pe = pe.at[:, 1::2].set(jnp.cos(pos * div))
    return pe


def init_params(key):
    keys = iter(jax.random.split(key, 256))

    def dense(din, dout):
        return {"w": 0.05 * jax.random.normal(next(keys), (din, dout), jnp.float32),
                "b": jnp.zeros((dout,), jnp.float32)}

    def attn_block():
        return {"q": dense(D_MODEL, D_MODEL), "k": dense(D_MODEL, D_MODEL),
                "v": dense(D_MODEL, D_MODEL), "o": dense(D_MODEL, D_MODEL)}

    def ln():
        return {"g": jnp.ones((D_MODEL,), jnp.float32),
                "b": jnp.zeros((D_MODEL,), jnp.float32)}

    def ffn():
        return {"w1": dense(D_MODEL, D_FF), "w2": dense(D_FF, D_MODEL)}

    return {
        "src_emb": 0.05 * jax.random.normal(next(keys), (VOCAB, D_MODEL), jnp.float32),
        "tgt_emb": 0.05 * jax.random.normal(next(keys), (VOCAB, D_MODEL), jnp.float32),
        "enc_layers": [{"self": attn_block(), "ffn": ffn(), "ln1": ln(), "ln2": ln()}
                       for _ in range(N_LAYERS)],
        "enc_norm": ln(),
        "dec_layers": [{"self": attn_block(), "cross": attn_block(), "ffn": ffn(),
                        "ln1": ln(), "ln2": ln(), "ln3": ln()}
                       for _ in range(N_LAYERS)],
        "dec_norm": ln(),
        "gen": dense(D_MODEL, VOCAB),
    }


# ------------------------------------ main ------------------------------------
if __name__ == "__main__":
    key = jax.random.PRNGKey(0)
    pkey, skey, tkey = jax.random.split(key, 3)

    params = init_params(pkey)

    B, S = 2, 8
    src = jax.random.randint(skey, (B, S), 0, VOCAB, dtype=jnp.int32)
    tgt = jax.random.randint(tkey, (B, S), 0, VOCAB, dtype=jnp.int32)
    tgt_mask = jnp.tril(jnp.ones((S, S), jnp.float32))   # subsequent (causal) mask
    pe = positional_encoding(64, D_MODEL)

    # num_groups=1: whole batch folded into one program (optimal on 1-TC chips).
    out = encoder_decoder_forward(params, src, tgt, tgt_mask, pe, num_groups=1)
    out = jax.block_until_ready(out)

    assert out.shape == (B, S, VOCAB), out.shape
    assert bool(jnp.all(jnp.isfinite(out)))
    # generator emits log-probs: each row should (approximately) sum to 1 after exp
    assert bool(jnp.allclose(jnp.exp(out).sum(-1), 1.0, atol=1e-4))
    print("KERNEL_OK")
</pallas_src>

<mosaic_0001>
module attributes {stable_mosaic.version = 11 : i64} {
  func.func @_fused_kernel(%arg0: i32, %arg1: memref<1x16x2xi32, #tpu.memory_space<vmem>>, %arg2: memref<1320x128xf32, #tpu.memory_space<vmem>>, %arg3: memref<1x16x128xf32, #tpu.memory_space<vmem>>, %arg4: memref<16x32xf32, #tpu.memory_space<vmem>>) attributes {dimension_semantics = [#tpu.dimension_semantics<parallel>], iteration_bounds = array<i64: 1>, scalar_prefetch = 0 : i64, scratch_operands = 1 : i64, tpu.core_type = #tpu.core_type<tc>, window_params = [{transform_indices = @transform_0, window_bounds = array<i64: 1, 16, 2>}, {pipeline_mode = #tpu.pipeline_mode<synchronous>, transform_indices = @transform_1, window_bounds = array<i64: 1320, 128>}, {transform_indices = @transform_2, window_bounds = array<i64: 1, 16, 128>}]} {
    %c0 = arith.constant 0 : index
    %c0_0 = arith.constant 0 : index
    %0 = vector.load %arg2[%c0, %c0_0] : memref<1320x128xf32, #tpu.memory_space<vmem>>, vector<16x32xf32>
    %c16 = arith.constant 16 : index
    %c0_1 = arith.constant 0 : index
    %1 = vector.load %arg2[%c16, %c0_1] : memref<1320x128xf32, #tpu.memory_space<vmem>>, vector<16x16xf32>
    %c32 = arith.constant 32 : index
    %c0_2 = arith.constant 0 : index
    %2 = vector.load %arg2[%c32, %c0_2] : memref<1320x128xf32, #tpu.memory_space<vmem>>, vector<16x16xf32>
    %c0_3 = arith.constant 0 : index
    %c0_4 = arith.constant 0 : index
    %c0_5 = arith.constant 0 : index
    %3 = vector.load %arg1[%c0_3, %c0_4, %c0_5] : memref<1x16x2xi32, #tpu.memory_space<vmem>>, vector<1x16x2xi32>
    %4 = vector.shape_cast %3 : vector<1x16x2xi32> to vector<16x2xi32>
    %5 = tpu.iota {dimensions = array<i32: 1>} : vector<16x16xi32>
    %6 = vector.extract_strided_slice %4 {offsets = [0, 0], sizes = [16, 1], strides = [1, 1]} : vector<16x2xi32> to vector<16x1xi32>
    %7 = vector.broadcast %6 : vector<16x1xi32> to vector<16x16xi32>
    %8 = arith.cmpi eq, %7, %5 : vector<16x16xi32>
    %9 = arith.extui %8 : vector<16x16xi1> to vector<16x16xi32>
    %10 = arith.sitofp %9 : vector<16x16xi32> to vector<16x16xf32>
    %c48 = arith.constant 48 : index
    %c0_6 = arith.constant 0 : index
    %11 = vector.load %arg2[%c48, %c0_6] : memref<1320x128xf32, #tpu.memory_space<vmem>>, vector<16x32xf32>
    %cst = arith.constant dense<0.000000e+00> : vector<16x32xf32>
    %12 = tpu.matmul %10, %11, %cst {dimension_numbers = #tpu.dot_dimension_numbers<[1], [0], [0], [1], [0, 0, 1, 1], [], []>} : vector<16x16xf32>, vector<16x32xf32>, vector<16x32xf32> -> vector<16x32xf32>
    %cst_7 = arith.constant 5.65685415 : f32
    %13 = vector.broadcast %cst_7 : f32 to vector<16x32xf32>
    %14 = arith.mulf %12, %13 : vector<16x32xf32>
    %15 = arith.addf %14, %0 : vector<16x32xf32>
    %c152 = arith.constant 152 : index
    %c0_8 = arith.constant 0 : index
    %16 = vector.load %arg2[%c152, %c0_8] : memref<1320x128xf32, #tpu.memory_space<vmem>>, vector<1x32xf32>
    %c160 = arith.constant 160 : index
    %c0_9 = arith.constant 0 : index
    %17 = vector.load %arg2[%c160, %c0_9] : memref<1320x128xf32, #tpu.memory_space<vmem>>, vector<1x32xf32>
    %cst_10 = arith.constant dense<0.000000e+00> : vector<16xf32>
    %18 = vector.multi_reduction <add>, %15, %cst_10 [1] : vector<16x32xf32> to vector<16xf32>
    %19 = vector.shape_cast %18 : vector<16xf32> to vector<16x1xf32>
    %cst_11 = arith.constant 3.200000e+01 : f32
    %20 = vector.broadcast %cst_11 : f32 to vector<16x1xf32>
    %21 = arith.divf %19, %20 : vector<16x1xf32>
    %22 = vector.broadcast %21 : vector<16x1xf32> to vector<16x32xf32>
    %23 = arith.subf %15, %22 : vector<16x32xf32>
    %24 = arith.mulf %23, %23 : vector<16x32xf32>
    %cst_12 = arith.constant dense<0.000000e+00> : vector<16xf32>
    %25 = vector.multi_reduction <add>, %24, %cst_12 [1] : vector<16x32xf32> to vector<16xf32>
    %26 = vector.shape_cast %25 : vector<16xf32> to vector<16x1xf32>
    %cst_13 = arith.constant 0.0322580636 : f32
    %27 = vector.broadcast %cst_13 : f32 to vector<16x1xf32>
    %28 = arith.mulf %26, %27 : vector<16x1xf32>
    %29 = math.sqrt %28 : vector<16x1xf32>
    %cst_14 = arith.constant 9.99999997E-7 : f32
    %30 = vector.broadcast %cst_14 : f32 to vector<16x1xf32>
    %31 = arith.addf %29, %30 : vector<16x1xf32>
    %32 = tpu.reciprocal %31 {approx = true} : vector<16x1xf32> -> vector<16x1xf32>
    %33 = vector.broadcast %21 : vector<16x1xf32> to vector<16x32xf32>
    %34 = arith.subf %15, %33 : vector<16x32xf32>
    %35 = vector.broadcast %16 : vector<1x32xf32> to vector<16x32xf32>
    %36 = arith.mulf %35, %34 : vector<16x32xf32>
    %37 = vector.broadcast %32 : vector<16x1xf32> to vector<16x32xf32>
    %38 = arith.mulf %36, %37 : vector<16x32xf32>
    %39 = vector.broadcast %17 : vector<1x32xf32> to vector<16x32xf32>
    %40 = arith.addf %38, %39 : vector<16x32xf32>
    %c168 = arith.constant 168 : index
    %c0_15 = arith.constant 0 : index
    %41 = vector.load %arg2[%c168, %c0_15] : memref<1320x128xf32, #tpu.memory_space<vmem>>, vector<32x96xf32>
    %cst_16 = arith.constant dense<0.000000e+00> : vector<16x96xf32>
    %42 = tpu.matmul %40, %41, %cst_16 {dimension_numbers = #tpu.dot_dimension_numbers<[1], [0], [0], [1], [0, 0, 1, 1], [], []>} : vector<16x32xf32>, vector<32x96xf32>, vector<16x96xf32> -> vector<16x96xf32>
    %c200 = arith.constant 200 : index
    %c0_17 = arith.constant 0 : index
    %43 = vector.load %arg2[%c200, %c0_17] : memref<1320x128xf32, #tpu.memory_space<vmem>>, vector<1x96xf32>
    %44 = vector.broadcast %43 : vector<1x96xf32> to vector<16x96xf32>
    %45 = arith.addf %42, %44 : vector<16x96xf32>
    %46 = vector.extract_strided_slice %45 {offsets = [0, 0], sizes = [16, 32], strides = [1, 1]} : vector<16x96xf32> to vector<16x32xf32>
    %47 = vector.extract_strided_slice %45 {offsets = [0, 32], sizes = [16, 32], strides = [1, 1]} : vector<16x96xf32> to vector<16x32xf32>
    %48 = vector.extract_strided_slice %45 {offsets = [0, 64], sizes = [16, 32], strides = [1, 1]} : vector<16x96xf32> to vector<16x32xf32>
    %c208 = arith.constant 208 : index
    %c0_18 = arith.constant 0 : index
    %49 = vector.load %arg2[%c208, %c0_18] : memref<1320x128xf32, #tpu.memory_space<vmem>>, vector<32x32xf32>
    %c240 = arith.constant 240 : index
    %c0_19 = arith.constant 0 : index
    %50 = vector.load %arg2[%c240, %c0_19] : memref<1320x128xf32, #tpu.memory_space<vmem>>, vector<1x32xf32>
    %51 = vector.extract_strided_slice %46 {offsets = [0, 0], sizes = [16, 8], strides = [1, 1]} : vector<16x32xf32> to vector<16x8xf32>
    %52 = vector.extract_strided_slice %47 {offsets = [0, 0], sizes = [16, 8], strides = [1, 1]} : vector<16x32xf32> to vector<16x8xf32>
    %cst_20 = arith.constant dense<0.000000e+00> : vector<16x16xf32>
    %53 = tpu.matmul %51, %52, %cst_20 {dimension_numbers = #tpu.dot_dimension_numbers<[1], [1], [0], [0], [0, 0, 1, 0], [], []>} : vector<16x8xf32>, vector<16x8xf32>, vector<16x16xf32> -> vector<16x16xf32>
    %cst_21 = arith.constant 0.353553385 : f32
    %54 = vector.broadcast %cst_21 : f32 to vector<16x16xf32>
    %55 = arith.mulf %53, %54 : vector<16x16xf32>
    %56 = arith.addf %55, %1 : vector<16x16xf32>
    %cst_22 = arith.constant dense<0xFF800000> : vector<16xf32>
    %57 = vector.multi_reduction <maximumf>, %56, %cst_22 [1] : vector<16x16xf32> to vector<16xf32>
    %58 = vector.shape_cast %57 : vector<16xf32> to vector<16x1xf32>
    %59 = vector.broadcast %58 : vector<16x1xf32> to vector<16x16xf32>
    %60 = arith.subf %56, %59 : vector<16x16xf32>
    %61 = math.exp %60 : vector<16x16xf32>
    %cst_23 = arith.constant dense<0.000000e+00> : vector<16xf32>
    %62 = vector.multi_reduction <add>, %61, %cst_23 [1] : vector<16x16xf32> to vector<16xf32>
    %63 = vector.shape_cast %62 : vector<16xf32> to vector<16x1xf32>
    %64 = tpu.reciprocal %63 {approx = true} : vector<16x1xf32> -> vector<16x1xf32>
    %65 = vector.broadcast %64 : vector<16x1xf32> to vector<16x16xf32>
    %66 = arith.mulf %61, %65 : vector<16x16xf32>
    %67 = vector.extract_strided_slice %48 {offsets = [0, 0], sizes = [16, 8], strides = [1, 1]} : vector<16x32xf32> to vector<16x8xf32>
    %cst_24 = arith.constant dense<0.000000e+00> : vector<16x8xf32>
    %68 = tpu.matmul %66, %67, %cst_24 {dimension_numbers = #tpu.dot_dimension_numbers<[1], [0], [0], [1], [0, 0, 1, 1], [], []>} : vector<16x16xf32>, vector<16x8xf32>, vector<16x8xf32> -> vector<16x8xf32>
    %c0_25 = arith.constant 0 : index
    %c0_26 = arith.constant 0 : index
    %69 = vector.load %arg4[%c0_25, %c0_26] : memref<16x32xf32, #tpu.memory_space<vmem>>, vector<16x8xf32>
    tpu.vector_store %arg4[%c0_25, %c0_26], %68 {strides = array<i32>} : memref<16x32xf32, #tpu.memory_space<vmem>>, vector<16x8xf32>,
    %70 = vector.extract_strided_slice %46 {offsets = [0, 8], sizes = [16, 8], strides = [1, 1]} : vector<16x32xf32> to vector<16x8xf32>
    %71 = vector.extract_strided_slice %47 {offsets = [0, 8], sizes = [16, 8], strides = [1, 1]} : vector<16x32xf32> to vector<16x8xf32>
    %cst_27 = arith.constant dense<0.000000e+00> : vector<16x16xf32>
    %72 = tpu.matmul %70, %71, %cst_27 {dimension_numbers = #tpu.dot_dimension_numbers<[1], [1], [0], [0], [0, 0, 1, 0], [], []>} : vector<16x8xf32>, vector<16x8xf32>, vector<16x16xf32> -> vector<16x16xf32>
    %cst_28 = arith.constant 0.353553385 : f32
    %73 = vector.broadcast %cst_28 : f32 to vector<16x16xf32>
    %74 = arith.mulf %72, %73 : vector<16x16xf32>
    %75 = arith.addf %74, %1 : vector<16x16xf32>
    %cst_29 = arith.constant dense<0xFF800000> : vector<16xf32>
    %76 = vector.multi_reduction <maximumf>, %75, %cst_29 [1] : vector<16x16xf32> to vector<16xf32>
    %77 = vector.shape_cast %76 : vector<16xf32> to vector<16x1xf32>
    %78 = vector.broadcast %77 : vector<16x1xf32> to vector<16x16xf32>
    %79 = arith.subf %75, %78 : vector<16x16xf32>
    %80 = math.exp %79 : vector<16x16xf32>
    %cst_30 = arith.constant dense<0.000000e+00> : vector<16xf32>
    %81 = vector.multi_reduction <add>, %80, %cst_30 [1] : vector<16x16xf32> to vector<16xf32>
    %82 = vector.shape_cast %81 : vector<16xf32> to vector<16x1xf32>
    %83 = tpu.reciprocal %82 {approx = true} : vector<16x1xf32> -> vector<16x1xf32>
    %84 = vector.broadcast %83 : vector<16x1xf32> to vector<16x16xf32>
    %85 = arith.mulf %80, %84 : vector<16x16xf32>
    %86 = vector.extract_strided_slice %48 {offsets = [0, 8], sizes = [16, 8], strides = [1, 1]} : vector<16x32xf32> to vector<16x8xf32>
    %cst_31 = arith.constant dense<0.000000e+00> : vector<16x8xf32>
    %87 = tpu.matmul %85, %86, %cst_31 {dimension_numbers = #tpu.dot_dimension_numbers<[1], [0], [0], [1], [0, 0, 1, 1], [], []>} : vector<16x16xf32>, vector<16x8xf32>, vector<16x8xf32> -> vector<16x8xf32>
    %c0_32 = arith.constant 0 : index
    %c8 = arith.constant 8 : index
    %88 = vector.load %arg4[%c0_32, %c8] : memref<16x32xf32, #tpu.memory_space<vmem>>, vector<16x8xf32>
    tpu.vector_store %arg4[%c0_32, %c8], %87 {strides = array<i32>} : memref<16x32xf32, #tpu.memory_space<vmem>>, vector<16x8xf32>,
    %89 = vector.extract_strided_slice %46 {offsets = [0, 16], sizes = [16, 8], strides = [1, 1]} : vector<16x32xf32> to vector<16x8xf32>
    %90 = vector.extract_strided_slice %47 {offsets = [0, 16], sizes = [16, 8], strides = [1, 1]} : vector<16x32xf32> to vector<16x8xf32>
    %cst_33 = arith.constant dense<0.000000e+00> : vector<16x16xf32>
    %91 = tpu.matmul %89, %90, %cst_33 {dimension_numbers = #tpu.dot_dimension_numbers<[1], [1], [0], [0], [0, 0, 1, 0], [], []>} : vector<16x8xf32>, vector<16x8xf32>, vector<16x16xf32> -> vector<16x16xf32>
    %cst_34 = arith.constant 0.353553385 : f32
    %92 = vector.broadcast %cst_34 : f32 to vector<16x16xf32>
    %93 = arith.mulf %91, %92 : vector<16x16xf32>
    %94 = arith.addf %93, %1 : vector<16x16xf32>
    %cst_35 = arith.constant dense<0xFF800000> : vector<16xf32>
    %95 = vector.multi_reduction <maximumf>, %94, %cst_35 [1] : vector<16x16xf32> to vector<16xf32>
    %96 = vector.shape_cast %95 : vector<16xf32> to vector<16x1xf32>
    %97 = vector.broadcast %96 : vector<16x1xf32> to vector<16x16xf32>
    %98 = arith.subf %94, %97 : vector<16x16xf32>
    %99 = math.exp %98 : vector<16x16xf32>
    %cst_36 = arith.constant dense<0.000000e+00> : vector<16xf32>
    %100 = vector.multi_reduction <add>, %99, %cst_36 [1] : vector<16x16xf32> to vector<16xf32>
    %101 = vector.shape_cast %100 : vector<16xf32> to vector<16x1xf32>
    %102 = tpu.reciprocal %101 {approx = true} : vector<16x1xf32> -> vector<16x1xf32>
    %103 = vector.broadcast %102 : vector<16x1xf32> to vector<16x16xf32>
    %104 = arith.mulf %99, %103 : vector<16x16xf32>
    %105 = vector.extract_strided_slice %48 {offsets = [0, 16], sizes = [16, 8], strides = [1, 1]} : vector<16x32xf32> to vector<16x8xf32>
    %cst_37 = arith.constant dense<0.000000e+00> : vector<16x8xf32>
    %106 = tpu.matmul %104, %105, %cst_37 {dimension_numbers = #tpu.dot_dimension_numbers<[1], [0], [0], [1], [0, 0, 1, 1], [], []>} : vector<16x16xf32>, vector<16x8xf32>, vector<16x8xf32> -> vector<16x8xf32>
    %c0_38 = arith.constant 0 : index
    %c16_39 = arith.constant 16 : index
    %107 = vector.load %arg4[%c0_38, %c16_39] : memref<16x32xf32, #tpu.memory_space<vmem>>, vector<16x8xf32>
    tpu.vector_store %arg4[%c0_38, %c16_39], %106 {strides = array<i32>} : memref<16x32xf32, #tpu.memory_space<vmem>>, vector<16x8xf32>,
    %108 = vector.extract_strided_slice %46 {offsets = [0, 24], sizes = [16, 8], strides = [1, 1]} : vector<16x32xf32> to vector<16x8xf32>
    %109 = vector.extract_strided_slice %47 {offsets = [0, 24], sizes = [16, 8], strides = [1, 1]} : vector<16x32xf32> to vector<16x8xf32>
    %cst_40 = arith.constant dense<0.000000e+00> : vector<16x16xf32>
    %110 = tpu.matmul %108, %109, %cst_40 {dimension_numbers = #tpu.dot_dimension_numbers<[1], [1], [0], [0], [0, 0, 1, 0], [], []>} : vector<16x8xf32>, vector<16x8xf32>, vector<16x16xf32> -> vector<16x16xf32>
    %cst_41 = arith.constant 0.353553385 : f32
    %111 = vector.broadcast %cst_41 : f32 to vector<16x16xf32>
    %112 = arith.mulf %110, %111 : vector<16x16xf32>
    %113 = arith.addf %112, %1 : vector<16x16xf32>
    %cst_42 = arith.constant dense<0xFF800000> : vector<16xf32>
    %114 = vector.multi_reduction <maximumf>, %113, %cst_42 [1] : vector<16x16xf32> to vector<16xf32>
    %115 = vector.shape_cast %114 : vector<16xf32> to vector<16x1xf32>
    %116 = vector.broadcast %115 : vector<16x1xf32> to vector<16x16xf32>
    %117 = arith.subf %113, %116 : vector<16x16xf32>
    %118 = math.exp %117 : vector<16x16xf32>
    %cst_43 = arith.constant dense<0.000000e+00> : vector<16xf32>
    %119 = vector.multi_reduction <add>, %118, %cst_43 [1] : vector<16x16xf32> to vector<16xf32>
    %120 = vector.shape_cast %119 : vector<16xf32> to vector<16x1xf32>
    %121 = tpu.reciprocal %120 {approx = true} : vector<16x1xf32> -> vector<16x1xf32>
    %122 = vector.broadcast %121 : vector<16x1xf32> to vector<16x16xf32>
    %123 = arith.mulf %118, %122 : vector<16x16xf32>
    %124 = vector.extract_strided_slice %48 {offsets = [0, 24], sizes = [16, 8], strides = [1, 1]} : vector<16x32xf32> to vector<16x8xf32>
    %cst_44 = arith.constant dense<0.000000e+00> : vector<16x8xf32>
    %125 = tpu.matmul %123, %124, %cst_44 {dimension_numbers = #tpu.dot_dimension_numbers<[1], [0], [0], [1], [0, 0, 1, 1], [], []>} : vector<16x16xf32>, vector<16x8xf32>, vector<16x8xf32> -> vector<16x8xf32>
    %c0_45 = arith.constant 0 : index
    %c24 = arith.constant 24 : index
    %126 = vector.load %arg4[%c0_45, %c24] : memref<16x32xf32, #tpu.memory_space<vmem>>, vector<16x8xf32>
    tpu.vector_store %arg4[%c0_45, %c24], %125 {strides = array<i32>} : memref<16x32xf32, #tpu.memory_space<vmem>>, vector<16x8xf32>,
    %c0_46 = arith.constant 0 : index
    %c0_47 = arith.constant 0 : index
    %127 = vector.load %arg4[%c0_46, %c0_47] : memref<16x32xf32, #tpu.memory_space<vmem>>, vector<16x32xf32>
    %cst_48 = arith.constant dense<0.000000e+00> : vector<16x32xf32>
    %128 = tpu.matmul %127, %49, %cst_48 {dimension_numbers = #tpu.dot_dimension_numbers<[1], [0], [0], [1], [0, 0, 1, 1], [], []>} : vector<16x32xf32>, vector<32x32xf32>, vector<16x32xf32> -> vector<16x32xf32>
    %129 = vector.broadcast %50 : vector<1x32xf32> to vector<16x32xf32>
    %130 = arith.addf %128, %129 : vector<16x32xf32>
    %131 = arith.addf %15, %130 : vector<16x32xf32>
    %c248 = arith.constant 248 : index
    %c0_49 = arith.constant 0 : index
    %132 = vector.load %arg2[%c248, %c0_49] : memref<1320x128xf32, #tpu.memory_space<vmem>>, vector<1x32xf32>
    %c256 = arith.constant 256 : index
    %c0_50 = arith.constant 0 : index
    %133 = vector.load %arg2[%c256, %c0_50] : memref<1320x128xf32, #tpu.memory_space<vmem>>, vector<1x32xf32>
    %cst_51 = arith.constant dense<0.000000e+00> : vector<16xf32>
    %134 = vector.multi_reduction <add>, %131, %cst_51 [1] : vector<16x32xf32> to vector<16xf32>
    %135 = vector.shape_cast %134 : vector<16xf32> to vector<16x1xf32>
    %cst_52 = arith.constant 3.200000e+01 : f32
    %136 = vector.broadcast %cst_52 : f32 to vector<16x1xf32>
    %137 = arith.divf %135, %136 : vector<16x1xf32>
    %138 = vector.broadcast %137 : vector<16x1xf32> to vector<16x32xf32>
    %139 = arith.subf %131, %138 : vector<16x32xf32>
    %140 = arith.mulf %139, %139 : vector<16x32xf32>
    %cst_53 = arith.constant dense<0.000000e+00> : vector<16xf32>
    %141 = vector.multi_reduction <add>, %140, %cst_53 [1] : vector<16x32xf32> to vector<16xf32>
    %142 = vector.shape_cast %141 : vector<16xf32> to vector<16x1xf32>
    %cst_54 = arith.constant 0.0322580636 : f32
    %143 = vector.broadcast %cst_54 : f32 to vector<16x1xf32>
    %144 = arith.mulf %142, %143 : vector<16x1xf32>
    %145 = math.sqrt %144 : vector<16x1xf32>
    %cst_55 = arith.constant 9.99999997E-7 : f32
    %146 = vector.broadcast %cst_55 : f32 to vector<16x1xf32>
    %147 = arith.addf %145, %146 : vector<16x1xf32>
    %148 = tpu.reciprocal %147 {approx = true} : vector<16x1xf32> -> vector<16x1xf32>
    %149 = vector.broadcast %137 : vector<16x1xf32> to vector<16x32xf32>
    %150 = arith.subf %131, %149 : vector<16x32xf32>
    %151 = vector.broadcast %132 : vector<1x32xf32> to vector<16x32xf32>
    %152 = arith.mulf %151, %150 : vector<16x32xf32>
    %153 = vector.broadcast %148 : vector<16x1xf32> to vector<16x32xf32>
    %154 = arith.mulf %152, %153 : vector<16x32xf32>
    %155 = vector.broadcast %133 : vector<1x32xf32> to vector<16x32xf32>
    %156 = arith.addf %154, %155 : vector<16x32xf32>
    %c264 = arith.constant 264 : index
    %c0_56 = arith.constant 0 : index
    %157 = vector.load %arg2[%c264, %c0_56] : memref<1320x128xf32, #tpu.memory_space<vmem>>, vector<32x64xf32>
    %c296 = arith.constant 296 : index
    %c0_57 = arith.constant 0 : index
    %158 = vector.load %arg2[%c296, %c0_57] : memref<1320x128xf32, #tpu.memory_space<vmem>>, vector<1x64xf32>
    %c304 = arith.constant 304 : index
    %c0_58 = arith.constant 0 : index
    %159 = vector.load %arg2[%c304, %c0_58] : memref<1320x128xf32, #tpu.memory_space<vmem>>, vector<64x32xf32>
    %c368 = arith.constant 368 : index
    %c0_59 = arith.constant 0 : index
    %160 = vector.load %arg2[%c368, %c0_59] : memref<1320x128xf32, #tpu.memory_space<vmem>>, vector<1x32xf32>
    %cst_60 = arith.constant dense<0.000000e+00> : vector<16x64xf32>
    %161 = tpu.matmul %156, %157, %cst_60 {dimension_numbers = #tpu.dot_dimension_numbers<[1], [0], [0], [1], [0, 0, 1, 1], [], []>} : vector<16x32xf32>, vector<32x64xf32>, vector<16x64xf32> -> vector<16x64xf32>
    %162 = vector.broadcast %158 : vector<1x64xf32> to vector<16x64xf32>
    %163 = arith.addf %161, %162 : vector<16x64xf32>
    %cst_61 = arith.constant 0.000000e+00 : f32
    %164 = vector.broadcast %cst_61 : f32 to vector<16x64xf32>
    %165 = arith.maximumf %163, %164 : vector<16x64xf32>
    %cst_62 = arith.constant dense<0.000000e+00> : vector<16x32xf32>
    %166 = tpu.matmul %165, %159, %cst_62 {dimension_numbers = #tpu.dot_dimension_numbers<[1], [0], [0], [1], [0, 0, 1, 1], [], []>} : vector<16x64xf32>, vector<64x32xf32>, vector<16x32xf32> -> vector<16x32xf32>
    %167 = vector.broadcast %160 : vector<1x32xf32> to vector<16x32xf32>
    %168 = arith.addf %166, %167 : vector<16x32xf32>
    %169 = arith.addf %131, %168 : vector<16x32xf32>
    %c376 = arith.constant 376 : index
    %c0_63 = arith.constant 0 : index
    %170 = vector.load %arg2[%c376, %c0_63] : memref<1320x128xf32, #tpu.memory_space<vmem>>, vector<1x32xf32>
    %c384 = arith.constant 384 : index
    %c0_64 = arith.constant 0 : index
    %171 = vector.load %arg2[%c384, %c0_64] : memref<1320x128xf32, #tpu.memory_space<vmem>>, vector<1x32xf32>
    %cst_65 = arith.constant dense<0.000000e+00> : vector<16xf32>
    %172 = vector.multi_reduction <add>, %169, %cst_65 [1] : vector<16x32xf32> to vector<16xf32>
    %173 = vector.shape_cast %172 : vector<16xf32> to vector<16x1xf32>
    %cst_66 = arith.constant 3.200000e+01 : f32
    %174 = vector.broadcast %cst_66 : f32 to vector<16x1xf32>
    %175 = arith.divf %173, %174 : vector<16x1xf32>
    %176 = vector.broadcast %175 : vector<16x1xf32> to vector<16x32xf32>
    %177 = arith.subf %169, %176 : vector<16x32xf32>
    %178 = arith.mulf %177, %177 : vector<16x32xf32>
    %cst_67 = arith.constant dense<0.000000e+00> : vector<16xf32>
    %179 = vector.multi_reduction <add>, %178, %cst_67 [1] : vector<16x32xf32> to vector<16xf32>
    %180 = vector.shape_cast %179 : vector<16xf32> to vector<16x1xf32>
    %cst_68 = arith.constant 0.0322580636 : f32
    %181 = vector.broadcast %cst_68 : f32 to vector<16x1xf32>
    %182 = arith.mulf %180, %181 : vector<16x1xf32>
    %183 = math.sqrt %182 : vector<16x1xf32>
    %cst_69 = arith.constant 9.99999997E-7 : f32
    %184 = vector.broadcast %cst_69 : f32 to vector<16x1xf32>
    %185 = arith.addf %183, %184 : vector<16x1xf32>
    %186 = tpu.reciprocal %185 {approx = true} : vector<16x1xf32> -> vector<16x1xf32>
    %187 = vector.broadcast %175 : vector<16x1xf32> to vector<16x32xf32>
    %188 = arith.subf %169, %187 : vector<16x32xf32>
    %189 = vector.broadcast %170 : vector<1x32xf32> to vector<16x32xf32>
    %190 = arith.mulf %189, %188 : vector<16x32xf32>
    %191 = vector.broadcast %186 : vector<16x1xf32> to vector<16x32xf32>
    %192 = arith.mulf %190, %191 : vector<16x32xf32>
    %193 = vector.broadcast %171 : vector<1x32xf32> to vector<16x32xf32>
    %194 = arith.addf %192, %193 : vector<16x32xf32>
    %c392 = arith.constant 392 : index
    %c0_70 = arith.constant 0 : index
    %195 = vector.load %arg2[%c392, %c0_70] : memref<1320x128xf32, #tpu.memory_space<vmem>>, vector<32x96xf32>
    %cst_71 = arith.constant dense<0.000000e+00> : vector<16x96xf32>
    %196 = tpu.matmul %194, %195, %cst_71 {dimension_numbers = #tpu.dot_dimension_numbers<[1], [0], [0], [1], [0, 0, 1, 1], [], []>} : vector<16x32xf32>, vector<32x96xf32>, vector<16x96xf32> -> vector<16x96xf32>
    %c424 = arith.constant 424 : index
    %c0_72 = arith.constant 0 : index
    %197 = vector.load %arg2[%c424, %c0_72] : memref<1320x128xf32, #tpu.memory_space<vmem>>, vector<1x96xf32>
    %198 = vector.broadcast %197 : vector<1x96xf32> to vector<16x96xf32>
    %199 = arith.addf %196, %198 : vector<16x96xf32>
    %200 = vector.extract_strided_slice %199 {offsets = [0, 0], sizes = [16, 32], strides = [1, 1]} : vector<16x96xf32> to vector<16x32xf32>
    %201 = vector.extract_strided_slice %199 {offsets = [0, 32], sizes = [16, 32], strides = [1, 1]} : vector<16x96xf32> to vector<16x32xf32>
    %202 = vector.extract_strided_slice %199 {offsets = [0, 64], sizes = [16, 32], strides = [1, 1]} : vector<16x96xf32> to vector<16x32xf32>
    %c432 = arith.constant 432 : index
    %c0_73 = arith.constant 0 : index
    %203 = vector.load %arg2[%c432, %c0_73] : memref<1320x128xf32, #tpu.memory_space<vmem>>, vector<32x32xf32>
    %c464 = arith.constant 464 : index
    %c0_74 = arith.constant 0 : index
    %204 = vector.load %arg2[%c464, %c0_74] : memref<1320x128xf32, #tpu.memory_space<vmem>>, vector<1x32xf32>
    %205 = vector.extract_strided_slice %200 {offsets = [0, 0], sizes = [16, 8], strides = [1, 1]} : vector<16x32xf32> to vector<16x8xf32>
    %206 = vector.extract_strided_slice %201 {offsets = [0, 0], sizes = [16, 8], strides = [1, 1]} : vector<16x32xf32> to vector<16x8xf32>
    %cst_75 = arith.constant dense<0.000000e+00> : vector<16x16xf32>
    %207 = tpu.matmul %205, %206, %cst_75 {dimension_numbers = #tpu.dot_dimension_numbers<[1], [1], [0], [0], [0, 0, 1, 0], [], []>} : vector<16x8xf32>, vector<16x8xf32>, vector<16x16xf32> -> vector<16x16xf32>
    %cst_76 = arith.constant 0.353553385 : f32
    %208 = vector.broadcast %cst_76 : f32 to vector<16x16xf32>
    %209 = arith.mulf %207, %208 : vector<16x16xf32>
    %210 = arith.addf %209, %1 : vector<16x16xf32>
    %cst_77 = arith.constant dense<0xFF800000> : vector<16xf32>
    %211 = vector.multi_reduction <maximumf>, %210, %cst_77 [1] : vector<16x16xf32> to vector<16xf32>
    %212 = vector.shape_cast %211 : vector<16xf32> to vector<16x1xf32>
    %213 = vector.broadcast %212 : vector<16x1xf32> to vector<16x16xf32>
    %214 = arith.subf %210, %213 : vector<16x16xf32>
    %215 = math.exp %214 : vector<16x16xf32>
    %cst_78 = arith.constant dense<0.000000e+00> : vector<16xf32>
    %216 = vector.multi_reduction <add>, %215, %cst_78 [1] : vector<16x16xf32> to vector<16xf32>
    %217 = vector.shape_cast %216 : vector<16xf32> to vector<16x1xf32>
    %218 = tpu.reciprocal %217 {approx = true} : vector<16x1xf32> -> vector<16x1xf32>
    %219 = vector.broadcast %218 : vector<16x1xf32> to vector<16x16xf32>
    %220 = arith.mulf %215, %219 : vector<16x16xf32>
    %221 = vector.extract_strided_slice %202 {offsets = [0, 0], sizes = [16, 8], strides = [1, 1]} : vector<16x32xf32> to vector<16x8xf32>
    %cst_79 = arith.constant dense<0.000000e+00> : vector<16x8xf32>
    %222 = tpu.matmul %220, %221, %cst_79 {dimension_numbers = #tpu.dot_dimension_numbers<[1], [0], [0], [1], [0, 0, 1, 1], [], []>} : vector<16x16xf32>, vector<16x8xf32>, vector<16x8xf32> -> vector<16x8xf32>
    %c0_80 = arith.constant 0 : index
    %c0_81 = arith.constant 0 : index
    %223 = vector.load %arg4[%c0_80, %c0_81] : memref<16x32xf32, #tpu.memory_space<vmem>>, vector<16x8xf32>
    tpu.vector_store %arg4[%c0_80, %c0_81], %222 {strides = array<i32>} : memref<16x32xf32, #tpu.memory_space<vmem>>, vector<16x8xf32>,
    %224 = vector.extract_strided_slice %200 {offsets = [0, 8], sizes = [16, 8], strides = [1, 1]} : vector<16x32xf32> to vector<16x8xf32>
    %225 = vector.extract_strided_slice %201 {offsets = [0, 8], sizes = [16, 8], strides = [1, 1]} : vector<16x32xf32> to vector<16x8xf32>
    %cst_82 = arith.constant dense<0.000000e+00> : vector<16x16xf32>
    %226 = tpu.matmul %224, %225, %cst_82 {dimension_numbers = #tpu.dot_dimension_numbers<[1], [1], [0], [0], [0, 0, 1, 0], [], []>} : vector<16x8xf32>, vector<16x8xf32>, vector<16x16xf32> -> vector<16x16xf32>
    %cst_83 = arith.constant 0.353553385 : f32
    %227 = vector.broadcast %cst_83 : f32 to vector<16x16xf32>
    %228 = arith.mulf %226, %227 : vector<16x16xf32>
    %229 = arith.addf %228, %1 : vector<16x16xf32>
    %cst_84 = arith.constant dense<0xFF800000> : vector<16xf32>
    %230 = vector.multi_reduction <maximumf>, %229, %cst_84 [1] : vector<16x16xf32> to vector<16xf32>
    %231 = vector.shape_cast %230 : vector<16xf32> to vector<16x1xf32>
    %232 = vector.broadcast %231 : vector<16x1xf32> to vector<16x16xf32>
    %233 = arith.subf %229, %232 : vector<16x16xf32>
    %234 = math.exp %233 : vector<16x16xf32>
    %cst_85 = arith.constant dense<0.000000e+00> : vector<16xf32>
    %235 = vector.multi_reduction <add>, %234, %cst_85 [1] : vector<16x16xf32> to vector<16xf32>
    %236 = vector.shape_cast %235 : vector<16xf32> to vector<16x1xf32>
    %237 = tpu.reciprocal %236 {approx = true} : vector<16x1xf32> -> vector<16x1xf32>
    %238 = vector.broadcast %237 : vector<16x1xf32> to vector<16x16xf32>
    %239 = arith.mulf %234, %238 : vector<16x16xf32>
    %240 = vector.extract_strided_slice %202 {offsets = [0, 8], sizes = [16, 8], strides = [1, 1]} : vector<16x32xf32> to vector<16x8xf32>
    %cst_86 = arith.constant dense<0.000000e+00> : vector<16x8xf32>
    %241 = tpu.matmul %239, %240, %cst_86 {dimension_numbers = #tpu.dot_dimension_numbers<[1], [0], [0], [1], [0, 0, 1, 1], [], []>} : vector<16x16xf32>, vector<16x8xf32>, vector<16x8xf32> -> vector<16x8xf32>
    %c0_87 = arith.constant 0 : index
    %c8_88 = arith.constant 8 : index
    %242 = vector.load %arg4[%c0_87, %c8_88] : memref<16x32xf32, #tpu.memory_space<vmem>>, vector<16x8xf32>
    tpu.vector_store %arg4[%c0_87, %c8_88], %241 {strides = array<i32>} : memref<16x32xf32, #tpu.memory_space<vmem>>, vector<16x8xf32>,
    %243 = vector.extract_strided_slice %200 {offsets = [0, 16], sizes = [16, 8], strides = [1, 1]} : vector<16x32xf32> to vector<16x8xf32>
    %244 = vector.extract_strided_slice %201 {offsets = [0, 16], sizes = [16, 8], strides = [1, 1]} : vector<16x32xf32> to vector<16x8xf32>
    %cst_89 = arith.constant dense<0.000000e+00> : vector<16x16xf32>
    %245 = tpu.matmul %243, %244, %cst_89 {dimension_numbers = #tpu.dot_dimension_numbers<[1], [1], [0], [0], [0, 0, 1, 0], [], []>} : vector<16x8xf32>, vector<16x8xf32>, vector<16x16xf32> -> vector<16x16xf32>
    %cst_90 = arith.constant 0.353553385 : f32
    %246 = vector.broadcast %cst_90 : f32 to vector<16x16xf32>
    %247 = arith.mulf %245, %246 : vector<16x16xf32>
    %248 = arith.addf %247, %1 : vector<16x16xf32>
    %cst_91 = arith.constant dense<0xFF800000> : vector<16xf32>
    %249 = vector.multi_reduction <maximumf>, %248, %cst_91 [1] : vector<16x16xf32> to vector<16xf32>
    %250 = vector.shape_cast %249 : vector<16xf32> to vector<16x1xf32>
    %251 = vector.broadcast %250 : vector<16x1xf32> to vector<16x16xf32>
    %252 = arith.subf %248, %251 : vector<16x16xf32>
    %253 = math.exp %252 : vector<16x16xf32>
    %cst_92 = arith.constant dense<0.000000e+00> : vector<16xf32>
    %254 = vector.multi_reduction <add>, %253, %cst_92 [1] : vector<16x16xf32> to vector<16xf32>
    %255 = vector.shape_cast %254 : vector<16xf32> to vector<16x1xf32>
    %256 = tpu.reciprocal %255 {approx = true} : vector<16x1xf32> -> vector<16x1xf32>
    %257 = vector.broadcast %256 : vector<16x1xf32> to vector<16x16xf32>
    %258 = arith.mulf %253, %257 : vector<16x16xf32>
    %259 = vector.extract_strided_slice %202 {offsets = [0, 16], sizes = [16, 8], strides = [1, 1]} : vector<16x32xf32> to vector<16x8xf32>
    %cst_93 = arith.constant dense<0.000000e+00> : vector<16x8xf32>
    %260 = tpu.matmul %258, %259, %cst_93 {dimension_numbers = #tpu.dot_dimension_numbers<[1], [0], [0], [1], [0, 0, 1, 1], [], []>} : vector<16x16xf32>, vector<16x8xf32>, vector<16x8xf32> -> vector<16x8xf32>
    %c0_94 = arith.constant 0 : index
    %c16_95 = arith.constant 16 : index
    %261 = vector.load %arg4[%c0_94, %c16_95] : memref<16x32xf32, #tpu.memory_space<vmem>>, vector<16x8xf32>
    tpu.vector_store %arg4[%c0_94, %c16_95], %260 {strides = array<i32>} : memref<16x32xf32, #tpu.memory_space<vmem>>, vector<16x8xf32>,
    %262 = vector.extract_strided_slice %200 {offsets = [0, 24], sizes = [16, 8], strides = [1, 1]} : vector<16x32xf32> to vector<16x8xf32>
    %263 = vector.extract_strided_slice %201 {offsets = [0, 24], sizes = [16, 8], strides = [1, 1]} : vector<16x32xf32> to vector<16x8xf32>
    %cst_96 = arith.constant dense<0.000000e+00> : vector<16x16xf32>
    %264 = tpu.matmul %262, %263, %cst_96 {dimension_numbers = #tpu.dot_dimension_numbers<[1], [1], [0], [0], [0, 0, 1, 0], [], []>} : vector<16x8xf32>, vector<16x8xf32>, vector<16x16xf32> -> vector<16x16xf32>
    %cst_97 = arith.constant 0.353553385 : f32
    %265 = vector.broadcast %cst_97 : f32 to vector<16x16xf32>
    %266 = arith.mulf %264, %265 : vector<16x16xf32>
    %267 = arith.addf %266, %1 : vector<16x16xf32>
    %cst_98 = arith.constant dense<0xFF800000> : vector<16xf32>
    %268 = vector.multi_reduction <maximumf>, %267, %cst_98 [1] : vector<16x16xf32> to vector<16xf32>
    %269 = vector.shape_cast %268 : vector<16xf32> to vector<16x1xf32>
    %270 = vector.broadcast %269 : vector<16x1xf32> to vector<16x16xf32>
    %271 = arith.subf %267, %270 : vector<16x16xf32>
    %272 = math.exp %271 : vector<16x16xf32>
    %cst_99 = arith.constant dense<0.000000e+00> : vector<16xf32>
    %273 = vector.multi_reduction <add>, %272, %cst_99 [1] : vector<16x16xf32> to vector<16xf32>
    %274 = vector.shape_cast %273 : vector<16xf32> to vector<16x1xf32>
    %275 = tpu.reciprocal %274 {approx = true} : vector<16x1xf32> -> vector<16x1xf32>
    %276 = vector.broadcast %275 : vector<16x1xf32> to vector<16x16xf32>
    %277 = arith.mulf %272, %276 : vector<16x16xf32>
    %278 = vector.extract_strided_slice %202 {offsets = [0, 24], sizes = [16, 8], strides = [1, 1]} : vector<16x32xf32> to vector<16x8xf32>
    %cst_100 = arith.constant dense<0.000000e+00> : vector<16x8xf32>
    %279 = tpu.matmul %277, %278, %cst_100 {dimension_numbers = #tpu.dot_dimension_numbers<[1], [0], [0], [1], [0, 0, 1, 1], [], []>} : vector<16x16xf32>, vector<16x8xf32>, vector<16x8xf32> -> vector<16x8xf32>
    %c0_101 = arith.constant 0 : index
    %c24_102 = arith.constant 24 : index
    %280 = vector.load %arg4[%c0_101, %c24_102] : memref<16x32xf32, #tpu.memory_space<vmem>>, vector<16x8xf32>
    tpu.vector_store %arg4[%c0_101, %c24_102], %279 {strides = array<i32>} : memref<16x32xf32, #tpu.memory_space<vmem>>, vector<16x8xf32>,
    %c0_103 = arith.constant 0 : index
    %c0_104 = arith.constant 0 : index
    %281 = vector.load %arg4[%c0_103, %c0_104] : memref<16x32xf32, #tpu.memory_space<vmem>>, vector<16x32xf32>
    %cst_105 = arith.constant dense<0.000000e+00> : vector<16x32xf32>
    %282 = tpu.matmul %281, %203, %cst_105 {dimension_numbers = #tpu.dot_dimension_numbers<[1], [0], [0], [1], [0, 0, 1, 1], [], []>} : vector<16x32xf32>, vector<32x32xf32>, vector<16x32xf32> -> vector<16x32xf32>
    %283 = vector.broadcast %204 : vector<1x32xf32> to vector<16x32xf32>
    %284 = arith.addf %282, %283 : vector<16x32xf32>
    %285 = arith.addf %169, %284 : vector<16x32xf32>
    %c472 = arith.constant 472 : index
    %c0_106 = arith.constant 0 : index
    %286 = vector.load %arg2[%c472, %c0_106] : memref<1320x128xf32, #tpu.memory_space<vmem>>, vector<1x32xf32>
    %c480 = arith.constant 480 : index
    %c0_107 = arith.constant 0 : index
    %287 = vector.load %arg2[%c480, %c0_107] : memref<1320x128xf32, #tpu.memory_space<vmem>>, vector<1x32xf32>
    %cst_108 = arith.constant dense<0.000000e+00> : vector<16xf32>
    %288 = vector.multi_reduction <add>, %285, %cst_108 [1] : vector<16x32xf32> to vector<16xf32>
    %289 = vector.shape_cast %288 : vector<16xf32> to vector<16x1xf32>
    %cst_109 = arith.constant 3.200000e+01 : f32
    %290 = vector.broadcast %cst_109 : f32 to vector<16x1xf32>
    %291 = arith.divf %289, %290 : vector<16x1xf32>
    %292 = vector.broadcast %291 : vector<16x1xf32> to vector<16x32xf32>
    %293 = arith.subf %285, %292 : vector<16x32xf32>
    %294 = arith.mulf %293, %293 : vector<16x32xf32>
    %cst_110 = arith.constant dense<0.000000e+00> : vector<16xf32>
    %295 = vector.multi_reduction <add>, %294, %cst_110 [1] : vector<16x32xf32> to vector<16xf32>
    %296 = vector.shape_cast %295 : vector<16xf32> to vector<16x1xf32>
    %cst_111 = arith.constant 0.0322580636 : f32
    %297 = vector.broadcast %cst_111 : f32 to vector<16x1xf32>
    %298 = arith.mulf %296, %297 : vector<16x1xf32>
    %299 = math.sqrt %298 : vector<16x1xf32>
    %cst_112 = arith.constant 9.99999997E-7 : f32
    %300 = vector.broadcast %cst_112 : f32 to vector<16x1xf32>
    %301 = arith.addf %299, %300 : vector<16x1xf32>
    %302 = tpu.reciprocal %301 {approx = true} : vector<16x1xf32> -> vector<16x1xf32>
    %303 = vector.broadcast %291 : vector<16x1xf32> to vector<16x32xf32>
    %304 = arith.subf %285, %303 : vector<16x32xf32>
    %305 = vector.broadcast %286 : vector<1x32xf32> to vector<16x32xf32>
    %306 = arith.mulf %305, %304 : vector<16x32xf32>
    %307 = vector.broadcast %302 : vector<16x1xf32> to vector<16x32xf32>
    %308 = arith.mulf %306, %307 : vector<16x32xf32>
    %309 = vector.broadcast %287 : vector<1x32xf32> to vector<16x32xf32>
    %310 = arith.addf %308, %309 : vector<16x32xf32>
    %c488 = arith.constant 488 : index
    %c0_113 = arith.constant 0 : index
    %311 = vector.load %arg2[%c488, %c0_113] : memref<1320x128xf32, #tpu.memory_space<vmem>>, vector<32x64xf32>
    %c520 = arith.constant 520 : index
    %c0_114 = arith.constant 0 : index
    %312 = vector.load %arg2[%c520, %c0_114] : memref<1320x128xf32, #tpu.memory_space<vmem>>, vector<1x64xf32>
    %c528 = arith.constant 528 : index
    %c0_115 = arith.constant 0 : index
    %313 = vector.load %arg2[%c528, %c0_115] : memref<1320x128xf32, #tpu.memory_space<vmem>>, vector<64x32xf32>
    %c592 = arith.constant 592 : index
    %c0_116 = arith.constant 0 : index
    %314 = vector.load %arg2[%c592, %c0_116] : memref<1320x128xf32, #tpu.memory_space<vmem>>, vector<1x32xf32>
    %cst_117 = arith.constant dense<0.000000e+00> : vector<16x64xf32>
    %315 = tpu.matmul %310, %311, %cst_117 {dimension_numbers = #tpu.dot_dimension_numbers<[1], [0], [0], [1], [0, 0, 1, 1], [], []>} : vector<16x32xf32>, vector<32x64xf32>, vector<16x64xf32> -> vector<16x64xf32>
    %316 = vector.broadcast %312 : vector<1x64xf32> to vector<16x64xf32>
    %317 = arith.addf %315, %316 : vector<16x64xf32>
    %cst_118 = arith.constant 0.000000e+00 : f32
    %318 = vector.broadcast %cst_118 : f32 to vector<16x64xf32>
    %319 = arith.maximumf %317, %318 : vector<16x64xf32>
    %cst_119 = arith.constant dense<0.000000e+00> : vector<16x32xf32>
    %320 = tpu.matmul %319, %313, %cst_119 {dimension_numbers = #tpu.dot_dimension_numbers<[1], [0], [0], [1], [0, 0, 1, 1], [], []>} : vector<16x64xf32>, vector<64x32xf32>, vector<16x32xf32> -> vector<16x32xf32>
    %321 = vector.broadcast %314 : vector<1x32xf32> to vector<16x32xf32>
    %322 = arith.addf %320, %321 : vector<16x32xf32>
    %323 = arith.addf %285, %322 : vector<16x32xf32>
    %c80 = arith.constant 80 : index
    %c0_120 = arith.constant 0 : index
    %324 = vector.load %arg2[%c80, %c0_120] : memref<1320x128xf32, #tpu.memory_space<vmem>>, vector<1x32xf32>
    %c88 = arith.constant 88 : index
    %c0_121 = arith.constant 0 : index
    %325 = vector.load %arg2[%c88, %c0_121] : memref<1320x128xf32, #tpu.memory_space<vmem>>, vector<1x32xf32>
    %cst_122 = arith.constant dense<0.000000e+00> : vector<16xf32>
    %326 = vector.multi_reduction <add>, %323, %cst_122 [1] : vector<16x32xf32> to vector<16xf32>
    %327 = vector.shape_cast %326 : vector<16xf32> to vector<16x1xf32>
    %cst_123 = arith.constant 3.200000e+01 : f32
    %328 = vector.broadcast %cst_123 : f32 to vector<16x1xf32>
    %329 = arith.divf %327, %328 : vector<16x1xf32>
    %330 = vector.broadcast %329 : vector<16x1xf32> to vector<16x32xf32>
    %331 = arith.subf %323, %330 : vector<16x32xf32>
    %332 = arith.mulf %331, %331 : vector<16x32xf32>
    %cst_124 = arith.constant dense<0.000000e+00> : vector<16xf32>
    %333 = vector.multi_reduction <add>, %332, %cst_124 [1] : vector<16x32xf32> to vector<16xf32>
    %334 = vector.shape_cast %333 : vector<16xf32> to vector<16x1xf32>
    %cst_125 = arith.constant 0.0322580636 : f32
    %335 = vector.broadcast %cst_125 : f32 to vector<16x1xf32>
    %336 = arith.mulf %334, %335 : vector<16x1xf32>
    %337 = math.sqrt %336 : vector<16x1xf32>
    %cst_126 = arith.constant 9.99999997E-7 : f32
    %338 = vector.broadcast %cst_126 : f32 to vector<16x1xf32>
    %339 = arith.addf %337, %338 : vector<16x1xf32>
    %340 = tpu.reciprocal %339 {approx = true} : vector<16x1xf32> -> vector<16x1xf32>
    %341 = vector.broadcast %329 : vector<16x1xf32> to vector<16x32xf32>
    %342 = arith.subf %323, %341 : vector<16x32xf32>
    %343 = vector.broadcast %324 : vector<1x32xf32> to vector<16x32xf32>
    %344 = arith.mulf %343, %342 : vector<16x32xf32>
    %345 = vector.broadcast %340 : vector<16x1xf32> to vector<16x32xf32>
    %346 = arith.mulf %344, %345 : vector<16x32xf32>
    %347 = vector.broadcast %325 : vector<1x32xf32> to vector<16x32xf32>
    %348 = arith.addf %346, %347 : vector<16x32xf32>
    %349 = vector.extract_strided_slice %4 {offsets = [0, 1], sizes = [16, 1], strides = [1, 1]} : vector<16x2xi32> to vector<16x1xi32>
    %350 = vector.broadcast %349 : vector<16x1xi32> to vector<16x16xi32>
    %351 = arith.cmpi eq, %350, %5 : vector<16x16xi32>
    %352 = arith.extui %351 : vector<16x16xi1> to vector<16x16xi32>
    %353 = arith.sitofp %352 : vector<16x16xi32> to vector<16x16xf32>
    %c64 = arith.constant 64 : index
    %c0_127 = arith.constant 0 : index
    %354 = vector.load %arg2[%c64, %c0_127] : memref<1320x128xf32, #tpu.memory_space<vmem>>, vector<16x32xf32>
    %cst_128 = arith.constant dense<0.000000e+00> : vector<16x32xf32>
    %355 = tpu.matmul %353, %354, %cst_128 {dimension_numbers = #tpu.dot_dimension_numbers<[1], [0], [0], [1], [0, 0, 1, 1], [], []>} : vector<16x16xf32>, vector<16x32xf32>, vector<16x32xf32> -> vector<16x32xf32>
    %cst_129 = arith.constant 5.65685415 : f32
    %356 = vector.broadcast %cst_129 : f32 to vector<16x32xf32>
    %357 = arith.mulf %355, %356 : vector<16x32xf32>
    %358 = arith.addf %357, %0 : vector<16x32xf32>
    %c600 = arith.constant 600 : index
    %c0_130 = arith.constant 0 : index
    %359 = vector.load %arg2[%c600, %c0_130] : memref<1320x128xf32, #tpu.memory_space<vmem>>, vector<1x32xf32>
    %c608 = arith.constant 608 : index
    %c0_131 = arith.constant 0 : index
    %360 = vector.load %arg2[%c608, %c0_131] : memref<1320x128xf32, #tpu.memory_space<vmem>>, vector<1x32xf32>
    %cst_132 = arith.constant dense<0.000000e+00> : vector<16xf32>
    %361 = vector.multi_reduction <add>, %358, %cst_132 [1] : vector<16x32xf32> to vector<16xf32>
    %362 = vector.shape_cast %361 : vector<16xf32> to vector<16x1xf32>
    %cst_133 = arith.constant 3.200000e+01 : f32
    %363 = vector.broadcast %cst_133 : f32 to vector<16x1xf32>
    %364 = arith.divf %362, %363 : vector<16x1xf32>
    %365 = vector.broadcast %364 : vector<16x1xf32> to vector<16x32xf32>
    %366 = arith.subf %358, %365 : vector<16x32xf32>
    %367 = arith.mulf %366, %366 : vector<16x32xf32>
    %cst_134 = arith.constant dense<0.000000e+00> : vector<16xf32>
    %368 = vector.multi_reduction <add>, %367, %cst_134 [1] : vector<16x32xf32> to vector<16xf32>
    %369 = vector.shape_cast %368 : vector<16xf32> to vector<16x1xf32>
    %cst_135 = arith.constant 0.0322580636 : f32
    %370 = vector.broadcast %cst_135 : f32 to vector<16x1xf32>
    %371 = arith.mulf %369, %370 : vector<16x1xf32>
    %372 = math.sqrt %371 : vector<16x1xf32>
    %cst_136 = arith.constant 9.99999997E-7 : f32
    %373 = vector.broadcast %cst_136 : f32 to vector<16x1xf32>
    %374 = arith.addf %372, %373 : vector<16x1xf32>
    %375 = tpu.reciprocal %374 {approx = true} : vector<16x1xf32> -> vector<16x1xf32>
    %376 = vector.broadcast %364 : vector<16x1xf32> to vector<16x32xf32>
    %377 = arith.subf %358, %376 : vector<16x32xf32>
    %378 = vector.broadcast %359 : vector<1x32xf32> to vector<16x32xf32>
    %379 = arith.mulf %378, %377 : vector<16x32xf32>
    %380 = vector.broadcast %375 : vector<16x1xf32> to vector<16x32xf32>
    %381 = arith.mulf %379, %380 : vector<16x32xf32>
    %382 = vector.broadcast %360 : vector<1x32xf32> to vector<16x32xf32>
    %383 = arith.addf %381, %382 : vector<16x32xf32>
    %c616 = arith.constant 616 : index
    %c0_137 = arith.constant 0 : index
    %384 = vector.load %arg2[%c616, %c0_137] : memref<1320x128xf32, #tpu.memory_space<vmem>>, vector<32x96xf32>
    %cst_138 = arith.constant dense<0.000000e+00> : vector<16x96xf32>
    %385 = tpu.matmul %383, %384, %cst_138 {dimension_numbers = #tpu.dot_dimension_numbers<[1], [0], [0], [1], [0, 0, 1, 1], [], []>} : vector<16x32xf32>, vector<32x96xf32>, vector<16x96xf32> -> vector<16x96xf32>
    %c648 = arith.constant 648 : index
    %c0_139 = arith.constant 0 : index
    %386 = vector.load %arg2[%c648, %c0_139] : memref<1320x128xf32, #tpu.memory_space<vmem>>, vector<1x96xf32>
    %387 = vector.broadcast %386 : vector<1x96xf32> to vector<16x96xf32>
    %388 = arith.addf %385, %387 : vector<16x96xf32>
    %389 = vector.extract_strided_slice %388 {offsets = [0, 0], sizes = [16, 32], strides = [1, 1]} : vector<16x96xf32> to vector<16x32xf32>
    %390 = vector.extract_strided_slice %388 {offsets = [0, 32], sizes = [16, 32], strides = [1, 1]} : vector<16x96xf32> to vector<16x32xf32>
    %391 = vector.extract_strided_slice %388 {offsets = [0, 64], sizes = [16, 32], strides = [1, 1]} : vector<16x96xf32> to vector<16x32xf32>
    %c656 = arith.constant 656 : index
    %c0_140 = arith.constant 0 : index
    %392 = vector.load %arg2[%c656, %c0_140] : memref<1320x128xf32, #tpu.memory_space<vmem>>, vector<32x32xf32>
    %c688 = arith.constant 688 : index
    %c0_141 = arith.constant 0 : index
    %393 = vector.load %arg2[%c688, %c0_141] : memref<1320x128xf32, #tpu.memory_space<vmem>>, vector<1x32xf32>
    %394 = vector.extract_strided_slice %389 {offsets = [0, 0], sizes = [16, 8], strides = [1, 1]} : vector<16x32xf32> to vector<16x8xf32>
    %395 = vector.extract_strided_slice %390 {offsets = [0, 0], sizes = [16, 8], strides = [1, 1]} : vector<16x32xf32> to vector<16x8xf32>
    %cst_142 = arith.constant dense<0.000000e+00> : vector<16x16xf32>
    %396 = tpu.matmul %394, %395, %cst_142 {dimension_numbers = #tpu.dot_dimension_numbers<[1], [1], [0], [0], [0, 0, 1, 0], [], []>} : vector<16x8xf32>, vector<16x8xf32>, vector<16x16xf32> -> vector<16x16xf32>
    %cst_143 = arith.constant 0.353553385 : f32
    %397 = vector.broadcast %cst_143 : f32 to vector<16x16xf32>
    %398 = arith.mulf %396, %397 : vector<16x16xf32>
    %399 = arith.addf %398, %2 : vector<16x16xf32>
    %cst_144 = arith.constant dense<0xFF800000> : vector<16xf32>
    %400 = vector.multi_reduction <maximumf>, %399, %cst_144 [1] : vector<16x16xf32> to vector<16xf32>
    %401 = vector.shape_cast %400 : vector<16xf32> to vector<16x1xf32>
    %402 = vector.broadcast %401 : vector<16x1xf32> to vector<16x16xf32>
    %403 = arith.subf %399, %402 : vector<16x16xf32>
    %404 = math.exp %403 : vector<16x16xf32>
    %cst_145 = arith.constant dense<0.000000e+00> : vector<16xf32>
    %405 = vector.multi_reduction <add>, %404, %cst_145 [1] : vector<16x16xf32> to vector<16xf32>
    %406 = vector.shape_cast %405 : vector<16xf32> to vector<16x1xf32>
    %407 = tpu.reciprocal %406 {approx = true} : vector<16x1xf32> -> vector<16x1xf32>
    %408 = vector.broadcast %407 : vector<16x1xf32> to vector<16x16xf32>
    %409 = arith.mulf %404, %408 : vector<16x16xf32>
    %410 = vector.extract_strided_slice %391 {offsets = [0, 0], sizes = [16, 8], strides = [1, 1]} : vector<16x32xf32> to vector<16x8xf32>
    %cst_146 = arith.constant dense<0.000000e+00> : vector<16x8xf32>
    %411 = tpu.matmul %409, %410, %cst_146 {dimension_numbers = #tpu.dot_dimension_numbers<[1], [0], [0], [1], [0, 0, 1, 1], [], []>} : vector<16x16xf32>, vector<16x8xf32>, vector<16x8xf32> -> vector<16x8xf32>
    %c0_147 = arith.constant 0 : index
    %c0_148 = arith.constant 0 : index
    %412 = vector.load %arg4[%c0_147, %c0_148] : memref<16x32xf32, #tpu.memory_space<vmem>>, vector<16x8xf32>
    tpu.vector_store %arg4[%c0_147, %c0_148], %411 {strides = array<i32>} : memref<16x32xf32, #tpu.memory_space<vmem>>, vector<16x8xf32>,
    %413 = vector.extract_strided_slice %389 {offsets = [0, 8], sizes = [16, 8], strides = [1, 1]} : vector<16x32xf32> to vector<16x8xf32>
    %414 = vector.extract_strided_slice %390 {offsets = [0, 8], sizes = [16, 8], strides = [1, 1]} : vector<16x32xf32> to vector<16x8xf32>
    %cst_149 = arith.constant dense<0.000000e+00> : vector<16x16xf32>
    %415 = tpu.matmul %413, %414, %cst_149 {dimension_numbers = #tpu.dot_dimension_numbers<[1], [1], [0], [0], [0, 0, 1, 0], [], []>} : vector<16x8xf32>, vector<16x8xf32>, vector<16x16xf32> -> vector<16x16xf32>
    %cst_150 = arith.constant 0.353553385 : f32
    %416 = vector.broadcast %cst_150 : f32 to vector<16x16xf32>
    %417 = arith.mulf %415, %416 : vector<16x16xf32>
    %418 = arith.addf %417, %2 : vector<16x16xf32>
    %cst_151 = arith.constant dense<0xFF800000> : vector<16xf32>
    %419 = vector.multi_reduction <maximumf>, %418, %cst_151 [1] : vector<16x16xf32> to vector<16xf32>
    %420 = vector.shape_cast %419 : vector<16xf32> to vector<16x1xf32>
    %421 = vector.broadcast %420 : vector<16x1xf32> to vector<16x16xf32>
    %422 = arith.subf %418, %421 : vector<16x16xf32>
    %423 = math.exp %422 : vector<16x16xf32>
    %cst_152 = arith.constant dense<0.000000e+00> : vector<16xf32>
    %424 = vector.multi_reduction <add>, %423, %cst_152 [1] : vector<16x16xf32> to vector<16xf32>
    %425 = vector.shape_cast %424 : vector<16xf32> to vector<16x1xf32>
    %426 = tpu.reciprocal %425 {approx = true} : vector<16x1xf32> -> vector<16x1xf32>
    %427 = vector.broadcast %426 : vector<16x1xf32> to vector<16x16xf32>
    %428 = arith.mulf %423, %427 : vector<16x16xf32>
    %429 = vector.extract_strided_slice %391 {offsets = [0, 8], sizes = [16, 8], strides = [1, 1]} : vector<16x32xf32> to vector<16x8xf32>
    %cst_153 = arith.constant dense<0.000000e+00> : vector<16x8xf32>
    %430 = tpu.matmul %428, %429, %cst_153 {dimension_numbers = #tpu.dot_dimension_numbers<[1], [0], [0], [1], [0, 0, 1, 1], [], []>} : vector<16x16xf32>, vector<16x8xf32>, vector<16x8xf32> -> vector<16x8xf32>
    %c0_154 = arith.constant 0 : index
    %c8_155 = arith.constant 8 : index
    %431 = vector.load %arg4[%c0_154, %c8_155] : memref<16x32xf32, #tpu.memory_space<vmem>>, vector<16x8xf32>
    tpu.vector_store %arg4[%c0_154, %c8_155], %430 {strides = array<i32>} : memref<16x32xf32, #tpu.memory_space<vmem>>, vector<16x8xf32>,
    %432 = vector.extract_strided_slice %389 {offsets = [0, 16], sizes = [16, 8], strides = [1, 1]} : vector<16x32xf32> to vector<16x8xf32>
    %433 = vector.extract_strided_slice %390 {offsets = [0, 16], sizes = [16, 8], strides = [1, 1]} : vector<16x32xf32> to vector<16x8xf32>
    %cst_156 = arith.constant dense<0.000000e+00> : vector<16x16xf32>
    %434 = tpu.matmul %432, %433, %cst_156 {dimension_numbers = #tpu.dot_dimension_numbers<[1], [1], [0], [0], [0, 0, 1, 0], [], []>} : vector<16x8xf32>, vector<16x8xf32>, vector<16x16xf32> -> vector<16x16xf32>
    %cst_157 = arith.constant 0.353553385 : f32
    %435 = vector.broadcast %cst_157 : f32 to vector<16x16xf32>
    %436 = arith.mulf %434, %435 : vector<16x16xf32>
    %437 = arith.addf %436, %2 : vector<16x16xf32>
    %cst_158 = arith.constant dense<0xFF800000> : vector<16xf32>
    %438 = vector.multi_reduction <maximumf>, %437, %cst_158 [1] : vector<16x16xf32> to vector<16xf32>
    %439 = vector.shape_cast %438 : vector<16xf32> to vector<16x1xf32>
    %440 = vector.broadcast %439 : vector<16x1xf32> to vector<16x16xf32>
    %441 = arith.subf %437, %440 : vector<16x16xf32>
    %442 = math.exp %441 : vector<16x16xf32>
    %cst_159 = arith.constant dense<0.000000e+00> : vector<16xf32>
    %443 = vector.multi_reduction <add>, %442, %cst_159 [1] : vector<16x16xf32> to vector<16xf32>
    %444 = vector.shape_cast %443 : vector<16xf32> to vector<16x1xf32>
    %445 = tpu.reciprocal %444 {approx = true} : vector<16x1xf32> -> vector<16x1xf32>
    %446 = vector.broadcast %445 : vector<16x1xf32> to vector<16x16xf32>
    %447 = arith.mulf %442, %446 : vector<16x16xf32>
    %448 = vector.extract_strided_slice %391 {offsets = [0, 16], sizes = [16, 8], strides = [1, 1]} : vector<16x32xf32> to vector<16x8xf32>
    %cst_160 = arith.constant dense<0.000000e+00> : vector<16x8xf32>
    %449 = tpu.matmul %447, %448, %cst_160 {dimension_numbers = #tpu.dot_dimension_numbers<[1], [0], [0], [1], [0, 0, 1, 1], [], []>} : vector<16x16xf32>, vector<16x8xf32>, vector<16x8xf32> -> vector<16x8xf32>
    %c0_161 = arith.constant 0 : index
    %c16_162 = arith.constant 16 : index
    %450 = vector.load %arg4[%c0_161, %c16_162] : memref<16x32xf32, #tpu.memory_space<vmem>>, vector<16x8xf32>
    tpu.vector_store %arg4[%c0_161, %c16_162], %449 {strides = array<i32>} : memref<16x32xf32, #tpu.memory_space<vmem>>, vector<16x8xf32>,
    %451 = vector.extract_strided_slice %389 {offsets = [0, 24], sizes = [16, 8], strides = [1, 1]} : vector<16x32xf32> to vector<16x8xf32>
    %452 = vector.extract_strided_slice %390 {offsets = [0, 24], sizes = [16, 8], strides = [1, 1]} : vector<16x32xf32> to vector<16x8xf32>
    %cst_163 = arith.constant dense<0.000000e+00> : vector<16x16xf32>
    %453 = tpu.matmul %451, %452, %cst_163 {dimension_numbers = #tpu.dot_dimension_numbers<[1], [1], [0], [0], [0, 0, 1, 0], [], []>} : vector<16x8xf32>, vector<16x8xf32>, vector<16x16xf32> -> vector<16x16xf32>
    %cst_164 = arith.constant 0.353553385 : f32
    %454 = vector.broadcast %cst_164 : f32 to vector<16x16xf32>
    %455 = arith.mulf %453, %454 : vector<16x16xf32>
    %456 = arith.addf %455, %2 : vector<16x16xf32>
    %cst_165 = arith.constant dense<0xFF800000> : vector<16xf32>
    %457 = vector.multi_reduction <maximumf>, %456, %cst_165 [1] : vector<16x16xf32> to vector<16xf32>
    %458 = vector.shape_cast %457 : vector<16xf32> to vector<16x1xf32>
    %459 = vector.broadcast %458 : vector<16x1xf32> to vector<16x16xf32>
    %460 = arith.subf %456, %459 : vector<16x16xf32>
    %461 = math.exp %460 : vector<16x16xf32>
    %cst_166 = arith.constant dense<0.000000e+00> : vector<16xf32>
    %462 = vector.multi_reduction <add>, %461, %cst_166 [1] : vector<16x16xf32> to vector<16xf32>
    %463 = vector.shape_cast %462 : vector<16xf32> to vector<16x1xf32>
    %464 = tpu.reciprocal %463 {approx = true} : vector<16x1xf32> -> vector<16x1xf32>
    %465 = vector.broadcast %464 : vector<16x1xf32> to vector<16x16xf32>
    %466 = arith.mulf %461, %465 : vector<16x16xf32>
    %467 = vector.extract_strided_slice %391 {offsets = [0, 24], sizes = [16, 8], strides = [1, 1]} : vector<16x32xf32> to vector<16x8xf32>
    %cst_167 = arith.constant dense<0.000000e+00> : vector<16x8xf32>
    %468 = tpu.matmul %466, %467, %cst_167 {dimension_numbers = #tpu.dot_dimension_numbers<[1], [0], [0], [1], [0, 0, 1, 1], [], []>} : vector<16x16xf32>, vector<16x8xf32>, vector<16x8xf32> -> vector<16x8xf32>
    %c0_168 = arith.constant 0 : index
    %c24_169 = arith.constant 24 : index
    %469 = vector.load %arg4[%c0_168, %c24_169] : memref<16x32xf32, #tpu.memory_space<vmem>>, vector<16x8xf32>
    tpu.vector_store %arg4[%c0_168, %c24_169], %468 {strides = array<i32>} : memref<16x32xf32, #tpu.memory_space<vmem>>, vector<16x8xf32>,
    %c0_170 = arith.constant 0 : index
    %c0_171 = arith.constant 0 : index
    %470 = vector.load %arg4[%c0_170, %c0_171] : memref<16x32xf32, #tpu.memory_space<vmem>>, vector<16x32xf32>
    %cst_172 = arith.constant dense<0.000000e+00> : vector<16x32xf32>
    %471 = tpu.matmul %470, %392, %cst_172 {dimension_numbers = #tpu.dot_dimension_numbers<[1], [0], [0], [1], [0, 0, 1, 1], [], []>} : vector<16x32xf32>, vector<32x32xf32>, vector<16x32xf32> -> vector<16x32xf32>
    %472 = vector.broadcast %393 : vector<1x32xf32> to vector<16x32xf32>
    %473 = arith.addf %471, %472 : vector<16x32xf32>
    %474 = arith.addf %358, %473 : vector<16x32xf32>
    %c696 = arith.constant 696 : index
    %c0_173 = arith.constant 0 : index
    %475 = vector.load %arg2[%c696, %c0_173] : memref<1320x128xf32, #tpu.memory_space<vmem>>, vector<1x32xf32>
    %c704 = arith.constant 704 : index
    %c0_174 = arith.constant 0 : index
    %476 = vector.load %arg2[%c704, %c0_174] : memref<1320x128xf32, #tpu.memory_space<vmem>>, vector<1x32xf32>
    %cst_175 = arith.constant dense<0.000000e+00> : vector<16xf32>
    %477 = vector.multi_reduction <add>, %474, %cst_175 [1] : vector<16x32xf32> to vector<16xf32>
    %478 = vector.shape_cast %477 : vector<16xf32> to vector<16x1xf32>
    %cst_176 = arith.constant 3.200000e+01 : f32
    %479 = vector.broadcast %cst_176 : f32 to vector<16x1xf32>
    %480 = arith.divf %478, %479 : vector<16x1xf32>
    %481 = vector.broadcast %480 : vector<16x1xf32> to vector<16x32xf32>
    %482 = arith.subf %474, %481 : vector<16x32xf32>
    %483 = arith.mulf %482, %482 : vector<16x32xf32>
    %cst_177 = arith.constant dense<0.000000e+00> : vector<16xf32>
    %484 = vector.multi_reduction <add>, %483, %cst_177 [1] : vector<16x32xf32> to vector<16xf32>
    %485 = vector.shape_cast %484 : vector<16xf32> to vector<16x1xf32>
    %cst_178 = arith.constant 0.0322580636 : f32
    %486 = vector.broadcast %cst_178 : f32 to vector<16x1xf32>
    %487 = arith.mulf %485, %486 : vector<16x1xf32>
    %488 = math.sqrt %487 : vector<16x1xf32>
    %cst_179 = arith.constant 9.99999997E-7 : f32
    %489 = vector.broadcast %cst_179 : f32 to vector<16x1xf32>
    %490 = arith.addf %488, %489 : vector<16x1xf32>
    %491 = tpu.reciprocal %490 {approx = true} : vector<16x1xf32> -> vector<16x1xf32>
    %492 = vector.broadcast %480 : vector<16x1xf32> to vector<16x32xf32>
    %493 = arith.subf %474, %492 : vector<16x32xf32>
    %494 = vector.broadcast %475 : vector<1x32xf32> to vector<16x32xf32>
    %495 = arith.mulf %494, %493 : vector<16x32xf32>
    %496 = vector.broadcast %491 : vector<16x1xf32> to vector<16x32xf32>
    %497 = arith.mulf %495, %496 : vector<16x32xf32>
    %498 = vector.broadcast %476 : vector<1x32xf32> to vector<16x32xf32>
    %499 = arith.addf %497, %498 : vector<16x32xf32>
    %c712 = arith.constant 712 : index
    %c0_180 = arith.constant 0 : index
    %500 = vector.load %arg2[%c712, %c0_180] : memref<1320x128xf32, #tpu.memory_space<vmem>>, vector<32x32xf32>
    %cst_181 = arith.constant dense<0.000000e+00> : vector<16x32xf32>
    %501 = tpu.matmul %499, %500, %cst_181 {dimension_numbers = #tpu.dot_dimension_numbers<[1], [0], [0], [1], [0, 0, 1, 1], [], []>} : vector<16x32xf32>, vector<32x32xf32>, vector<16x32xf32> -> vector<16x32xf32>
    %c744 = arith.constant 744 : index
    %c0_182 = arith.constant 0 : index
    %502 = vector.load %arg2[%c744, %c0_182] : memref<1320x128xf32, #tpu.memory_space<vmem>>, vector<1x32xf32>
    %503 = vector.broadcast %502 : vector<1x32xf32> to vector<16x32xf32>
    %504 = arith.addf %501, %503 : vector<16x32xf32>
    %c752 = arith.constant 752 : index
    %c0_183 = arith.constant 0 : index
    %505 = vector.load %arg2[%c752, %c0_183] : memref<1320x128xf32, #tpu.memory_space<vmem>>, vector<32x64xf32>
    %cst_184 = arith.constant dense<0.000000e+00> : vector<16x64xf32>
    %506 = tpu.matmul %348, %505, %cst_184 {dimension_numbers = #tpu.dot_dimension_numbers<[1], [0], [0], [1], [0, 0, 1, 1], [], []>} : vector<16x32xf32>, vector<32x64xf32>, vector<16x64xf32> -> vector<16x64xf32>
    %c784 = arith.constant 784 : index
    %c0_185 = arith.constant 0 : index
    %507 = vector.load %arg2[%c784, %c0_185] : memref<1320x128xf32, #tpu.memory_space<vmem>>, vector<1x64xf32>
    %508 = vector.broadcast %507 : vector<1x64xf32> to vector<16x64xf32>
    %509 = arith.addf %506, %508 : vector<16x64xf32>
    %510 = vector.extract_strided_slice %509 {offsets = [0, 0], sizes = [16, 32], strides = [1, 1]} : vector<16x64xf32> to vector<16x32xf32>
    %511 = vector.extract_strided_slice %509 {offsets = [0, 32], sizes = [16, 32], strides = [1, 1]} : vector<16x64xf32> to vector<16x32xf32>
    %c792 = arith.constant 792 : index
    %c0_186 = arith.constant 0 : index
    %512 = vector.load %arg2[%c792, %c0_186] : memref<1320x128xf32, #tpu.memory_space<vmem>>, vector<32x32xf32>
    %c824 = arith.constant 824 : index
    %c0_187 = arith.constant 0 : index
    %513 = vector.load %arg2[%c824, %c0_187] : memref<1320x128xf32, #tpu.memory_space<vmem>>, vector<1x32xf32>
    %514 = vector.extract_strided_slice %504 {offsets = [0, 0], sizes = [16, 8], strides = [1, 1]} : vector<16x32xf32> to vector<16x8xf32>
    %515 = vector.extract_strided_slice %510 {offsets = [0, 0], sizes = [16, 8], strides = [1, 1]} : vector<16x32xf32> to vector<16x8xf32>
    %cst_188 = arith.constant dense<0.000000e+00> : vector<16x16xf32>
    %516 = tpu.matmul %514, %515, %cst_188 {dimension_numbers = #tpu.dot_dimension_numbers<[1], [1], [0], [0], [0, 0, 1, 0], [], []>} : vector<16x8xf32>, vector<16x8xf32>, vector<16x16xf32> -> vector<16x16xf32>
    %cst_189 = arith.constant 0.353553385 : f32
    %517 = vector.broadcast %cst_189 : f32 to vector<16x16xf32>
    %518 = arith.mulf %516, %517 : vector<16x16xf32>
    %519 = arith.addf %518, %1 : vector<16x16xf32>
    %cst_190 = arith.constant dense<0xFF800000> : vector<16xf32>
    %520 = vector.multi_reduction <maximumf>, %519, %cst_190 [1] : vector<16x16xf32> to vector<16xf32>
    %521 = vector.shape_cast %520 : vector<16xf32> to vector<16x1xf32>
    %522 = vector.broadcast %521 : vector<16x1xf32> to vector<16x16xf32>
    %523 = arith.subf %519, %522 : vector<16x16xf32>
    %524 = math.exp %523 : vector<16x16xf32>
    %cst_191 = arith.constant dense<0.000000e+00> : vector<16xf32>
    %525 = vector.multi_reduction <add>, %524, %cst_191 [1] : vector<16x16xf32> to vector<16xf32>
    %526 = vector.shape_cast %525 : vector<16xf32> to vector<16x1xf32>
    %527 = tpu.reciprocal %526 {approx = true} : vector<16x1xf32> -> vector<16x1xf32>
    %528 = vector.broadcast %527 : vector<16x1xf32> to vector<16x16xf32>
    %529 = arith.mulf %524, %528 : vector<16x16xf32>
    %530 = vector.extract_strided_slice %511 {offsets = [0, 0], sizes = [16, 8], strides = [1, 1]} : vector<16x32xf32> to vector<16x8xf32>
    %cst_192 = arith.constant dense<0.000000e+00> : vector<16x8xf32>
    %531 = tpu.matmul %529, %530, %cst_192 {dimension_numbers = #tpu.dot_dimension_numbers<[1], [0], [0], [1], [0, 0, 1, 1], [], []>} : vector<16x16xf32>, vector<16x8xf32>, vector<16x8xf32> -> vector<16x8xf32>
    %c0_193 = arith.constant 0 : index
    %c0_194 = arith.constant 0 : index
    %532 = vector.load %arg4[%c0_193, %c0_194] : memref<16x32xf32, #tpu.memory_space<vmem>>, vector<16x8xf32>
    tpu.vector_store %arg4[%c0_193, %c0_194], %531 {strides = array<i32>} : memref<16x32xf32, #tpu.memory_space<vmem>>, vector<16x8xf32>,
    %533 = vector.extract_strided_slice %504 {offsets = [0, 8], sizes = [16, 8], strides = [1, 1]} : vector<16x32xf32> to vector<16x8xf32>
    %534 = vector.extract_strided_slice %510 {offsets = [0, 8], sizes = [16, 8], strides = [1, 1]} : vector<16x32xf32> to vector<16x8xf32>
    %cst_195 = arith.constant dense<0.000000e+00> : vector<16x16xf32>
    %535 = tpu.matmul %533, %534, %cst_195 {dimension_numbers = #tpu.dot_dimension_numbers<[1], [1], [0], [0], [0, 0, 1, 0], [], []>} : vector<16x8xf32>, vector<16x8xf32>, vector<16x16xf32> -> vector<16x16xf32>
    %cst_196 = arith.constant 0.353553385 : f32
    %536 = vector.broadcast %cst_196 : f32 to vector<16x16xf32>
    %537 = arith.mulf %535, %536 : vector<16x16xf32>
    %538 = arith.addf %537, %1 : vector<16x16xf32>
    %cst_197 = arith.constant dense<0xFF800000> : vector<16xf32>
    %539 = vector.multi_reduction <maximumf>, %538, %cst_197 [1] : vector<16x16xf32> to vector<16xf32>
    %540 = vector.shape_cast %539 : vector<16xf32> to vector<16x1xf32>
    %541 = vector.broadcast %540 : vector<16x1xf32> to vector<16x16xf32>
    %542 = arith.subf %538, %541 : vector<16x16xf32>
    %543 = math.exp %542 : vector<16x16xf32>
    %cst_198 = arith.constant dense<0.000000e+00> : vector<16xf32>
    %544 = vector.multi_reduction <add>, %543, %cst_198 [1] : vector<16x16xf32> to vector<16xf32>
    %545 = vector.shape_cast %544 : vector<16xf32> to vector<16x1xf32>
    %546 = tpu.reciprocal %545 {approx = true} : vector<16x1xf32> -> vector<16x1xf32>
    %547 = vector.broadcast %546 : vector<16x1xf32> to vector<16x16xf32>
    %548 = arith.mulf %543, %547 : vector<16x16xf32>
    %549 = vector.extract_strided_slice %511 {offsets = [0, 8], sizes = [16, 8], strides = [1, 1]} : vector<16x32xf32> to vector<16x8xf32>
    %cst_199 = arith.constant dense<0.000000e+00> : vector<16x8xf32>
    %550 = tpu.matmul %548, %549, %cst_199 {dimension_numbers = #tpu.dot_dimension_numbers<[1], [0], [0], [1], [0, 0, 1, 1], [], []>} : vector<16x16xf32>, vector<16x8xf32>, vector<16x8xf32> -> vector<16x8xf32>
    %c0_200 = arith.constant 0 : index
    %c8_201 = arith.constant 8 : index
    %551 = vector.load %arg4[%c0_200, %c8_201] : memref<16x32xf32, #tpu.memory_space<vmem>>, vector<16x8xf32>
    tpu.vector_store %arg4[%c0_200, %c8_201], %550 {strides = array<i32>} : memref<16x32xf32, #tpu.memory_space<vmem>>, vector<16x8xf32>,
    %552 = vector.extract_strided_slice %504 {offsets = [0, 16], sizes = [16, 8], strides = [1, 1]} : vector<16x32xf32> to vector<16x8xf32>
    %553 = vector.extract_strided_slice %510 {offsets = [0, 16], sizes = [16, 8], strides = [1, 1]} : vector<16x32xf32> to vector<16x8xf32>
    %cst_202 = arith.constant dense<0.000000e+00> : vector<16x16xf32>
    %554 = tpu.matmul %552, %553, %cst_202 {dimension_numbers = #tpu.dot_dimension_numbers<[1], [1], [0], [0], [0, 0, 1, 0], [], []>} : vector<16x8xf32>, vector<16x8xf32>, vector<16x16xf32> -> vector<16x16xf32>
    %cst_203 = arith.constant 0.353553385 : f32
    %555 = vector.broadcast %cst_203 : f32 to vector<16x16xf32>
    %556 = arith.mulf %554, %555 : vector<16x16xf32>
    %557 = arith.addf %556, %1 : vector<16x16xf32>
    %cst_204 = arith.constant dense<0xFF800000> : vector<16xf32>
    %558 = vector.multi_reduction <maximumf>, %557, %cst_204 [1] : vector<16x16xf32> to vector<16xf32>
    %559 = vector.shape_cast %558 : vector<16xf32> to vector<16x1xf32>
    %560 = vector.broadcast %559 : vector<16x1xf32> to vector<16x16xf32>
    %561 = arith.subf %557, %560 : vector<16x16xf32>
    %562 = math.exp %561 : vector<16x16xf32>
    %cst_205 = arith.constant dense<0.000000e+00> : vector<16xf32>
    %563 = vector.multi_reduction <add>, %562, %cst_205 [1] : vector<16x16xf32> to vector<16xf32>
    %564 = vector.shape_cast %563 : vector<16xf32> to vector<16x1xf32>
    %565 = tpu.reciprocal %564 {approx = true} : vector<16x1xf32> -> vector<16x1xf32>
    %566 = vector.broadcast %565 : vector<16x1xf32> to vector<16x16xf32>
    %567 = arith.mulf %562, %566 : vector<16x16xf32>
    %568 = vector.extract_strided_slice %511 {offsets = [0, 16], sizes = [16, 8], strides = [1, 1]} : vector<16x32xf32> to vector<16x8xf32>
    %cst_206 = arith.constant dense<0.000000e+00> : vector<16x8xf32>
    %569 = tpu.matmul %567, %568, %cst_206 {dimension_numbers = #tpu.dot_dimension_numbers<[1], [0], [0], [1], [0, 0, 1, 1], [], []>} : vector<16x16xf32>, vector<16x8xf32>, vector<16x8xf32> -> vector<16x8xf32>
    %c0_207 = arith.constant 0 : index
    %c16_208 = arith.constant 16 : index
    %570 = vector.load %arg4[%c0_207, %c16_208] : memref<16x32xf32, #tpu.memory_space<vmem>>, vector<16x8xf32>
    tpu.vector_store %arg4[%c0_207, %c16_208], %569 {strides = array<i32>} : memref<16x32xf32, #tpu.memory_space<vmem>>, vector<16x8xf32>,
    %571 = vector.extract_strided_slice %504 {offsets = [0, 24], sizes = [16, 8], strides = [1, 1]} : vector<16x32xf32> to vector<16x8xf32>
    %572 = vector.extract_strided_slice %510 {offsets = [0, 24], sizes = [16, 8], strides = [1, 1]} : vector<16x32xf32> to vector<16x8xf32>
    %cst_209 = arith.constant dense<0.000000e+00> : vector<16x16xf32>
    %573 = tpu.matmul %571, %572, %cst_209 {dimension_numbers = #tpu.dot_dimension_numbers<[1], [1], [0], [0], [0, 0, 1, 0], [], []>} : vector<16x8xf32>, vector<16x8xf32>, vector<16x16xf32> -> vector<16x16xf32>
    %cst_210 = arith.constant 0.353553385 : f32
    %574 = vector.broadcast %cst_210 : f32 to vector<16x16xf32>
    %575 = arith.mulf %573, %574 : vector<16x16xf32>
    %576 = arith.addf %575, %1 : vector<16x16xf32>
    %cst_211 = arith.constant dense<0xFF800000> : vector<16xf32>
    %577 = vector.multi_reduction <maximumf>, %576, %cst_211 [1] : vector<16x16xf32> to vector<16xf32>
    %578 = vector.shape_cast %577 : vector<16xf32> to vector<16x1xf32>
    %579 = vector.broadcast %578 : vector<16x1xf32> to vector<16x16xf32>
    %580 = arith.subf %576, %579 : vector<16x16xf32>
    %581 = math.exp %580 : vector<16x16xf32>
    %cst_212 = arith.constant dense<0.000000e+00> : vector<16xf32>
    %582 = vector.multi_reduction <add>, %581, %cst_212 [1] : vector<16x16xf32> to vector<16xf32>
    %583 = vector.shape_cast %582 : vector<16xf32> to vector<16x1xf32>
    %584 = tpu.reciprocal %583 {approx = true} : vector<16x1xf32> -> vector<16x1xf32>
    %585 = vector.broadcast %584 : vector<16x1xf32> to vector<16x16xf32>
    %586 = arith.mulf %581, %585 : vector<16x16xf32>
    %587 = vector.extract_strided_slice %511 {offsets = [0, 24], sizes = [16, 8], strides = [1, 1]} : vector<16x32xf32> to vector<16x8xf32>
    %cst_213 = arith.constant dense<0.000000e+00> : vector<16x8xf32>
    %588 = tpu.matmul %586, %587, %cst_213 {dimension_numbers = #tpu.dot_dimension_numbers<[1], [0], [0], [1], [0, 0, 1, 1], [], []>} : vector<16x16xf32>, vector<16x8xf32>, vector<16x8xf32> -> vector<16x8xf32>
    %c0_214 = arith.constant 0 : index
    %c24_215 = arith.constant 24 : index
    %589 = vector.load %arg4[%c0_214, %c24_215] : memref<16x32xf32, #tpu.memory_space<vmem>>, vector<16x8xf32>
    tpu.vector_store %arg4[%c0_214, %c24_215], %588 {strides = array<i32>} : memref<16x32xf32, #tpu.memory_space<vmem>>, vector<16x8xf32>,
    %c0_216 = arith.constant 0 : index
    %c0_217 = arith.constant 0 : index
    %590 = vector.load %arg4[%c0_216, %c0_217] : memref<16x32xf32, #tpu.memory_space<vmem>>, vector<16x32xf32>
    %cst_218 = arith.constant dense<0.000000e+00> : vector<16x32xf32>
    %591 = tpu.matmul %590, %512, %cst_218 {dimension_numbers = #tpu.dot_dimension_numbers<[1], [0], [0], [1], [0, 0, 1, 1], [], []>} : vector<16x32xf32>, vector<32x32xf32>, vector<16x32xf32> -> vector<16x32xf32>
    %592 = vector.broadcast %513 : vector<1x32xf32> to vector<16x32xf32>
    %593 = arith.addf %591, %592 : vector<16x32xf32>
    %594 = arith.addf %474, %593 : vector<16x32xf32>
    %c832 = arith.constant 832 : index
    %c0_219 = arith.constant 0 : index
    %595 = vector.load %arg2[%c832, %c0_219] : memref<1320x128xf32, #tpu.memory_space<vmem>>, vector<1x32xf32>
    %c840 = arith.constant 840 : index
    %c0_220 = arith.constant 0 : index
    %596 = vector.load %arg2[%c840, %c0_220] : memref<1320x128xf32, #tpu.memory_space<vmem>>, vector<1x32xf32>
    %cst_221 = arith.constant dense<0.000000e+00> : vector<16xf32>
    %597 = vector.multi_reduction <add>, %594, %cst_221 [1] : vector<16x32xf32> to vector<16xf32>
    %598 = vector.shape_cast %597 : vector<16xf32> to vector<16x1xf32>
    %cst_222 = arith.constant 3.200000e+01 : f32
    %599 = vector.broadcast %cst_222 : f32 to vector<16x1xf32>
    %600 = arith.divf %598, %599 : vector<16x1xf32>
    %601 = vector.broadcast %600 : vector<16x1xf32> to vector<16x32xf32>
    %602 = arith.subf %594, %601 : vector<16x32xf32>
    %603 = arith.mulf %602, %602 : vector<16x32xf32>
    %cst_223 = arith.constant dense<0.000000e+00> : vector<16xf32>
    %604 = vector.multi_reduction <add>, %603, %cst_223 [1] : vector<16x32xf32> to vector<16xf32>
    %605 = vector.shape_cast %604 : vector<16xf32> to vector<16x1xf32>
    %cst_224 = arith.constant 0.0322580636 : f32
    %606 = vector.broadcast %cst_224 : f32 to vector<16x1xf32>
    %607 = arith.mulf %605, %606 : vector<16x1xf32>
    %608 = math.sqrt %607 : vector<16x1xf32>
    %cst_225 = arith.constant 9.99999997E-7 : f32
    %609 = vector.broadcast %cst_225 : f32 to vector<16x1xf32>
    %610 = arith.addf %608, %609 : vector<16x1xf32>
    %611 = tpu.reciprocal %610 {approx = true} : vector<16x1xf32> -> vector<16x1xf32>
    %612 = vector.broadcast %600 : vector<16x1xf32> to vector<16x32xf32>
    %613 = arith.subf %594, %612 : vector<16x32xf32>
    %614 = vector.broadcast %595 : vector<1x32xf32> to vector<16x32xf32>
    %615 = arith.mulf %614, %613 : vector<16x32xf32>
    %616 = vector.broadcast %611 : vector<16x1xf32> to vector<16x32xf32>
    %617 = arith.mulf %615, %616 : vector<16x32xf32>
    %618 = vector.broadcast %596 : vector<1x32xf32> to vector<16x32xf32>
    %619 = arith.addf %617, %618 : vector<16x32xf32>
    %c848 = arith.constant 848 : index
    %c0_226 = arith.constant 0 : index
    %620 = vector.load %arg2[%c848, %c0_226] : memref<1320x128xf32, #tpu.memory_space<vmem>>, vector<32x64xf32>
    %c880 = arith.constant 880 : index
    %c0_227 = arith.constant 0 : index
    %621 = vector.load %arg2[%c880, %c0_227] : memref<1320x128xf32, #tpu.memory_space<vmem>>, vector<1x64xf32>
    %c888 = arith.constant 888 : index
    %c0_228 = arith.constant 0 : index
    %622 = vector.load %arg2[%c888, %c0_228] : memref<1320x128xf32, #tpu.memory_space<vmem>>, vector<64x32xf32>
    %c952 = arith.constant 952 : index
    %c0_229 = arith.constant 0 : index
    %623 = vector.load %arg2[%c952, %c0_229] : memref<1320x128xf32, #tpu.memory_space<vmem>>, vector<1x32xf32>
    %cst_230 = arith.constant dense<0.000000e+00> : vector<16x64xf32>
    %624 = tpu.matmul %619, %620, %cst_230 {dimension_numbers = #tpu.dot_dimension_numbers<[1], [0], [0], [1], [0, 0, 1, 1], [], []>} : vector<16x32xf32>, vector<32x64xf32>, vector<16x64xf32> -> vector<16x64xf32>
    %625 = vector.broadcast %621 : vector<1x64xf32> to vector<16x64xf32>
    %626 = arith.addf %624, %625 : vector<16x64xf32>
    %cst_231 = arith.constant 0.000000e+00 : f32
    %627 = vector.broadcast %cst_231 : f32 to vector<16x64xf32>
    %628 = arith.maximumf %626, %627 : vector<16x64xf32>
    %cst_232 = arith.constant dense<0.000000e+00> : vector<16x32xf32>
    %629 = tpu.matmul %628, %622, %cst_232 {dimension_numbers = #tpu.dot_dimension_numbers<[1], [0], [0], [1], [0, 0, 1, 1], [], []>} : vector<16x64xf32>, vector<64x32xf32>, vector<16x32xf32> -> vector<16x32xf32>
    %630 = vector.broadcast %623 : vector<1x32xf32> to vector<16x32xf32>
    %631 = arith.addf %629, %630 : vector<16x32xf32>
    %632 = arith.addf %594, %631 : vector<16x32xf32>
    %c960 = arith.constant 960 : index
    %c0_233 = arith.constant 0 : index
    %633 = vector.load %arg2[%c960, %c0_233] : memref<1320x128xf32, #tpu.memory_space<vmem>>, vector<1x32xf32>
    %c968 = arith.constant 968 : index
    %c0_234 = arith.constant 0 : index
    %634 = vector.load %arg2[%c968, %c0_234] : memref<1320x128xf32, #tpu.memory_space<vmem>>, vector<1x32xf32>
    %cst_235 = arith.constant dense<0.000000e+00> : vector<16xf32>
    %635 = vector.multi_reduction <add>, %632, %cst_235 [1] : vector<16x32xf32> to vector<16xf32>
    %636 = vector.shape_cast %635 : vector<16xf32> to vector<16x1xf32>
    %cst_236 = arith.constant 3.200000e+01 : f32
    %637 = vector.broadcast %cst_236 : f32 to vector<16x1xf32>
    %638 = arith.divf %636, %637 : vector<16x1xf32>
    %639 = vector.broadcast %638 : vector<16x1xf32> to vector<16x32xf32>
    %640 = arith.subf %632, %639 : vector<16x32xf32>
    %641 = arith.mulf %640, %640 : vector<16x32xf32>
    %cst_237 = arith.constant dense<0.000000e+00> : vector<16xf32>
    %642 = vector.multi_reduction <add>, %641, %cst_237 [1] : vector<16x32xf32> to vector<16xf32>
    %643 = vector.shape_cast %642 : vector<16xf32> to vector<16x1xf32>
    %cst_238 = arith.constant 0.0322580636 : f32
    %644 = vector.broadcast %cst_238 : f32 to vector<16x1xf32>
    %645 = arith.mulf %643, %644 : vector<16x1xf32>
    %646 = math.sqrt %645 : vector<16x1xf32>
    %cst_239 = arith.constant 9.99999997E-7 : f32
    %647 = vector.broadcast %cst_239 : f32 to vector<16x1xf32>
    %648 = arith.addf %646, %647 : vector<16x1xf32>
    %649 = tpu.reciprocal %648 {approx = true} : vector<16x1xf32> -> vector<16x1xf32>
    %650 = vector.broadcast %638 : vector<16x1xf32> to vector<16x32xf32>
    %651 = arith.subf %632, %650 : vector<16x32xf32>
    %652 = vector.broadcast %633 : vector<1x32xf32> to vector<16x32xf32>
    %653 = arith.mulf %652, %651 : vector<16x32xf32>
    %654 = vector.broadcast %649 : vector<16x1xf32> to vector<16x32xf32>
    %655 = arith.mulf %653, %654 : vector<16x32xf32>
    %656 = vector.broadcast %634 : vector<1x32xf32> to vector<16x32xf32>
    %657 = arith.addf %655, %656 : vector<16x32xf32>
    %c976 = arith.constant 976 : index
    %c0_240 = arith.constant 0 : index
    %658 = vector.load %arg2[%c976, %c0_240] : memref<1320x128xf32, #tpu.memory_space<vmem>>, vector<32x96xf32>
    %cst_241 = arith.constant dense<0.000000e+00> : vector<16x96xf32>
    %659 = tpu.matmul %657, %658, %cst_241 {dimension_numbers = #tpu.dot_dimension_numbers<[1], [0], [0], [1], [0, 0, 1, 1], [], []>} : vector<16x32xf32>, vector<32x96xf32>, vector<16x96xf32> -> vector<16x96xf32>
    %c1008 = arith.constant 1008 : index
    %c0_242 = arith.constant 0 : index
    %660 = vector.load %arg2[%c1008, %c0_242] : memref<1320x128xf32, #tpu.memory_space<vmem>>, vector<1x96xf32>
    %661 = vector.broadcast %660 : vector<1x96xf32> to vector<16x96xf32>
    %662 = arith.addf %659, %661 : vector<16x96xf32>
    %663 = vector.extract_strided_slice %662 {offsets = [0, 0], sizes = [16, 32], strides = [1, 1]} : vector<16x96xf32> to vector<16x32xf32>
    %664 = vector.extract_strided_slice %662 {offsets = [0, 32], sizes = [16, 32], strides = [1, 1]} : vector<16x96xf32> to vector<16x32xf32>
    %665 = vector.extract_strided_slice %662 {offsets = [0, 64], sizes = [16, 32], strides = [1, 1]} : vector<16x96xf32> to vector<16x32xf32>
    %c1016 = arith.constant 1016 : index
    %c0_243 = arith.constant 0 : index
    %666 = vector.load %arg2[%c1016, %c0_243] : memref<1320x128xf32, #tpu.memory_space<vmem>>, vector<32x32xf32>
    %c1048 = arith.constant 1048 : index
    %c0_244 = arith.constant 0 : index
    %667 = vector.load %arg2[%c1048, %c0_244] : memref<1320x128xf32, #tpu.memory_space<vmem>>, vector<1x32xf32>
    %668 = vector.extract_strided_slice %663 {offsets = [0, 0], sizes = [16, 8], strides = [1, 1]} : vector<16x32xf32> to vector<16x8xf32>
    %669 = vector.extract_strided_slice %664 {offsets = [0, 0], sizes = [16, 8], strides = [1, 1]} : vector<16x32xf32> to vector<16x8xf32>
    %cst_245 = arith.constant dense<0.000000e+00> : vector<16x16xf32>
    %670 = tpu.matmul %668, %669, %cst_245 {dimension_numbers = #tpu.dot_dimension_numbers<[1], [1], [0], [0], [0, 0, 1, 0], [], []>} : vector<16x8xf32>, vector<16x8xf32>, vector<16x16xf32> -> vector<16x16xf32>
    %cst_246 = arith.constant 0.353553385 : f32
    %671 = vector.broadcast %cst_246 : f32 to vector<16x16xf32>
    %672 = arith.mulf %670, %671 : vector<16x16xf32>
    %673 = arith.addf %672, %2 : vector<16x16xf32>
    %cst_247 = arith.constant dense<0xFF800000> : vector<16xf32>
    %674 = vector.multi_reduction <maximumf>, %673, %cst_247 [1] : vector<16x16xf32> to vector<16xf32>
    %675 = vector.shape_cast %674 : vector<16xf32> to vector<16x1xf32>
    %676 = vector.broadcast %675 : vector<16x1xf32> to vector<16x16xf32>
    %677 = arith.subf %673, %676 : vector<16x16xf32>
    %678 = math.exp %677 : vector<16x16xf32>
    %cst_248 = arith.constant dense<0.000000e+00> : vector<16xf32>
    %679 = vector.multi_reduction <add>, %678, %cst_248 [1] : vector<16x16xf32> to vector<16xf32>
    %680 = vector.shape_cast %679 : vector<16xf32> to vector<16x1xf32>
    %681 = tpu.reciprocal %680 {approx = true} : vector<16x1xf32> -> vector<16x1xf32>
    %682 = vector.broadcast %681 : vector<16x1xf32> to vector<16x16xf32>
    %683 = arith.mulf %678, %682 : vector<16x16xf32>
    %684 = vector.extract_strided_slice %665 {offsets = [0, 0], sizes = [16, 8], strides = [1, 1]} : vector<16x32xf32> to vector<16x8xf32>
    %cst_249 = arith.constant dense<0.000000e+00> : vector<16x8xf32>
    %685 = tpu.matmul %683, %684, %cst_249 {dimension_numbers = #tpu.dot_dimension_numbers<[1], [0], [0], [1], [0, 0, 1, 1], [], []>} : vector<16x16xf32>, vector<16x8xf32>, vector<16x8xf32> -> vector<16x8xf32>
    %c0_250 = arith.constant 0 : index
    %c0_251 = arith.constant 0 : index
    %686 = vector.load %arg4[%c0_250, %c0_251] : memref<16x32xf32, #tpu.memory_space<vmem>>, vector<16x8xf32>
    tpu.vector_store %arg4[%c0_250, %c0_251], %685 {strides = array<i32>} : memref<16x32xf32, #tpu.memory_space<vmem>>, vector<16x8xf32>,
    %687 = vector.extract_strided_slice %663 {offsets = [0, 8], sizes = [16, 8], strides = [1, 1]} : vector<16x32xf32> to vector<16x8xf32>
    %688 = vector.extract_strided_slice %664 {offsets = [0, 8], sizes = [16, 8], strides = [1, 1]} : vector<16x32xf32> to vector<16x8xf32>
    %cst_252 = arith.constant dense<0.000000e+00> : vector<16x16xf32>
    %689 = tpu.matmul %687, %688, %cst_252 {dimension_numbers = #tpu.dot_dimension_numbers<[1], [1], [0], [0], [0, 0, 1, 0], [], []>} : vector<16x8xf32>, vector<16x8xf32>, vector<16x16xf32> -> vector<16x16xf32>
    %cst_253 = arith.constant 0.353553385 : f32
    %690 = vector.broadcast %cst_253 : f32 to vector<16x16xf32>
    %691 = arith.mulf %689, %690 : vector<16x16xf32>
    %692 = arith.addf %691, %2 : vector<16x16xf32>
    %cst_254 = arith.constant dense<0xFF800000> : vector<16xf32>
    %693 = vector.multi_reduction <maximumf>, %692, %cst_254 [1] : vector<16x16xf32> to vector<16xf32>
    %694 = vector.shape_cast %693 : vector<16xf32> to vector<16x1xf32>
    %695 = vector.broadcast %694 : vector<16x1xf32> to vector<16x16xf32>
    %696 = arith.subf %692, %695 : vector<16x16xf32>
    %697 = math.exp %696 : vector<16x16xf32>
    %cst_255 = arith.constant dense<0.000000e+00> : vector<16xf32>
    %698 = vector.multi_reduction <add>, %697, %cst_255 [1] : vector<16x16xf32> to vector<16xf32>
    %699 = vector.shape_cast %698 : vector<16xf32> to vector<16x1xf32>
    %700 = tpu.reciprocal %699 {approx = true} : vector<16x1xf32> -> vector<16x1xf32>
    %701 = vector.broadcast %700 : vector<16x1xf32> to vector<16x16xf32>
    %702 = arith.mulf %697, %701 : vector<16x16xf32>
    %703 = vector.extract_strided_slice %665 {offsets = [0, 8], sizes = [16, 8], strides = [1, 1]} : vector<16x32xf32> to vector<16x8xf32>
    %cst_256 = arith.constant dense<0.000000e+00> : vector<16x8xf32>
    %704 = tpu.matmul %702, %703, %cst_256 {dimension_numbers = #tpu.dot_dimension_numbers<[1], [0], [0], [1], [0, 0, 1, 1], [], []>} : vector<16x16xf32>, vector<16x8xf32>, vector<16x8xf32> -> vector<16x8xf32>
    %c0_257 = arith.constant 0 : index
    %c8_258 = arith.constant 8 : index
    %705 = vector.load %arg4[%c0_257, %c8_258] : memref<16x32xf32, #tpu.memory_space<vmem>>, vector<16x8xf32>
    tpu.vector_store %arg4[%c0_257, %c8_258], %704 {strides = array<i32>} : memref<16x32xf32, #tpu.memory_space<vmem>>, vector<16x8xf32>,
    %706 = vector.extract_strided_slice %663 {offsets = [0, 16], sizes = [16, 8], strides = [1, 1]} : vector<16x32xf32> to vector<16x8xf32>
    %707 = vector.extract_strided_slice %664 {offsets = [0, 16], sizes = [16, 8], strides = [1, 1]} : vector<16x32xf32> to vector<16x8xf32>
    %cst_259 = arith.constant dense<0.000000e+00> : vector<16x16xf32>
    %708 = tpu.matmul %706, %707, %cst_259 {dimension_numbers = #tpu.dot_dimension_numbers<[1], [1], [0], [0], [0, 0, 1, 0], [], []>} : vector<16x8xf32>, vector<16x8xf32>, vector<16x16xf32> -> vector<16x16xf32>
    %cst_260 = arith.constant 0.353553385 : f32
    %709 = vector.broadcast %cst_260 : f32 to vector<16x16xf32>
    %710 = arith.mulf %708, %709 : vector<16x16xf32>
    %711 = arith.addf %710, %2 : vector<16x16xf32>
    %cst_261 = arith.constant dense<0xFF800000> : vector<16xf32>
    %712 = vector.multi_reduction <maximumf>, %711, %cst_261 [1] : vector<16x16xf32> to vector<16xf32>
    %713 = vector.shape_cast %712 : vector<16xf32> to vector<16x1xf32>
    %714 = vector.broadcast %713 : vector<16x1xf32> to vector<16x16xf32>
    %715 = arith.subf %711, %714 : vector<16x16xf32>
    %716 = math.exp %715 : vector<16x16xf32>
    %cst_262 = arith.constant dense<0.000000e+00> : vector<16xf32>
    %717 = vector.multi_reduction <add>, %716, %cst_262 [1] : vector<16x16xf32> to vector<16xf32>
    %718 = vector.shape_cast %717 : vector<16xf32> to vector<16x1xf32>
    %719 = tpu.reciprocal %718 {approx = true} : vector<16x1xf32> -> vector<16x1xf32>
    %720 = vector.broadcast %719 : vector<16x1xf32> to vector<16x16xf32>
    %721 = arith.mulf %716, %720 : vector<16x16xf32>
    %722 = vector.extract_strided_slice %665 {offsets = [0, 16], sizes = [16, 8], strides = [1, 1]} : vector<16x32xf32> to vector<16x8xf32>
    %cst_263 = arith.constant dense<0.000000e+00> : vector<16x8xf32>
    %723 = tpu.matmul %721, %722, %cst_263 {dimension_numbers = #tpu.dot_dimension_numbers<[1], [0], [0], [1], [0, 0, 1, 1], [], []>} : vector<16x16xf32>, vector<16x8xf32>, vector<16x8xf32> -> vector<16x8xf32>
    %c0_264 = arith.constant 0 : index
    %c16_265 = arith.constant 16 : index
    %724 = vector.load %arg4[%c0_264, %c16_265] : memref<16x32xf32, #tpu.memory_space<vmem>>, vector<16x8xf32>
    tpu.vector_store %arg4[%c0_264, %c16_265], %723 {strides = array<i32>} : memref<16x32xf32, #tpu.memory_space<vmem>>, vector<16x8xf32>,
    %725 = vector.extract_strided_slice %663 {offsets = [0, 24], sizes = [16, 8], strides = [1, 1]} : vector<16x32xf32> to vector<16x8xf32>
    %726 = vector.extract_strided_slice %664 {offsets = [0, 24], sizes = [16, 8], strides = [1, 1]} : vector<16x32xf32> to vector<16x8xf32>
    %cst_266 = arith.constant dense<0.000000e+00> : vector<16x16xf32>
    %727 = tpu.matmul %725, %726, %cst_266 {dimension_numbers = #tpu.dot_dimension_numbers<[1], [1], [0], [0], [0, 0, 1, 0], [], []>} : vector<16x8xf32>, vector<16x8xf32>, vector<16x16xf32> -> vector<16x16xf32>
    %cst_267 = arith.constant 0.353553385 : f32
    %728 = vector.broadcast %cst_267 : f32 to vector<16x16xf32>
    %729 = arith.mulf %727, %728 : vector<16x16xf32>
    %730 = arith.addf %729, %2 : vector<16x16xf32>
    %cst_268 = arith.constant dense<0xFF800000> : vector<16xf32>
    %731 = vector.multi_reduction <maximumf>, %730, %cst_268 [1] : vector<16x16xf32> to vector<16xf32>
    %732 = vector.shape_cast %731 : vector<16xf32> to vector<16x1xf32>
    %733 = vector.broadcast %732 : vector<16x1xf32> to vector<16x16xf32>
    %734 = arith.subf %730, %733 : vector<16x16xf32>
    %735 = math.exp %734 : vector<16x16xf32>
    %cst_269 = arith.constant dense<0.000000e+00> : vector<16xf32>
    %736 = vector.multi_reduction <add>, %735, %cst_269 [1] : vector<16x16xf32> to vector<16xf32>
    %737 = vector.shape_cast %736 : vector<16xf32> to vector<16x1xf32>
    %738 = tpu.reciprocal %737 {approx = true} : vector<16x1xf32> -> vector<16x1xf32>
    %739 = vector.broadcast %738 : vector<16x1xf32> to vector<16x16xf32>
    %740 = arith.mulf %735, %739 : vector<16x16xf32>
    %741 = vector.extract_strided_slice %665 {offsets = [0, 24], sizes = [16, 8], strides = [1, 1]} : vector<16x32xf32> to vector<16x8xf32>
    %cst_270 = arith.constant dense<0.000000e+00> : vector<16x8xf32>
    %742 = tpu.matmul %740, %741, %cst_270 {dimension_numbers = #tpu.dot_dimension_numbers<[1], [0], [0], [1], [0, 0, 1, 1], [], []>} : vector<16x16xf32>, vector<16x8xf32>, vector<16x8xf32> -> vector<16x8xf32>
    %c0_271 = arith.constant 0 : index
    %c24_272 = arith.constant 24 : index
    %743 = vector.load %arg4[%c0_271, %c24_272] : memref<16x32xf32, #tpu.memory_space<vmem>>, vector<16x8xf32>
    tpu.vector_store %arg4[%c0_271, %c24_272], %742 {strides = array<i32>} : memref<16x32xf32, #tpu.memory_space<vmem>>, vector<16x8xf32>,
    %c0_273 = arith.constant 0 : index
    %c0_274 = arith.constant 0 : index
    %744 = vector.load %arg4[%c0_273, %c0_274] : memref<16x32xf32, #tpu.memory_space<vmem>>, vector<16x32xf32>
    %cst_275 = arith.constant dense<0.000000e+00> : vector<16x32xf32>
    %745 = tpu.matmul %744, %666, %cst_275 {dimension_numbers = #tpu.dot_dimension_numbers<[1], [0], [0], [1], [0, 0, 1, 1], [], []>} : vector<16x32xf32>, vector<32x32xf32>, vector<16x32xf32> -> vector<16x32xf32>
    %746 = vector.broadcast %667 : vector<1x32xf32> to vector<16x32xf32>
    %747 = arith.addf %745, %746 : vector<16x32xf32>
    %748 = arith.addf %632, %747 : vector<16x32xf32>
    %c1056 = arith.constant 1056 : index
    %c0_276 = arith.constant 0 : index
    %749 = vector.load %arg2[%c1056, %c0_276] : memref<1320x128xf32, #tpu.memory_space<vmem>>, vector<1x32xf32>
    %c1064 = arith.constant 1064 : index
    %c0_277 = arith.constant 0 : index
    %750 = vector.load %arg2[%c1064, %c0_277] : memref<1320x128xf32, #tpu.memory_space<vmem>>, vector<1x32xf32>
    %cst_278 = arith.constant dense<0.000000e+00> : vector<16xf32>
    %751 = vector.multi_reduction <add>, %748, %cst_278 [1] : vector<16x32xf32> to vector<16xf32>
    %752 = vector.shape_cast %751 : vector<16xf32> to vector<16x1xf32>
    %cst_279 = arith.constant 3.200000e+01 : f32
    %753 = vector.broadcast %cst_279 : f32 to vector<16x1xf32>
    %754 = arith.divf %752, %753 : vector<16x1xf32>
    %755 = vector.broadcast %754 : vector<16x1xf32> to vector<16x32xf32>
    %756 = arith.subf %748, %755 : vector<16x32xf32>
    %757 = arith.mulf %756, %756 : vector<16x32xf32>
    %cst_280 = arith.constant dense<0.000000e+00> : vector<16xf32>
    %758 = vector.multi_reduction <add>, %757, %cst_280 [1] : vector<16x32xf32> to vector<16xf32>
    %759 = vector.shape_cast %758 : vector<16xf32> to vector<16x1xf32>
    %cst_281 = arith.constant 0.0322580636 : f32
    %760 = vector.broadcast %cst_281 : f32 to vector<16x1xf32>
    %761 = arith.mulf %759, %760 : vector<16x1xf32>
    %762 = math.sqrt %761 : vector<16x1xf32>
    %cst_282 = arith.constant 9.99999997E-7 : f32
    %763 = vector.broadcast %cst_282 : f32 to vector<16x1xf32>
    %764 = arith.addf %762, %763 : vector<16x1xf32>
    %765 = tpu.reciprocal %764 {approx = true} : vector<16x1xf32> -> vector<16x1xf32>
    %766 = vector.broadcast %754 : vector<16x1xf32> to vector<16x32xf32>
    %767 = arith.subf %748, %766 : vector<16x32xf32>
    %768 = vector.broadcast %749 : vector<1x32xf32> to vector<16x32xf32>
    %769 = arith.mulf %768, %767 : vector<16x32xf32>
    %770 = vector.broadcast %765 : vector<16x1xf32> to vector<16x32xf32>
    %771 = arith.mulf %769, %770 : vector<16x32xf32>
    %772 = vector.broadcast %750 : vector<1x32xf32> to vector<16x32xf32>
    %773 = arith.addf %771, %772 : vector<16x32xf32>
    %c1072 = arith.constant 1072 : index
    %c0_283 = arith.constant 0 : index
    %774 = vector.load %arg2[%c1072, %c0_283] : memref<1320x128xf32, #tpu.memory_space<vmem>>, vector<32x32xf32>
    %cst_284 = arith.constant dense<0.000000e+00> : vector<16x32xf32>
    %775 = tpu.matmul %773, %774, %cst_284 {dimension_numbers = #tpu.dot_dimension_numbers<[1], [0], [0], [1], [0, 0, 1, 1], [], []>} : vector<16x32xf32>, vector<32x32xf32>, vector<16x32xf32> -> vector<16x32xf32>
    %c1104 = arith.constant 1104 : index
    %c0_285 = arith.constant 0 : index
    %776 = vector.load %arg2[%c1104, %c0_285] : memref<1320x128xf32, #tpu.memory_space<vmem>>, vector<1x32xf32>
    %777 = vector.broadcast %776 : vector<1x32xf32> to vector<16x32xf32>
    %778 = arith.addf %775, %777 : vector<16x32xf32>
    %c1112 = arith.constant 1112 : index
    %c0_286 = arith.constant 0 : index
    %779 = vector.load %arg2[%c1112, %c0_286] : memref<1320x128xf32, #tpu.memory_space<vmem>>, vector<32x64xf32>
    %cst_287 = arith.constant dense<0.000000e+00> : vector<16x64xf32>
    %780 = tpu.matmul %348, %779, %cst_287 {dimension_numbers = #tpu.dot_dimension_numbers<[1], [0], [0], [1], [0, 0, 1, 1], [], []>} : vector<16x32xf32>, vector<32x64xf32>, vector<16x64xf32> -> vector<16x64xf32>
    %c1144 = arith.constant 1144 : index
    %c0_288 = arith.constant 0 : index
    %781 = vector.load %arg2[%c1144, %c0_288] : memref<1320x128xf32, #tpu.memory_space<vmem>>, vector<1x64xf32>
    %782 = vector.broadcast %781 : vector<1x64xf32> to vector<16x64xf32>
    %783 = arith.addf %780, %782 : vector<16x64xf32>
    %784 = vector.extract_strided_slice %783 {offsets = [0, 0], sizes = [16, 32], strides = [1, 1]} : vector<16x64xf32> to vector<16x32xf32>
    %785 = vector.extract_strided_slice %783 {offsets = [0, 32], sizes = [16, 32], strides = [1, 1]} : vector<16x64xf32> to vector<16x32xf32>
    %c1152 = arith.constant 1152 : index
    %c0_289 = arith.constant 0 : index
    %786 = vector.load %arg2[%c1152, %c0_289] : memref<1320x128xf32, #tpu.memory_space<vmem>>, vector<32x32xf32>
    %c1184 = arith.constant 1184 : index
    %c0_290 = arith.constant 0 : index
    %787 = vector.load %arg2[%c1184, %c0_290] : memref<1320x128xf32, #tpu.memory_space<vmem>>, vector<1x32xf32>
    %788 = vector.extract_strided_slice %778 {offsets = [0, 0], sizes = [16, 8], strides = [1, 1]} : vector<16x32xf32> to vector<16x8xf32>
    %789 = vector.extract_strided_slice %784 {offsets = [0, 0], sizes = [16, 8], strides = [1, 1]} : vector<16x32xf32> to vector<16x8xf32>
    %cst_291 = arith.constant dense<0.000000e+00> : vector<16x16xf32>
    %790 = tpu.matmul %788, %789, %cst_291 {dimension_numbers = #tpu.dot_dimension_numbers<[1], [1], [0], [0], [0, 0, 1, 0], [], []>} : vector<16x8xf32>, vector<16x8xf32>, vector<16x16xf32> -> vector<16x16xf32>
    %cst_292 = arith.constant 0.353553385 : f32
    %791 = vector.broadcast %cst_292 : f32 to vector<16x16xf32>
    %792 = arith.mulf %790, %791 : vector<16x16xf32>
    %793 = arith.addf %792, %1 : vector<16x16xf32>
    %cst_293 = arith.constant dense<0xFF800000> : vector<16xf32>
    %794 = vector.multi_reduction <maximumf>, %793, %cst_293 [1] : vector<16x16xf32> to vector<16xf32>
    %795 = vector.shape_cast %794 : vector<16xf32> to vector<16x1xf32>
    %796 = vector.broadcast %795 : vector<16x1xf32> to vector<16x16xf32>
    %797 = arith.subf %793, %796 : vector<16x16xf32>
    %798 = math.exp %797 : vector<16x16xf32>
    %cst_294 = arith.constant dense<0.000000e+00> : vector<16xf32>
    %799 = vector.multi_reduction <add>, %798, %cst_294 [1] : vector<16x16xf32> to vector<16xf32>
    %800 = vector.shape_cast %799 : vector<16xf32> to vector<16x1xf32>
    %801 = tpu.reciprocal %800 {approx = true} : vector<16x1xf32> -> vector<16x1xf32>
    %802 = vector.broadcast %801 : vector<16x1xf32> to vector<16x16xf32>
    %803 = arith.mulf %798, %802 : vector<16x16xf32>
    %804 = vector.extract_strided_slice %785 {offsets = [0, 0], sizes = [16, 8], strides = [1, 1]} : vector<16x32xf32> to vector<16x8xf32>
    %cst_295 = arith.constant dense<0.000000e+00> : vector<16x8xf32>
    %805 = tpu.matmul %803, %804, %cst_295 {dimension_numbers = #tpu.dot_dimension_numbers<[1], [0], [0], [1], [0, 0, 1, 1], [], []>} : vector<16x16xf32>, vector<16x8xf32>, vector<16x8xf32> -> vector<16x8xf32>
    %c0_296 = arith.constant 0 : index
    %c0_297 = arith.constant 0 : index
    %806 = vector.load %arg4[%c0_296, %c0_297] : memref<16x32xf32, #tpu.memory_space<vmem>>, vector<16x8xf32>
    tpu.vector_store %arg4[%c0_296, %c0_297], %805 {strides = array<i32>} : memref<16x32xf32, #tpu.memory_space<vmem>>, vector<16x8xf32>,
    %807 = vector.extract_strided_slice %778 {offsets = [0, 8], sizes = [16, 8], strides = [1, 1]} : vector<16x32xf32> to vector<16x8xf32>
    %808 = vector.extract_strided_slice %784 {offsets = [0, 8], sizes = [16, 8], strides = [1, 1]} : vector<16x32xf32> to vector<16x8xf32>
    %cst_298 = arith.constant dense<0.000000e+00> : vector<16x16xf32>
    %809 = tpu.matmul %807, %808, %cst_298 {dimension_numbers = #tpu.dot_dimension_numbers<[1], [1], [0], [0], [0, 0, 1, 0], [], []>} : vector<16x8xf32>, vector<16x8xf32>, vector<16x16xf32> -> vector<16x16xf32>
    %cst_299 = arith.constant 0.353553385 : f32
    %810 = vector.broadcast %cst_299 : f32 to vector<16x16xf32>
    %811 = arith.mulf %809, %810 : vector<16x16xf32>
    %812 = arith.addf %811, %1 : vector<16x16xf32>
    %cst_300 = arith.constant dense<0xFF800000> : vector<16xf32>
    %813 = vector.multi_reduction <maximumf>, %812, %cst_300 [1] : vector<16x16xf32> to vector<16xf32>
    %814 = vector.shape_cast %813 : vector<16xf32> to vector<16x1xf32>
    %815 = vector.broadcast %814 : vector<16x1xf32> to vector<16x16xf32>
    %816 = arith.subf %812, %815 : vector<16x16xf32>
    %817 = math.exp %816 : vector<16x16xf32>
    %cst_301 = arith.constant dense<0.000000e+00> : vector<16xf32>
    %818 = vector.multi_reduction <add>, %817, %cst_301 [1] : vector<16x16xf32> to vector<16xf32>
    %819 = vector.shape_cast %818 : vector<16xf32> to vector<16x1xf32>
    %820 = tpu.reciprocal %819 {approx = true} : vector<16x1xf32> -> vector<16x1xf32>
    %821 = vector.broadcast %820 : vector<16x1xf32> to vector<16x16xf32>
    %822 = arith.mulf %817, %821 : vector<16x16xf32>
    %823 = vector.extract_strided_slice %785 {offsets = [0, 8], sizes = [16, 8], strides = [1, 1]} : vector<16x32xf32> to vector<16x8xf32>
    %cst_302 = arith.constant dense<0.000000e+00> : vector<16x8xf32>
    %824 = tpu.matmul %822, %823, %cst_302 {dimension_numbers = #tpu.dot_dimension_numbers<[1], [0], [0], [1], [0, 0, 1, 1], [], []>} : vector<16x16xf32>, vector<16x8xf32>, vector<16x8xf32> -> vector<16x8xf32>
    %c0_303 = arith.constant 0 : index
    %c8_304 = arith.constant 8 : index
    %825 = vector.load %arg4[%c0_303, %c8_304] : memref<16x32xf32, #tpu.memory_space<vmem>>, vector<16x8xf32>
    tpu.vector_store %arg4[%c0_303, %c8_304], %824 {strides = array<i32>} : memref<16x32xf32, #tpu.memory_space<vmem>>, vector<16x8xf32>,
    %826 = vector.extract_strided_slice %778 {offsets = [0, 16], sizes = [16, 8], strides = [1, 1]} : vector<16x32xf32> to vector<16x8xf32>
    %827 = vector.extract_strided_slice %784 {offsets = [0, 16], sizes = [16, 8], strides = [1, 1]} : vector<16x32xf32> to vector<16x8xf32>
    %cst_305 = arith.constant dense<0.000000e+00> : vector<16x16xf32>
    %828 = tpu.matmul %826, %827, %cst_305 {dimension_numbers = #tpu.dot_dimension_numbers<[1], [1], [0], [0], [0, 0, 1, 0], [], []>} : vector<16x8xf32>, vector<16x8xf32>, vector<16x16xf32> -> vector<16x16xf32>
    %cst_306 = arith.constant 0.353553385 : f32
    %829 = vector.broadcast %cst_306 : f32 to vector<16x16xf32>
    %830 = arith.mulf %828, %829 : vector<16x16xf32>
    %831 = arith.addf %830, %1 : vector<16x16xf32>
    %cst_307 = arith.constant dense<0xFF800000> : vector<16xf32>
    %832 = vector.multi_reduction <maximumf>, %831, %cst_307 [1] : vector<16x16xf32> to vector<16xf32>
    %833 = vector.shape_cast %832 : vector<16xf32> to vector<16x1xf32>
    %834 = vector.broadcast %833 : vector<16x1xf32> to vector<16x16xf32>
    %835 = arith.subf %831, %834 : vector<16x16xf32>
    %836 = math.exp %835 : vector<16x16xf32>
    %cst_308 = arith.constant dense<0.000000e+00> : vector<16xf32>
    %837 = vector.multi_reduction <add>, %836, %cst_308 [1] : vector<16x16xf32> to vector<16xf32>
    %838 = vector.shape_cast %837 : vector<16xf32> to vector<16x1xf32>
    %839 = tpu.reciprocal %838 {approx = true} : vector<16x1xf32> -> vector<16x1xf32>
    %840 = vector.broadcast %839 : vector<16x1xf32> to vector<16x16xf32>
    %841 = arith.mulf %836, %840 : vector<16x16xf32>
    %842 = vector.extract_strided_slice %785 {offsets = [0, 16], sizes = [16, 8], strides = [1, 1]} : vector<16x32xf32> to vector<16x8xf32>
    %cst_309 = arith.constant dense<0.000000e+00> : vector<16x8xf32>
    %843 = tpu.matmul %841, %842, %cst_309 {dimension_numbers = #tpu.dot_dimension_numbers<[1], [0], [0], [1], [0, 0, 1, 1], [], []>} : vector<16x16xf32>, vector<16x8xf32>, vector<16x8xf32> -> vector<16x8xf32>
    %c0_310 = arith.constant 0 : index
    %c16_311 = arith.constant 16 : index
    %844 = vector.load %arg4[%c0_310, %c16_311] : memref<16x32xf32, #tpu.memory_space<vmem>>, vector<16x8xf32>
    tpu.vector_store %arg4[%c0_310, %c16_311], %843 {strides = array<i32>} : memref<16x32xf32, #tpu.memory_space<vmem>>, vector<16x8xf32>,
    %845 = vector.extract_strided_slice %778 {offsets = [0, 24], sizes = [16, 8], strides = [1, 1]} : vector<16x32xf32> to vector<16x8xf32>
    %846 = vector.extract_strided_slice %784 {offsets = [0, 24], sizes = [16, 8], strides = [1, 1]} : vector<16x32xf32> to vector<16x8xf32>
    %cst_312 = arith.constant dense<0.000000e+00> : vector<16x16xf32>
    %847 = tpu.matmul %845, %846, %cst_312 {dimension_numbers = #tpu.dot_dimension_numbers<[1], [1], [0], [0], [0, 0, 1, 0], [], []>} : vector<16x8xf32>, vector<16x8xf32>, vector<16x16xf32> -> vector<16x16xf32>
    %cst_313 = arith.constant 0.353553385 : f32
    %848 = vector.broadcast %cst_313 : f32 to vector<16x16xf32>
    %849 = arith.mulf %847, %848 : vector<16x16xf32>
    %850 = arith.addf %849, %1 : vector<16x16xf32>
    %cst_314 = arith.constant dense<0xFF800000> : vector<16xf32>
    %851 = vector.multi_reduction <maximumf>, %850, %cst_314 [1] : vector<16x16xf32> to vector<16xf32>
    %852 = vector.shape_cast %851 : vector<16xf32> to vector<16x1xf32>
    %853 = vector.broadcast %852 : vector<16x1xf32> to vector<16x16xf32>
    %854 = arith.subf %850, %853 : vector<16x16xf32>
    %855 = math.exp %854 : vector<16x16xf32>
    %cst_315 = arith.constant dense<0.000000e+00> : vector<16xf32>
    %856 = vector.multi_reduction <add>, %855, %cst_315 [1] : vector<16x16xf32> to vector<16xf32>
    %857 = vector.shape_cast %856 : vector<16xf32> to vector<16x1xf32>
    %858 = tpu.reciprocal %857 {approx = true} : vector<16x1xf32> -> vector<16x1xf32>
    %859 = vector.broadcast %858 : vector<16x1xf32> to vector<16x16xf32>
    %860 = arith.mulf %855, %859 : vector<16x16xf32>
    %861 = vector.extract_strided_slice %785 {offsets = [0, 24], sizes = [16, 8], strides = [1, 1]} : vector<16x32xf32> to vector<16x8xf32>
    %cst_316 = arith.constant dense<0.000000e+00> : vector<16x8xf32>
    %862 = tpu.matmul %860, %861, %cst_316 {dimension_numbers = #tpu.dot_dimension_numbers<[1], [0], [0], [1], [0, 0, 1, 1], [], []>} : vector<16x16xf32>, vector<16x8xf32>, vector<16x8xf32> -> vector<16x8xf32>
    %c0_317 = arith.constant 0 : index
    %c24_318 = arith.constant 24 : index
    %863 = vector.load %arg4[%c0_317, %c24_318] : memref<16x32xf32, #tpu.memory_space<vmem>>, vector<16x8xf32>
    tpu.vector_store %arg4[%c0_317, %c24_318], %862 {strides = array<i32>} : memref<16x32xf32, #tpu.memory_space<vmem>>, vector<16x8xf32>,
    %c0_319 = arith.constant 0 : index
    %c0_320 = arith.constant 0 : index
    %864 = vector.load %arg4[%c0_319, %c0_320] : memref<16x32xf32, #tpu.memory_space<vmem>>, vector<16x32xf32>
    %cst_321 = arith.constant dense<0.000000e+00> : vector<16x32xf32>
    %865 = tpu.matmul %864, %786, %cst_321 {dimension_numbers = #tpu.dot_dimension_numbers<[1], [0], [0], [1], [0, 0, 1, 1], [], []>} : vector<16x32xf32>, vector<32x32xf32>, vector<16x32xf32> -> vector<16x32xf32>
    %866 = vector.broadcast %787 : vector<1x32xf32> to vector<16x32xf32>
    %867 = arith.addf %865, %866 : vector<16x32xf32>
    %868 = arith.addf %748, %867 : vector<16x32xf32>
    %c1192 = arith.constant 1192 : index
    %c0_322 = arith.constant 0 : index
    %869 = vector.load %arg2[%c1192, %c0_322] : memref<1320x128xf32, #tpu.memory_space<vmem>>, vector<1x32xf32>
    %c1200 = arith.constant 1200 : index
    %c0_323 = arith.constant 0 : index
    %870 = vector.load %arg2[%c1200, %c0_323] : memref<1320x128xf32, #tpu.memory_space<vmem>>, vector<1x32xf32>
    %cst_324 = arith.constant dense<0.000000e+00> : vector<16xf32>
    %871 = vector.multi_reduction <add>, %868, %cst_324 [1] : vector<16x32xf32> to vector<16xf32>
    %872 = vector.shape_cast %871 : vector<16xf32> to vector<16x1xf32>
    %cst_325 = arith.constant 3.200000e+01 : f32
    %873 = vector.broadcast %cst_325 : f32 to vector<16x1xf32>
    %874 = arith.divf %872, %873 : vector<16x1xf32>
    %875 = vector.broadcast %874 : vector<16x1xf32> to vector<16x32xf32>
    %876 = arith.subf %868, %875 : vector<16x32xf32>
    %877 = arith.mulf %876, %876 : vector<16x32xf32>
    %cst_326 = arith.constant dense<0.000000e+00> : vector<16xf32>
    %878 = vector.multi_reduction <add>, %877, %cst_326 [1] : vector<16x32xf32> to vector<16xf32>
    %879 = vector.shape_cast %878 : vector<16xf32> to vector<16x1xf32>
    %cst_327 = arith.constant 0.0322580636 : f32
    %880 = vector.broadcast %cst_327 : f32 to vector<16x1xf32>
    %881 = arith.mulf %879, %880 : vector<16x1xf32>
    %882 = math.sqrt %881 : vector<16x1xf32>
    %cst_328 = arith.constant 9.99999997E-7 : f32
    %883 = vector.broadcast %cst_328 : f32 to vector<16x1xf32>
    %884 = arith.addf %882, %883 : vector<16x1xf32>
    %885 = tpu.reciprocal %884 {approx = true} : vector<16x1xf32> -> vector<16x1xf32>
    %886 = vector.broadcast %874 : vector<16x1xf32> to vector<16x32xf32>
    %887 = arith.subf %868, %886 : vector<16x32xf32>
    %888 = vector.broadcast %869 : vector<1x32xf32> to vector<16x32xf32>
    %889 = arith.mulf %888, %887 : vector<16x32xf32>
    %890 = vector.broadcast %885 : vector<16x1xf32> to vector<16x32xf32>
    %891 = arith.mulf %889, %890 : vector<16x32xf32>
    %892 = vector.broadcast %870 : vector<1x32xf32> to vector<16x32xf32>
    %893 = arith.addf %891, %892 : vector<16x32xf32>
    %c1208 = arith.constant 1208 : index
    %c0_329 = arith.constant 0 : index
    %894 = vector.load %arg2[%c1208, %c0_329] : memref<1320x128xf32, #tpu.memory_space<vmem>>, vector<32x64xf32>
    %c1240 = arith.constant 1240 : index
    %c0_330 = arith.constant 0 : index
    %895 = vector.load %arg2[%c1240, %c0_330] : memref<1320x128xf32, #tpu.memory_space<vmem>>, vector<1x64xf32>
    %c1248 = arith.constant 1248 : index
    %c0_331 = arith.constant 0 : index
    %896 = vector.load %arg2[%c1248, %c0_331] : memref<1320x128xf32, #tpu.memory_space<vmem>>, vector<64x32xf32>
    %c1312 = arith.constant 1312 : index
    %c0_332 = arith.constant 0 : index
    %897 = vector.load %arg2[%c1312, %c0_332] : memref<1320x128xf32, #tpu.memory_space<vmem>>, vector<1x32xf32>
    %cst_333 = arith.constant dense<0.000000e+00> : vector<16x64xf32>
    %898 = tpu.matmul %893, %894, %cst_333 {dimension_numbers = #tpu.dot_dimension_numbers<[1], [0], [0], [1], [0, 0, 1, 1], [], []>} : vector<16x32xf32>, vector<32x64xf32>, vector<16x64xf32> -> vector<16x64xf32>
    %899 = vector.broadcast %895 : vector<1x64xf32> to vector<16x64xf32>
    %900 = arith.addf %898, %899 : vector<16x64xf32>
    %cst_334 = arith.constant 0.000000e+00 : f32
    %901 = vector.broadcast %cst_334 : f32 to vector<16x64xf32>
    %902 = arith.maximumf %900, %901 : vector<16x64xf32>
    %cst_335 = arith.constant dense<0.000000e+00> : vector<16x32xf32>
    %903 = tpu.matmul %902, %896, %cst_335 {dimension_numbers = #tpu.dot_dimension_numbers<[1], [0], [0], [1], [0, 0, 1, 1], [], []>} : vector<16x64xf32>, vector<64x32xf32>, vector<16x32xf32> -> vector<16x32xf32>
    %904 = vector.broadcast %897 : vector<1x32xf32> to vector<16x32xf32>
    %905 = arith.addf %903, %904 : vector<16x32xf32>
    %906 = arith.addf %868, %905 : vector<16x32xf32>
    %c96 = arith.constant 96 : index
    %c0_336 = arith.constant 0 : index
    %907 = vector.load %arg2[%c96, %c0_336] : memref<1320x128xf32, #tpu.memory_space<vmem>>, vector<1x32xf32>
    %c104 = arith.constant 104 : index
    %c0_337 = arith.constant 0 : index
    %908 = vector.load %arg2[%c104, %c0_337] : memref<1320x128xf32, #tpu.memory_space<vmem>>, vector<1x32xf32>
    %cst_338 = arith.constant dense<0.000000e+00> : vector<16xf32>
    %909 = vector.multi_reduction <add>, %906, %cst_338 [1] : vector<16x32xf32> to vector<16xf32>
    %910 = vector.shape_cast %909 : vector<16xf32> to vector<16x1xf32>
    %cst_339 = arith.constant 3.200000e+01 : f32
    %911 = vector.broadcast %cst_339 : f32 to vector<16x1xf32>
    %912 = arith.divf %910, %911 : vector<16x1xf32>
    %913 = vector.broadcast %912 : vector<16x1xf32> to vector<16x32xf32>
    %914 = arith.subf %906, %913 : vector<16x32xf32>
    %915 = arith.mulf %914, %914 : vector<16x32xf32>
    %cst_340 = arith.constant dense<0.000000e+00> : vector<16xf32>
    %916 = vector.multi_reduction <add>, %915, %cst_340 [1] : vector<16x32xf32> to vector<16xf32>
    %917 = vector.shape_cast %916 : vector<16xf32> to vector<16x1xf32>
    %cst_341 = arith.constant 0.0322580636 : f32
    %918 = vector.broadcast %cst_341 : f32 to vector<16x1xf32>
    %919 = arith.mulf %917, %918 : vector<16x1xf32>
    %920 = math.sqrt %919 : vector<16x1xf32>
    %cst_342 = arith.constant 9.99999997E-7 : f32
    %921 = vector.broadcast %cst_342 : f32 to vector<16x1xf32>
    %922 = arith.addf %920, %921 : vector<16x1xf32>
    %923 = tpu.reciprocal %922 {approx = true} : vector<16x1xf32> -> vector<16x1xf32>
    %924 = vector.broadcast %912 : vector<16x1xf32> to vector<16x32xf32>
    %925 = arith.subf %906, %924 : vector<16x32xf32>
    %926 = vector.broadcast %907 : vector<1x32xf32> to vector<16x32xf32>
    %927 = arith.mulf %926, %925 : vector<16x32xf32>
    %928 = vector.broadcast %923 : vector<16x1xf32> to vector<16x32xf32>
    %929 = arith.mulf %927, %928 : vector<16x32xf32>
    %930 = vector.broadcast %908 : vector<1x32xf32> to vector<16x32xf32>
    %931 = arith.addf %929, %930 : vector<16x32xf32>
    %c112 = arith.constant 112 : index
    %c0_343 = arith.constant 0 : index
    %932 = vector.load %arg2[%c112, %c0_343] : memref<1320x128xf32, #tpu.memory_space<vmem>>, vector<32x16xf32>
    %cst_344 = arith.constant dense<0.000000e+00> : vector<16x16xf32>
    %933 = tpu.matmul %931, %932, %cst_344 {dimension_numbers = #tpu.dot_dimension_numbers<[1], [0], [0], [1], [0, 0, 1, 1], [], []>} : vector<16x32xf32>, vector<32x16xf32>, vector<16x16xf32> -> vector<16x16xf32>
    %c144 = arith.constant 144 : index
    %c0_345 = arith.constant 0 : index
    %934 = vector.load %arg2[%c144, %c0_345] : memref<1320x128xf32, #tpu.memory_space<vmem>>, vector<1x16xf32>
    %935 = vector.broadcast %934 : vector<1x16xf32> to vector<16x16xf32>
    %936 = arith.addf %933, %935 : vector<16x16xf32>
    %cst_346 = arith.constant dense<0xFF800000> : vector<16xf32>
    %937 = vector.multi_reduction <maximumf>, %936, %cst_346 [1] : vector<16x16xf32> to vector<16xf32>
    %938 = vector.shape_cast %937 : vector<16xf32> to vector<16x1xf32>
    %939 = vector.broadcast %938 : vector<16x1xf32> to vector<16x16xf32>
    %940 = arith.subf %936, %939 : vector<16x16xf32>
    %941 = math.exp %940 : vector<16x16xf32>
    %cst_347 = arith.constant dense<0.000000e+00> : vector<16xf32>
    %942 = vector.multi_reduction <add>, %941, %cst_347 [1] : vector<16x16xf32> to vector<16xf32>
    %943 = vector.shape_cast %942 : vector<16xf32> to vector<16x1xf32>
    %944 = math.log %943 : vector<16x1xf32>
    %945 = vector.broadcast %944 : vector<16x1xf32> to vector<16x16xf32>
    %946 = arith.subf %940, %945 : vector<16x16xf32>
    %cst_348 = arith.constant 0.000000e+00 : f32
    %947 = vector.broadcast %cst_348 : f32 to vector<1x16x128xf32>
    %c0_349 = arith.constant 0 : index
    %c0_350 = arith.constant 0 : index
    %c0_351 = arith.constant 0 : index
    %948 = vector.load %arg3[%c0_349, %c0_350, %c0_351] : memref<1x16x128xf32, #tpu.memory_space<vmem>>, vector<1x16x128xf32>
    tpu.vector_store %arg3[%c0_349, %c0_350, %c0_351], %947 {strides = array<i32>} : memref<1x16x128xf32, #tpu.memory_space<vmem>>, vector<1x16x128xf32>,
    %c0_352 = arith.constant 0 : index
    %c0_353 = arith.constant 0 : index
    %c0_354 = arith.constant 0 : index
    %949 = vector.load %arg3[%c0_352, %c0_353, %c0_354] : memref<1x16x128xf32, #tpu.memory_space<vmem>>, vector<1x16x16xf32>
    %950 = vector.shape_cast %949 : vector<1x16x16xf32> to vector<16x16xf32>
    %951 = vector.shape_cast %946 : vector<16x16xf32> to vector<1x16x16xf32>
    tpu.vector_store %arg3[%c0_352, %c0_353, %c0_354], %951 {strides = array<i32>} : memref<1x16x128xf32, #tpu.memory_space<vmem>>, vector<1x16x16xf32>,
    return
  }
  func.func @transform_0(%arg0: i32) -> (i32, i32, i32) {
    %c0_i32 = arith.constant 0 : i32
    %c0_i32_0 = arith.constant 0 : i32
    %c0_i32_1 = arith.constant 0 : i32
    return %arg0, %c0_i32, %c0_i32_0 : i32, i32, i32
  }
  func.func @transform_1(%arg0: i32) -> (i32, i32) {
    %c0_i32 = arith.constant 0 : i32
    %c0_i32_0 = arith.constant 0 : i32
    %c0_i32_1 = arith.constant 0 : i32
    return %c0_i32, %c0_i32_0 : i32, i32
  }
  func.func @transform_2(%arg0: i32) -> (i32, i32, i32) {
    %c0_i32 = arith.constant 0 : i32
    %c0_i32_0 = arith.constant 0 : i32
    %c0_i32_1 = arith.constant 0 : i32
    return %arg0, %c0_i32, %c0_i32_0 : i32, i32, i32
  }
}

</mosaic_0001>

<bundles_post_ra>
// kernel: tpu_custom_call.1
= control target key start
LH: loop header
LB: loop body
LE: loop exit
PB: predicated region body
PF: predicated region fallthrough
CT: control target
= control target key end

     0   :  { %7 = vsyncpa [#allocation4], 0  ;;  %s11464_s0 = inlined_call_operand.vmem [shape: s32[1,16,2], index: 0, kind: input, shape index: {}]   ;;  %s11465_s1 = inlined_call_operand.hbm [shape: f32[1320,128], index: 1, kind: input, shape index: {}]   ;;  %s11466_s2 = inlined_call_operand.hbm [shape: f32[1,16,128], index: 2, kind: output, shape index: {}]  }
   0x1   :  { %8 = vsyncpa [#allocation5], 0  ;;  %s10435_s9 = smov [#allocation3]   ;;  %s10387_s13 = scalar_lea.hbm %s11465_s1, 21120 }
   0x2   :  { %s16_s10 = sshll.u32 %s10435_s9, 4  ;;  %p10388_p0 = scmp.ne.s32.totalorder %s11465_s1, %s10387_s13  ;;  %s17_s10 = int_to_ptr.vmem [resolvable:$true] %s16_s10 }
   0x3   :  { %p10391_p1 = scmp.lt.u32.totalorder %s10387_s13, %s11465_s1 }
   0x5   :  { %p10393_p2 = pnand %p10391_p1, %p10388_p0 }
   0x7   :  { %10396 = shalt.err (!%p10393_p2)
}
   0x8   :  { %s10397_s18 = scalar_lea.vmem %s17_s10, 21120  ;;  %p10402_p4 = scmp.lt.s32.totalorder %s17_s10, %s17_s10 }
   0x9   :  { %p10398_p3 = scmp.ne.s32.totalorder %s17_s10, %s10397_s18  ;;  %p10403_p5 = scmp.lt.s32.totalorder %s10397_s18, %s10397_s18 }
   0xb   :  { %p10404_p6 = por %p10403_p5, %p10402_p4 }
   0xd   :  { %p10405_p7 = pnand %p10404_p6, %p10398_p3 }
   0xf   :  { %10408 = shalt.err (!%p10405_p7)
}
  0x10   :  { %s10436_s19 = smov 128   ;;  %s10437_s20 = smov 8  }
  0x11   :  { %22 = dma.hbm_to_vmem [thread:$0]  %s11465_s1, 21120, %s17_s10, [#allocation4], %s10436_s19, %s10436_s19, %s10437_s20  }
  0x12   :  { %10431 = dma.done.wait [#allocation4], 21120  }
  0x13   :  { %10432 = vsyncadd [#allocation4], 4294946176  ;;  %v10438_v0 = vmov 0   ;;  %v32_v1 = vld [vmem:[%s11464_s0] sm:$0xff]  ;;  %v49_v3 = vld [vmem:[#allocation3 + $0x38] sm:$0xff]  ;;  %v10439_v6 = vmov 0.0   ;;  %v34_v7 = vlaneseq }
  0x14   :  { %9845 = vset.pattern.permute.xlu0 %v10438_v0  ;;  %v48_v2 = vld [vmem:[#allocation3 + $0x30] sm:$0xff]  ;;  %v33_v4 = vld [vmem:[%s11464_s0 + $0x8] sm:$0xff]  ;;  %8106 = vst [vmem:[#allocation6] sm:$0xff] %v10439_v6  ;;  %8107 = vst [vmem:[#allocation6 + $0x8] sm:$0xff] %v10439_v6  ;;  %vm50_vm0 = vcmask 130048   ;;  %vm138_vm3 = vcmask 261120  }
  0x15   :  { %37 = vperm.xlu0 %9845, %v32_v1   ;;  %v9361_v5 = vpack.c.bf16 %v49_v3, %v48_v2  ;;  %v10491_v8 = vand.u32 127, %v34_v7  ;;  %v26_v14 = vld [vmem:[#allocation3] sm:$0xff]  ;;  %v27_v18 = vld [vmem:[#allocation3 + $0x8] sm:$0xff]  ;;  %v193_v34 = vld [vmem:[#allocation3 + $0xb0] sm:$0xff]  ;;  %vm293_vm8 = vcmask 64512   ;;  %s10440_s1 = smov 96  }
  0x16   :  { %v192_v33 = vld [vmem:[#allocation3 + $0xa8] sm:$0xff]  ;;  %v194_v35 = vld [vmem:[#allocation3 + $0xb8] sm:$0xff]  ;;  %v195_v37 = vld [vmem:[#allocation3 + $0xc0] sm:$0xff]  ;;  %s10441_s27 = smov 88   ;;  %s10442_s28 = smov 120   ;;  %vm704_vm10 = vcmask 130112  }
  0x17   :  { %9362 = vmatprep.subr.bf16.mxu1 %v9361_v5  ;;  %v9365_v36 = vpack.c.bf16 %v193_v34, %v192_v33  ;;  %v9369_v38 = vpack.c.bf16 %v195_v37, %v194_v35  ;;  %v8131_v55 = vld [vmem:[#allocation3 + $0x98] ss:$0 sm:$0xff]  ;;  %v8132_v58 = vld [vmem:[#allocation3 + $0xa0] ss:$0 sm:$0xff]  ;;  %v8133_v1 = vld [vmem:[#allocation3 + $0xc8] ss:$0 sm:$0xff] }
  0x18   :  { %9364 = vmatpush3.bf16.msra.mxu1 %v9361_v5  ;;  %vm10531_vm9 = vmpackc.low %vm293_vm8, %vm293_vm8  ;;  %s10443_s29 = smov 56   ;;  %s10444_s30 = smov 112   ;;  %vm919_vm11 = vcmask 195712   ;;  %vm1134_vm12 = vcmask 261312  }
  0x19   :  { %40 = vperm.xlu0 %9845, %v33_v4   ;;  %9366 = vmatprep.subr.bf16.mxu1 %v9365_v36  ;;  %s10445_s3 = smov 64   ;;  %s10446_s4 = smov 80  }
  0x1a   :  { %s10447_s5 = smov 48   ;;  %s10448_s6 = smov 104  }
  0x1b   :  { %s10449_s7 = smov 72   ;;  %s10450_s8 = smov 40  }
  0x1c   :  { %s10451_s9 = smov 16   ;;  %s10452_s10 = smov 24  }
  0x94   :  { %v38_v9 = vpop.permute.xlu0 %37 }
  0x95   :  { %vm42_vm1 = vcmp.eq.s32.totalorder %v38_v9, %v10491_v8 }
  0x96   :  { %v8127_v10 = vsel %vm42_vm1, 1.0, %v10439_v6 }
  0x97   :  { %8730 = vmatprep.mubr.msk.f32.mxu1 %vm50_vm0, %v8127_v10 }
  0x98   :  { %v41_v11 = vpop.permute.xlu0 %40 }
  0x99   :  { %vm43_vm2 = vcmp.eq.s32.totalorder %v41_v11, %v10491_v8 }
  0x9a   :  { %v8128_v12 = vsel %vm43_vm2, 1.0, %v10439_v6  ;;  %vm1385_vm2 = vcmask 523264  }
  0x9b   :  { %8731 = vmatmul.mubr.msk.f32.vlgmr.msra.gmra.mrb[0].mxu1 %vm50_vm0, %v8128_v12 }
  0x9c   :  { %9368 = vmatpush3.bf16.msra.mxu1 %v9365_v36 }
  0x9d   :  { %9370 = vmatprep.subr.bf16.mxu1 %v9369_v38 }
  0xa0   :  { %9372 = vmatpush3.bf16.msra.mxu1 %v9369_v38 }
 0x16e   :  { %v8732_v13 = vpop.f32.mrb[0].mxu1 }
 0x16f   :  { %v123_v15 = vpop.f32.mrb[1].mxu1  ;;  %v133_v16 = vmul.f32 5.656854, %v8732_v13 }
 0x170   :  { %v132_v17 = vmul.f32 5.656854, %v123_v15 }
 0x171   :  { %v10499_v20 = vadd.f32 %v133_v16, %v27_v18 }
 0x172   :  { %v10497_v19 = vadd.f32 %v132_v17, %v26_v14 }
 0x173   :  { %v142_v22 = vsel %vm138_vm3, %v10499_v20, 0.0 }
 0x174   :  { %v139_v21 = vsel %vm138_vm3, %v10497_v19, 0.0 }
 0x175   :  { %140 = vadd.xlane.f32.xlu1 %v139_v21 }
 0x179   :  { %143 = vadd.xlane.f32.xlu1 %v142_v22  ;;  %v10547_v22 = vld [vmem:[#allocation3 + $0x18] sm:$0xff] }
 0x202   :  { %v141_v23 = vpop.xlane.xlu1 %140 }
 0x203   :  { %v146_v24 = vmul.f32 0.03125, %v141_v23 }
 0x205   :  { %v148_v25 = vsub.f32 %v10497_v19, %v146_v24 }
 0x206   :  { %v144_v26 = vpop.xlane.xlu1 %143 }
 0x207   :  { %v147_v27 = vmul.f32 0.03125, %v144_v26  ;;  %v150_v28 = vmul.f32 %v148_v25, %v148_v25  ;;  %v182_v56 = vmul.f32 %v8131_v55, %v148_v25  ;;  %v10549_v25 = vld [vmem:[#allocation3 + $0x10] sm:$0xff] }
 0x209   :  { %v149_v29 = vsub.f32 %v10499_v20, %v147_v27  ;;  %v152_v30 = vsel %vm138_vm3, %v150_v28, 0.0 }
 0x20a   :  { %153 = vadd.xlane.f32.xlu0 %v152_v30 }
 0x20b   :  { %v151_v31 = vmul.f32 %v149_v29, %v149_v29  ;;  %v183_v60 = vmul.f32 %v8131_v55, %v149_v29 }
 0x20d   :  { %v155_v32 = vsel %vm138_vm3, %v151_v31, 0.0 }
 0x20e   :  { %156 = vadd.xlane.f32.xlu1 %v155_v32 }
 0x297   :  { %v154_v39 = vpop.xlane.xlu0 %153 }
 0x298   :  { %v158_v40 = vmul.f32 0.032258064, %v154_v39 }
 0x29a   :  { %10078 = vrsqrt.f32 %v158_v40  ;;  %vm162_vm4 = vcmp.eq.f32.partialorder %v158_v40, inf  ;;  %v165_v45 = vand.u32 2147483648, %v158_v40  ;;  %vm164_vm5 = vcmp.eq.f32.partialorder %v158_v40, 0.0 }
 0x29b   :  { %v157_v41 = vpop.xlane.xlu1 %156 }
 0x29c   :  { %v159_v42 = vmul.f32 0.032258064, %v157_v41 }
 0x29e   :  { %10080 = vrsqrt.f32 %v159_v42  ;;  %vm169_vm6 = vcmp.eq.f32.partialorder %v159_v42, inf  ;;  %v172_v51 = vand.u32 2147483648, %v159_v42  ;;  %vm171_vm7 = vcmp.eq.f32.partialorder %v159_v42, 0.0 }
 0x2a4   :  { %v10079_v43 = vpop.eup %10078 }
 0x2a5   :  { %v161_v44 = vmul.f32 %v10079_v43, %v158_v40 }
 0x2a7   :  { %v163_v46 = vsel %vm162_vm4, %v158_v40, %v161_v44 }
 0x2a8   :  { %v10081_v47 = vpop.eup %10080  ;;  %v166_v48 = vsel %vm164_vm5, %v165_v45, %v163_v46 }
 0x2a9   :  { %v168_v49 = vmul.f32 %v10081_v47, %v159_v42  ;;  %v174_v50 = vadd.f32 1e-06, %v166_v48 }
 0x2ab   :  { %v170_v52 = vsel %vm169_vm6, %v159_v42, %v168_v49  ;;  %10082 = vrcp.f32 %v174_v50 }
 0x2ac   :  { %v173_v53 = vsel %vm171_vm7, %v172_v51, %v170_v52 }
 0x2ad   :  { %v175_v54 = vadd.f32 1e-06, %v173_v53 }
 0x2af   :  { %10084 = vrcp.f32 %v175_v54 }
 0x2b5   :  { %v10083_v57 = vpop.eup %10082 }
 0x2b6   :  { %v184_v59 = vmul.f32 %v10083_v57, %v182_v56 }
 0x2b8   :  { %v190_v61 = vadd.f32 %v8132_v58, %v184_v59 }
 0x2b9   :  { %v10085_v62 = vpop.eup %10084 }
 0x2ba   :  { %v185_v63 = vmul.f32 %v10085_v62, %v183_v60  ;;  %8741 = vmatprep.mubr.msk.f32.mxu1 %vm138_vm3, %v190_v61 }
 0x2bc   :  { %v191_v0 = vadd.f32 %v8132_v58, %v185_v63 }
 0x2be   :  { %8742 = vmatmul.mubr.msk.f32.vlgmr.msra.gmra.mrb[2].mxu1 %vm138_vm3, %v191_v0 }
 0x391   :  { %v8743_v2 = vpop.f32.mrb[2].mxu1 }
 0x392   :  { %v10511_v3 = vadd.f32 %v8743_v2, %v8133_v1  ;;  %v273_v4 = vpop.f32.mrb[3].mxu1 }
 0x393   :  { %v10513_v5 = vadd.f32 %v8133_v1, %v273_v4 }
 0x395   :  { %8748 = vmatprep.mubr.msk.f32.mxu0 %vm293_vm8, %v10513_v5  ;;  %v10519_v6 = vpack.i.bf16 %v10511_v3, %v10513_v5 }
 0x397   :  { %9847 = vrot.lane.b32.xlu1 %v10519_v6, %s10440_s1 }
 0x39b   :  { %9852 = vrot.lane.b32.xlu1 %v10519_v6, %s10441_s27 }
 0x39f   :  { %492 = vrot.lane.b32.xlu1 %v10513_v5, %s10442_s28 }
 0x3a3   :  { %494 = vrot.lane.b32.xlu1 %v10511_v3, %s10442_s28 }
 0x409   :  { %v9848_v7 = vpop.permute.xlu1 %9847 }
 0x40a   :  { %v9850_v9 = vunpack.i.h.bf16 %v9848_v7  ;;  %v9849_v10 = vunpack.i.l.bf16 %v9848_v7 }
 0x40c   :  { %v9373_v12 = vpack.c.bf16 %v9850_v9, %v9849_v10 }
 0x40d   :  { %v9853_v13 = vpop.permute.xlu1 %9852 }
 0x40e   :  { %v9855_v14 = vunpack.i.h.bf16 %v9853_v13  ;;  %v9854_v15 = vunpack.i.l.bf16 %v9853_v13  ;;  %9375 = vmatprep.subr.msk.bf16.mxu0 %vm10531_vm9, %v9373_v12 }
 0x40f   :  { %9378 = vmatpush3.bf16.xpose.msk.msra.mxu0 %vm10531_vm9, %v9373_v12 }
 0x410   :  { %v9383_v16 = vpack.c.bf16 %v9855_v14, %v9854_v15 }
 0x411   :  { %v493_v17 = vpop.permute.xlu1 %492 }
 0x412   :  { %9385 = vmatprep.subr.msk.bf16.mxu0 %vm10531_vm9, %v9383_v16 }
 0x415   :  { %v495_v18 = vpop.permute.xlu1 %494 }
 0x416   :  { %8749 = vmatmul.mubr.msk.f32.vlgmr.msra.gmra.mrb[0].mxu0 %vm293_vm8, %v10511_v3 }
 0x417   :  { %9388 = vmatpush3.bf16.xpose.msk.msra.mxu0 %vm10531_vm9, %v9383_v16  ;;  %8762 = vmatprep.mubr.msk.f32.mxu0 %vm293_vm8, %v493_v17 }
 0x41e   :  { %8763 = vmatmul.mubr.msk.f32.vlgmr.msra.gmra.mrb[2].mxu0 %vm293_vm8, %v495_v18 }
 0x4e9   :  { %v8750_v21 = vpop.f32.mrb[0].mxu0 }
 0x4ea   :  { %v378_v23 = vmul.f32 0.35355338, %v8750_v21  ;;  %v368_v24 = vpop.f32.mrb[1].mxu0 }
 0x4eb   :  { %v377_v26 = vmul.f32 0.35355338, %v368_v24 }
 0x4ec   :  { %v380_v27 = vadd.f32 %v378_v23, %v10547_v22 }
 0x4ed   :  { %v379_v28 = vadd.f32 %v377_v26, %v10549_v25 }
 0x4ee   :  { %v384_v29 = vsel %vm50_vm0, %v380_v27, -inf }
 0x4ef   :  { %385 = vmax.xlane.f32.xlu1 %v384_v29  ;;  %v381_v30 = vsel %vm50_vm0, %v379_v28, -inf }
 0x4f0   :  { %382 = vmax.xlane.f32.xlu0 %v381_v30 }
 0x4f1   :  { %v8764_v31 = vpop.f32.mrb[2].mxu0 }
 0x4f2   :  { %v574_v32 = vpop.f32.mrb[3].mxu0  ;;  %v584_v33 = vmul.f32 0.35355338, %v8764_v31 }
 0x4f3   :  { %v583_v34 = vmul.f32 0.35355338, %v574_v32 }
 0x4f4   :  { %v586_v37 = vadd.f32 %v584_v33, %v10547_v22 }
 0x4f5   :  { %v585_v35 = vadd.f32 %v583_v34, %v10549_v25 }
 0x4f6   :  { %v590_v38 = vsel %vm50_vm0, %v586_v37, -inf }
 0x4f7   :  { %v587_v36 = vsel %vm50_vm0, %v585_v35, -inf }
 0x4f8   :  { %588 = vmax.xlane.f32.xlu0 %v587_v36 }
 0x4fc   :  { %591 = vmax.xlane.f32.xlu0 %v590_v38 }
 0x500   :  { %9862 = vrot.lane.b32.xlu1 %v10519_v6, %s10443_s29 }
 0x504   :  { %709 = vrot.lane.b32.xlu1 %v10511_v3, %s10444_s30 }
 0x512   :  { %9857 = vrot.lane.b32.xlu0 %v10519_v6, %s10445_s3 }
 0x57c   :  { %v386_v39 = vpop.xlane.xlu1 %385 }
 0x57d   :  { %v388_v40 = vsub.f32 %v380_v27, %v386_v39  ;;  %v383_v41 = vpop.xlane.xlu0 %382 }
 0x57e   :  { %v387_v42 = vsub.f32 %v379_v28, %v383_v41 }
 0x57f   :  { %v391_v43 = vmul.f32 1.442695, %v388_v40 }
 0x580   :  { %v389_v44 = vmul.f32 1.442695, %v387_v42  ;;  %v9863_v48 = vpop.permute.xlu1 %9862 }
 0x581   :  { %10086 = vpow2.f32 %v391_v43  ;;  %v9865_v55 = vunpack.i.h.bf16 %v9863_v48  ;;  %v9864_v57 = vunpack.i.l.bf16 %v9863_v48 }
 0x582   :  { %10088 = vpow2.f32 %v389_v44 }
 0x583   :  { %v9389_v62 = vpack.c.bf16 %v9865_v55, %v9864_v57 }
 0x584   :  { %v710_v29 = vpop.permute.xlu1 %709 }
 0x585   :  { %v589_v45 = vpop.xlane.xlu0 %588 }
 0x586   :  { %v593_v46 = vsub.f32 %v585_v35, %v589_v45 }
 0x588   :  { %v595_v51 = vmul.f32 1.442695, %v593_v46 }
 0x589   :  { %v592_v47 = vpop.xlane.xlu0 %591 }
 0x58a   :  { %v594_v49 = vsub.f32 %v586_v37, %v592_v47 }
 0x58b   :  { %v10087_v50 = vpop.eup %10086 }
 0x58c   :  { %v597_v52 = vmul.f32 1.442695, %v594_v49  ;;  %v396_v53 = vsel %vm50_vm0, %v10087_v50, 0.0  ;;  %v10089_v54 = vpop.eup %10088 }
 0x58d   :  { %397 = vadd.xlane.f32.xlu0 %v396_v53  ;;  %v9858_v56 = vpop.permute.xlu0 %9857  ;;  %v393_v60 = vsel %vm50_vm0, %v10089_v54, 0.0 }
 0x58e   :  { %10090 = vpow2.f32 %v597_v52  ;;  %v9860_v58 = vunpack.i.h.bf16 %v9858_v56  ;;  %v9859_v59 = vunpack.i.l.bf16 %v9858_v56 }
 0x58f   :  { %10092 = vpow2.f32 %v595_v51 }
 0x590   :  { %v9379_v61 = vpack.c.bf16 %v9860_v58, %v9859_v59 }
 0x591   :  { %394 = vadd.xlane.f32.xlu0 %v393_v60 }
 0x592   :  { %9380 = vmatprep.subr.bf16.mxu1 %v9379_v61 }
 0x593   :  { %9382 = vmatpush3.bf16.msra.mxu1 %v9379_v61 }
 0x594   :  { %9390 = vmatprep.subr.bf16.mxu1 %v9389_v62 }
 0x598   :  { %v10091_v63 = vpop.eup %10090 }
 0x599   :  { %v602_v0 = vsel %vm50_vm0, %v10091_v63, 0.0  ;;  %v10093_v1 = vpop.eup %10092 }
 0x59a   :  { %603 = vadd.xlane.f32.xlu0 %v602_v0  ;;  %v599_v2 = vsel %vm50_vm0, %v10093_v1, 0.0 }
 0x59e   :  { %600 = vadd.xlane.f32.xlu0 %v599_v2 }
 0x5b4   :  { %9867 = vrot.lane.b32.xlu0 %v10519_v6, %s10446_s4 }
 0x5b8   :  { %707 = vrot.lane.b32.xlu0 %v10513_v5, %s10444_s30 }
 0x61a   :  { %v398_v4 = vpop.xlane.xlu0 %397 }
 0x61b   :  { %10094 = vrcp.f32 %v398_v4 }
 0x61e   :  { %v395_v7 = vpop.xlane.xlu0 %394 }
 0x61f   :  { %10096 = vrcp.f32 %v395_v7 }
 0x625   :  { %v10095_v10 = vpop.eup %10094 }
 0x626   :  { %v402_v15 = vmul.f32 %v10095_v10, %v10087_v50 }
 0x627   :  { %v604_v9 = vpop.xlane.xlu0 %603 }
 0x628   :  { %10098 = vrcp.f32 %v604_v9 }
 0x629   :  { %v10097_v12 = vpop.eup %10096 }
 0x62a   :  { %v401_v13 = vmul.f32 %v10097_v12, %v10089_v54 }
 0x62b   :  { %v601_v14 = vpop.xlane.xlu0 %600 }
 0x62c   :  { %10100 = vrcp.f32 %v601_v14  ;;  %8755 = vmatprep.mubr.msk.f32.mxu1 %vm50_vm0, %v401_v13 }
 0x62d   :  { %8756 = vmatmul.mubr.msk.f32.vlgmr.msra.gmra.mrb[4].mxu1 %vm50_vm0, %v402_v15 }
 0x62e   :  { %9392 = vmatpush3.bf16.msra.mxu1 %v9389_v62 }
 0x62f   :  { %v9868_v16 = vpop.permute.xlu0 %9867 }
 0x630   :  { %v9870_v17 = vunpack.i.h.bf16 %v9868_v16  ;;  %v9869_v18 = vunpack.i.l.bf16 %v9868_v16 }
 0x632   :  { %v9393_v21 = vpack.c.bf16 %v9870_v17, %v9869_v18  ;;  %v10099_v23 = vpop.eup %10098 }
 0x633   :  { %v608_v27 = vmul.f32 %v10099_v23, %v10091_v63  ;;  %v708_v28 = vpop.permute.xlu0 %707 }
 0x634   :  { %9395 = vmatprep.subr.msk.bf16.mxu1 %vm10531_vm9, %v9393_v21 }
 0x636   :  { %v10101_v24 = vpop.eup %10100 }
 0x637   :  { %v607_v26 = vmul.f32 %v10101_v24, %v10093_v1 }
 0x639   :  { %8769 = vmatprep.mubr.msk.f32.mxu1 %vm50_vm0, %v607_v26 }
 0x63a   :  { %8770 = vmatmul.mubr.msk.f32.vlgmr.msra.gmra.mrb[6].mxu1 %vm50_vm0, %v608_v27 }
 0x63b   :  { %9398 = vmatpush3.bf16.xpose.msk.msra.mxu1 %vm10531_vm9, %v9393_v21  ;;  %8776 = vmatprep.mubr.msk.f32.mxu1 %vm293_vm8, %v708_v28 }
 0x642   :  { %8777 = vmatmul.mubr.msk.f32.vlgmr.msra.gmra.mrb[8].mxu1 %vm293_vm8, %v710_v29 }
 0x700   :  { %v8757_v30 = vpop.f32.mrb[4].mxu1 }
 0x701   :  { %491 = vst.msk [vmem:[#allocation2 + $0x8] sm:$0xff] %vm293_vm8, %v8757_v30  ;;  %v481_v31 = vpop.f32.mrb[5].mxu1 }
 0x702   :  { %490 = vst.msk [vmem:[#allocation2] sm:$0xff] %vm293_vm8, %v481_v31 }
 0x70d   :  { %v10585_v32 = vpop.f32.mrb[6].mxu1 }
 0x70e   :  { %v10587_v33 = vpop.f32.mrb[7].mxu1 }
 0x715   :  { %v8778_v34 = vpop.f32.mrb[8].mxu1 }
 0x716   :  { %v799_v35 = vmul.f32 0.35355338, %v8778_v34  ;;  %v789_v36 = vpop.f32.mrb[9].mxu1 }
 0x717   :  { %v798_v37 = vmul.f32 0.35355338, %v789_v36 }
 0x718   :  { %v801_v38 = vadd.f32 %v799_v35, %v10547_v22 }
 0x719   :  { %v800_v39 = vadd.f32 %v798_v37, %v10549_v25 }
 0x71a   :  { %v805_v40 = vsel %vm50_vm0, %v801_v38, -inf }
 0x71b   :  { %806 = vmax.xlane.f32.xlu1 %v805_v40  ;;  %v802_v41 = vsel %vm50_vm0, %v800_v39, -inf }
 0x71c   :  { %803 = vmax.xlane.f32.xlu0 %v802_v41 }
 0x72c   :  { %9872 = vrot.lane.b32.xlu1 %v10519_v6, %s10447_s5 }
 0x730   :  { %922 = vrot.lane.b32.xlu1 %v10513_v5, %s10448_s6 }
 0x734   :  { %924 = vrot.lane.b32.xlu1 %v10511_v3, %s10448_s6 }
 0x7a8   :  { %v807_v42 = vpop.xlane.xlu1 %806 }
 0x7a9   :  { %v809_v43 = vsub.f32 %v801_v38, %v807_v42  ;;  %v804_v44 = vpop.xlane.xlu0 %803 }
 0x7aa   :  { %v808_v45 = vsub.f32 %v800_v39, %v804_v44  ;;  %v282_v44 = vld [vmem:[#allocation3 + $0xd0] sm:$0xff] }
 0x7ab   :  { %v812_v46 = vmul.f32 1.442695, %v809_v43 }
 0x7ac   :  { %v810_v47 = vmul.f32 1.442695, %v808_v45  ;;  %v9873_v48 = vpop.permute.xlu1 %9872  ;;  %v283_v45 = vld [vmem:[#allocation3 + $0xd8] sm:$0xff] }
 0x7ad   :  { %10102 = vpow2.f32 %v812_v46  ;;  %v9875_v49 = vunpack.i.h.bf16 %v9873_v48  ;;  %v9874_v50 = vunpack.i.l.bf16 %v9873_v48  ;;  %v9413_v46 = vpack.c.bf16 %v283_v45, %v282_v44  ;;  %v285_v48 = vld [vmem:[#allocation3 + $0xe8] sm:$0xff] }
 0x7ae   :  { %10104 = vpow2.f32 %v810_v47  ;;  %v284_v47 = vld [vmem:[#allocation3 + $0xe0] sm:$0xff] }
 0x7af   :  { %v9399_v51 = vpack.c.bf16 %v9875_v49, %v9874_v50  ;;  %v9417_v49 = vpack.c.bf16 %v285_v48, %v284_v47 }
 0x7b0   :  { %v923_v0 = vpop.permute.xlu1 %922 }
 0x7b1   :  { %9400 = vmatprep.subr.bf16.mxu0 %v9399_v51 }
 0x7b2   :  { %9402 = vmatpush3.bf16.msra.mxu0 %v9399_v51 }
 0x7b4   :  { %v925_v1 = vpop.permute.xlu1 %924 }
 0x7b7   :  { %v10103_v52 = vpop.eup %10102 }
 0x7b8   :  { %v817_v5 = vsel %vm50_vm0, %v10103_v52, 0.0  ;;  %v10105_v53 = vpop.eup %10104 }
 0x7b9   :  { %818 = vadd.xlane.f32.xlu0 %v817_v5  ;;  %v814_v3 = vsel %vm50_vm0, %v10105_v53, 0.0 }
 0x7bd   :  { %815 = vadd.xlane.f32.xlu0 %v814_v3 }
 0x7d3   :  { %9877 = vrot.lane.b32.xlu0 %v10519_v6, %s10449_s7 }
 0x846   :  { %v819_v54 = vpop.xlane.xlu0 %818 }
 0x847   :  { %10106 = vrcp.f32 %v819_v54  ;;  %v8160_v54 = vld [vmem:[#allocation3 + $0xf0] ss:$0 sm:$0xff] }
 0x84a   :  { %v816_v55 = vpop.xlane.xlu0 %815 }
 0x84b   :  { %10108 = vrcp.f32 %v816_v55 }
 0x84e   :  { %v9878_v56 = vpop.permute.xlu0 %9877 }
 0x84f   :  { %v9880_v57 = vunpack.i.h.bf16 %v9878_v56  ;;  %v9879_v58 = vunpack.i.l.bf16 %v9878_v56 }
 0x851   :  { %v9403_v59 = vpack.c.bf16 %v9880_v57, %v9879_v58  ;;  %v10107_v60 = vpop.eup %10106 }
 0x852   :  { %v823_v63 = vmul.f32 %v10107_v60, %v10103_v52 }
 0x853   :  { %9405 = vmatprep.subr.msk.bf16.mxu0 %vm10531_vm9, %v9403_v59 }
 0x855   :  { %v10109_v61 = vpop.eup %10108 }
 0x856   :  { %v822_v62 = vmul.f32 %v10109_v61, %v10105_v53 }
 0x858   :  { %8783 = vmatprep.mubr.msk.f32.mxu0 %vm50_vm0, %v822_v62 }
 0x859   :  { %8784 = vmatmul.mubr.msk.f32.vlgmr.msra.gmra.mrb[4].mxu0 %vm50_vm0, %v823_v63 }
 0x85a   :  { %9408 = vmatpush3.bf16.xpose.msk.msra.mxu0 %vm10531_vm9, %v9403_v59  ;;  %8790 = vmatprep.mubr.msk.f32.mxu0 %vm293_vm8, %v923_v0 }
 0x861   :  { %8791 = vmatmul.mubr.msk.f32.vlgmr.msra.gmra.mrb[6].mxu0 %vm293_vm8, %v925_v1 }
 0x92c   :  { %v8785_v2 = vpop.f32.mrb[4].mxu0 }
 0x92d   :  { %v902_v4 = vpop.f32.mrb[5].mxu0 }
 0x934   :  { %v8792_v7 = vpop.f32.mrb[6].mxu0 }
 0x935   :  { %v1014_v9 = vmul.f32 0.35355338, %v8792_v7  ;;  %v1004_v10 = vpop.f32.mrb[7].mxu0 }
 0x936   :  { %v1013_v12 = vmul.f32 0.35355338, %v1004_v10 }
 0x937   :  { %v1016_v13 = vadd.f32 %v1014_v9, %v10547_v22 }
 0x938   :  { %v1015_v14 = vadd.f32 %v1013_v12, %v10549_v25  ;;  %v1280_v12 = vld [vmem:[#allocation3 + $0x108] sm:$0xff] }
 0x939   :  { %v1020_v15 = vsel %vm50_vm0, %v1016_v13, -inf }
 0x93a   :  { %1021 = vmax.xlane.f32.xlu1 %v1020_v15  ;;  %v1017_v16 = vsel %vm50_vm0, %v1015_v14, -inf }
 0x93b   :  { %1018 = vmax.xlane.f32.xlu0 %v1017_v16  ;;  %v1283_v16 = vld [vmem:[#allocation3 + $0x120] sm:$0xff] }
 0x94b   :  { %9882 = vrot.lane.b32.xlu1 %v10519_v6, %s10450_s8 }
 0x94f   :  { %700 = vrot.lane.b32.xlu1 %v10585_v32, %s10437_s20 }
 0x953   :  { %913 = vrot.lane.b32.xlu1 %v902_v4, %s10451_s9 }
 0x9c7   :  { %v1022_v17 = vpop.xlane.xlu1 %1021 }
 0x9c8   :  { %v1024_v18 = vsub.f32 %v1016_v13, %v1022_v17  ;;  %v1019_v21 = vpop.xlane.xlu0 %1018  ;;  %v1281_v13 = vld [vmem:[#allocation3 + $0x110] sm:$0xff] }
 0x9c9   :  { %v1023_v23 = vsub.f32 %v1015_v14, %v1019_v21  ;;  %v1282_v14 = vld [vmem:[#allocation3 + $0x118] sm:$0xff]  ;;  %v9421_v15 = vpack.c.bf16 %v1281_v13, %v1280_v12 }
 0x9ca   :  { %v1027_v24 = vmul.f32 1.442695, %v1024_v18  ;;  %v9425_v17 = vpack.c.bf16 %v1283_v16, %v1282_v14  ;;  %v1285_v18 = vld [vmem:[#allocation3 + $0x130] sm:$0xff]  ;;  %v1286_v21 = vld [vmem:[#allocation3 + $0x138] sm:$0xff] }
 0x9cb   :  { %v1025_v26 = vmul.f32 1.442695, %v1023_v23  ;;  %v9883_v27 = vpop.permute.xlu1 %9882  ;;  %9422 = vmatprep.subr.bf16.mxu0 %v9421_v15  ;;  %v1287_v23 = vld [vmem:[#allocation3 + $0x140] sm:$0xff] }
 0x9cc   :  { %v9885_v28 = vunpack.i.h.bf16 %v9883_v27  ;;  %v9884_v29 = vunpack.i.l.bf16 %v9883_v27  ;;  %9424 = vmatpush3.bf16.msra.mxu0 %v9421_v15 }
 0x9cd   :  { %10110 = vpow2.f32 %v1025_v26  ;;  %9426 = vmatprep.subr.bf16.mxu0 %v9425_v17  ;;  %v1288_v26 = vld [vmem:[#allocation3 + $0x148] sm:$0xff] }
 0x9ce   :  { %v9409_v30 = vpack.c.bf16 %v9885_v28, %v9884_v29  ;;  %10112 = vpow2.f32 %v1027_v24  ;;  %v9429_v24 = vpack.c.bf16 %v1286_v21, %v1285_v18  ;;  %v9433_v27 = vpack.c.bf16 %v1288_v26, %v1287_v23  ;;  %v1289_v28 = vld [vmem:[#allocation3 + $0x150] sm:$0xff]  ;;  %v1290_v29 = vld [vmem:[#allocation3 + $0x158] sm:$0xff]  ;;  %v1523_v26 = vld [vmem:[#allocation3 + $0x188] sm:$0xff] }
 0x9cf   :  { %v701_v6 = vpop.permute.xlu1 %700 }
 0x9d0   :  { %706 = vst.msk [vmem:[#allocation2 + $0x8] sm:$0xff] %vm704_vm10, %v701_v6  ;;  %9410 = vmatprep.subr.bf16.mxu1 %v9409_v30  ;;  %9428 = vmatpush3.bf16.msra.mxu0 %v9425_v17 }
 0x9d1   :  { %9412 = vmatpush3.bf16.msra.mxu1 %v9409_v30  ;;  %v9437_v30 = vpack.c.bf16 %v1290_v29, %v1289_v28  ;;  %v1525_v28 = vld [vmem:[#allocation3 + $0x198] sm:$0xff] }
 0x9d2   :  { %9414 = vmatprep.subr.bf16.mxu1 %v9413_v46 }
 0x9d3   :  { %v914_v39 = vpop.permute.xlu1 %913 }
 0x9d7   :  { %v10111_v31 = vpop.eup %10110 }
 0x9d8   :  { %v1029_v32 = vsel %vm50_vm0, %v10111_v31, 0.0  ;;  %v10113_v34 = vpop.eup %10112 }
 0x9d9   :  { %1030 = vadd.xlane.f32.xlu0 %v1029_v32  ;;  %v1032_v35 = vsel %vm50_vm0, %v10113_v34, 0.0 }
 0x9dd   :  { %1033 = vadd.xlane.f32.xlu0 %v1032_v35 }
 0x9f3   :  { %698 = vrot.lane.b32.xlu0 %v10587_v33, %s10437_s20 }
 0x9f7   :  { %915 = vrot.lane.b32.xlu0 %v8785_v2, %s10451_s9 }
 0xa66   :  { %v1031_v36 = vpop.xlane.xlu0 %1030 }
 0xa67   :  { %10114 = vrcp.f32 %v1031_v36 }
 0xa6a   :  { %v1034_v37 = vpop.xlane.xlu0 %1033 }
 0xa6b   :  { %10116 = vrcp.f32 %v1034_v37 }
 0xa6e   :  { %v699_v38 = vpop.permute.xlu0 %698 }
 0xa6f   :  { %705 = vst.msk [vmem:[#allocation2] sm:$0xff] %vm704_vm10, %v699_v38 }
 0xa70   :  { %920 = vst.msk [vmem:[#allocation2] sm:$0xff] %vm919_vm11, %v914_v39 }
 0xa71   :  { %v10115_v40 = vpop.eup %10114 }
 0xa72   :  { %v916_v41 = vpop.permute.xlu0 %915  ;;  %v1037_v42 = vmul.f32 %v10115_v40, %v10111_v31 }
 0xa73   :  { %921 = vst.msk [vmem:[#allocation2 + $0x8] sm:$0xff] %vm919_vm11, %v916_v41 }
 0xa74   :  { %8797 = vmatprep.mubr.msk.f32.mxu1 %vm50_vm0, %v1037_v42 }
 0xa75   :  { %v10117_v33 = vpop.eup %10116 }
 0xa76   :  { %v1038_v43 = vmul.f32 %v10117_v33, %v10113_v34 }
 0xa78   :  { %8798 = vmatmul.mubr.msk.f32.vlgmr.msra.gmra.mrb[10].mxu1 %vm50_vm0, %v1038_v43 }
 0xa79   :  { %9416 = vmatpush3.bf16.msra.mxu1 %v9413_v46  ;;  %v8163_v46 = vld [vmem:[#allocation3 + $0xf8] ss:$0 sm:$0xff] }
 0xa7a   :  { %9418 = vmatprep.subr.bf16.mxu1 %v9417_v49 }
 0xa7d   :  { %9420 = vmatpush3.bf16.msra.mxu1 %v9417_v49 }
 0xa7e   :  { %9430 = vmatprep.subr.bf16.mxu1 %v9429_v24 }
 0xb4b   :  { %v8799_v50 = vpop.f32.mrb[10].mxu1 }
 0xb4c   :  { %1130 = vrot.lane.b32.xlu0 %v8799_v50, %s10452_s10  ;;  %v1117_v51 = vpop.f32.mrb[11].mxu1 }
 0xb4d   :  { %1128 = vrot.lane.b32.xlu1 %v1117_v51, %s10452_s10  ;;  %v8164_v51 = vld [vmem:[#allocation3 + $0x100] ss:$0 sm:$0xff] }
 0xbbe   :  { %v1131_v52 = vpop.permute.xlu0 %1130 }
 0xbbf   :  { %1136 = vst.msk [vmem:[#allocation2 + $0x8] sm:$0xff] %vm1134_vm12, %v1131_v52  ;;  %v1129_v5 = vpop.permute.xlu1 %1128 }
 0xbc0   :  { %1135 = vst.msk [vmem:[#allocation2] sm:$0xff] %vm1134_vm12, %v1129_v5 }
 0xbc6   :  { %v1138_v3 = vld [vmem:[#allocation2 + $0x8] sm:$0xff] }
 0xbc7   :  { %v1137_v53 = vld [vmem:[#allocation2] sm:$0xff] }
 0xbc8   :  { %8808 = vmatprep.mubr.msk.f32.mxu1 %vm138_vm3, %v1137_v53 }
 0xbc9   :  { %8809 = vmatmul.mubr.msk.f32.vlgmr.msra.gmra.mrb[12].mxu1 %vm138_vm3, %v1138_v3 }
 0xbca   :  { %9432 = vmatpush3.bf16.msra.mxu1 %v9429_v24 }
 0xbcb   :  { %9434 = vmatprep.subr.bf16.mxu1 %v9433_v27 }
 0xbce   :  { %9436 = vmatpush3.bf16.msra.mxu1 %v9433_v27  ;;  %v1524_v27 = vld [vmem:[#allocation3 + $0x190] sm:$0xff] }
 0xbcf   :  { %9438 = vmatprep.subr.bf16.mxu1 %v9437_v30  ;;  %v9445_v29 = vpack.c.bf16 %v1524_v27, %v1523_v26 }
 0xbd1   :  { %9446 = vmatprep.subr.bf16.mxu0 %v9445_v29 }
 0xbd2   :  { %9440 = vmatpush3.bf16.msra.mxu1 %v9437_v30  ;;  %v1526_v30 = vld [vmem:[#allocation3 + $0x1a0] sm:$0xff] }
 0xc9c   :  { %v8810_v55 = vpop.f32.mrb[12].mxu1 }
 0xc9d   :  { %v1221_v56 = vadd.f32 %v8810_v55, %v8160_v54  ;;  %v1215_v57 = vpop.f32.mrb[13].mxu1  ;;  %v1292_v55 = vld [vmem:[#allocation3 + $0x168] sm:$0xff] }
 0xc9e   :  { %v1216_v58 = vadd.f32 %v8160_v54, %v1215_v57  ;;  %v1291_v54 = vld [vmem:[#allocation3 + $0x160] sm:$0xff]  ;;  %v8165_v57 = vld [vmem:[#allocation3 + $0x128] ss:$0 sm:$0xff] }
 0xc9f   :  { %v10638_v59 = vadd.f32 %v1221_v56, %v10499_v20  ;;  %v9441_v56 = vpack.c.bf16 %v1292_v55, %v1291_v54  ;;  %v8173_v55 = vld [vmem:[#allocation3 + $0x1a8] ss:$0 sm:$0xff] }
 0xca0   :  { %v10641_v60 = vadd.f32 %v1216_v58, %v10497_v19 }
 0xca1   :  { %v1231_v61 = vsel %vm138_vm3, %v10638_v59, 0.0  ;;  %9442 = vmatprep.subr.bf16.mxu1 %v9441_v56 }
 0xca2   :  { %1232 = vadd.xlane.f32.xlu0 %v1231_v61  ;;  %v1228_v62 = vsel %vm138_vm3, %v10641_v60, 0.0  ;;  %9444 = vmatpush3.bf16.msra.mxu1 %v9441_v56 }
 0xca3   :  { %1229 = vadd.xlane.f32.xlu1 %v1228_v62 }
 0xd2f   :  { %v1233_v63 = vpop.xlane.xlu0 %1232 }
 0xd30   :  { %v1235_v0 = vmul.f32 0.03125, %v1233_v63  ;;  %v1230_v1 = vpop.xlane.xlu1 %1229 }
 0xd31   :  { %v1234_v2 = vmul.f32 0.03125, %v1230_v1 }
 0xd32   :  { %v1237_v4 = vsub.f32 %v10638_v59, %v1235_v0 }
 0xd33   :  { %v1236_v20 = vsub.f32 %v10641_v60, %v1234_v2  ;;  %v8168_v2 = vld [vmem:[#allocation3 + $0x170] ss:$0 sm:$0xff] }
 0xd34   :  { %v1239_v7 = vmul.f32 %v1237_v4, %v1237_v4  ;;  %v1271_v47 = vmul.f32 %v8163_v46, %v1237_v4 }
 0xd35   :  { %v1238_v9 = vmul.f32 %v1236_v20, %v1236_v20  ;;  %v1270_v49 = vmul.f32 %v8163_v46, %v1236_v20 }
 0xd36   :  { %v1243_v19 = vsel %vm138_vm3, %v1239_v7, 0.0 }
 0xd37   :  { %1244 = vadd.xlane.f32.xlu1 %v1243_v19  ;;  %v1240_v10 = vsel %vm138_vm3, %v1238_v9, 0.0 }
 0xd38   :  { %1241 = vadd.xlane.f32.xlu0 %v1240_v10 }
 0xdc4   :  { %v1245_v6 = vpop.xlane.xlu1 %1244 }
 0xdc5   :  { %v1247_v31 = vmul.f32 0.032258064, %v1245_v6  ;;  %v1242_v32 = vpop.xlane.xlu0 %1241  ;;  %v9449_v6 = vpack.c.bf16 %v1526_v30, %v1525_v28 }
 0xdc6   :  { %v1246_v34 = vmul.f32 0.032258064, %v1242_v32 }
 0xdc7   :  { %10118 = vrsqrt.f32 %v1247_v31  ;;  %vm1257_vm13 = vcmp.eq.f32.partialorder %v1247_v31, inf  ;;  %v1260_v38 = vand.u32 2147483648, %v1247_v31  ;;  %vm1259_vm14 = vcmp.eq.f32.partialorder %v1247_v31, 0.0 }
 0xdc8   :  { %10120 = vrsqrt.f32 %v1246_v34  ;;  %vm1250_vm15 = vcmp.eq.f32.partialorder %v1246_v34, inf  ;;  %v1253_v41 = vand.u32 2147483648, %v1246_v34  ;;  %vm1252_vm1 = vcmp.eq.f32.partialorder %v1246_v34, 0.0 }
 0xdd1   :  { %v10119_v35 = vpop.eup %10118 }
 0xdd2   :  { %v10121_v36 = vpop.eup %10120  ;;  %v1256_v37 = vmul.f32 %v10119_v35, %v1247_v31 }
 0xdd3   :  { %v1249_v39 = vmul.f32 %v10121_v36, %v1246_v34 }
 0xdd4   :  { %v1258_v40 = vsel %vm1257_vm13, %v1247_v31, %v1256_v37 }
 0xdd5   :  { %v1261_v42 = vsel %vm1259_vm14, %v1260_v38, %v1258_v40  ;;  %v1251_v33 = vsel %vm1250_vm15, %v1246_v34, %v1249_v39 }
 0xdd6   :  { %v1263_v43 = vadd.f32 1e-06, %v1261_v42  ;;  %v1254_v44 = vsel %vm1252_vm1, %v1253_v41, %v1251_v33 }
 0xdd7   :  { %v1262_v45 = vadd.f32 1e-06, %v1254_v44 }
 0xdd8   :  { %10122 = vrcp.f32 %v1263_v43 }
 0xdd9   :  { %10124 = vrcp.f32 %v1262_v45 }
 0xde2   :  { %v10123_v48 = vpop.eup %10122 }
 0xde3   :  { %v10125_v50 = vpop.eup %10124  ;;  %v1273_v52 = vmul.f32 %v10123_v48, %v1271_v47  ;;  %v8171_v47 = vld [vmem:[#allocation3 + $0x178] ss:$0 sm:$0xff] }
 0xde4   :  { %v1272_v5 = vmul.f32 %v10125_v50, %v1270_v49 }
 0xde5   :  { %v1279_v3 = vadd.f32 %v8164_v51, %v1273_v52  ;;  %v8172_v52 = vld [vmem:[#allocation3 + $0x180] ss:$0 sm:$0xff] }
 0xde6   :  { %v1278_v53 = vadd.f32 %v8164_v51, %v1272_v5 }
 0xde8   :  { %8819 = vmatprep.mubr.msk.f32.mxu0 %vm138_vm3, %v1278_v53 }
 0xde9   :  { %8820 = vmatmul.mubr.msk.f32.vlgmr.msra.gmra.mrb[8].mxu0 %vm138_vm3, %v1279_v3 }
 0xdea   :  { %9448 = vmatpush3.bf16.msra.mxu0 %v9445_v29 }
 0xdeb   :  { %9450 = vmatprep.subr.bf16.mxu0 %v9449_v6 }
 0xdee   :  { %9452 = vmatpush3.bf16.msra.mxu0 %v9449_v6 }
 0xebc   :  { %v8821_v58 = vpop.f32.mrb[8].mxu0 }
 0xebd   :  { %v1376_v61 = vadd.f32 %v8821_v58, %v8165_v57  ;;  %v1370_v62 = vpop.f32.mrb[9].mxu0 }
 0xebe   :  { %v1371_v63 = vadd.f32 %v8165_v57, %v1370_v62 }
 0xebf   :  { %v1380_v1 = vmax.f32 %v1376_v61, 0.0 }
 0xec0   :  { %v1379_v0 = vmax.f32 %v1371_v63, 0.0 }
 0xec2   :  { %8838 = vmatprep.mubr.msk.f32.mxu1 %vm1385_vm2, %v1379_v0 }
 0xec3   :  { %8839 = vmatmul.mubr.msk.f32.vlgmr.msra.gmra.mrb[14].mxu1 %vm1385_vm2, %v1380_v1 }
 0xf96   :  { %v8840_v4 = vpop.f32.mrb[14].mxu1 }
 0xf97   :  { %v1464_v20 = vadd.f32 %v8840_v4, %v8168_v2  ;;  %v1458_v7 = vpop.f32.mrb[15].mxu1 }
 0xf98   :  { %v1459_v9 = vadd.f32 %v8168_v2, %v1458_v7 }
 0xf99   :  { %v10656_v19 = vadd.f32 %v1464_v20, %v10638_v59 }
 0xf9a   :  { %v10659_v10 = vadd.f32 %v1459_v9, %v10641_v60 }
 0xf9b   :  { %v1474_v12 = vsel %vm138_vm3, %v10656_v19, 0.0 }
 0xf9c   :  { %1475 = vadd.xlane.f32.xlu1 %v1474_v12  ;;  %v1471_v13 = vsel %vm138_vm3, %v10659_v10, 0.0 }
 0xf9d   :  { %1472 = vadd.xlane.f32.xlu0 %v1471_v13 }
0x1029   :  { %v1476_v14 = vpop.xlane.xlu1 %1475 }
0x102a   :  { %v1478_v15 = vmul.f32 0.03125, %v1476_v14  ;;  %v1473_v16 = vpop.xlane.xlu0 %1472 }
0x102b   :  { %v1477_v17 = vmul.f32 0.03125, %v1473_v16 }
0x102c   :  { %v1480_v18 = vsub.f32 %v10656_v19, %v1478_v15 }
0x102d   :  { %v1479_v59 = vsub.f32 %v10659_v10, %v1477_v17 }
0x102e   :  { %v1482_v21 = vmul.f32 %v1480_v18, %v1480_v18  ;;  %v1514_v48 = vmul.f32 %v8171_v47, %v1480_v18 }
0x102f   :  { %v1481_v23 = vmul.f32 %v1479_v59, %v1479_v59  ;;  %v1513_v50 = vmul.f32 %v8171_v47, %v1479_v59 }
0x1030   :  { %v1486_v60 = vsel %vm138_vm3, %v1482_v21, 0.0 }
0x1031   :  { %1487 = vadd.xlane.f32.xlu1 %v1486_v60  ;;  %v1483_v24 = vsel %vm138_vm3, %v1481_v23, 0.0 }
0x1032   :  { %1484 = vadd.xlane.f32.xlu0 %v1483_v24 }
0x10be   :  { %v1488_v31 = vpop.xlane.xlu1 %1487 }
0x10bf   :  { %v1490_v32 = vmul.f32 0.032258064, %v1488_v31  ;;  %v1485_v34 = vpop.xlane.xlu0 %1484 }
0x10c0   :  { %v1489_v35 = vmul.f32 0.032258064, %v1485_v34 }
0x10c1   :  { %10126 = vrsqrt.f32 %v1490_v32  ;;  %vm1500_vm4 = vcmp.eq.f32.partialorder %v1490_v32, inf  ;;  %v1503_v39 = vand.u32 2147483648, %v1490_v32  ;;  %vm1502_vm5 = vcmp.eq.f32.partialorder %v1490_v32, 0.0 }
0x10c2   :  { %10128 = vrsqrt.f32 %v1489_v35  ;;  %vm1493_vm6 = vcmp.eq.f32.partialorder %v1489_v35, inf  ;;  %v1496_v42 = vand.u32 2147483648, %v1489_v35  ;;  %vm1495_vm7 = vcmp.eq.f32.partialorder %v1489_v35, 0.0 }
0x10cb   :  { %v10127_v36 = vpop.eup %10126 }
0x10cc   :  { %v10129_v37 = vpop.eup %10128  ;;  %v1499_v38 = vmul.f32 %v10127_v36, %v1490_v32 }
0x10cd   :  { %v1492_v40 = vmul.f32 %v10129_v37, %v1489_v35 }
0x10ce   :  { %v1501_v41 = vsel %vm1500_vm4, %v1490_v32, %v1499_v38 }
0x10cf   :  { %v1504_v33 = vsel %vm1502_vm5, %v1503_v39, %v1501_v41  ;;  %v1494_v43 = vsel %vm1493_vm6, %v1489_v35, %v1492_v40 }
0x10d0   :  { %v1506_v44 = vadd.f32 1e-06, %v1504_v33  ;;  %v1497_v45 = vsel %vm1495_vm7, %v1496_v42, %v1494_v43 }
0x10d1   :  { %v1505_v46 = vadd.f32 1e-06, %v1497_v45 }
0x10d2   :  { %10130 = vrcp.f32 %v1506_v44 }
0x10d3   :  { %10132 = vrcp.f32 %v1505_v46 }
0x10dc   :  { %v10131_v49 = vpop.eup %10130 }
0x10dd   :  { %v10133_v51 = vpop.eup %10132  ;;  %v1516_v5 = vmul.f32 %v10131_v49, %v1514_v48 }
0x10de   :  { %v1515_v53 = vmul.f32 %v10133_v51, %v1513_v50 }
0x10df   :  { %v1522_v54 = vadd.f32 %v8172_v52, %v1516_v5 }
0x10e0   :  { %v1521_v3 = vadd.f32 %v8172_v52, %v1515_v53 }
0x10e2   :  { %8849 = vmatprep.mubr.msk.f32.mxu0 %vm138_vm3, %v1521_v3 }
0x10e3   :  { %8850 = vmatmul.mubr.msk.f32.vlgmr.msra.gmra.mrb[10].mxu0 %vm138_vm3, %v1522_v54 }
0x11b6   :  { %v8851_v56 = vpop.f32.mrb[10].mxu0 }
0x11b7   :  { %v10671_v57 = vadd.f32 %v8851_v56, %v8173_v55  ;;  %v1604_v58 = vpop.f32.mrb[11].mxu0 }
0x11b8   :  { %v10673_v61 = vadd.f32 %v8173_v55, %v1604_v58 }
0x11ba   :  { %8856 = vmatprep.mubr.msk.f32.mxu0 %vm293_vm8, %v10673_v61  ;;  %v10679_v62 = vpack.i.bf16 %v10671_v57, %v10673_v61 }
0x11bc   :  { %9892 = vrot.lane.b32.xlu1 %v10679_v62, %s10441_s27  ;;  %9887 = vrot.lane.b32.xlu0 %v10679_v62, %s10440_s1 }
0x11c0   :  { %1822 = vrot.lane.b32.xlu1 %v10673_v61, %s10442_s28  ;;  %1824 = vrot.lane.b32.xlu0 %v10671_v57, %s10442_s28 }
0x122e   :  { %v9893_v63 = vpop.permute.xlu1 %9892  ;;  %v9888_v0 = vpop.permute.xlu0 %9887 }
0x122f   :  { %v9895_v1 = vunpack.i.h.bf16 %v9893_v63  ;;  %v9894_v2 = vunpack.i.l.bf16 %v9893_v63  ;;  %v9890_v4 = vunpack.i.h.bf16 %v9888_v0  ;;  %v9889_v20 = vunpack.i.l.bf16 %v9888_v0 }
0x1231   :  { %v9453_v7 = vpack.c.bf16 %v9890_v4, %v9889_v20  ;;  %v9463_v9 = vpack.c.bf16 %v9895_v1, %v9894_v2 }
0x1232   :  { %v1823_v12 = vpop.permute.xlu1 %1822  ;;  %v1825_v13 = vpop.permute.xlu0 %1824 }
0x1233   :  { %9455 = vmatprep.subr.msk.bf16.mxu0 %vm10531_vm9, %v9453_v7 }
0x1234   :  { %9458 = vmatpush3.bf16.xpose.msk.msra.mxu0 %vm10531_vm9, %v9453_v7 }
0x1235   :  { %9465 = vmatprep.subr.msk.bf16.mxu0 %vm10531_vm9, %v9463_v9 }
0x123b   :  { %8857 = vmatmul.mubr.msk.f32.vlgmr.msra.gmra.mrb[12].mxu0 %vm293_vm8, %v10671_v57 }
0x123c   :  { %9468 = vmatpush3.bf16.xpose.msk.msra.mxu0 %vm10531_vm9, %v9463_v9  ;;  %8870 = vmatprep.mubr.msk.f32.mxu0 %vm293_vm8, %v1823_v12 }
0x1243   :  { %8871 = vmatmul.mubr.msk.f32.vlgmr.msra.gmra.mrb[14].mxu0 %vm293_vm8, %v1825_v13 }
0x130e   :  { %v8858_v14 = vpop.f32.mrb[12].mxu0 }
0x130f   :  { %v1708_v15 = vmul.f32 0.35355338, %v8858_v14  ;;  %v1698_v16 = vpop.f32.mrb[13].mxu0 }
0x1310   :  { %v1707_v17 = vmul.f32 0.35355338, %v1698_v16 }
0x1311   :  { %v1710_v18 = vadd.f32 %v1708_v15, %v10547_v22 }
0x1312   :  { %v1709_v59 = vadd.f32 %v1707_v17, %v10549_v25 }
0x1313   :  { %v1714_v21 = vsel %vm50_vm0, %v1710_v18, -inf }
0x1314   :  { %1715 = vmax.xlane.f32.xlu0 %v1714_v21  ;;  %v1711_v23 = vsel %vm50_vm0, %v1709_v59, -inf }
0x1315   :  { %1712 = vmax.xlane.f32.xlu1 %v1711_v23 }
0x1316   :  { %v8872_v60 = vpop.f32.mrb[14].mxu0 }
0x1317   :  { %v1914_v24 = vmul.f32 0.35355338, %v8872_v60  ;;  %v1904_v26 = vpop.f32.mrb[15].mxu0 }
0x1318   :  { %v1913_v27 = vmul.f32 0.35355338, %v1904_v26 }
0x1319   :  { %v1916_v28 = vadd.f32 %v1914_v24, %v10547_v22 }
0x131a   :  { %v1915_v29 = vadd.f32 %v1913_v27, %v10549_v25 }
0x131b   :  { %v1920_v30 = vsel %vm50_vm0, %v1916_v28, -inf }
0x131c   :  { %1921 = vmax.xlane.f32.xlu1 %v1920_v30  ;;  %v1917_v6 = vsel %vm50_vm0, %v1915_v29, -inf }
0x131d   :  { %1918 = vmax.xlane.f32.xlu0 %v1917_v6  ;;  %v10375_v6 = vld [vmem:[#allocation3 + $0x10] sm:$0xff] }
0x13a1   :  { %v1716_v31 = vpop.xlane.xlu0 %1715 }
0x13a2   :  { %v1718_v32 = vsub.f32 %v1710_v18, %v1716_v31  ;;  %v1713_v34 = vpop.xlane.xlu1 %1712 }
0x13a3   :  { %v1717_v35 = vsub.f32 %v1709_v59, %v1713_v34 }
0x13a4   :  { %v1721_v36 = vmul.f32 1.442695, %v1718_v32 }
0x13a5   :  { %v1719_v37 = vmul.f32 1.442695, %v1717_v35 }
0x13a6   :  { %10134 = vpow2.f32 %v1721_v36 }
0x13a7   :  { %10136 = vpow2.f32 %v1719_v37 }
0x13a9   :  { %v1922_v38 = vpop.xlane.xlu1 %1921 }
0x13aa   :  { %v1924_v39 = vsub.f32 %v1916_v28, %v1922_v38  ;;  %v1919_v40 = vpop.xlane.xlu0 %1918 }
0x13ab   :  { %v1923_v22 = vsub.f32 %v1915_v29, %v1919_v40  ;;  %v10374_v29 = vld [vmem:[#allocation3 + $0x18] sm:$0xff] }
0x13ac   :  { %v1927_v41 = vmul.f32 1.442695, %v1924_v39 }
0x13ad   :  { %v1925_v25 = vmul.f32 1.442695, %v1923_v22 }
0x13ae   :  { %10138 = vpow2.f32 %v1927_v41 }
0x13af   :  { %10140 = vpow2.f32 %v1925_v25 }
0x13b0   :  { %v10135_v42 = vpop.eup %10134 }
0x13b1   :  { %v10137_v33 = vpop.eup %10136  ;;  %v1726_v43 = vsel %vm50_vm0, %v10135_v42, 0.0 }
0x13b2   :  { %1727 = vadd.xlane.f32.xlu1 %v1726_v43  ;;  %v1723_v44 = vsel %vm50_vm0, %v10137_v33, 0.0 }
0x13b3   :  { %1724 = vadd.xlane.f32.xlu0 %v1723_v44 }
0x13b8   :  { %v10139_v45 = vpop.eup %10138 }
0x13b9   :  { %v10141_v46 = vpop.eup %10140  ;;  %v1932_v47 = vsel %vm50_vm0, %v10139_v45, 0.0 }
0x13ba   :  { %1933 = vadd.xlane.f32.xlu1 %v1932_v47  ;;  %v1929_v48 = vsel %vm50_vm0, %v10141_v46, 0.0 }
0x13bb   :  { %1930 = vadd.xlane.f32.xlu0 %v1929_v48 }
0x13cb   :  { %9902 = vrot.lane.b32.xlu1 %v10679_v62, %s10443_s29 }
0x13cf   :  { %9907 = vrot.lane.b32.xlu1 %v10679_v62, %s10446_s4 }
0x13d1   :  { %9897 = vrot.lane.b32.xlu0 %v10679_v62, %s10445_s3 }
0x13d3   :  { %2038 = vrot.lane.b32.xlu1 %v10671_v57, %s10444_s30 }
0x13d5   :  { %2036 = vrot.lane.b32.xlu0 %v10673_v61, %s10444_s30 }
0x143f   :  { %v1728_v50 = vpop.xlane.xlu1 %1727 }
0x1440   :  { %v1725_v49 = vpop.xlane.xlu0 %1724 }
0x1441   :  { %10142 = vrcp.f32 %v1725_v49 }
0x1442   :  { %10144 = vrcp.f32 %v1728_v50 }
0x1447   :  { %v1934_v51 = vpop.xlane.xlu1 %1933 }
0x1448   :  { %v1931_v52 = vpop.xlane.xlu0 %1930 }
0x1449   :  { %10146 = vrcp.f32 %v1931_v52 }
0x144a   :  { %10148 = vrcp.f32 %v1934_v51 }
0x144b   :  { %v10143_v5 = vpop.eup %10142  ;;  %v9903_v53 = vpop.permute.xlu1 %9902 }
0x144c   :  { %v9898_v3 = vpop.permute.xlu0 %9897  ;;  %v1731_v54 = vmul.f32 %v10143_v5, %v10137_v33  ;;  %v9905_v55 = vunpack.i.h.bf16 %v9903_v53  ;;  %v9904_v56 = vunpack.i.l.bf16 %v9903_v53  ;;  %v10145_v2 = vpop.eup %10144 }
0x144d   :  { %v9900_v58 = vunpack.i.h.bf16 %v9898_v3  ;;  %v9899_v63 = vunpack.i.l.bf16 %v9898_v3  ;;  %v1732_v12 = vmul.f32 %v10145_v2, %v10135_v42 }
0x144e   :  { %8863 = vmatprep.mubr.msk.f32.mxu1 %vm50_vm0, %v1731_v54  ;;  %v9469_v7 = vpack.c.bf16 %v9905_v55, %v9904_v56 }
0x144f   :  { %v9908_v0 = vpop.permute.xlu1 %9907  ;;  %v9459_v1 = vpack.c.bf16 %v9900_v58, %v9899_v63 }
0x1450   :  { %v9910_v4 = vunpack.i.h.bf16 %v9908_v0  ;;  %v9909_v20 = vunpack.i.l.bf16 %v9908_v0  ;;  %v2037_v17 = vpop.permute.xlu0 %2036 }
0x1451   :  { %9460 = vmatprep.subr.bf16.mxu1 %v9459_v1 }
0x1452   :  { %9462 = vmatpush3.bf16.msra.mxu1 %v9459_v1  ;;  %v9473_v15 = vpack.c.bf16 %v9910_v4, %v9909_v20 }
0x1453   :  { %v10147_v9 = vpop.eup %10146  ;;  %9470 = vmatprep.subr.bf16.mxu1 %v9469_v7  ;;  %v2039_v18 = vpop.permute.xlu1 %2038 }
0x1454   :  { %v10149_v13 = vpop.eup %10148  ;;  %v1937_v14 = vmul.f32 %v10147_v9, %v10141_v46 }
0x1455   :  { %8864 = vmatmul.mubr.msk.f32.vlgmr.msra.gmra.mrb[16].mxu1 %vm50_vm0, %v1732_v12  ;;  %v1938_v16 = vmul.f32 %v10149_v13, %v10139_v45 }
0x1456   :  { %9472 = vmatpush3.bf16.msra.mxu1 %v9469_v7  ;;  %8877 = vmatprep.mubr.msk.f32.mxu1 %vm50_vm0, %v1937_v14 }
0x1457   :  { %9475 = vmatprep.subr.msk.bf16.mxu1 %vm10531_vm9, %v9473_v15 }
0x1459   :  { %8878 = vmatmul.mubr.msk.f32.vlgmr.msra.gmra.mrb[18].mxu1 %vm50_vm0, %v1938_v16 }
0x145a   :  { %8884 = vmatprep.mubr.msk.f32.mxu1 %vm293_vm8, %v2037_v17 }
0x145f   :  { %9478 = vmatpush3.bf16.xpose.msk.msra.mxu1 %vm10531_vm9, %v9473_v15 }
0x1466   :  { %8885 = vmatmul.mubr.msk.f32.vlgmr.msra.gmra.mrb[20].mxu1 %vm293_vm8, %v2039_v18 }
0x1528   :  { %v8865_v59 = vpop.f32.mrb[16].mxu1 }
0x1529   :  { %1821 = vst.msk [vmem:[#allocation2 + $0x8] sm:$0xff] %vm293_vm8, %v8865_v59  ;;  %v1811_v21 = vpop.f32.mrb[17].mxu1 }
0x152a   :  { %1820 = vst.msk [vmem:[#allocation2] sm:$0xff] %vm293_vm8, %v1811_v21 }
0x152c   :  { %v10735_v23 = vpop.f32.mrb[18].mxu1 }
0x152d   :  { %v10737_v60 = vpop.f32.mrb[19].mxu1 }
0x1539   :  { %v8886_v24 = vpop.f32.mrb[20].mxu1 }
0x153a   :  { %v2128_v26 = vmul.f32 0.35355338, %v8886_v24  ;;  %v2118_v27 = vpop.f32.mrb[21].mxu1 }
0x153b   :  { %v2127_v28 = vmul.f32 0.35355338, %v2118_v27 }
0x153c   :  { %v2130_v30 = vadd.f32 %v10374_v29, %v2128_v26 }
0x153d   :  { %v2129_v31 = vadd.f32 %v10375_v6, %v2127_v28 }
0x153e   :  { %v2134_v32 = vsel %vm50_vm0, %v2130_v30, -inf }
0x153f   :  { %2135 = vmax.xlane.f32.xlu1 %v2134_v32  ;;  %v2131_v34 = vsel %vm50_vm0, %v2129_v31, -inf }
0x1540   :  { %2132 = vmax.xlane.f32.xlu0 %v2131_v34 }
0x1550   :  { %9912 = vrot.lane.b32.xlu1 %v10679_v62, %s10447_s5 }
0x1554   :  { %2250 = vrot.lane.b32.xlu1 %v10673_v61, %s10448_s6 }
0x1558   :  { %2252 = vrot.lane.b32.xlu1 %v10671_v57, %s10448_s6 }
0x15cc   :  { %v2136_v35 = vpop.xlane.xlu1 %2135 }
0x15cd   :  { %v2138_v36 = vsub.f32 %v2130_v30, %v2136_v35  ;;  %v2133_v37 = vpop.xlane.xlu0 %2132  ;;  %v1613_v35 = vld [vmem:[#allocation3 + $0x1b0] sm:$0xff] }
0x15ce   :  { %v2137_v38 = vsub.f32 %v2129_v31, %v2133_v37 }
0x15cf   :  { %v2141_v39 = vmul.f32 1.442695, %v2138_v36  ;;  %v1614_v36 = vld [vmem:[#allocation3 + $0x1b8] sm:$0xff] }
0x15d0   :  { %v2139_v40 = vmul.f32 1.442695, %v2137_v38  ;;  %v9913_v22 = vpop.permute.xlu1 %9912  ;;  %v9493_v37 = vpack.c.bf16 %v1614_v36, %v1613_v35  ;;  %v1615_v38 = vld [vmem:[#allocation3 + $0x1c0] sm:$0xff] }
0x15d1   :  { %10150 = vpow2.f32 %v2141_v39  ;;  %v9915_v41 = vunpack.i.h.bf16 %v9913_v22  ;;  %v9914_v25 = vunpack.i.l.bf16 %v9913_v22  ;;  %v1616_v39 = vld [vmem:[#allocation3 + $0x1c8] sm:$0xff] }
0x15d2   :  { %10152 = vpow2.f32 %v2139_v40  ;;  %v9497_v40 = vpack.c.bf16 %v1616_v39, %v1615_v38 }
0x15d3   :  { %v9479_v42 = vpack.c.bf16 %v9915_v41, %v9914_v25 }
0x15d4   :  { %v2251_v53 = vpop.permute.xlu1 %2250 }
0x15d5   :  { %9480 = vmatprep.subr.bf16.mxu0 %v9479_v42 }
0x15d6   :  { %9482 = vmatpush3.bf16.msra.mxu0 %v9479_v42 }
0x15d8   :  { %v2253_v3 = vpop.permute.xlu1 %2252 }
0x15db   :  { %v10151_v33 = vpop.eup %10150 }
0x15dc   :  { %v2146_v61 = vsel %vm50_vm0, %v10151_v33, 0.0  ;;  %v10153_v43 = vpop.eup %10152 }
0x15dd   :  { %2147 = vadd.xlane.f32.xlu0 %v2146_v61  ;;  %v2143_v57 = vsel %vm50_vm0, %v10153_v43, 0.0 }
0x15e1   :  { %2144 = vadd.xlane.f32.xlu0 %v2143_v57 }
0x15f7   :  { %9917 = vrot.lane.b32.xlu0 %v10679_v62, %s10449_s7 }
0x166a   :  { %v2148_v44 = vpop.xlane.xlu0 %2147 }
0x166b   :  { %10154 = vrcp.f32 %v2148_v44 }
0x166e   :  { %v2145_v45 = vpop.xlane.xlu0 %2144 }
0x166f   :  { %10156 = vrcp.f32 %v2145_v45 }
0x1672   :  { %v9918_v46 = vpop.permute.xlu0 %9917 }
0x1673   :  { %v9920_v47 = vunpack.i.h.bf16 %v9918_v46  ;;  %v9919_v48 = vunpack.i.l.bf16 %v9918_v46 }
0x1675   :  { %v9483_v49 = vpack.c.bf16 %v9920_v47, %v9919_v48  ;;  %v10155_v50 = vpop.eup %10154 }
0x1676   :  { %v2152_v5 = vmul.f32 %v10155_v50, %v10151_v33 }
0x1677   :  { %9485 = vmatprep.subr.msk.bf16.mxu0 %vm10531_vm9, %v9483_v49 }
0x1679   :  { %v10157_v51 = vpop.eup %10156 }
0x167a   :  { %v2151_v52 = vmul.f32 %v10157_v51, %v10153_v43  ;;  %v8200_v43 = vld [vmem:[#allocation3 + $0x1d0] ss:$0 sm:$0xff]  ;;  %v10453_v51 = vmov 1  }
0x167b   :  { %9926 = vset.pattern.permute.xlu0 %v10453_v51  ;;  %9927 = vset.pattern.permute.xlu1 %v10453_v51 }
0x167c   :  { %8891 = vmatprep.mubr.msk.f32.mxu0 %vm50_vm0, %v2151_v52 }
0x167d   :  { %8892 = vmatmul.mubr.msk.f32.vlgmr.msra.gmra.mrb[16].mxu0 %vm50_vm0, %v2152_v5 }
0x167e   :  { %9488 = vmatpush3.bf16.xpose.msk.msra.mxu0 %vm10531_vm9, %v9483_v49  ;;  %8898 = vmatprep.mubr.msk.f32.mxu0 %vm293_vm8, %v2251_v53 }
0x1685   :  { %8899 = vmatmul.mubr.msk.f32.vlgmr.msra.gmra.mrb[18].mxu0 %vm293_vm8, %v2253_v3 }
0x1750   :  { %v8893_v54 = vpop.f32.mrb[16].mxu0 }
0x1751   :  { %v2231_v55 = vpop.f32.mrb[17].mxu0 }
0x1758   :  { %v8900_v56 = vpop.f32.mrb[18].mxu0 }
0x1759   :  { %v2342_v58 = vmul.f32 0.35355338, %v8900_v56  ;;  %v2332_v63 = vpop.f32.mrb[19].mxu0 }
0x175a   :  { %v2341_v0 = vmul.f32 0.35355338, %v2332_v63  ;;  %v10376_v63 = vld [vmem:[%s11464_s0 + $0x8] sm:$0xff] }
0x175b   :  { %v2344_v1 = vadd.f32 %v10374_v29, %v2342_v58 }
0x175c   :  { %v2343_v2 = vadd.f32 %v10375_v6, %v2341_v0  ;;  %v10377_v0 = vld [vmem:[%s11464_s0] sm:$0xff]  ;;  %s10454_s0 = smov [#allocation6]  }
0x175d   :  { %v2348_v4 = vsel %vm50_vm0, %v2344_v1, -inf  ;;  %s8115_s15 = sshll.u32 %s10454_s0, 4  ;;  %s8116_s15 = int_to_ptr.vmem [resolvable:$true] %s8115_s15 }
0x175e   :  { %2349 = vmax.xlane.f32.xlu1 %v2348_v4  ;;  %v2345_v20 = vsel %vm50_vm0, %v2343_v2, -inf  ;;  %v2609_v4 = vld [vmem:[#allocation3 + $0x1f8] sm:$0xff]  ;;  %s10409_s16 = scalar_lea.vmem %s8116_s15, 256  ;;  %p10414_p9 = scmp.lt.s32.totalorder %s8116_s15, %s8116_s15 }
0x175f   :  { %2346 = vmax.xlane.f32.xlu0 %v2345_v20  ;;  %p10410_p8 = scmp.ne.s32.totalorder %s8116_s15, %s10409_s16  ;;  %p10415_p10 = scmp.lt.s32.totalorder %s10409_s16, %s10409_s16 }
0x1761   :  { %p10416_p11 = por %p10415_p10, %p10414_p9 }
0x1763   :  { %p10417_p12 = pnand %p10416_p11, %p10410_p8 }
0x176f   :  { %9922 = vrot.lane.b32.xlu1 %v10679_v62, %s10450_s8 }
0x1773   :  { %2030 = vrot.lane.b32.xlu1 %v10735_v23, %s10437_s20 }
0x1777   :  { %2242 = vrot.lane.b32.xlu1 %v2231_v55, %s10451_s9 }
0x17eb   :  { %v2350_v7 = vpop.xlane.xlu1 %2349 }
0x17ec   :  { %v2352_v9 = vsub.f32 %v2344_v1, %v2350_v7  ;;  %v2347_v12 = vpop.xlane.xlu0 %2346  ;;  %v2607_v1 = vld [vmem:[#allocation3 + $0x1e8] sm:$0xff]  ;;  %v2610_v7 = vld [vmem:[#allocation3 + $0x200] sm:$0xff] }
0x17ed   :  { %v2351_v13 = vsub.f32 %v2343_v2, %v2347_v12  ;;  %v2608_v2 = vld [vmem:[#allocation3 + $0x1f0] sm:$0xff]  ;;  %v2861_v12 = vld [vmem:[#allocation3 + $0x40] sm:$0xff] }
0x17ee   :  { %v2355_v14 = vmul.f32 1.442695, %v2352_v9  ;;  %v9501_v20 = vpack.c.bf16 %v2608_v2, %v2607_v1  ;;  %v9505_v9 = vpack.c.bf16 %v2610_v7, %v2609_v4  ;;  %v10379_v4 = vld [vmem:[#allocation3 + $0x8] sm:$0xff]  ;;  %v10380_v7 = vld [vmem:[#allocation3] sm:$0xff] }
0x17ef   :  { %v2353_v15 = vmul.f32 1.442695, %v2351_v13  ;;  %v9923_v16 = vpop.permute.xlu1 %9922  ;;  %v2862_v13 = vld [vmem:[#allocation3 + $0x48] sm:$0xff] }
0x17f0   :  { %v9925_v17 = vunpack.i.h.bf16 %v9923_v16  ;;  %v9924_v18 = vunpack.i.l.bf16 %v9923_v16  ;;  %9502 = vmatprep.subr.bf16.mxu0 %v9501_v20  ;;  %v2613_v16 = vld [vmem:[#allocation3 + $0x218] sm:$0xff] }
0x17f1   :  { %10158 = vpow2.f32 %v2353_v15  ;;  %9504 = vmatpush3.bf16.msra.mxu0 %v9501_v20  ;;  %v2612_v15 = vld [vmem:[#allocation3 + $0x210] sm:$0xff] }
0x17f2   :  { %v9489_v59 = vpack.c.bf16 %v9925_v17, %v9924_v18  ;;  %10160 = vpow2.f32 %v2355_v14  ;;  %9506 = vmatprep.subr.bf16.mxu0 %v9505_v9  ;;  %v9525_v14 = vpack.c.bf16 %v2862_v13, %v2861_v12  ;;  %v2614_v17 = vld [vmem:[#allocation3 + $0x220] sm:$0xff]  ;;  %v9509_v18 = vpack.c.bf16 %v2613_v16, %v2612_v15 }
0x17f3   :  { %v2031_v21 = vpop.permute.xlu1 %2030 }
0x17f4   :  { %2035 = vst.msk [vmem:[#allocation2 + $0x8] sm:$0xff] %vm704_vm10, %v2031_v21  ;;  %9490 = vmatprep.subr.bf16.mxu1 %v9489_v59 }
0x17f5   :  { %9492 = vmatpush3.bf16.msra.mxu1 %v9489_v59  ;;  %9508 = vmatpush3.bf16.msra.mxu0 %v9505_v9  ;;  %v2615_v59 = vld [vmem:[#allocation3 + $0x228] sm:$0xff] }
0x17f6   :  { %9494 = vmatprep.subr.bf16.mxu1 %v9493_v37  ;;  %9526 = vmatprep.subr.bf16.mxu0 %v9525_v14  ;;  %v9513_v21 = vpack.c.bf16 %v2615_v59, %v2614_v17 }
0x17f7   :  { %v2243_v30 = vpop.permute.xlu1 %2242 }
0x17fb   :  { %v10159_v62 = vpop.eup %10158 }
0x17fc   :  { %v2357_v23 = vsel %vm50_vm0, %v10159_v62, 0.0  ;;  %v10161_v24 = vpop.eup %10160 }
0x17fd   :  { %2358 = vadd.xlane.f32.xlu0 %v2357_v23  ;;  %v2360_v26 = vsel %vm50_vm0, %v10161_v24, 0.0  ;;  %v2617_v23 = vld [vmem:[#allocation3 + $0x238] sm:$0xff] }
0x1801   :  { %2361 = vadd.xlane.f32.xlu0 %v2360_v26 }
0x1817   :  { %2028 = vrot.lane.b32.xlu0 %v10737_v60, %s10437_s20 }
0x181b   :  { %2244 = vrot.lane.b32.xlu0 %v8893_v54, %s10451_s9 }
0x188a   :  { %v2359_v27 = vpop.xlane.xlu0 %2358 }
0x188b   :  { %10162 = vrcp.f32 %v2359_v27 }
0x188e   :  { %v2362_v28 = vpop.xlane.xlu0 %2361 }
0x188f   :  { %10164 = vrcp.f32 %v2362_v28 }
0x1892   :  { %v2029_v29 = vpop.permute.xlu0 %2028 }
0x1893   :  { %2034 = vst.msk [vmem:[#allocation2] sm:$0xff] %vm704_vm10, %v2029_v29 }
0x1894   :  { %2248 = vst.msk [vmem:[#allocation2] sm:$0xff] %vm919_vm11, %v2243_v30 }
0x1895   :  { %v10163_v6 = vpop.eup %10162 }
0x1896   :  { %v2245_v31 = vpop.permute.xlu0 %2244  ;;  %v2365_v32 = vmul.f32 %v10163_v6, %v10159_v62  ;;  %v2616_v62 = vld [vmem:[#allocation3 + $0x230] sm:$0xff] }
0x1897   :  { %2249 = vst.msk [vmem:[#allocation2 + $0x8] sm:$0xff] %vm919_vm11, %v2245_v31 }
0x1898   :  { %8905 = vmatprep.mubr.msk.f32.mxu1 %vm50_vm0, %v2365_v32 }
0x1899   :  { %v10165_v60 = vpop.eup %10164 }
0x189a   :  { %v2366_v34 = vmul.f32 %v10165_v60, %v10161_v24  ;;  %v9517_v24 = vpack.c.bf16 %v2617_v23, %v2616_v62 }
0x189c   :  { %8906 = vmatmul.mubr.msk.f32.vlgmr.msra.gmra.mrb[22].mxu1 %vm50_vm0, %v2366_v34 }
0x189d   :  { %9496 = vmatpush3.bf16.msra.mxu1 %v9493_v37 }
0x189e   :  { %9498 = vmatprep.subr.bf16.mxu1 %v9497_v40 }
0x18a1   :  { %9500 = vmatpush3.bf16.msra.mxu1 %v9497_v40 }
0x18a2   :  { %9510 = vmatprep.subr.bf16.mxu1 %v9509_v18 }
0x196f   :  { %v8907_v22 = vpop.f32.mrb[22].mxu1 }
0x1970   :  { %2458 = vrot.lane.b32.xlu0 %v8907_v22, %s10452_s10  ;;  %v2445_v41 = vpop.f32.mrb[23].mxu1  ;;  %v8203_v22 = vld [vmem:[#allocation3 + $0x1d8] ss:$0 sm:$0xff] }
0x1971   :  { %2456 = vrot.lane.b32.xlu1 %v2445_v41, %s10452_s10 }
0x19e2   :  { %v2459_v25 = vpop.permute.xlu0 %2458 }
0x19e3   :  { %2463 = vst.msk [vmem:[#allocation2 + $0x8] sm:$0xff] %vm1134_vm12, %v2459_v25  ;;  %v2457_v42 = vpop.permute.xlu1 %2456 }
0x19e4   :  { %2462 = vst.msk [vmem:[#allocation2] sm:$0xff] %vm1134_vm12, %v2457_v42 }
0x19ea   :  { %v2465_v61 = vld [vmem:[#allocation2 + $0x8] sm:$0xff] }
0x19eb   :  { %v2464_v33 = vld [vmem:[#allocation2] sm:$0xff] }
0x19ec   :  { %8916 = vmatprep.mubr.msk.f32.mxu1 %vm138_vm3, %v2464_v33 }
0x19ed   :  { %8917 = vmatmul.mubr.msk.f32.vlgmr.msra.gmra.mrb[24].mxu1 %vm138_vm3, %v2465_v61 }
0x19ee   :  { %9512 = vmatpush3.bf16.msra.mxu1 %v9509_v18 }
0x19ef   :  { %9514 = vmatprep.subr.bf16.mxu1 %v9513_v21 }
0x19f2   :  { %9516 = vmatpush3.bf16.msra.mxu1 %v9513_v21 }
0x19f3   :  { %9518 = vmatprep.subr.bf16.mxu1 %v9517_v24 }
0x19f6   :  { %9520 = vmatpush3.bf16.msra.mxu1 %v9517_v24 }
0x1ac0   :  { %v8918_v57 = vpop.f32.mrb[24].mxu1 }
0x1ac1   :  { %v2548_v44 = vadd.f32 %v8918_v57, %v8200_v43  ;;  %v2542_v45 = vpop.f32.mrb[25].mxu1 }
0x1ac2   :  { %v2543_v46 = vadd.f32 %v8200_v43, %v2542_v45  ;;  %v8204_v43 = vld [vmem:[#allocation3 + $0x1e0] ss:$0 sm:$0xff] }
0x1ac3   :  { %v10784_v47 = vadd.f32 %v2548_v44, %v10656_v19 }
0x1ac4   :  { %v10787_v48 = vadd.f32 %v2543_v46, %v10659_v10 }
0x1ac5   :  { %v2558_v49 = vsel %vm138_vm3, %v10784_v47, 0.0 }
0x1ac6   :  { %2559 = vadd.xlane.f32.xlu0 %v2558_v49  ;;  %v2555_v50 = vsel %vm138_vm3, %v10787_v48, 0.0 }
0x1ac7   :  { %2556 = vadd.xlane.f32.xlu1 %v2555_v50  ;;  %v10378_v50 = vld [vmem:[#allocation6] sm:$0xff] }
0x1b53   :  { %v2560_v52 = vpop.xlane.xlu0 %2559 }
0x1b54   :  { %v2562_v5 = vmul.f32 0.03125, %v2560_v52  ;;  %v2557_v53 = vpop.xlane.xlu1 %2556 }
0x1b55   :  { %v2561_v3 = vmul.f32 0.03125, %v2557_v53  ;;  %v2619_v53 = vld [vmem:[#allocation3 + $0x248] sm:$0xff] }
0x1b56   :  { %v10794_v19 = vsub.f32 %v10784_v47, %v2562_v5  ;;  %v2618_v5 = vld [vmem:[#allocation3 + $0x240] sm:$0xff] }
0x1b57   :  { %v10797_v10 = vsub.f32 %v10787_v48, %v2561_v3  ;;  %v9521_v3 = vpack.c.bf16 %v2619_v53, %v2618_v5 }
0x1b58   :  { %v2566_v54 = vmul.f32 %v10794_v19, %v10794_v19  ;;  %v2598_v41 = vmul.f32 %v8203_v22, %v10794_v19  ;;  %v8205_v19 = vld [vmem:[#allocation3 + $0x208] ss:$0 sm:$0xff] }
0x1b59   :  { %v2565_v55 = vmul.f32 %v10797_v10, %v10797_v10  ;;  %v2597_v33 = vmul.f32 %v8203_v22, %v10797_v10  ;;  %9522 = vmatprep.subr.bf16.mxu1 %v9521_v3 }
0x1b5a   :  { %v2570_v56 = vsel %vm138_vm3, %v2566_v54, 0.0  ;;  %9524 = vmatpush3.bf16.msra.mxu1 %v9521_v3 }
0x1b5b   :  { %2571 = vadd.xlane.f32.xlu1 %v2570_v56  ;;  %v2567_v58 = vsel %vm138_vm3, %v2565_v55, 0.0 }
0x1b5c   :  { %2568 = vadd.xlane.f32.xlu0 %v2567_v58 }
0x1b6c   :  { %2853 = vperm.xlu1 %9927, %v10376_v63  }
0x1b72   :  { %2850 = vperm.xlu0 %9926, %v10377_v0  }
0x1be8   :  { %v2572_v26 = vpop.xlane.xlu1 %2571 }
0x1be9   :  { %v2574_v27 = vmul.f32 0.032258064, %v2572_v26  ;;  %v2569_v28 = vpop.xlane.xlu0 %2568  ;;  %v3002_v26 = vld [vmem:[#allocation3 + $0x268] sm:$0xff] }
0x1bea   :  { %v2573_v29 = vmul.f32 0.032258064, %v2569_v28  ;;  %v3004_v28 = vld [vmem:[#allocation3 + $0x278] sm:$0xff] }
0x1beb   :  { %10166 = vrsqrt.f32 %v2574_v27  ;;  %vm2584_vm13 = vcmp.eq.f32.partialorder %v2574_v27, inf  ;;  %v2587_v32 = vand.u32 2147483648, %v2574_v27  ;;  %vm2586_vm14 = vcmp.eq.f32.partialorder %v2574_v27, 0.0 }
0x1bec   :  { %10168 = vrsqrt.f32 %v2573_v29  ;;  %vm2577_vm15 = vcmp.eq.f32.partialorder %v2573_v29, inf  ;;  %v2580_v35 = vand.u32 2147483648, %v2573_v29  ;;  %vm2579_vm1 = vcmp.eq.f32.partialorder %v2573_v29, 0.0  ;;  %v2854_v45 = vpop.permute.xlu1 %2853 }
0x1bed   :  { %vm2856_vm5 = vcmp.eq.s32.totalorder %v2854_v45, %v10491_v8 }
0x1bee   :  { %v8214_v52 = vsel %vm2856_vm5, 1.0, %v10378_v50 }
0x1bf1   :  { %v2851_v25 = vpop.permute.xlu0 %2850 }
0x1bf2   :  { %vm2855_vm4 = vcmp.eq.s32.totalorder %v2851_v25, %v10491_v8 }
0x1bf3   :  { %v8213_v51 = vsel %vm2855_vm4, 1.0, %v10378_v50 }
0x1bf5   :  { %v10167_v30 = vpop.eup %10166 }
0x1bf6   :  { %v10169_v6 = vpop.eup %10168  ;;  %v2583_v31 = vmul.f32 %v10167_v30, %v2574_v27  ;;  %v3005_v30 = vld [vmem:[#allocation3 + $0x280] sm:$0xff] }
0x1bf7   :  { %v2576_v60 = vmul.f32 %v10169_v6, %v2573_v29  ;;  %v9533_v6 = vpack.c.bf16 %v3005_v30, %v3004_v28 }
0x1bf8   :  { %v2585_v34 = vsel %vm2584_vm13, %v2574_v27, %v2583_v31  ;;  %v3003_v27 = vld [vmem:[#allocation3 + $0x270] sm:$0xff] }
0x1bf9   :  { %v2588_v36 = vsel %vm2586_vm14, %v2587_v32, %v2585_v34  ;;  %v2578_v37 = vsel %vm2577_vm15, %v2573_v29, %v2576_v60  ;;  %v9529_v29 = vpack.c.bf16 %v3003_v27, %v3002_v26 }
0x1bfa   :  { %v2590_v38 = vadd.f32 1e-06, %v2588_v36  ;;  %v2581_v39 = vsel %vm2579_vm1, %v2580_v35, %v2578_v37 }
0x1bfb   :  { %v2589_v40 = vadd.f32 1e-06, %v2581_v39 }
0x1bfc   :  { %10170 = vrcp.f32 %v2590_v38 }
0x1bfd   :  { %10172 = vrcp.f32 %v2589_v40 }
0x1c06   :  { %v10171_v42 = vpop.eup %10170 }
0x1c07   :  { %v10173_v61 = vpop.eup %10172  ;;  %v2600_v57 = vmul.f32 %v10171_v42, %v2598_v41 }
0x1c08   :  { %v2599_v44 = vmul.f32 %v10173_v61, %v2597_v33 }
0x1c09   :  { %v2606_v49 = vadd.f32 %v8204_v43, %v2600_v57 }
0x1c0a   :  { %v2605_v46 = vadd.f32 %v8204_v43, %v2599_v44  ;;  %v8217_v44 = vld [vmem:[#allocation3 + $0x258] ss:$0 sm:$0xff] }
0x1c0c   :  { %8927 = vmatprep.mubr.msk.f32.mxu0 %vm138_vm3, %v2605_v46 }
0x1c0d   :  { %8928 = vmatmul.mubr.msk.f32.vlgmr.msra.gmra.mrb[20].mxu0 %vm138_vm3, %v2606_v49  ;;  %v8218_v49 = vld [vmem:[#allocation3 + $0x260] ss:$0 sm:$0xff] }
0x1c0e   :  { %9528 = vmatpush3.bf16.msra.mxu0 %v9525_v14  ;;  %8953 = vmatprep.mubr.msk.f32.mxu0 %vm50_vm0, %v8213_v51 }
0x1c0f   :  { %9530 = vmatprep.subr.bf16.mxu0 %v9529_v29 }
0x1c11   :  { %8954 = vmatmul.mubr.msk.f32.vlgmr.msra.gmra.mrb[22].mxu0 %vm50_vm0, %v8214_v52 }
0x1c12   :  { %9532 = vmatpush3.bf16.msra.mxu0 %v9529_v29 }
0x1c13   :  { %9534 = vmatprep.subr.bf16.mxu0 %v9533_v6 }
0x1c16   :  { %9536 = vmatpush3.bf16.msra.mxu0 %v9533_v6 }
0x1ce0   :  { %v8929_v10 = vpop.f32.mrb[20].mxu0 }
0x1ce1   :  { %v2703_v54 = vadd.f32 %v8929_v10, %v8205_v19  ;;  %v2697_v55 = vpop.f32.mrb[21].mxu0 }
0x1ce2   :  { %v2698_v8 = vadd.f32 %v8205_v19, %v2697_v55  ;;  %v8219_v19 = vld [vmem:[#allocation3 + $0x288] ss:$0 sm:$0xff] }
0x1ce3   :  { %v2707_v63 = vmax.f32 %v2703_v54, 0.0 }
0x1ce4   :  { %v2706_v56 = vmax.f32 %v2698_v8, 0.0  ;;  %v8955_v58 = vpop.f32.mrb[22].mxu0 }
0x1ce5   :  { %v2945_v0 = vmul.f32 5.656854, %v8955_v58  ;;  %v2935_v1 = vpop.f32.mrb[23].mxu0 }
0x1ce6   :  { %v2944_v2 = vmul.f32 5.656854, %v2935_v1  ;;  %8946 = vmatprep.mubr.msk.f32.mxu1 %vm1385_vm2, %v2706_v56 }
0x1ce7   :  { %v10820_v20 = vadd.f32 %v10379_v4, %v2945_v0  ;;  %8947 = vmatmul.mubr.msk.f32.vlgmr.msra.gmra.mrb[26].mxu1 %vm1385_vm2, %v2707_v63  ;;  %v10857_v4 = vld [vmem:[#allocation3 + $0x20] sm:$0xff] }
0x1ce8   :  { %v10823_v9 = vadd.f32 %v10380_v7, %v2944_v2 }
0x1ce9   :  { %v2953_v12 = vsel %vm138_vm3, %v10820_v20, 0.0 }
0x1cea   :  { %2954 = vadd.xlane.f32.xlu0 %v2953_v12  ;;  %v2950_v13 = vsel %vm138_vm3, %v10823_v9, 0.0 }
0x1ceb   :  { %2951 = vadd.xlane.f32.xlu1 %v2950_v13 }
0x1d77   :  { %v2955_v14 = vpop.xlane.xlu0 %2954 }
0x1d78   :  { %v2957_v15 = vmul.f32 0.03125, %v2955_v14  ;;  %v2952_v16 = vpop.xlane.xlu1 %2951  ;;  %v10859_v14 = vld [vmem:[#allocation3 + $0x28] sm:$0xff] }
0x1d79   :  { %v2956_v17 = vmul.f32 0.03125, %v2952_v16 }
0x1d7a   :  { %v2959_v18 = vsub.f32 %v10820_v20, %v2957_v15 }
0x1d7b   :  { %v2958_v59 = vsub.f32 %v10823_v9, %v2956_v17 }
0x1d7c   :  { %v2961_v23 = vmul.f32 %v2959_v18, %v2959_v18  ;;  %v2993_v51 = vmul.f32 %v8217_v44, %v2959_v18 }
0x1d7d   :  { %v2960_v21 = vmul.f32 %v2958_v59, %v2958_v59  ;;  %v2992_v45 = vmul.f32 %v8217_v44, %v2958_v59 }
0x1d7e   :  { %v2965_v24 = vsel %vm138_vm3, %v2961_v23, 0.0 }
0x1d7f   :  { %v2962_v62 = vsel %vm138_vm3, %v2960_v21, 0.0 }
0x1d80   :  { %2963 = vadd.xlane.f32.xlu1 %v2962_v62 }
0x1d84   :  { %2966 = vadd.xlane.f32.xlu1 %v2965_v24 }
0x1dba   :  { %v10833_v31 = vpop.f32.mrb[26].mxu1 }
0x1dbb   :  { %v10835_v32 = vpop.f32.mrb[27].mxu1 }
0x1e0d   :  { %v2964_v60 = vpop.xlane.xlu1 %2963 }
0x1e0e   :  { %v2968_v34 = vmul.f32 0.032258064, %v2964_v60 }
0x1e10   :  { %10174 = vrsqrt.f32 %v2968_v34  ;;  %vm2972_vm6 = vcmp.eq.f32.partialorder %v2968_v34, inf  ;;  %v2975_v39 = vand.u32 2147483648, %v2968_v34  ;;  %vm2974_vm7 = vcmp.eq.f32.partialorder %v2968_v34, 0.0 }
0x1e11   :  { %v2967_v35 = vpop.xlane.xlu1 %2966 }
0x1e12   :  { %v2969_v36 = vmul.f32 0.032258064, %v2967_v35 }
0x1e14   :  { %10176 = vrsqrt.f32 %v2969_v36  ;;  %vm2979_vm13 = vcmp.eq.f32.partialorder %v2969_v36, inf  ;;  %v2982_v33 = vand.u32 2147483648, %v2969_v36  ;;  %vm2981_vm14 = vcmp.eq.f32.partialorder %v2969_v36, 0.0 }
0x1e1a   :  { %v10175_v37 = vpop.eup %10174 }
0x1e1b   :  { %v2971_v38 = vmul.f32 %v10175_v37, %v2968_v34 }
0x1e1d   :  { %v2973_v40 = vsel %vm2972_vm6, %v2968_v34, %v2971_v38 }
0x1e1e   :  { %v10177_v22 = vpop.eup %10176  ;;  %v2976_v41 = vsel %vm2974_vm7, %v2975_v39, %v2973_v40 }
0x1e1f   :  { %v2978_v25 = vmul.f32 %v10177_v22, %v2969_v36  ;;  %v2984_v42 = vadd.f32 1e-06, %v2976_v41 }
0x1e21   :  { %v2980_v61 = vsel %vm2979_vm13, %v2969_v36, %v2978_v25  ;;  %10178 = vrcp.f32 %v2984_v42 }
0x1e22   :  { %v2983_v43 = vsel %vm2981_vm14, %v2982_v33, %v2980_v61 }
0x1e23   :  { %v2985_v57 = vadd.f32 1e-06, %v2983_v43 }
0x1e25   :  { %10180 = vrcp.f32 %v2985_v57 }
0x1e2b   :  { %v10179_v46 = vpop.eup %10178 }
0x1e2c   :  { %v2994_v50 = vmul.f32 %v10179_v46, %v2992_v45 }
0x1e2e   :  { %v3000_v52 = vadd.f32 %v8218_v49, %v2994_v50 }
0x1e2f   :  { %v10181_v5 = vpop.eup %10180 }
0x1e30   :  { %v2995_v53 = vmul.f32 %v10181_v5, %v2993_v51  ;;  %8964 = vmatprep.mubr.msk.f32.mxu0 %vm138_vm3, %v3000_v52 }
0x1e32   :  { %v3001_v3 = vadd.f32 %v8218_v49, %v2995_v53 }
0x1e34   :  { %8965 = vmatmul.mubr.msk.f32.vlgmr.msra.gmra.mrb[24].mxu0 %vm138_vm3, %v3001_v3 }
0x1f07   :  { %v8966_v10 = vpop.f32.mrb[24].mxu0 }
0x1f08   :  { %v10839_v54 = vadd.f32 %v8966_v10, %v8219_v19  ;;  %v3083_v55 = vpop.f32.mrb[25].mxu0 }
0x1f09   :  { %v10841_v8 = vadd.f32 %v8219_v19, %v3083_v55 }
0x1f0b   :  { %8971 = vmatprep.mubr.msk.f32.mxu0 %vm293_vm8, %v10841_v8  ;;  %v10847_v56 = vpack.i.bf16 %v10839_v54, %v10841_v8 }
0x1f0d   :  { %9929 = vrot.lane.b32.xlu1 %v10847_v56, %s10440_s1 }
0x1f7f   :  { %v9930_v58 = vpop.permute.xlu1 %9929 }
0x1f80   :  { %v9932_v63 = vunpack.i.h.bf16 %v9930_v58  ;;  %v9931_v0 = vunpack.i.l.bf16 %v9930_v58 }
0x1f82   :  { %v9537_v1 = vpack.c.bf16 %v9932_v63, %v9931_v0 }
0x1f84   :  { %9539 = vmatprep.subr.msk.bf16.mxu0 %vm10531_vm9, %v9537_v1 }
0x1f85   :  { %9542 = vmatpush3.bf16.xpose.msk.msra.mxu0 %vm10531_vm9, %v9537_v1 }
0x1f8c   :  { %8972 = vmatmul.mubr.msk.f32.vlgmr.msra.gmra.mrb[26].mxu0 %vm293_vm8, %v10839_v54 }
0x205f   :  { %v8973_v2 = vpop.f32.mrb[26].mxu0 }
0x2060   :  { %v3177_v7 = vpop.f32.mrb[27].mxu0  ;;  %v3187_v12 = vmul.f32 0.35355338, %v8973_v2 }
0x2061   :  { %v3186_v13 = vmul.f32 0.35355338, %v3177_v7 }
0x2062   :  { %v3189_v16 = vadd.f32 %v3187_v12, %v10859_v14 }
0x2063   :  { %v3188_v15 = vadd.f32 %v3186_v13, %v10857_v4 }
0x2064   :  { %v3193_v18 = vsel %vm50_vm0, %v3189_v16, -inf }
0x2065   :  { %v3190_v17 = vsel %vm50_vm0, %v3188_v15, -inf }
0x2066   :  { %3191 = vmax.xlane.f32.xlu0 %v3190_v17 }
0x206a   :  { %3194 = vmax.xlane.f32.xlu0 %v3193_v18 }
0x2080   :  { %9934 = vrot.lane.b32.xlu0 %v10847_v56, %s10445_s3 }
0x20f3   :  { %v3192_v59 = vpop.xlane.xlu0 %3191 }
0x20f4   :  { %v3196_v21 = vsub.f32 %v3188_v15, %v3192_v59 }
0x20f6   :  { %v3198_v62 = vmul.f32 1.442695, %v3196_v21 }
0x20f7   :  { %v3195_v23 = vpop.xlane.xlu0 %3194 }
0x20f8   :  { %10182 = vpow2.f32 %v3198_v62  ;;  %v3197_v24 = vsub.f32 %v3189_v16, %v3195_v23 }
0x20fa   :  { %v3200_v26 = vmul.f32 1.442695, %v3197_v24 }
0x20fb   :  { %v9935_v27 = vpop.permute.xlu0 %9934 }
0x20fc   :  { %10184 = vpow2.f32 %v3200_v26  ;;  %v9937_v28 = vunpack.i.h.bf16 %v9935_v27  ;;  %v9936_v29 = vunpack.i.l.bf16 %v9935_v27 }
0x20fe   :  { %v9543_v30 = vpack.c.bf16 %v9937_v28, %v9936_v29 }
0x2100   :  { %9544 = vmatprep.subr.bf16.mxu1 %v9543_v30 }
0x2101   :  { %9546 = vmatpush3.bf16.msra.mxu1 %v9543_v30 }
0x2102   :  { %v10183_v6 = vpop.eup %10182 }
0x2103   :  { %v3202_v60 = vsel %vm50_vm0, %v10183_v6, 0.0 }
0x2104   :  { %3203 = vadd.xlane.f32.xlu1 %v3202_v60 }
0x2106   :  { %v10185_v34 = vpop.eup %10184 }
0x2107   :  { %v3205_v35 = vsel %vm50_vm0, %v10185_v34, 0.0 }
0x2108   :  { %3206 = vadd.xlane.f32.xlu0 %v3205_v35 }
0x2115   :  { %3303 = vrot.lane.b32.xlu1 %v10839_v54, %s10442_s28 }
0x211e   :  { %9939 = vrot.lane.b32.xlu0 %v10847_v56, %s10441_s27 }
0x2122   :  { %3301 = vrot.lane.b32.xlu0 %v10841_v8, %s10442_s28 }
0x2191   :  { %v3204_v36 = vpop.xlane.xlu1 %3203 }
0x2192   :  { %10186 = vrcp.f32 %v3204_v36 }
0x2195   :  { %v3207_v37 = vpop.xlane.xlu0 %3206  ;;  %v3304_v43 = vpop.permute.xlu1 %3303 }
0x2196   :  { %10188 = vrcp.f32 %v3207_v37 }
0x2199   :  { %v9940_v38 = vpop.permute.xlu0 %9939 }
0x219a   :  { %v9942_v39 = vunpack.i.h.bf16 %v9940_v38  ;;  %v9941_v40 = vunpack.i.l.bf16 %v9940_v38 }
0x219c   :  { %v10187_v22 = vpop.eup %10186  ;;  %v9547_v41 = vpack.c.bf16 %v9942_v39, %v9941_v40 }
0x219d   :  { %v3210_v25 = vmul.f32 %v10187_v22, %v10183_v6  ;;  %v3302_v61 = vpop.permute.xlu0 %3301 }
0x219e   :  { %9549 = vmatprep.subr.msk.bf16.mxu1 %vm10531_vm9, %v9547_v41 }
0x219f   :  { %8978 = vmatprep.mubr.msk.f32.mxu1 %vm50_vm0, %v3210_v25 }
0x21a0   :  { %v10189_v42 = vpop.eup %10188 }
0x21a1   :  { %v3211_v33 = vmul.f32 %v10189_v42, %v10185_v34 }
0x21a3   :  { %8979 = vmatmul.mubr.msk.f32.vlgmr.msra.gmra.mrb[28].mxu1 %vm50_vm0, %v3211_v33 }
0x21a4   :  { %9552 = vmatpush3.bf16.xpose.msk.msra.mxu1 %vm10531_vm9, %v9547_v41  ;;  %8985 = vmatprep.mubr.msk.f32.mxu1 %vm293_vm8, %v3302_v61 }
0x21ab   :  { %8986 = vmatmul.mubr.msk.f32.vlgmr.msra.gmra.mrb[30].mxu1 %vm293_vm8, %v3304_v43 }
0x2276   :  { %v8980_v57 = vpop.f32.mrb[28].mxu1 }
0x2277   :  { %3300 = vst.msk [vmem:[#allocation2 + $0x8] sm:$0xff] %vm293_vm8, %v8980_v57  ;;  %v3290_v44 = vpop.f32.mrb[29].mxu1 }
0x2278   :  { %3299 = vst.msk [vmem:[#allocation2] sm:$0xff] %vm293_vm8, %v3290_v44 }
0x227e   :  { %v8987_v45 = vpop.f32.mrb[30].mxu1 }
0x227f   :  { %v3393_v46 = vmul.f32 0.35355338, %v8987_v45  ;;  %v3383_v49 = vpop.f32.mrb[31].mxu1 }
0x2280   :  { %v3392_v50 = vmul.f32 0.35355338, %v3383_v49 }
0x2281   :  { %v3395_v51 = vadd.f32 %v3393_v46, %v10859_v14 }
0x2282   :  { %v3394_v52 = vadd.f32 %v3392_v50, %v10857_v4 }
0x2283   :  { %v3399_v5 = vsel %vm50_vm0, %v3395_v51, -inf }
0x2284   :  { %3400 = vmax.xlane.f32.xlu1 %v3399_v5  ;;  %v3396_v53 = vsel %vm50_vm0, %v3394_v52, -inf }
0x2285   :  { %3397 = vmax.xlane.f32.xlu0 %v3396_v53 }
0x2295   :  { %9949 = vrot.lane.b32.xlu1 %v10847_v56, %s10446_s4 }
0x229b   :  { %9944 = vrot.lane.b32.xlu0 %v10847_v56, %s10443_s29 }
0x2311   :  { %v3401_v3 = vpop.xlane.xlu1 %3400 }
0x2312   :  { %v3403_v19 = vsub.f32 %v3395_v51, %v3401_v3  ;;  %v3398_v10 = vpop.xlane.xlu0 %3397 }
0x2313   :  { %v3402_v55 = vsub.f32 %v3394_v52, %v3398_v10 }
0x2314   :  { %v3406_v58 = vmul.f32 1.442695, %v3403_v19 }
0x2315   :  { %v3404_v63 = vmul.f32 1.442695, %v3402_v55  ;;  %v9950_v0 = vpop.permute.xlu1 %9949 }
0x2316   :  { %10190 = vpow2.f32 %v3406_v58  ;;  %v9945_v1 = vpop.permute.xlu0 %9944  ;;  %v9952_v2 = vunpack.i.h.bf16 %v9950_v0  ;;  %v9951_v7 = vunpack.i.l.bf16 %v9950_v0 }
0x2317   :  { %v9947_v12 = vunpack.i.h.bf16 %v9945_v1  ;;  %v9946_v13 = vunpack.i.l.bf16 %v9945_v1  ;;  %10192 = vpow2.f32 %v3404_v63 }
0x2318   :  { %v9557_v16 = vpack.c.bf16 %v9952_v2, %v9951_v7 }
0x2319   :  { %v9553_v15 = vpack.c.bf16 %v9947_v12, %v9946_v13 }
0x231b   :  { %9554 = vmatprep.subr.bf16.mxu0 %v9553_v15 }
0x231c   :  { %9556 = vmatpush3.bf16.msra.mxu0 %v9553_v15 }
0x231d   :  { %9559 = vmatprep.subr.msk.bf16.mxu0 %vm10531_vm9, %v9557_v16 }
0x2320   :  { %v10191_v17 = vpop.eup %10190 }
0x2321   :  { %v3411_v18 = vsel %vm50_vm0, %v10191_v17, 0.0  ;;  %v10193_v59 = vpop.eup %10192 }
0x2322   :  { %3412 = vadd.xlane.f32.xlu0 %v3411_v18  ;;  %v3408_v21 = vsel %vm50_vm0, %v10193_v59, 0.0 }
0x2326   :  { %3409 = vadd.xlane.f32.xlu0 %v3408_v21 }
0x233c   :  { %3515 = vrot.lane.b32.xlu0 %v10841_v8, %s10444_s30 }
0x2340   :  { %3517 = vrot.lane.b32.xlu0 %v10839_v54, %s10444_s30 }
0x23af   :  { %v3413_v62 = vpop.xlane.xlu0 %3412 }
0x23b0   :  { %10194 = vrcp.f32 %v3413_v62 }
0x23b3   :  { %v3410_v23 = vpop.xlane.xlu0 %3409 }
0x23b4   :  { %10196 = vrcp.f32 %v3410_v23 }
0x23b7   :  { %v3516_v29 = vpop.permute.xlu0 %3515 }
0x23ba   :  { %v10195_v24 = vpop.eup %10194 }
0x23bb   :  { %v3417_v28 = vmul.f32 %v10195_v24, %v10191_v17  ;;  %v3518_v30 = vpop.permute.xlu0 %3517 }
0x23be   :  { %v10197_v26 = vpop.eup %10196 }
0x23bf   :  { %v3416_v27 = vmul.f32 %v10197_v26, %v10193_v59 }
0x23c1   :  { %8992 = vmatprep.mubr.msk.f32.mxu0 %vm50_vm0, %v3416_v27 }
0x23c2   :  { %8993 = vmatmul.mubr.msk.f32.vlgmr.msra.gmra.mrb[28].mxu0 %vm50_vm0, %v3417_v28 }
0x23c3   :  { %9562 = vmatpush3.bf16.xpose.msk.msra.mxu0 %vm10531_vm9, %v9557_v16  ;;  %8999 = vmatprep.mubr.msk.f32.mxu0 %vm293_vm8, %v3516_v29 }
0x23ca   :  { %9000 = vmatmul.mubr.msk.f32.vlgmr.msra.gmra.mrb[30].mxu0 %vm293_vm8, %v3518_v30 }
0x2495   :  { %v10907_v6 = vpop.f32.mrb[28].mxu0 }
0x2496   :  { %v10909_v60 = vpop.f32.mrb[29].mxu0 }
0x249d   :  { %v9001_v34 = vpop.f32.mrb[30].mxu0 }
0x249e   :  { %v3607_v35 = vmul.f32 0.35355338, %v9001_v34  ;;  %v3597_v36 = vpop.f32.mrb[31].mxu0 }
0x249f   :  { %v3606_v37 = vmul.f32 0.35355338, %v3597_v36 }
0x24a0   :  { %v3609_v38 = vadd.f32 %v3607_v35, %v10859_v14 }
0x24a1   :  { %v3608_v39 = vadd.f32 %v3606_v37, %v10857_v4 }
0x24a2   :  { %v3613_v40 = vsel %vm50_vm0, %v3609_v38, -inf }
0x24a3   :  { %3614 = vmax.xlane.f32.xlu1 %v3613_v40  ;;  %v3610_v22 = vsel %vm50_vm0, %v3608_v39, -inf }
0x24a4   :  { %3611 = vmax.xlane.f32.xlu0 %v3610_v22 }
0x24b4   :  { %9954 = vrot.lane.b32.xlu1 %v10847_v56, %s10447_s5 }
0x24b8   :  { %3729 = vrot.lane.b32.xlu1 %v10841_v8, %s10448_s6 }
0x24bc   :  { %3731 = vrot.lane.b32.xlu1 %v10839_v54, %s10448_s6 }
0x2530   :  { %v3615_v41 = vpop.xlane.xlu1 %3614 }
0x2531   :  { %v3617_v25 = vsub.f32 %v3609_v38, %v3615_v41  ;;  %v3612_v42 = vpop.xlane.xlu0 %3611 }
0x2532   :  { %v3616_v33 = vsub.f32 %v3608_v39, %v3612_v42 }
0x2533   :  { %v3620_v61 = vmul.f32 1.442695, %v3617_v25 }
0x2534   :  { %v3618_v43 = vmul.f32 1.442695, %v3616_v33  ;;  %v9955_v57 = vpop.permute.xlu1 %9954  ;;  %v3092_v33 = vld [vmem:[#allocation3 + $0x290] sm:$0xff] }
0x2535   :  { %10198 = vpow2.f32 %v3620_v61  ;;  %v9957_v44 = vunpack.i.h.bf16 %v9955_v57  ;;  %v9956_v45 = vunpack.i.l.bf16 %v9955_v57  ;;  %v3093_v61 = vld [vmem:[#allocation3 + $0x298] sm:$0xff]  ;;  %v3094_v57 = vld [vmem:[#allocation3 + $0x2a0] sm:$0xff] }
0x2536   :  { %10200 = vpow2.f32 %v3618_v43  ;;  %v9577_v43 = vpack.c.bf16 %v3093_v61, %v3092_v33 }
0x2537   :  { %v9563_v46 = vpack.c.bf16 %v9957_v44, %v9956_v45  ;;  %v3095_v44 = vld [vmem:[#allocation3 + $0x2a8] sm:$0xff] }
0x2538   :  { %v3730_v0 = vpop.permute.xlu1 %3729  ;;  %v9581_v45 = vpack.c.bf16 %v3095_v44, %v3094_v57 }
0x2539   :  { %9564 = vmatprep.subr.bf16.mxu1 %v9563_v46 }
0x253a   :  { %9566 = vmatpush3.bf16.msra.mxu1 %v9563_v46 }
0x253c   :  { %v3732_v1 = vpop.permute.xlu1 %3731 }
0x253f   :  { %v10199_v49 = vpop.eup %10198 }
0x2540   :  { %v3625_v8 = vsel %vm50_vm0, %v10199_v49, 0.0  ;;  %v10201_v50 = vpop.eup %10200 }
0x2541   :  { %3626 = vadd.xlane.f32.xlu0 %v3625_v8  ;;  %v3622_v54 = vsel %vm50_vm0, %v10201_v50, 0.0  ;;  %v8208_v8 = vld [vmem:[#allocation3 + $0x250] ss:$0 sm:$0xff] }
0x2545   :  { %3623 = vadd.xlane.f32.xlu0 %v3622_v54 }
0x255b   :  { %9959 = vrot.lane.b32.xlu0 %v10847_v56, %s10449_s7 }
0x25ce   :  { %v3627_v51 = vpop.xlane.xlu0 %3626 }
0x25cf   :  { %10202 = vrcp.f32 %v3627_v51  ;;  %v2785_v51 = vadd.f32 %v8208_v8, %v10835_v32 }
0x25d2   :  { %v3624_v52 = vpop.xlane.xlu0 %3623 }
0x25d3   :  { %10204 = vrcp.f32 %v3624_v52 }
0x25d6   :  { %v9960_v5 = vpop.permute.xlu0 %9959 }
0x25d7   :  { %v9962_v53 = vunpack.i.h.bf16 %v9960_v5  ;;  %v9961_v3 = vunpack.i.l.bf16 %v9960_v5  ;;  %v2793_v5 = vadd.f32 %v2785_v51, %v10787_v48  ;;  %v8246_v48 = vld [vmem:[#allocation3 + $0x2b0] ss:$0 sm:$0xff] }
0x25d9   :  { %v9567_v19 = vpack.c.bf16 %v9962_v53, %v9961_v3  ;;  %v10203_v10 = vpop.eup %10202  ;;  %v2797_v53 = vsel %vm138_vm3, %v2793_v5, 0.0 }
0x25da   :  { %v3631_v63 = vmul.f32 %v10203_v10, %v10199_v49 }
0x25db   :  { %9569 = vmatprep.subr.msk.bf16.mxu1 %vm10531_vm9, %v9567_v19 }
0x25dd   :  { %v10205_v55 = vpop.eup %10204 }
0x25de   :  { %v3630_v58 = vmul.f32 %v10205_v55, %v10201_v50  ;;  %v2790_v50 = vadd.f32 %v10833_v31, %v8208_v8 }
0x25e0   :  { %9006 = vmatprep.mubr.msk.f32.mxu1 %vm50_vm0, %v3630_v58  ;;  %v2794_v54 = vadd.f32 %v2790_v50, %v10784_v47 }
0x25e1   :  { %9007 = vmatmul.mubr.msk.f32.vlgmr.msra.gmra.mrb[32].mxu1 %vm50_vm0, %v3631_v63 }
0x25e2   :  { %9572 = vmatpush3.bf16.xpose.msk.msra.mxu1 %vm10531_vm9, %v9567_v19  ;;  %9013 = vmatprep.mubr.msk.f32.mxu1 %vm293_vm8, %v3730_v0  ;;  %v2800_v52 = vsel %vm138_vm3, %v2794_v54, 0.0 }
0x25e9   :  { %9014 = vmatmul.mubr.msk.f32.vlgmr.msra.gmra.mrb[34].mxu1 %vm293_vm8, %v3732_v1 }
0x26b4   :  { %v9008_v2 = vpop.f32.mrb[32].mxu1 }
0x26b5   :  { %v3710_v7 = vpop.f32.mrb[33].mxu1 }
0x26bc   :  { %v9015_v12 = vpop.f32.mrb[34].mxu1 }
0x26bd   :  { %v3821_v13 = vmul.f32 0.35355338, %v9015_v12  ;;  %v3811_v15 = vpop.f32.mrb[35].mxu1 }
0x26be   :  { %v3820_v16 = vmul.f32 0.35355338, %v3811_v15 }
0x26bf   :  { %v3823_v17 = vadd.f32 %v3821_v13, %v10859_v14 }
0x26c0   :  { %v3822_v18 = vadd.f32 %v3820_v16, %v10857_v4 }
0x26c1   :  { %v3827_v59 = vsel %vm50_vm0, %v3823_v17, -inf }
0x26c2   :  { %3828 = vmax.xlane.f32.xlu1 %v3827_v59  ;;  %v3824_v21 = vsel %vm50_vm0, %v3822_v18, -inf }
0x26c3   :  { %3825 = vmax.xlane.f32.xlu0 %v3824_v21  ;;  %v4176_v21 = vld [vmem:[#allocation3 + $0x2f0] sm:$0xff] }
0x26d3   :  { %9964 = vrot.lane.b32.xlu1 %v10847_v56, %s10450_s8 }
0x26d7   :  { %3509 = vrot.lane.b32.xlu1 %v10907_v6, %s10437_s20 }
0x26db   :  { %3721 = vrot.lane.b32.xlu1 %v3710_v7, %s10451_s9 }
0x274f   :  { %v3829_v62 = vpop.xlane.xlu1 %3828 }
0x2750   :  { %v3831_v23 = vsub.f32 %v3823_v17, %v3829_v62  ;;  %v3826_v24 = vpop.xlane.xlu0 %3825  ;;  %v4177_v62 = vld [vmem:[#allocation3 + $0x2f8] sm:$0xff] }
0x2751   :  { %v3830_v14 = vsub.f32 %v3822_v18, %v3826_v24  ;;  %v9593_v24 = vpack.c.bf16 %v4177_v62, %v4176_v21 }
0x2752   :  { %v3834_v26 = vmul.f32 1.442695, %v3831_v23  ;;  %v4178_v23 = vld [vmem:[#allocation3 + $0x300] sm:$0xff] }
0x2753   :  { %v3832_v4 = vmul.f32 1.442695, %v3830_v14  ;;  %v9965_v27 = vpop.permute.xlu1 %9964  ;;  %v4179_v14 = vld [vmem:[#allocation3 + $0x308] sm:$0xff] }
0x2754   :  { %v9967_v28 = vunpack.i.h.bf16 %v9965_v27  ;;  %v9966_v29 = vunpack.i.l.bf16 %v9965_v27 }
0x2755   :  { %10206 = vpow2.f32 %v3832_v4 }
0x2756   :  { %v9573_v30 = vpack.c.bf16 %v9967_v28, %v9966_v29  ;;  %10208 = vpow2.f32 %v3834_v26  ;;  %v9597_v26 = vpack.c.bf16 %v4179_v14, %v4178_v23 }
0x2757   :  { %v3510_v34 = vpop.permute.xlu1 %3509 }
0x2758   :  { %3514 = vst.msk [vmem:[#allocation2 + $0x8] sm:$0xff] %vm704_vm10, %v3510_v34  ;;  %9574 = vmatprep.subr.bf16.mxu0 %v9573_v30 }
0x2759   :  { %9576 = vmatpush3.bf16.msra.mxu0 %v9573_v30 }
0x275a   :  { %9578 = vmatprep.subr.bf16.mxu0 %v9577_v43 }
0x275b   :  { %v3722_v40 = vpop.permute.xlu1 %3721 }
0x275f   :  { %v10207_v56 = vpop.eup %10206 }
0x2760   :  { %v3836_v6 = vsel %vm50_vm0, %v10207_v56, 0.0  ;;  %v10209_v35 = vpop.eup %10208 }
0x2761   :  { %3837 = vadd.xlane.f32.xlu0 %v3836_v6  ;;  %v3839_v36 = vsel %vm50_vm0, %v10209_v35, 0.0 }
0x2765   :  { %3840 = vadd.xlane.f32.xlu0 %v3839_v36 }
0x277b   :  { %3507 = vrot.lane.b32.xlu0 %v10909_v60, %s10437_s20 }
0x277f   :  { %3723 = vrot.lane.b32.xlu0 %v9008_v2, %s10451_s9 }
0x27ee   :  { %v3838_v37 = vpop.xlane.xlu0 %3837 }
0x27ef   :  { %10210 = vrcp.f32 %v3838_v37 }
0x27f2   :  { %v3841_v38 = vpop.xlane.xlu0 %3840 }
0x27f3   :  { %10212 = vrcp.f32 %v3841_v38 }
0x27f6   :  { %v3508_v39 = vpop.permute.xlu0 %3507 }
0x27f7   :  { %3513 = vst.msk [vmem:[#allocation2] sm:$0xff] %vm704_vm10, %v3508_v39 }
0x27f8   :  { %3727 = vst.msk [vmem:[#allocation2] sm:$0xff] %vm919_vm11, %v3722_v40 }
0x27f9   :  { %v10211_v22 = vpop.eup %10210 }
0x27fa   :  { %v3724_v41 = vpop.permute.xlu0 %3723  ;;  %v3844_v25 = vmul.f32 %v10211_v22, %v10207_v56 }
0x27fb   :  { %3728 = vst.msk [vmem:[#allocation2 + $0x8] sm:$0xff] %vm919_vm11, %v3724_v41 }
0x27fc   :  { %9020 = vmatprep.mubr.msk.f32.mxu0 %vm50_vm0, %v3844_v25 }
0x27fd   :  { %v10213_v60 = vpop.eup %10212 }
0x27fe   :  { %v3845_v42 = vmul.f32 %v10213_v60, %v10209_v35 }
0x2800   :  { %9021 = vmatmul.mubr.msk.f32.vlgmr.msra.gmra.mrb[32].mxu0 %vm50_vm0, %v3845_v42 }
0x2801   :  { %9580 = vmatpush3.bf16.msra.mxu0 %v9577_v43 }
0x2802   :  { %9582 = vmatprep.subr.bf16.mxu0 %v9581_v45 }
0x2805   :  { %9584 = vmatpush3.bf16.msra.mxu0 %v9581_v45 }
0x2806   :  { %9594 = vmatprep.subr.bf16.mxu0 %v9593_v24 }
0x28d3   :  { %v9022_v46 = vpop.f32.mrb[32].mxu0 }
0x28d4   :  { %3937 = vrot.lane.b32.xlu0 %v9022_v46, %s10452_s10  ;;  %v3924_v49 = vpop.f32.mrb[33].mxu0 }
0x28d5   :  { %3935 = vrot.lane.b32.xlu1 %v3924_v49, %s10452_s10  ;;  %v8211_v49 = vld [vmem:[#allocation3 + $0x50] ss:$0 sm:$0xff] }
0x28f3   :  { %2801 = vadd.xlane.f32.xlu0 %v2800_v52  ;;  %v8212_v52 = vld [vmem:[#allocation3 + $0x58] ss:$0 sm:$0xff] }
0x28f9   :  { %2798 = vadd.xlane.f32.xlu1 %v2797_v53 }
0x2946   :  { %v3938_v3 = vpop.permute.xlu0 %3937 }
0x2947   :  { %3942 = vst.msk [vmem:[#allocation2 + $0x8] sm:$0xff] %vm1134_vm12, %v3938_v3  ;;  %v3936_v19 = vpop.permute.xlu1 %3935 }
0x2948   :  { %3941 = vst.msk [vmem:[#allocation2] sm:$0xff] %vm1134_vm12, %v3936_v19 }
0x294e   :  { %v3944_v47 = vld [vmem:[#allocation2 + $0x8] sm:$0xff] }
0x294f   :  { %v3943_v10 = vld [vmem:[#allocation2] sm:$0xff] }
0x2950   :  { %9031 = vmatprep.mubr.msk.f32.mxu0 %vm138_vm3, %v3943_v10  ;;  %v4086_v10 = vld [vmem:[#allocation3 + $0x2c8] sm:$0xff] }
0x2951   :  { %9032 = vmatmul.mubr.msk.f32.vlgmr.msra.gmra.mrb[34].mxu0 %vm138_vm3, %v3944_v47  ;;  %v4087_v47 = vld [vmem:[#allocation3 + $0x2d0] sm:$0xff] }
0x2952   :  { %9596 = vmatpush3.bf16.msra.mxu0 %v9593_v24  ;;  %v8249_v24 = vld [vmem:[#allocation3 + $0x2b8] ss:$0 sm:$0xff] }
0x2953   :  { %9598 = vmatprep.subr.bf16.mxu0 %v9597_v26 }
0x2956   :  { %9600 = vmatpush3.bf16.msra.mxu0 %v9597_v26 }
0x2980   :  { %v2802_v31 = vpop.xlane.xlu0 %2801 }
0x2981   :  { %v2804_v55 = vmul.f32 0.03125, %v2802_v31  ;;  %v4088_v31 = vld [vmem:[#allocation3 + $0x2d8] sm:$0xff] }
0x2983   :  { %v10965_v0 = vsub.f32 %v2794_v54, %v2804_v55  ;;  %v4089_v55 = vld [vmem:[#allocation3 + $0x2e0] sm:$0xff] }
0x2985   :  { %v2808_v17 = vmul.f32 %v10965_v0, %v10965_v0  ;;  %v2840_v8 = vmul.f32 %v8211_v49, %v10965_v0 }
0x2986   :  { %v2799_v32 = vpop.xlane.xlu1 %2798 }
0x2987   :  { %v2803_v58 = vmul.f32 0.03125, %v2799_v32  ;;  %v9585_v32 = vpack.c.bf16 %v4087_v47, %v4086_v10 }
0x2989   :  { %v10967_v7 = vsub.f32 %v2793_v5, %v2803_v58  ;;  %v9589_v58 = vpack.c.bf16 %v4089_v55, %v4088_v31  ;;  %9586 = vmatprep.subr.bf16.mxu1 %v9585_v32 }
0x298a   :  { %9588 = vmatpush3.bf16.msra.mxu1 %v9585_v32 }
0x298b   :  { %v2807_v59 = vmul.f32 %v10967_v7, %v10967_v7  ;;  %v2839_v54 = vmul.f32 %v8211_v49, %v10967_v7  ;;  %9590 = vmatprep.subr.bf16.mxu1 %v9589_v58 }
0x298e   :  { %9592 = vmatpush3.bf16.msra.mxu1 %v9589_v58 }
0x2a24   :  { %v9033_v63 = vpop.f32.mrb[34].mxu0 }
0x2a25   :  { %v4027_v1 = vadd.f32 %v9033_v63, %v8246_v48  ;;  %v4021_v2 = vpop.f32.mrb[35].mxu0 }
0x2a26   :  { %v4022_v12 = vadd.f32 %v8246_v48, %v4021_v2 }
0x2a27   :  { %v10970_v13 = vadd.f32 %v4027_v1, %v10820_v20  ;;  %v2812_v20 = vsel %vm138_vm3, %v2808_v17, 0.0 }
0x2a28   :  { %v10973_v15 = vadd.f32 %v4022_v12, %v10823_v9  ;;  %v2809_v9 = vsel %vm138_vm3, %v2807_v59, 0.0 }
0x2a29   :  { %v4037_v16 = vsel %vm138_vm3, %v10970_v13, 0.0 }
0x2a2a   :  { %4038 = vadd.xlane.f32.xlu1 %v4037_v16  ;;  %v4034_v18 = vsel %vm138_vm3, %v10973_v15, 0.0 }
0x2a2b   :  { %4035 = vadd.xlane.f32.xlu0 %v4034_v18 }
0x2a2e   :  { %2813 = vadd.xlane.f32.xlu1 %v2812_v20 }
0x2a2f   :  { %2810 = vadd.xlane.f32.xlu0 %v2809_v9 }
0x2ab7   :  { %v4039_v4 = vpop.xlane.xlu1 %4038 }
0x2ab8   :  { %v4041_v27 = vmul.f32 0.03125, %v4039_v4  ;;  %v4036_v28 = vpop.xlane.xlu0 %4035 }
0x2ab9   :  { %v4040_v29 = vmul.f32 0.03125, %v4036_v28  ;;  %v8250_v28 = vld [vmem:[#allocation3 + $0x2c0] ss:$0 sm:$0xff] }
0x2aba   :  { %v10986_v30 = vsub.f32 %v10970_v13, %v4041_v27 }
0x2abb   :  { %v10989_v34 = vsub.f32 %v10973_v15, %v4040_v29  ;;  %v2814_v56 = vpop.xlane.xlu1 %2813 }
0x2abc   :  { %v2816_v6 = vmul.f32 0.032258064, %v2814_v56  ;;  %v2811_v35 = vpop.xlane.xlu0 %2810  ;;  %v4045_v36 = vmul.f32 %v10986_v30, %v10986_v30  ;;  %v4077_v14 = vmul.f32 %v8249_v24, %v10986_v30 }
0x2abd   :  { %v2815_v37 = vmul.f32 0.032258064, %v2811_v35  ;;  %v4044_v38 = vmul.f32 %v10989_v34, %v10989_v34  ;;  %v4076_v4 = vmul.f32 %v8249_v24, %v10989_v34 }
0x2abe   :  { %10214 = vrsqrt.f32 %v2816_v6  ;;  %v4049_v39 = vsel %vm138_vm3, %v4045_v36, 0.0  ;;  %vm2826_vm15 = vcmp.eq.f32.partialorder %v2816_v6, inf  ;;  %v2829_v60 = vand.u32 2147483648, %v2816_v6  ;;  %v8254_v36 = vld [vmem:[#allocation3 + $0x310] ss:$0 sm:$0xff] }
0x2abf   :  { %10216 = vrsqrt.f32 %v2815_v37  ;;  %v4046_v40 = vsel %vm138_vm3, %v4044_v38, 0.0  ;;  %4050 = vadd.xlane.f32.xlu1 %v4049_v39  ;;  %vm2828_vm1 = vcmp.eq.f32.partialorder %v2816_v6, 0.0  ;;  %vm2819_vm4 = vcmp.eq.f32.partialorder %v2815_v37, inf }
0x2ac0   :  { %4047 = vadd.xlane.f32.xlu0 %v4046_v40  ;;  %v2822_v61 = vand.u32 2147483648, %v2815_v37  ;;  %vm2821_vm5 = vcmp.eq.f32.partialorder %v2815_v37, 0.0 }
0x2ac8   :  { %v10215_v22 = vpop.eup %10214 }
0x2ac9   :  { %v10217_v41 = vpop.eup %10216  ;;  %v2825_v25 = vmul.f32 %v10215_v22, %v2816_v6 }
0x2aca   :  { %v2818_v42 = vmul.f32 %v10217_v41, %v2815_v37 }
0x2acb   :  { %v2827_v33 = vsel %vm2826_vm15, %v2816_v6, %v2825_v25 }
0x2acc   :  { %v2830_v43 = vsel %vm2828_vm1, %v2829_v60, %v2827_v33  ;;  %v2820_v57 = vsel %vm2819_vm4, %v2815_v37, %v2818_v42  ;;  %v8251_v42 = vld [vmem:[#allocation3 + $0x2e8] ss:$0 sm:$0xff] }
0x2acd   :  { %v2832_v44 = vadd.f32 1e-06, %v2830_v43  ;;  %v2823_v45 = vsel %vm2821_vm5, %v2822_v61, %v2820_v57 }
0x2ace   :  { %v2831_v46 = vadd.f32 1e-06, %v2823_v45 }
0x2acf   :  { %10218 = vrcp.f32 %v2832_v44 }
0x2ad0   :  { %10220 = vrcp.f32 %v2831_v46 }
0x2ad9   :  { %v10219_v50 = vpop.eup %10218 }
0x2ada   :  { %v10221_v51 = vpop.eup %10220  ;;  %v2842_v5 = vmul.f32 %v10219_v50, %v2840_v8 }
0x2adb   :  { %v2841_v53 = vmul.f32 %v10221_v51, %v2839_v54  ;;  %v11037_v54 = vld [vmem:[#allocation3 + $0x18] sm:$0xff] }
0x2adc   :  { %v11001_v19 = vadd.f32 %v8212_v52, %v2842_v5 }
0x2add   :  { %v10999_v3 = vadd.f32 %v8212_v52, %v2841_v53  ;;  %v11040_v52 = vld [vmem:[#allocation3 + $0x10] sm:$0xff] }
0x2adf   :  { %9053 = vmatprep.mubr.msk.f32.mxu0 %vm138_vm3, %v10999_v3 }
0x2ae0   :  { %9054 = vmatmul.mubr.msk.f32.vlgmr.msra.gmra.mrb[36].mxu0 %vm138_vm3, %v11001_v19 }
0x2b4c   :  { %v4051_v48 = vpop.xlane.xlu1 %4050 }
0x2b4d   :  { %v4048_v63 = vpop.xlane.xlu0 %4047  ;;  %v4053_v0 = vmul.f32 0.032258064, %v4051_v48 }
0x2b4e   :  { %v4052_v1 = vmul.f32 0.032258064, %v4048_v63 }
0x2b4f   :  { %10222 = vrsqrt.f32 %v4053_v0  ;;  %vm4063_vm6 = vcmp.eq.f32.partialorder %v4053_v0, inf  ;;  %v4066_v16 = vand.u32 2147483648, %v4053_v0  ;;  %vm4065_vm7 = vcmp.eq.f32.partialorder %v4053_v0, 0.0 }
0x2b50   :  { %10224 = vrsqrt.f32 %v4052_v1  ;;  %vm4056_vm13 = vcmp.eq.f32.partialorder %v4052_v1, inf  ;;  %v4059_v59 = vand.u32 2147483648, %v4052_v1  ;;  %vm4058_vm14 = vcmp.eq.f32.partialorder %v4052_v1, 0.0 }
0x2b59   :  { %v10223_v2 = vpop.eup %10222 }
0x2b5a   :  { %v10225_v7 = vpop.eup %10224  ;;  %v4062_v12 = vmul.f32 %v10223_v2, %v4053_v0 }
0x2b5b   :  { %v4055_v17 = vmul.f32 %v10225_v7, %v4052_v1 }
0x2b5c   :  { %v4064_v18 = vsel %vm4063_vm6, %v4053_v0, %v4062_v12 }
0x2b5d   :  { %v4067_v20 = vsel %vm4065_vm7, %v4066_v16, %v4064_v18  ;;  %v4057_v9 = vsel %vm4056_vm13, %v4052_v1, %v4055_v17 }
0x2b5e   :  { %v4069_v21 = vadd.f32 1e-06, %v4067_v20  ;;  %v4060_v62 = vsel %vm4058_vm14, %v4059_v59, %v4057_v9 }
0x2b5f   :  { %v4068_v23 = vadd.f32 1e-06, %v4060_v62 }
0x2b60   :  { %10226 = vrcp.f32 %v4069_v21 }
0x2b61   :  { %10228 = vrcp.f32 %v4068_v23 }
0x2b6a   :  { %v10227_v26 = vpop.eup %10226 }
0x2b6b   :  { %v10229_v27 = vpop.eup %10228  ;;  %v4079_v29 = vmul.f32 %v10227_v26, %v4077_v14 }
0x2b6c   :  { %v4078_v56 = vmul.f32 %v10229_v27, %v4076_v4 }
0x2b6d   :  { %v4085_v35 = vadd.f32 %v8250_v28, %v4079_v29 }
0x2b6e   :  { %v4084_v6 = vadd.f32 %v8250_v28, %v4078_v56 }
0x2b70   :  { %9042 = vmatprep.mubr.msk.f32.mxu1 %vm138_vm3, %v4084_v6 }
0x2b71   :  { %9043 = vmatmul.mubr.msk.f32.vlgmr.msra.gmra.mrb[36].mxu1 %vm138_vm3, %v4085_v35 }
0x2bb3   :  { %v9055_v37 = vpop.f32.mrb[36].mxu0 }
0x2bb4   :  { %v4263_v38 = vadd.f32 %v9055_v37, %v8254_v36  ;;  %v4257_v39 = vpop.f32.mrb[37].mxu0 }
0x2bb5   :  { %v4258_v40 = vadd.f32 %v8254_v36, %v4257_v39 }
0x2bb7   :  { %v11011_v22 = vpack.i.bf16 %v4263_v38, %v4258_v40  ;;  %v9601_v30 = vpack.c.bf16 %v4263_v38, %v4258_v40 }
0x2bb9   :  { %9969 = vrot.lane.b32.xlu0 %v11011_v22, %s10442_s28  ;;  %9603 = vmatprep.subr.msk.bf16.mxu1 %vm10531_vm9, %v9601_v30 }
0x2bba   :  { %9606 = vmatpush3.bf16.xpose.msk.msra.mxu1 %vm10531_vm9, %v9601_v30 }
0x2c2b   :  { %v9970_v34 = vpop.permute.xlu0 %9969 }
0x2c2c   :  { %v9972_v41 = vunpack.i.h.bf16 %v9970_v34  ;;  %v9971_v25 = vunpack.i.l.bf16 %v9970_v34 }
0x2c2e   :  { %v9611_v60 = vpack.c.bf16 %v9972_v41, %v9971_v25 }
0x2c30   :  { %9613 = vmatprep.subr.msk.bf16.mxu1 %vm10531_vm9, %v9611_v60 }
0x2c44   :  { %v9044_v33 = vpop.f32.mrb[36].mxu1 }
0x2c45   :  { %v4167_v61 = vpop.f32.mrb[37].mxu1  ;;  %v11023_v57 = vadd.f32 %v9044_v33, %v8251_v42 }
0x2c46   :  { %v11021_v43 = vadd.f32 %v8251_v42, %v4167_v61 }
0x2c48   :  { %4473 = vrot.lane.b32.xlu1 %v11021_v43, %s10442_s28  ;;  %9060 = vmatprep.mubr.msk.f32.mxu1 %vm293_vm8, %v11021_v43 }
0x2c49   :  { %9061 = vmatmul.mubr.msk.f32.vlgmr.msra.gmra.mrb[38].mxu1 %vm293_vm8, %v11023_v57 }
0x2c4a   :  { %9616 = vmatpush3.bf16.xpose.msk.msra.mxu1 %vm10531_vm9, %v9611_v60 }
0x2c4c   :  { %4475 = vrot.lane.b32.xlu1 %v11023_v57, %s10442_s28 }
0x2cba   :  { %v4474_v44 = vpop.permute.xlu1 %4473 }
0x2cbb   :  { %9074 = vmatprep.mubr.msk.f32.mxu1 %vm293_vm8, %v4474_v44 }
0x2cbe   :  { %v4476_v45 = vpop.permute.xlu1 %4475 }
0x2cbf   :  { %9075 = vmatmul.mubr.msk.f32.vlgmr.msra.gmra.mrb[40].mxu1 %vm293_vm8, %v4476_v45 }
0x2d1c   :  { %v9062_v46 = vpop.f32.mrb[38].mxu1 }
0x2d1d   :  { %v4359_v49 = vmul.f32 0.35355338, %v9062_v46  ;;  %v4349_v8 = vpop.f32.mrb[39].mxu1 }
0x2d1e   :  { %v4358_v50 = vmul.f32 0.35355338, %v4349_v8 }
0x2d1f   :  { %v4361_v51 = vadd.f32 %v11037_v54, %v4359_v49 }
0x2d20   :  { %v4360_v5 = vadd.f32 %v11040_v52, %v4358_v50 }
0x2d21   :  { %v4365_v53 = vsel %vm50_vm0, %v4361_v51, -inf }
0x2d22   :  { %4366 = vmax.xlane.f32.xlu1 %v4365_v53  ;;  %v4362_v10 = vsel %vm50_vm0, %v4360_v5, -inf }
0x2d23   :  { %4363 = vmax.xlane.f32.xlu0 %v4362_v10 }
0x2d33   :  { %9974 = vrot.lane.b32.xlu1 %v11011_v22, %s10440_s1 }
0x2d92   :  { %v9076_v47 = vpop.f32.mrb[40].mxu1 }
0x2d93   :  { %v4555_v31 = vpop.f32.mrb[41].mxu1  ;;  %v4565_v32 = vmul.f32 0.35355338, %v9076_v47 }
0x2d94   :  { %v4564_v55 = vmul.f32 0.35355338, %v4555_v31 }
0x2d95   :  { %v4567_v48 = vadd.f32 %v11037_v54, %v4565_v32 }
0x2d96   :  { %v4566_v58 = vadd.f32 %v11040_v52, %v4564_v55 }
0x2d97   :  { %v4571_v0 = vsel %vm50_vm0, %v4567_v48, -inf }
0x2d98   :  { %v4568_v63 = vsel %vm50_vm0, %v4566_v58, -inf }
0x2d99   :  { %4569 = vmax.xlane.f32.xlu0 %v4568_v63 }
0x2d9d   :  { %4572 = vmax.xlane.f32.xlu0 %v4571_v0 }
0x2daf   :  { %v4367_v1 = vpop.xlane.xlu1 %4366 }
0x2db0   :  { %v4369_v2 = vsub.f32 %v4361_v51, %v4367_v1  ;;  %v4364_v7 = vpop.xlane.xlu0 %4363 }
0x2db1   :  { %v4368_v12 = vsub.f32 %v4360_v5, %v4364_v7 }
0x2db2   :  { %v4372_v16 = vmul.f32 1.442695, %v4369_v2 }
0x2db3   :  { %v4370_v17 = vmul.f32 1.442695, %v4368_v12  ;;  %v9975_v18 = vpop.permute.xlu1 %9974 }
0x2db4   :  { %10230 = vpow2.f32 %v4372_v16  ;;  %v9977_v59 = vunpack.i.h.bf16 %v9975_v18  ;;  %v9976_v20 = vunpack.i.l.bf16 %v9975_v18 }
0x2db5   :  { %10232 = vpow2.f32 %v4370_v17 }
0x2db6   :  { %v9607_v9 = vpack.c.bf16 %v9977_v59, %v9976_v20 }
0x2db8   :  { %9608 = vmatprep.subr.bf16.mxu0 %v9607_v9 }
0x2db9   :  { %9610 = vmatpush3.bf16.msra.mxu0 %v9607_v9 }
0x2dbe   :  { %v10231_v21 = vpop.eup %10230 }
0x2dbf   :  { %v10233_v62 = vpop.eup %10232  ;;  %v4377_v23 = vsel %vm50_vm0, %v10231_v21, 0.0 }
0x2dc0   :  { %4378 = vadd.xlane.f32.xlu0 %v4377_v23  ;;  %v4374_v24 = vsel %vm50_vm0, %v10233_v62, 0.0 }
0x2dc1   :  { %4375 = vadd.xlane.f32.xlu1 %v4374_v24 }
0x2dd2   :  { %9984 = vrot.lane.b32.xlu1 %v11011_v22, %s10444_s30 }
0x2e26   :  { %v4570_v14 = vpop.xlane.xlu0 %4569 }
0x2e27   :  { %v4574_v26 = vsub.f32 %v4566_v58, %v4570_v14 }
0x2e29   :  { %v4576_v4 = vmul.f32 1.442695, %v4574_v26 }
0x2e2a   :  { %v4573_v27 = vpop.xlane.xlu0 %4572 }
0x2e2b   :  { %10234 = vpow2.f32 %v4576_v4  ;;  %v4575_v28 = vsub.f32 %v4567_v48, %v4573_v27 }
0x2e2d   :  { %v4578_v29 = vmul.f32 1.442695, %v4575_v28 }
0x2e2f   :  { %10236 = vpow2.f32 %v4578_v29 }
0x2e35   :  { %v10235_v56 = vpop.eup %10234 }
0x2e36   :  { %v4580_v6 = vsel %vm50_vm0, %v10235_v56, 0.0 }
0x2e37   :  { %4581 = vadd.xlane.f32.xlu1 %v4580_v6 }
0x2e39   :  { %v10237_v35 = vpop.eup %10236 }
0x2e3a   :  { %v4583_v36 = vsel %vm50_vm0, %v10237_v35, 0.0 }
0x2e3b   :  { %4584 = vadd.xlane.f32.xlu0 %v4583_v36 }
0x2e48   :  { %4687 = vrot.lane.b32.xlu1 %v11021_v43, %s10444_s30 }
0x2e4d   :  { %v4379_v37 = vpop.xlane.xlu0 %4378 }
0x2e4e   :  { %10238 = vrcp.f32 %v4379_v37  ;;  %v4376_v38 = vpop.xlane.xlu1 %4375 }
0x2e4f   :  { %10240 = vrcp.f32 %v4376_v38 }
0x2e51   :  { %9979 = vrot.lane.b32.xlu0 %v11011_v22, %s10441_s27 }
0x2e52   :  { %v9985_v41 = vpop.permute.xlu1 %9984 }
0x2e53   :  { %v9987_v33 = vunpack.i.h.bf16 %v9985_v41  ;;  %v9986_v61 = vunpack.i.l.bf16 %v9985_v41 }
0x2e55   :  { %4689 = vrot.lane.b32.xlu0 %v11023_v57, %s10444_s30  ;;  %v9621_v50 = vpack.c.bf16 %v9987_v33, %v9986_v61 }
0x2e58   :  { %v10239_v39 = vpop.eup %10238 }
0x2e59   :  { %v10241_v40 = vpop.eup %10240  ;;  %v4383_v34 = vmul.f32 %v10239_v39, %v10231_v21 }
0x2e5a   :  { %v4382_v30 = vmul.f32 %v10241_v40, %v10233_v62 }
0x2e5c   :  { %9067 = vmatprep.mubr.msk.f32.mxu0 %vm50_vm0, %v4382_v30 }
0x2e5d   :  { %9068 = vmatmul.mubr.msk.f32.vlgmr.msra.gmra.mrb[38].mxu0 %vm50_vm0, %v4383_v34 }
0x2ec4   :  { %v4582_v25 = vpop.xlane.xlu1 %4581 }
0x2ec5   :  { %10242 = vrcp.f32 %v4582_v25 }
0x2ec8   :  { %v4585_v60 = vpop.xlane.xlu0 %4584  ;;  %v4688_v53 = vpop.permute.xlu1 %4687 }
0x2ec9   :  { %10244 = vrcp.f32 %v4585_v60 }
0x2ecc   :  { %v9980_v42 = vpop.permute.xlu0 %9979 }
0x2ecd   :  { %v9982_v44 = vunpack.i.h.bf16 %v9980_v42  ;;  %v9981_v45 = vunpack.i.l.bf16 %v9980_v42 }
0x2ecf   :  { %v10243_v46 = vpop.eup %10242  ;;  %v9617_v49 = vpack.c.bf16 %v9982_v44, %v9981_v45 }
0x2ed0   :  { %v4588_v8 = vmul.f32 %v10243_v46, %v10235_v56  ;;  %v4690_v10 = vpop.permute.xlu0 %4689 }
0x2ed1   :  { %9618 = vmatprep.subr.bf16.mxu0 %v9617_v49 }
0x2ed2   :  { %9620 = vmatpush3.bf16.msra.mxu0 %v9617_v49  ;;  %9081 = vmatprep.mubr.msk.f32.mxu0 %vm50_vm0, %v4588_v8 }
0x2ed3   :  { %v10245_v51 = vpop.eup %10244  ;;  %9623 = vmatprep.subr.msk.bf16.mxu0 %vm10531_vm9, %v9621_v50 }
0x2ed4   :  { %v4589_v5 = vmul.f32 %v10245_v51, %v10237_v35 }
0x2ed6   :  { %9082 = vmatmul.mubr.msk.f32.vlgmr.msra.gmra.mrb[40].mxu0 %vm50_vm0, %v4589_v5 }
0x2ed7   :  { %9088 = vmatprep.mubr.msk.f32.mxu0 %vm293_vm8, %v4688_v53 }
0x2edb   :  { %9626 = vmatpush3.bf16.xpose.msk.msra.mxu0 %vm10531_vm9, %v9621_v50 }
0x2ee2   :  { %9089 = vmatmul.mubr.msk.f32.vlgmr.msra.gmra.mrb[42].mxu0 %vm293_vm8, %v4690_v10 }
0x2f30   :  { %v9069_v47 = vpop.f32.mrb[38].mxu0 }
0x2f31   :  { %4472 = vst.msk [vmem:[#allocation2 + $0x8] sm:$0xff] %vm293_vm8, %v9069_v47  ;;  %v4462_v31 = vpop.f32.mrb[39].mxu0 }
0x2f32   :  { %4471 = vst.msk [vmem:[#allocation2] sm:$0xff] %vm293_vm8, %v4462_v31 }
0x2fa9   :  { %v11075_v32 = vpop.f32.mrb[40].mxu0 }
0x2faa   :  { %v11077_v55 = vpop.f32.mrb[41].mxu0 }
0x2fb5   :  { %v9090_v58 = vpop.f32.mrb[42].mxu0 }
0x2fb6   :  { %v4779_v48 = vmul.f32 0.35355338, %v9090_v58  ;;  %v4769_v63 = vpop.f32.mrb[43].mxu0 }
0x2fb7   :  { %v4778_v0 = vmul.f32 0.35355338, %v4769_v63 }
0x2fb8   :  { %v4781_v1 = vadd.f32 %v11037_v54, %v4779_v48 }
0x2fb9   :  { %v4780_v2 = vadd.f32 %v11040_v52, %v4778_v0 }
0x2fba   :  { %v4785_v7 = vsel %vm50_vm0, %v4781_v1, -inf }
0x2fbb   :  { %4786 = vmax.xlane.f32.xlu0 %v4785_v7  ;;  %v4782_v12 = vsel %vm50_vm0, %v4780_v2, -inf }
0x2fbc   :  { %4783 = vmax.xlane.f32.xlu1 %v4782_v12 }
0x3048   :  { %v4787_v16 = vpop.xlane.xlu0 %4786 }
0x3049   :  { %v4789_v17 = vsub.f32 %v4781_v1, %v4787_v16  ;;  %v4784_v18 = vpop.xlane.xlu1 %4783 }
0x304a   :  { %v4788_v59 = vsub.f32 %v4780_v2, %v4784_v18  ;;  %v4267_v18 = vld [vmem:[#allocation3 + $0x320] sm:$0xff] }
0x304b   :  { %v4792_v20 = vmul.f32 1.442695, %v4789_v17  ;;  %v4266_v17 = vld [vmem:[#allocation3 + $0x318] sm:$0xff] }
0x304c   :  { %v4790_v9 = vmul.f32 1.442695, %v4788_v59  ;;  %v9641_v59 = vpack.c.bf16 %v4267_v18, %v4266_v17  ;;  %v8284_v18 = vld [vmem:[#allocation3 + $0x340] ss:$0 sm:$0xff] }
0x304d   :  { %10246 = vpow2.f32 %v4792_v20  ;;  %v4268_v20 = vld [vmem:[#allocation3 + $0x328] sm:$0xff] }
0x304e   :  { %10248 = vpow2.f32 %v4790_v9  ;;  %v4269_v9 = vld [vmem:[#allocation3 + $0x330] sm:$0xff] }
0x3057   :  { %v10247_v21 = vpop.eup %10246 }
0x3058   :  { %v10249_v62 = vpop.eup %10248  ;;  %v4797_v23 = vsel %vm50_vm0, %v10247_v21, 0.0 }
0x3059   :  { %4798 = vadd.xlane.f32.xlu1 %v4797_v23  ;;  %v4794_v24 = vsel %vm50_vm0, %v10249_v62, 0.0 }
0x305a   :  { %4795 = vadd.xlane.f32.xlu0 %v4794_v24 }
0x306a   :  { %9994 = vrot.lane.b32.xlu1 %v11011_v22, %s10448_s6 }
0x306e   :  { %4901 = vrot.lane.b32.xlu1 %v11021_v43, %s10448_s6 }
0x3070   :  { %9989 = vrot.lane.b32.xlu0 %v11011_v22, %s10446_s4 }
0x3074   :  { %4903 = vrot.lane.b32.xlu0 %v11023_v57, %s10448_s6 }
0x30e6   :  { %v4799_v14 = vpop.xlane.xlu1 %4798 }
0x30e7   :  { %10250 = vrcp.f32 %v4799_v14  ;;  %v4796_v26 = vpop.xlane.xlu0 %4795 }
0x30e8   :  { %10252 = vrcp.f32 %v4796_v26 }
0x30ea   :  { %v9995_v4 = vpop.permute.xlu1 %9994 }
0x30eb   :  { %v9990_v27 = vpop.permute.xlu0 %9989  ;;  %v9997_v28 = vunpack.i.h.bf16 %v9995_v4  ;;  %v9996_v29 = vunpack.i.l.bf16 %v9995_v4 }
0x30ec   :  { %v9992_v56 = vunpack.i.h.bf16 %v9990_v27  ;;  %v9991_v6 = vunpack.i.l.bf16 %v9990_v27  ;;  %v8281_v27 = vld [vmem:[#allocation3 + $0x338] ss:$0 sm:$0xff] }
0x30ed   :  { %v9631_v36 = vpack.c.bf16 %v9997_v28, %v9996_v29 }
0x30ee   :  { %v9627_v35 = vpack.c.bf16 %v9992_v56, %v9991_v6  ;;  %v4902_v39 = vpop.permute.xlu1 %4901 }
0x30ef   :  { %v4904_v40 = vpop.permute.xlu0 %4903 }
0x30f0   :  { %9628 = vmatprep.subr.bf16.mxu1 %v9627_v35 }
0x30f1   :  { %v10251_v43 = vpop.eup %10250  ;;  %9630 = vmatpush3.bf16.msra.mxu1 %v9627_v35 }
0x30f2   :  { %v10253_v37 = vpop.eup %10252  ;;  %9633 = vmatprep.subr.msk.bf16.mxu1 %vm10531_vm9, %v9631_v36  ;;  %v4803_v38 = vmul.f32 %v10251_v43, %v10247_v21  ;;  %v9645_v21 = vpack.c.bf16 %v4269_v9, %v4268_v20  ;;  %v8285_v9 = vld [vmem:[#allocation3 + $0x348] ss:$0 sm:$0xff] }
0x30f3   :  { %v4802_v57 = vmul.f32 %v10253_v37, %v10249_v62 }
0x30f5   :  { %9095 = vmatprep.mubr.msk.f32.mxu1 %vm50_vm0, %v4802_v57 }
0x30f6   :  { %9096 = vmatmul.mubr.msk.f32.vlgmr.msra.gmra.mrb[42].mxu1 %vm50_vm0, %v4803_v38 }
0x30f7   :  { %9102 = vmatprep.mubr.msk.f32.mxu1 %vm293_vm8, %v4902_v39 }
0x30fa   :  { %9636 = vmatpush3.bf16.xpose.msk.msra.mxu1 %vm10531_vm9, %v9631_v36 }
0x3101   :  { %9103 = vmatmul.mubr.msk.f32.vlgmr.msra.gmra.mrb[44].mxu1 %vm293_vm8, %v4904_v40 }
0x31c9   :  { %v9097_v30 = vpop.f32.mrb[42].mxu1 }
0x31ca   :  { %v4882_v34 = vpop.f32.mrb[43].mxu1 }
0x31d4   :  { %v9104_v41 = vpop.f32.mrb[44].mxu1 }
0x31d5   :  { %v4993_v25 = vmul.f32 0.35355338, %v9104_v41  ;;  %v4983_v60 = vpop.f32.mrb[45].mxu1 }
0x31d6   :  { %v4992_v42 = vmul.f32 0.35355338, %v4983_v60  ;;  %v5258_v60 = vld [vmem:[#allocation3 + $0x350] sm:$0xff] }
0x31d7   :  { %v4995_v33 = vadd.f32 %v11037_v54, %v4993_v25 }
0x31d8   :  { %v4994_v61 = vadd.f32 %v11040_v52, %v4992_v42  ;;  %v5259_v42 = vld [vmem:[#allocation3 + $0x358] sm:$0xff] }
0x31d9   :  { %v4999_v44 = vsel %vm50_vm0, %v4995_v33, -inf }
0x31da   :  { %5000 = vmax.xlane.f32.xlu0 %v4999_v44  ;;  %v4996_v45 = vsel %vm50_vm0, %v4994_v61, -inf  ;;  %v5261_v44 = vld [vmem:[#allocation3 + $0x368] sm:$0xff] }
0x31db   :  { %4997 = vmax.xlane.f32.xlu1 %v4996_v45 }
0x3267   :  { %v5001_v46 = vpop.xlane.xlu0 %5000 }
0x3268   :  { %v5003_v49 = vsub.f32 %v4995_v33, %v5001_v46  ;;  %v4998_v8 = vpop.xlane.xlu1 %4997  ;;  %v5260_v33 = vld [vmem:[#allocation3 + $0x360] sm:$0xff]  ;;  %v5263_v46 = vld [vmem:[#allocation3 + $0x378] sm:$0xff] }
0x3269   :  { %v5002_v50 = vsub.f32 %v4994_v61, %v4998_v8  ;;  %v9649_v61 = vpack.c.bf16 %v5259_v42, %v5258_v60  ;;  %v9653_v45 = vpack.c.bf16 %v5261_v44, %v5260_v33  ;;  %v5265_v8 = vld [vmem:[#allocation3 + $0x388] sm:$0xff] }
0x326a   :  { %v5006_v51 = vmul.f32 1.442695, %v5003_v49  ;;  %v5264_v49 = vld [vmem:[#allocation3 + $0x380] sm:$0xff] }
0x326b   :  { %v5004_v5 = vmul.f32 1.442695, %v5002_v50  ;;  %9650 = vmatprep.subr.bf16.mxu1 %v9649_v61  ;;  %v9657_v50 = vpack.c.bf16 %v5264_v49, %v5263_v46 }
0x326c   :  { %10254 = vpow2.f32 %v5006_v51  ;;  %9652 = vmatpush3.bf16.msra.mxu1 %v9649_v61  ;;  %v5266_v51 = vld [vmem:[#allocation3 + $0x390] sm:$0xff] }
0x326d   :  { %10256 = vpow2.f32 %v5004_v5  ;;  %9654 = vmatprep.subr.bf16.mxu1 %v9653_v45  ;;  %v9661_v5 = vpack.c.bf16 %v5266_v51, %v5265_v8  ;;  %v5501_v51 = vld [vmem:[#allocation3 + $0x3d8] sm:$0xff] }
0x3270   :  { %9656 = vmatpush3.bf16.msra.mxu1 %v9653_v45 }
0x3276   :  { %v10255_v53 = vpop.eup %10254 }
0x3277   :  { %v10257_v10 = vpop.eup %10256  ;;  %v5011_v54 = vsel %vm50_vm0, %v10255_v53, 0.0 }
0x3278   :  { %5012 = vadd.xlane.f32.xlu1 %v5011_v54  ;;  %v5008_v52 = vsel %vm50_vm0, %v10257_v10, 0.0 }
0x3279   :  { %5009 = vadd.xlane.f32.xlu0 %v5008_v52 }
0x3289   :  { %4679 = vrot.lane.b32.xlu1 %v11077_v55, %s10437_s20 }
0x328d   :  { %4681 = vrot.lane.b32.xlu1 %v11075_v32, %s10437_s20 }
0x328f   :  { %9999 = vrot.lane.b32.xlu0 %v11011_v22, %s10449_s7 }
0x3291   :  { %4895 = vrot.lane.b32.xlu1 %v9097_v30, %s10451_s9 }
0x3293   :  { %4893 = vrot.lane.b32.xlu0 %v4882_v34, %s10451_s9 }
0x3305   :  { %v5013_v47 = vpop.xlane.xlu1 %5012 }
0x3306   :  { %10258 = vrcp.f32 %v5013_v47  ;;  %v5010_v31 = vpop.xlane.xlu0 %5009 }
0x3307   :  { %10260 = vrcp.f32 %v5010_v31 }
0x3309   :  { %v4680_v58 = vpop.permute.xlu1 %4679 }
0x330a   :  { %4685 = vst.msk [vmem:[#allocation2] sm:$0xff] %vm704_vm10, %v4680_v58  ;;  %v10000_v48 = vpop.permute.xlu0 %9999 }
0x330b   :  { %v10002_v63 = vunpack.i.h.bf16 %v10000_v48  ;;  %v10001_v55 = vunpack.i.l.bf16 %v10000_v48 }
0x330d   :  { %v4682_v0 = vpop.permute.xlu1 %4681  ;;  %v9637_v1 = vpack.c.bf16 %v10002_v63, %v10001_v55 }
0x330e   :  { %4686 = vst.msk [vmem:[#allocation2 + $0x8] sm:$0xff] %vm704_vm10, %v4682_v0  ;;  %v4894_v32 = vpop.permute.xlu0 %4893 }
0x330f   :  { %4899 = vst.msk [vmem:[#allocation2] sm:$0xff] %vm919_vm11, %v4894_v32  ;;  %9638 = vmatprep.subr.bf16.mxu0 %v9637_v1 }
0x3310   :  { %v10259_v22 = vpop.eup %10258  ;;  %9640 = vmatpush3.bf16.msra.mxu0 %v9637_v1 }
0x3311   :  { %v10261_v2 = vpop.eup %10260  ;;  %v4896_v7 = vpop.permute.xlu1 %4895  ;;  %v5017_v16 = vmul.f32 %v10259_v22, %v10255_v53  ;;  %9642 = vmatprep.subr.bf16.mxu0 %v9641_v59  ;;  %v5267_v53 = vld [vmem:[#allocation3 + $0x398] sm:$0xff] }
0x3312   :  { %4900 = vst.msk [vmem:[#allocation2 + $0x8] sm:$0xff] %vm919_vm11, %v4896_v7  ;;  %v5016_v12 = vmul.f32 %v10261_v2, %v10257_v10  ;;  %v5268_v10 = vld [vmem:[#allocation3 + $0x3a0] sm:$0xff] }
0x3313   :  { %v9665_v54 = vpack.c.bf16 %v5268_v10, %v5267_v53  ;;  %v5503_v10 = vld [vmem:[#allocation3 + $0x3e8] sm:$0xff] }
0x3314   :  { %9109 = vmatprep.mubr.msk.f32.mxu0 %vm50_vm0, %v5016_v12 }
0x3315   :  { %9110 = vmatmul.mubr.msk.f32.vlgmr.msra.gmra.mrb[44].mxu0 %vm50_vm0, %v5017_v16 }
0x3316   :  { %9644 = vmatpush3.bf16.msra.mxu0 %v9641_v59 }
0x3317   :  { %9646 = vmatprep.subr.bf16.mxu0 %v9645_v21 }
0x331a   :  { %9648 = vmatpush3.bf16.msra.mxu0 %v9645_v21 }
0x331b   :  { %9658 = vmatprep.subr.bf16.mxu0 %v9657_v50 }
0x33e8   :  { %v9111_v62 = vpop.f32.mrb[44].mxu0 }
0x33e9   :  { %5109 = vrot.lane.b32.xlu1 %v9111_v62, %s10452_s10  ;;  %v5096_v23 = vpop.f32.mrb[45].mxu0 }
0x33ea   :  { %5107 = vrot.lane.b32.xlu0 %v5096_v23, %s10452_s10 }
0x345b   :  { %v5110_v24 = vpop.permute.xlu1 %5109 }
0x345c   :  { %5114 = vst.msk [vmem:[#allocation2 + $0x8] sm:$0xff] %vm1134_vm12, %v5110_v24  ;;  %v5108_v14 = vpop.permute.xlu0 %5107 }
0x345d   :  { %5113 = vst.msk [vmem:[#allocation2] sm:$0xff] %vm1134_vm12, %v5108_v14 }
0x3463   :  { %v5116_v4 = vld [vmem:[#allocation2 + $0x8] sm:$0xff] }
0x3464   :  { %v5115_v26 = vld [vmem:[#allocation2] sm:$0xff] }
0x3465   :  { %9120 = vmatprep.mubr.msk.f32.mxu0 %vm138_vm3, %v5115_v26 }
0x3466   :  { %9121 = vmatmul.mubr.msk.f32.vlgmr.msra.gmra.mrb[46].mxu0 %vm138_vm3, %v5116_v4  ;;  %v5269_v4 = vld [vmem:[#allocation3 + $0x3a8] sm:$0xff] }
0x3467   :  { %9660 = vmatpush3.bf16.msra.mxu0 %v9657_v50  ;;  %v5500_v50 = vld [vmem:[#allocation3 + $0x3d0] sm:$0xff] }
0x3468   :  { %9662 = vmatprep.subr.bf16.mxu0 %v9661_v5  ;;  %v9673_v53 = vpack.c.bf16 %v5501_v51, %v5500_v50 }
0x346a   :  { %9674 = vmatprep.subr.bf16.mxu1 %v9673_v53 }
0x346b   :  { %9664 = vmatpush3.bf16.msra.mxu0 %v9661_v5  ;;  %v5502_v5 = vld [vmem:[#allocation3 + $0x3e0] sm:$0xff] }
0x346c   :  { %9666 = vmatprep.subr.bf16.mxu0 %v9665_v54 }
0x346f   :  { %9668 = vmatpush3.bf16.msra.mxu0 %v9665_v54  ;;  %v9677_v54 = vpack.c.bf16 %v5503_v10, %v5502_v5 }
0x3539   :  { %v9122_v28 = vpop.f32.mrb[46].mxu0 }
0x353a   :  { %v5199_v29 = vadd.f32 %v9122_v28, %v8281_v27  ;;  %v5193_v56 = vpop.f32.mrb[47].mxu0 }
0x353b   :  { %v5194_v6 = vadd.f32 %v8281_v27, %v5193_v56  ;;  %v5270_v27 = vld [vmem:[#allocation3 + $0x3b0] sm:$0xff] }
0x353c   :  { %v11128_v35 = vadd.f32 %v5199_v29, %v10970_v13  ;;  %v9669_v28 = vpack.c.bf16 %v5270_v27, %v5269_v4  ;;  %v8286_v29 = vld [vmem:[#allocation3 + $0x370] ss:$0 sm:$0xff] }
0x353d   :  { %v11131_v36 = vadd.f32 %v5194_v6, %v10973_v15  ;;  %v8294_v4 = vld [vmem:[#allocation3 + $0x3f0] ss:$0 sm:$0xff] }
0x353e   :  { %v5209_v43 = vsel %vm138_vm3, %v11128_v35, 0.0  ;;  %9670 = vmatprep.subr.bf16.mxu0 %v9669_v28 }
0x353f   :  { %5210 = vadd.xlane.f32.xlu1 %v5209_v43  ;;  %v5206_v37 = vsel %vm138_vm3, %v11131_v36, 0.0  ;;  %9672 = vmatpush3.bf16.msra.mxu0 %v9669_v28 }
0x3540   :  { %5207 = vadd.xlane.f32.xlu0 %v5206_v37 }
0x35cc   :  { %v5211_v57 = vpop.xlane.xlu1 %5210 }
0x35cd   :  { %v5213_v38 = vmul.f32 0.03125, %v5211_v57  ;;  %v5208_v39 = vpop.xlane.xlu0 %5207 }
0x35ce   :  { %v5212_v40 = vmul.f32 0.03125, %v5208_v39  ;;  %v8289_v39 = vld [vmem:[#allocation3 + $0x3b8] ss:$0 sm:$0xff] }
0x35cf   :  { %v5215_v30 = vsub.f32 %v11128_v35, %v5213_v38 }
0x35d0   :  { %v5214_v13 = vsub.f32 %v11131_v36, %v5212_v40 }
0x35d1   :  { %v5217_v41 = vmul.f32 %v5215_v30, %v5215_v30  ;;  %v5249_v62 = vmul.f32 %v8284_v18, %v5215_v30 }
0x35d2   :  { %v5216_v34 = vmul.f32 %v5214_v13, %v5214_v13  ;;  %v5248_v59 = vmul.f32 %v8284_v18, %v5214_v13  ;;  %v8292_v18 = vld [vmem:[#allocation3 + $0x3c0] ss:$0 sm:$0xff] }
0x35d3   :  { %v5221_v25 = vsel %vm138_vm3, %v5217_v41, 0.0 }
0x35d4   :  { %v5218_v15 = vsel %vm138_vm3, %v5216_v34, 0.0 }
0x35d5   :  { %5219 = vadd.xlane.f32.xlu0 %v5218_v15 }
0x35d9   :  { %5222 = vadd.xlane.f32.xlu0 %v5221_v25 }
0x3662   :  { %v5220_v52 = vpop.xlane.xlu0 %5219 }
0x3663   :  { %v5224_v47 = vmul.f32 0.032258064, %v5220_v52 }
0x3665   :  { %10262 = vrsqrt.f32 %v5224_v47  ;;  %vm5228_vm15 = vcmp.eq.f32.partialorder %v5224_v47, inf  ;;  %v5231_v55 = vand.u32 2147483648, %v5224_v47  ;;  %vm5230_vm1 = vcmp.eq.f32.partialorder %v5224_v47, 0.0 }
0x3666   :  { %v5223_v31 = vpop.xlane.xlu0 %5222 }
0x3667   :  { %v5225_v58 = vmul.f32 0.032258064, %v5223_v31 }
0x3669   :  { %10264 = vrsqrt.f32 %v5225_v58  ;;  %vm5235_vm4 = vcmp.eq.f32.partialorder %v5225_v58, inf  ;;  %v5238_v7 = vand.u32 2147483648, %v5225_v58  ;;  %vm5237_vm5 = vcmp.eq.f32.partialorder %v5225_v58, 0.0 }
0x366f   :  { %v10263_v48 = vpop.eup %10262 }
0x3670   :  { %v5227_v63 = vmul.f32 %v10263_v48, %v5224_v47 }
0x3672   :  { %v5229_v0 = vsel %vm5228_vm15, %v5224_v47, %v5227_v63 }
0x3673   :  { %v10265_v1 = vpop.eup %10264  ;;  %v5232_v32 = vsel %vm5230_vm1, %v5231_v55, %v5229_v0 }
0x3674   :  { %v5234_v22 = vmul.f32 %v10265_v1, %v5225_v58  ;;  %v5240_v2 = vadd.f32 1e-06, %v5232_v32 }
0x3676   :  { %v5236_v12 = vsel %vm5235_vm4, %v5225_v58, %v5234_v22  ;;  %10266 = vrcp.f32 %v5240_v2 }
0x3677   :  { %v5239_v16 = vsel %vm5237_vm5, %v5238_v7, %v5236_v12 }
0x3678   :  { %v5241_v17 = vadd.f32 1e-06, %v5239_v16 }
0x367a   :  { %10268 = vrcp.f32 %v5241_v17 }
0x3680   :  { %v10267_v20 = vpop.eup %10266 }
0x3681   :  { %v5250_v21 = vmul.f32 %v10267_v20, %v5248_v59 }
0x3683   :  { %v5256_v23 = vadd.f32 %v8285_v9, %v5250_v21 }
0x3684   :  { %v10269_v24 = vpop.eup %10268 }
0x3685   :  { %v5251_v14 = vmul.f32 %v10269_v24, %v5249_v62  ;;  %9131 = vmatprep.mubr.msk.f32.mxu1 %vm138_vm3, %v5256_v23  ;;  %v8293_v62 = vld [vmem:[#allocation3 + $0x3c8] ss:$0 sm:$0xff] }
0x3687   :  { %v5257_v26 = vadd.f32 %v8285_v9, %v5251_v14 }
0x3689   :  { %9132 = vmatmul.mubr.msk.f32.vlgmr.msra.gmra.mrb[46].mxu1 %vm138_vm3, %v5257_v26 }
0x368a   :  { %9676 = vmatpush3.bf16.msra.mxu1 %v9673_v53 }
0x368b   :  { %9678 = vmatprep.subr.bf16.mxu1 %v9677_v54 }
0x368e   :  { %9680 = vmatpush3.bf16.msra.mxu1 %v9677_v54 }
0x375c   :  { %v9133_v56 = vpop.f32.mrb[46].mxu1 }
0x375d   :  { %v5354_v6 = vadd.f32 %v9133_v56, %v8286_v29  ;;  %v5348_v43 = vpop.f32.mrb[47].mxu1 }
0x375e   :  { %v5349_v37 = vadd.f32 %v8286_v29, %v5348_v43 }
0x375f   :  { %v5358_v38 = vmax.f32 %v5354_v6, 0.0 }
0x3760   :  { %v5357_v57 = vmax.f32 %v5349_v37, 0.0 }
0x3762   :  { %9150 = vmatprep.mubr.msk.f32.mxu0 %vm1385_vm2, %v5357_v57 }
0x3763   :  { %9151 = vmatmul.mubr.msk.f32.vlgmr.msra.gmra.mrb[48].mxu0 %vm1385_vm2, %v5358_v38 }
0x3836   :  { %v9152_v40 = vpop.f32.mrb[48].mxu0 }
0x3837   :  { %v5441_v30 = vadd.f32 %v9152_v40, %v8289_v39  ;;  %v5435_v13 = vpop.f32.mrb[49].mxu0 }
0x3838   :  { %v5436_v34 = vadd.f32 %v8289_v39, %v5435_v13 }
0x3839   :  { %v11146_v15 = vadd.f32 %v5441_v30, %v11128_v35 }
0x383a   :  { %v11149_v41 = vadd.f32 %v5436_v34, %v11131_v36 }
0x383b   :  { %v5451_v25 = vsel %vm138_vm3, %v11146_v15, 0.0 }
0x383c   :  { %5452 = vadd.xlane.f32.xlu0 %v5451_v25  ;;  %v5448_v60 = vsel %vm138_vm3, %v11149_v41, 0.0 }
0x383d   :  { %5449 = vadd.xlane.f32.xlu1 %v5448_v60 }
0x38c9   :  { %v5453_v42 = vpop.xlane.xlu0 %5452 }
0x38ca   :  { %v5455_v33 = vmul.f32 0.03125, %v5453_v42  ;;  %v5450_v61 = vpop.xlane.xlu1 %5449 }
0x38cb   :  { %v5454_v44 = vmul.f32 0.03125, %v5450_v61 }
0x38cc   :  { %v5457_v45 = vsub.f32 %v11146_v15, %v5455_v33 }
0x38cd   :  { %v5456_v35 = vsub.f32 %v11149_v41, %v5454_v44  ;;  %v11191_v44 = vld [vmem:[#allocation3 + $0x28] sm:$0xff] }
0x38ce   :  { %v5459_v46 = vmul.f32 %v5457_v45, %v5457_v45  ;;  %v5491_v59 = vmul.f32 %v8292_v18, %v5457_v45 }
0x38cf   :  { %v5458_v49 = vmul.f32 %v5456_v35, %v5456_v35  ;;  %v5490_v9 = vmul.f32 %v8292_v18, %v5456_v35  ;;  %v11194_v35 = vld [vmem:[#allocation3 + $0x20] sm:$0xff] }
0x38d0   :  { %v5463_v36 = vsel %vm138_vm3, %v5459_v46, 0.0 }
0x38d1   :  { %5464 = vadd.xlane.f32.xlu0 %v5463_v36  ;;  %v5460_v8 = vsel %vm138_vm3, %v5458_v49, 0.0 }
0x38d2   :  { %5461 = vadd.xlane.f32.xlu1 %v5460_v8 }
0x395e   :  { %v5465_v52 = vpop.xlane.xlu0 %5464 }
0x395f   :  { %v5467_v47 = vmul.f32 0.032258064, %v5465_v52  ;;  %v5462_v31 = vpop.xlane.xlu1 %5461 }
0x3960   :  { %v5466_v58 = vmul.f32 0.032258064, %v5462_v31 }
0x3961   :  { %10270 = vrsqrt.f32 %v5467_v47  ;;  %vm5477_vm6 = vcmp.eq.f32.partialorder %v5467_v47, inf  ;;  %v5480_v0 = vand.u32 2147483648, %v5467_v47  ;;  %vm5479_vm7 = vcmp.eq.f32.partialorder %v5467_v47, 0.0 }
0x3962   :  { %10272 = vrsqrt.f32 %v5466_v58  ;;  %vm5470_vm13 = vcmp.eq.f32.partialorder %v5466_v58, inf  ;;  %v5473_v22 = vand.u32 2147483648, %v5466_v58  ;;  %vm5472_vm14 = vcmp.eq.f32.partialorder %v5466_v58, 0.0 }
0x396b   :  { %v10271_v48 = vpop.eup %10270 }
0x396c   :  { %v10273_v63 = vpop.eup %10272  ;;  %v5476_v55 = vmul.f32 %v10271_v48, %v5467_v47 }
0x396d   :  { %v5469_v1 = vmul.f32 %v10273_v63, %v5466_v58 }
0x396e   :  { %v5478_v32 = vsel %vm5477_vm6, %v5467_v47, %v5476_v55 }
0x396f   :  { %v5481_v2 = vsel %vm5479_vm7, %v5480_v0, %v5478_v32  ;;  %v5471_v7 = vsel %vm5470_vm13, %v5466_v58, %v5469_v1 }
0x3970   :  { %v5483_v12 = vadd.f32 1e-06, %v5481_v2  ;;  %v5474_v16 = vsel %vm5472_vm14, %v5473_v22, %v5471_v7 }
0x3971   :  { %v5482_v17 = vadd.f32 1e-06, %v5474_v16 }
0x3972   :  { %10274 = vrcp.f32 %v5483_v12 }
0x3973   :  { %10276 = vrcp.f32 %v5482_v17 }
0x397c   :  { %v10275_v20 = vpop.eup %10274 }
0x397d   :  { %v10277_v21 = vpop.eup %10276  ;;  %v5493_v23 = vmul.f32 %v10275_v20, %v5491_v59 }
0x397e   :  { %v5492_v24 = vmul.f32 %v10277_v21, %v5490_v9 }
0x397f   :  { %v5499_v26 = vadd.f32 %v8293_v62, %v5493_v23 }
0x3980   :  { %v5498_v14 = vadd.f32 %v8293_v62, %v5492_v24 }
0x3982   :  { %9161 = vmatprep.mubr.msk.f32.mxu1 %vm138_vm3, %v5498_v14 }
0x3983   :  { %9162 = vmatmul.mubr.msk.f32.vlgmr.msra.gmra.mrb[48].mxu1 %vm138_vm3, %v5499_v26 }
0x3a56   :  { %v9163_v27 = vpop.f32.mrb[48].mxu1 }
0x3a57   :  { %v11161_v28 = vadd.f32 %v9163_v27, %v8294_v4  ;;  %v5581_v29 = vpop.f32.mrb[49].mxu1 }
0x3a58   :  { %v11163_v56 = vadd.f32 %v8294_v4, %v5581_v29 }
0x3a5a   :  { %9168 = vmatprep.mubr.msk.f32.mxu1 %vm293_vm8, %v11163_v56  ;;  %v11169_v6 = vpack.i.bf16 %v11161_v28, %v11163_v56 }
0x3a5c   :  { %10009 = vrot.lane.b32.xlu0 %v11169_v6, %s10441_s27  ;;  %10004 = vrot.lane.b32.xlu1 %v11169_v6, %s10440_s1 }
0x3a60   :  { %5799 = vrot.lane.b32.xlu1 %v11163_v56, %s10442_s28 }
0x3a64   :  { %5801 = vrot.lane.b32.xlu1 %v11161_v28, %s10442_s28 }
0x3ace   :  { %v10010_v43 = vpop.permute.xlu0 %10009  ;;  %v10005_v37 = vpop.permute.xlu1 %10004 }
0x3acf   :  { %v10012_v57 = vunpack.i.h.bf16 %v10010_v43  ;;  %v10011_v38 = vunpack.i.l.bf16 %v10010_v43  ;;  %v10007_v39 = vunpack.i.h.bf16 %v10005_v37  ;;  %v10006_v40 = vunpack.i.l.bf16 %v10005_v37 }
0x3ad1   :  { %v9681_v30 = vpack.c.bf16 %v10007_v39, %v10006_v40  ;;  %v9691_v13 = vpack.c.bf16 %v10012_v57, %v10011_v38 }
0x3ad2   :  { %v5800_v34 = vpop.permute.xlu1 %5799 }
0x3ad3   :  { %9683 = vmatprep.subr.msk.bf16.mxu1 %vm10531_vm9, %v9681_v30 }
0x3ad4   :  { %9686 = vmatpush3.bf16.xpose.msk.msra.mxu1 %vm10531_vm9, %v9681_v30 }
0x3ad5   :  { %9693 = vmatprep.subr.msk.bf16.mxu1 %vm10531_vm9, %v9691_v13 }
0x3ad6   :  { %v5802_v25 = vpop.permute.xlu1 %5801 }
0x3adb   :  { %9169 = vmatmul.mubr.msk.f32.vlgmr.msra.gmra.mrb[50].mxu1 %vm293_vm8, %v11161_v28 }
0x3adc   :  { %9696 = vmatpush3.bf16.xpose.msk.msra.mxu1 %vm10531_vm9, %v9691_v13  ;;  %9182 = vmatprep.mubr.msk.f32.mxu1 %vm293_vm8, %v5800_v34 }
0x3ae3   :  { %9183 = vmatmul.mubr.msk.f32.vlgmr.msra.gmra.mrb[52].mxu1 %vm293_vm8, %v5802_v25 }
0x3bae   :  { %v9170_v60 = vpop.f32.mrb[50].mxu1 }
0x3baf   :  { %v5685_v42 = vmul.f32 0.35355338, %v9170_v60  ;;  %v5675_v33 = vpop.f32.mrb[51].mxu1 }
0x3bb0   :  { %v5684_v61 = vmul.f32 0.35355338, %v5675_v33 }
0x3bb1   :  { %v5687_v45 = vadd.f32 %v11191_v44, %v5685_v42 }
0x3bb2   :  { %v5686_v46 = vadd.f32 %v11194_v35, %v5684_v61 }
0x3bb3   :  { %v5691_v49 = vsel %vm50_vm0, %v5687_v45, -inf }
0x3bb4   :  { %5692 = vmax.xlane.f32.xlu1 %v5691_v49  ;;  %v5688_v36 = vsel %vm50_vm0, %v5686_v46, -inf }
0x3bb5   :  { %5689 = vmax.xlane.f32.xlu0 %v5688_v36 }
0x3bb6   :  { %v9184_v8 = vpop.f32.mrb[52].mxu1 }
0x3bb7   :  { %v5881_v50 = vpop.f32.mrb[53].mxu1  ;;  %v5891_v51 = vmul.f32 0.35355338, %v9184_v8 }
0x3bb8   :  { %v5890_v5 = vmul.f32 0.35355338, %v5881_v50 }
0x3bb9   :  { %v5893_v10 = vadd.f32 %v11191_v44, %v5891_v51 }
0x3bba   :  { %v5892_v53 = vadd.f32 %v11194_v35, %v5890_v5 }
0x3bbb   :  { %v5897_v52 = vsel %vm50_vm0, %v5893_v10, -inf }
0x3bbc   :  { %v5894_v54 = vsel %vm50_vm0, %v5892_v53, -inf }
0x3bbd   :  { %5895 = vmax.xlane.f32.xlu0 %v5894_v54 }
0x3bc1   :  { %5898 = vmax.xlane.f32.xlu0 %v5897_v52 }
0x3bc5   :  { %10014 = vrot.lane.b32.xlu1 %v11169_v6, %s10445_s3 }
0x3c41   :  { %v5693_v47 = vpop.xlane.xlu1 %5692 }
0x3c42   :  { %v5695_v31 = vsub.f32 %v5687_v45, %v5693_v47  ;;  %v5690_v58 = vpop.xlane.xlu0 %5689 }
0x3c43   :  { %v5694_v48 = vsub.f32 %v5686_v46, %v5690_v58 }
0x3c44   :  { %v5698_v63 = vmul.f32 1.442695, %v5695_v31 }
0x3c45   :  { %v5696_v55 = vmul.f32 1.442695, %v5694_v48  ;;  %v10015_v0 = vpop.permute.xlu1 %10014 }
0x3c46   :  { %10278 = vpow2.f32 %v5698_v63  ;;  %v10017_v1 = vunpack.i.h.bf16 %v10015_v0  ;;  %v10016_v32 = vunpack.i.l.bf16 %v10015_v0 }
0x3c47   :  { %10280 = vpow2.f32 %v5696_v55 }
0x3c48   :  { %v9687_v22 = vpack.c.bf16 %v10017_v1, %v10016_v32 }
0x3c4a   :  { %9688 = vmatprep.subr.bf16.mxu0 %v9687_v22  ;;  %v5896_v2 = vpop.xlane.xlu0 %5895 }
0x3c4b   :  { %9690 = vmatpush3.bf16.msra.mxu0 %v9687_v22  ;;  %v5900_v62 = vsub.f32 %v5892_v53, %v5896_v2 }
0x3c4d   :  { %v5902_v23 = vmul.f32 1.442695, %v5900_v62 }
0x3c4e   :  { %v5899_v7 = vpop.xlane.xlu0 %5898 }
0x3c4f   :  { %v5901_v12 = vsub.f32 %v5893_v10, %v5899_v7 }
0x3c50   :  { %v10279_v16 = vpop.eup %10278 }
0x3c51   :  { %v10281_v17 = vpop.eup %10280  ;;  %v5904_v18 = vmul.f32 1.442695, %v5901_v12  ;;  %v5703_v59 = vsel %vm50_vm0, %v10279_v16, 0.0 }
0x3c52   :  { %5704 = vadd.xlane.f32.xlu0 %v5703_v59  ;;  %v5700_v20 = vsel %vm50_vm0, %v10281_v17, 0.0 }
0x3c53   :  { %10282 = vpow2.f32 %v5904_v18  ;;  %5701 = vadd.xlane.f32.xlu1 %v5700_v20 }
0x3c54   :  { %10284 = vpow2.f32 %v5902_v23 }
0x3c5d   :  { %v10283_v9 = vpop.eup %10282 }
0x3c5e   :  { %v5909_v21 = vsel %vm50_vm0, %v10283_v9, 0.0  ;;  %v10285_v24 = vpop.eup %10284 }
0x3c5f   :  { %5910 = vadd.xlane.f32.xlu0 %v5909_v21  ;;  %v5906_v14 = vsel %vm50_vm0, %v10285_v24, 0.0 }
0x3c64   :  { %10024 = vrot.lane.b32.xlu1 %v11169_v6, %s10446_s4 }
0x3c75   :  { %10019 = vrot.lane.b32.xlu0 %v11169_v6, %s10443_s29 }
0x3c79   :  { %6015 = vrot.lane.b32.xlu0 %v11161_v28, %s10444_s30 }
0x3c88   :  { %5907 = vadd.xlane.f32.xlu1 %v5906_v14 }
0x3c99   :  { %6013 = vrot.lane.b32.xlu1 %v11163_v56, %s10444_s30 }
0x3cdf   :  { %v5705_v26 = vpop.xlane.xlu0 %5704 }
0x3ce0   :  { %10286 = vrcp.f32 %v5705_v26  ;;  %v5702_v4 = vpop.xlane.xlu1 %5701 }
0x3ce1   :  { %10288 = vrcp.f32 %v5702_v4 }
0x3ce4   :  { %v10025_v38 = vpop.permute.xlu1 %10024 }
0x3ce5   :  { %v10027_v40 = vunpack.i.h.bf16 %v10025_v38  ;;  %v10026_v30 = vunpack.i.l.bf16 %v10025_v38 }
0x3ce7   :  { %v9701_v60 = vpack.c.bf16 %v10027_v40, %v10026_v30 }
0x3cea   :  { %v10287_v27 = vpop.eup %10286 }
0x3ceb   :  { %v10289_v29 = vpop.eup %10288  ;;  %v5709_v57 = vmul.f32 %v10287_v27, %v10279_v16 }
0x3cec   :  { %v5911_v43 = vpop.xlane.xlu0 %5910  ;;  %v5708_v37 = vmul.f32 %v10289_v29, %v10281_v17 }
0x3ced   :  { %10290 = vrcp.f32 %v5911_v43 }
0x3cee   :  { %9175 = vmatprep.mubr.msk.f32.mxu0 %vm50_vm0, %v5708_v37 }
0x3cef   :  { %9176 = vmatmul.mubr.msk.f32.vlgmr.msra.gmra.mrb[50].mxu0 %vm50_vm0, %v5709_v57 }
0x3cf0   :  { %v10020_v39 = vpop.permute.xlu0 %10019 }
0x3cf1   :  { %v10022_v13 = vunpack.i.h.bf16 %v10020_v39  ;;  %v10021_v34 = vunpack.i.l.bf16 %v10020_v39 }
0x3cf3   :  { %v9697_v25 = vpack.c.bf16 %v10022_v13, %v10021_v34 }
0x3cf4   :  { %v6016_v36 = vpop.permute.xlu0 %6015 }
0x3cf5   :  { %9698 = vmatprep.subr.bf16.mxu0 %v9697_v25 }
0x3cf6   :  { %9700 = vmatpush3.bf16.msra.mxu0 %v9697_v25 }
0x3cf7   :  { %9703 = vmatprep.subr.msk.bf16.mxu0 %vm10531_vm9, %v9701_v60  ;;  %v10291_v33 = vpop.eup %10290 }
0x3cf8   :  { %v5915_v46 = vmul.f32 %v10291_v33, %v10283_v9 }
0x3d15   :  { %v5908_v42 = vpop.xlane.xlu1 %5907 }
0x3d16   :  { %10292 = vrcp.f32 %v5908_v42 }
0x3d19   :  { %v6014_v49 = vpop.permute.xlu1 %6013 }
0x3d20   :  { %v10293_v61 = vpop.eup %10292 }
0x3d21   :  { %v5914_v45 = vmul.f32 %v10293_v61, %v10285_v24 }
0x3d23   :  { %9189 = vmatprep.mubr.msk.f32.mxu0 %vm50_vm0, %v5914_v45 }
0x3d24   :  { %9190 = vmatmul.mubr.msk.f32.vlgmr.msra.gmra.mrb[52].mxu0 %vm50_vm0, %v5915_v46 }
0x3d25   :  { %9706 = vmatpush3.bf16.xpose.msk.msra.mxu0 %vm10531_vm9, %v9701_v60  ;;  %9196 = vmatprep.mubr.msk.f32.mxu0 %vm293_vm8, %v6014_v49 }
0x3d2c   :  { %9197 = vmatmul.mubr.msk.f32.vlgmr.msra.gmra.mrb[54].mxu0 %vm293_vm8, %v6016_v36 }
0x3dc2   :  { %v9177_v8 = vpop.f32.mrb[50].mxu0 }
0x3dc3   :  { %5798 = vst.msk [vmem:[#allocation2 + $0x8] sm:$0xff] %vm293_vm8, %v9177_v8  ;;  %v5788_v50 = vpop.f32.mrb[51].mxu0 }
0x3dc4   :  { %5797 = vst.msk [vmem:[#allocation2] sm:$0xff] %vm293_vm8, %v5788_v50 }
0x3df7   :  { %v11229_v51 = vpop.f32.mrb[52].mxu0 }
0x3df8   :  { %v11231_v5 = vpop.f32.mrb[53].mxu0 }
0x3dff   :  { %v9198_v53 = vpop.f32.mrb[54].mxu0 }
0x3e00   :  { %v6105_v10 = vmul.f32 0.35355338, %v9198_v53  ;;  %v6095_v54 = vpop.f32.mrb[55].mxu0 }
0x3e01   :  { %v6104_v52 = vmul.f32 0.35355338, %v6095_v54 }
0x3e02   :  { %v6107_v47 = vadd.f32 %v11191_v44, %v6105_v10 }
0x3e03   :  { %v6106_v31 = vadd.f32 %v11194_v35, %v6104_v52 }
0x3e04   :  { %v6111_v58 = vsel %vm50_vm0, %v6107_v47, -inf }
0x3e05   :  { %6112 = vmax.xlane.f32.xlu0 %v6111_v58  ;;  %v6108_v48 = vsel %vm50_vm0, %v6106_v31, -inf }
0x3e06   :  { %6109 = vmax.xlane.f32.xlu1 %v6108_v48 }
0x3e92   :  { %v6113_v63 = vpop.xlane.xlu0 %6112 }
0x3e93   :  { %v6115_v55 = vsub.f32 %v6107_v47, %v6113_v63  ;;  %v6110_v0 = vpop.xlane.xlu1 %6109 }
0x3e94   :  { %v6114_v1 = vsub.f32 %v6106_v31, %v6110_v0  ;;  %v5591_v0 = vld [vmem:[#allocation3 + $0x400] sm:$0xff] }
0x3e95   :  { %v6118_v32 = vmul.f32 1.442695, %v6115_v55  ;;  %v5590_v55 = vld [vmem:[#allocation3 + $0x3f8] sm:$0xff] }
0x3e96   :  { %v6116_v22 = vmul.f32 1.442695, %v6114_v1  ;;  %v9721_v1 = vpack.c.bf16 %v5591_v0, %v5590_v55 }
0x3e97   :  { %10294 = vpow2.f32 %v6118_v32  ;;  %v5592_v32 = vld [vmem:[#allocation3 + $0x408] sm:$0xff] }
0x3e98   :  { %10296 = vpow2.f32 %v6116_v22  ;;  %v5593_v22 = vld [vmem:[#allocation3 + $0x410] sm:$0xff] }
0x3ea1   :  { %v10295_v2 = vpop.eup %10294 }
0x3ea2   :  { %v10297_v7 = vpop.eup %10296  ;;  %v6123_v12 = vsel %vm50_vm0, %v10295_v2, 0.0 }
0x3ea3   :  { %6124 = vadd.xlane.f32.xlu1 %v6123_v12  ;;  %v6120_v16 = vsel %vm50_vm0, %v10297_v7, 0.0  ;;  %v6675_v12 = vld [vmem:[#allocation3 + $0x460] sm:$0xff] }
0x3ea4   :  { %6121 = vadd.xlane.f32.xlu0 %v6120_v16 }
0x3eb4   :  { %10034 = vrot.lane.b32.xlu1 %v11169_v6, %s10449_s7 }
0x3eb8   :  { %6227 = vrot.lane.b32.xlu1 %v11163_v56, %s10448_s6 }
0x3eba   :  { %10029 = vrot.lane.b32.xlu0 %v11169_v6, %s10447_s5 }
0x3ebe   :  { %6229 = vrot.lane.b32.xlu0 %v11161_v28, %s10448_s6 }
0x3f30   :  { %v6125_v17 = vpop.xlane.xlu1 %6124 }
0x3f31   :  { %10298 = vrcp.f32 %v6125_v17  ;;  %v6122_v18 = vpop.xlane.xlu0 %6121 }
0x3f32   :  { %10300 = vrcp.f32 %v6122_v18 }
0x3f34   :  { %v10035_v59 = vpop.permute.xlu1 %10034 }
0x3f35   :  { %v10030_v20 = vpop.permute.xlu0 %10029  ;;  %v10037_v9 = vunpack.i.h.bf16 %v10035_v59  ;;  %v10036_v21 = vunpack.i.l.bf16 %v10035_v59 }
0x3f36   :  { %v10032_v62 = vunpack.i.h.bf16 %v10030_v20  ;;  %v10031_v23 = vunpack.i.l.bf16 %v10030_v20 }
0x3f37   :  { %v9711_v14 = vpack.c.bf16 %v10037_v9, %v10036_v21  ;;  %v6676_v9 = vld [vmem:[#allocation3 + $0x468] sm:$0xff]  ;;  %v6677_v21 = vld [vmem:[#allocation3 + $0x470] sm:$0xff] }
0x3f38   :  { %v9707_v24 = vpack.c.bf16 %v10032_v62, %v10031_v23  ;;  %v6228_v27 = vpop.permute.xlu1 %6227  ;;  %v9741_v23 = vpack.c.bf16 %v6677_v21, %v6676_v9 }
0x3f39   :  { %v6230_v29 = vpop.permute.xlu0 %6229 }
0x3f3a   :  { %9708 = vmatprep.subr.bf16.mxu1 %v9707_v24 }
0x3f3b   :  { %v10299_v56 = vpop.eup %10298  ;;  %9710 = vmatpush3.bf16.msra.mxu1 %v9707_v24 }
0x3f3c   :  { %v10301_v26 = vpop.eup %10300  ;;  %9713 = vmatprep.subr.msk.bf16.mxu1 %vm10531_vm9, %v9711_v14  ;;  %v6129_v4 = vmul.f32 %v10299_v56, %v10295_v2  ;;  %v9725_v2 = vpack.c.bf16 %v5593_v22, %v5592_v32  ;;  %v6585_v56 = vld [vmem:[#allocation3 + $0x438] sm:$0xff]  ;;  %v8324_v32 = vld [vmem:[#allocation3 + $0x420] ss:$0 sm:$0xff] }
0x3f3d   :  { %v6128_v28 = vmul.f32 %v10301_v26, %v10297_v7  ;;  %v6674_v7 = vld [vmem:[#allocation3 + $0x458] sm:$0xff] }
0x3f3e   :  { %v9737_v16 = vpack.c.bf16 %v6675_v12, %v6674_v7  ;;  %v8325_v7 = vld [vmem:[#allocation3 + $0x428] ss:$0 sm:$0xff] }
0x3f3f   :  { %9203 = vmatprep.mubr.msk.f32.mxu1 %vm50_vm0, %v6128_v28  ;;  %v6586_v28 = vld [vmem:[#allocation3 + $0x440] sm:$0xff] }
0x3f40   :  { %9204 = vmatmul.mubr.msk.f32.vlgmr.msra.gmra.mrb[54].mxu1 %vm50_vm0, %v6129_v4  ;;  %v6587_v4 = vld [vmem:[#allocation3 + $0x448] sm:$0xff] }
0x3f41   :  { %9210 = vmatprep.mubr.msk.f32.mxu1 %vm293_vm8, %v6228_v27  ;;  %v9733_v27 = vpack.c.bf16 %v6587_v4, %v6586_v28 }
0x3f44   :  { %9716 = vmatpush3.bf16.xpose.msk.msra.mxu1 %vm10531_vm9, %v9711_v14  ;;  %v6584_v14 = vld [vmem:[#allocation3 + $0x430] sm:$0xff] }
0x3f45   :  { %v9729_v26 = vpack.c.bf16 %v6585_v56, %v6584_v14 }
0x3f47   :  { %9730 = vmatprep.subr.bf16.mxu1 %v9729_v26 }
0x3f4b   :  { %9211 = vmatmul.mubr.msk.f32.vlgmr.msra.gmra.mrb[56].mxu1 %vm293_vm8, %v6230_v29  ;;  %v8321_v29 = vld [vmem:[#allocation3 + $0x418] ss:$0 sm:$0xff] }
0x3f4c   :  { %9732 = vmatpush3.bf16.msra.mxu1 %v9729_v26 }
0x3f4d   :  { %9734 = vmatprep.subr.bf16.mxu1 %v9733_v27 }
0x3f50   :  { %9736 = vmatpush3.bf16.msra.mxu1 %v9733_v27 }
0x4013   :  { %v9205_v43 = vpop.f32.mrb[54].mxu1 }
0x4014   :  { %v6208_v37 = vpop.f32.mrb[55].mxu1 }
0x401e   :  { %v9212_v57 = vpop.f32.mrb[56].mxu1 }
0x401f   :  { %v6319_v38 = vmul.f32 0.35355338, %v9212_v57  ;;  %v6309_v39 = vpop.f32.mrb[57].mxu1 }
0x4020   :  { %v6318_v40 = vmul.f32 0.35355338, %v6309_v39 }
0x4021   :  { %v6321_v30 = vadd.f32 %v11191_v44, %v6319_v38 }
0x4022   :  { %v6320_v13 = vadd.f32 %v11194_v35, %v6318_v40  ;;  %v8329_v40 = vld [vmem:[#allocation3 + $0x478] ss:$0 sm:$0xff] }
0x4023   :  { %v6325_v34 = vsel %vm50_vm0, %v6321_v30, -inf }
0x4024   :  { %6326 = vmax.xlane.f32.xlu0 %v6325_v34  ;;  %v6322_v25 = vsel %vm50_vm0, %v6320_v13, -inf }
0x4025   :  { %6323 = vmax.xlane.f32.xlu1 %v6322_v25 }
0x40b1   :  { %v6327_v60 = vpop.xlane.xlu0 %6326 }
0x40b2   :  { %v6329_v42 = vsub.f32 %v6321_v30, %v6327_v60  ;;  %v6324_v33 = vpop.xlane.xlu1 %6323 }
0x40b3   :  { %v6328_v61 = vsub.f32 %v6320_v13, %v6324_v33 }
0x40b4   :  { %v6332_v45 = vmul.f32 1.442695, %v6329_v42 }
0x40b5   :  { %v6330_v46 = vmul.f32 1.442695, %v6328_v61 }
0x40b6   :  { %10302 = vpow2.f32 %v6332_v45 }
0x40b7   :  { %10304 = vpow2.f32 %v6330_v46 }
0x40c0   :  { %v10303_v49 = vpop.eup %10302 }
0x40c1   :  { %v10305_v36 = vpop.eup %10304  ;;  %v6337_v44 = vsel %vm50_vm0, %v10303_v49, 0.0 }
0x40c2   :  { %6338 = vadd.xlane.f32.xlu1 %v6337_v44  ;;  %v6334_v35 = vsel %vm50_vm0, %v10305_v36, 0.0 }
0x40c3   :  { %6335 = vadd.xlane.f32.xlu0 %v6334_v35 }
0x40d3   :  { %6005 = vrot.lane.b32.xlu1 %v11231_v5, %s10437_s20 }
0x40d7   :  { %6007 = vrot.lane.b32.xlu1 %v11229_v51, %s10437_s20 }
0x40d9   :  { %10039 = vrot.lane.b32.xlu0 %v11169_v6, %s10450_s8 }
0x40db   :  { %6221 = vrot.lane.b32.xlu1 %v9205_v43, %s10451_s9 }
0x40dd   :  { %6219 = vrot.lane.b32.xlu0 %v6208_v37, %s10451_s9 }
0x414f   :  { %v6339_v8 = vpop.xlane.xlu1 %6338 }
0x4150   :  { %10306 = vrcp.f32 %v6339_v8  ;;  %v6336_v50 = vpop.xlane.xlu0 %6335 }
0x4151   :  { %10308 = vrcp.f32 %v6336_v50 }
0x4153   :  { %v6006_v53 = vpop.permute.xlu1 %6005 }
0x4154   :  { %6011 = vst.msk [vmem:[#allocation2] sm:$0xff] %vm704_vm10, %v6006_v53  ;;  %v10040_v10 = vpop.permute.xlu0 %10039 }
0x4155   :  { %v10042_v54 = vunpack.i.h.bf16 %v10040_v10  ;;  %v10041_v5 = vunpack.i.l.bf16 %v10040_v10 }
0x4157   :  { %v9717_v52 = vpack.c.bf16 %v10042_v54, %v10041_v5  ;;  %v6008_v47 = vpop.permute.xlu1 %6007 }
0x4158   :  { %6012 = vst.msk [vmem:[#allocation2 + $0x8] sm:$0xff] %vm704_vm10, %v6008_v47  ;;  %v6220_v51 = vpop.permute.xlu0 %6219 }
0x4159   :  { %6225 = vst.msk [vmem:[#allocation2] sm:$0xff] %vm919_vm11, %v6220_v51  ;;  %9718 = vmatprep.subr.bf16.mxu0 %v9717_v52 }
0x415a   :  { %v10307_v6 = vpop.eup %10306  ;;  %9720 = vmatpush3.bf16.msra.mxu0 %v9717_v52 }
0x415b   :  { %v10309_v31 = vpop.eup %10308  ;;  %v6222_v58 = vpop.permute.xlu1 %6221  ;;  %v6343_v63 = vmul.f32 %v10307_v6, %v10303_v49  ;;  %9722 = vmatprep.subr.bf16.mxu0 %v9721_v1 }
0x415c   :  { %6226 = vst.msk [vmem:[#allocation2 + $0x8] sm:$0xff] %vm919_vm11, %v6222_v58  ;;  %v6342_v48 = vmul.f32 %v10309_v31, %v10305_v36 }
0x415e   :  { %9217 = vmatprep.mubr.msk.f32.mxu0 %vm50_vm0, %v6342_v48 }
0x415f   :  { %9218 = vmatmul.mubr.msk.f32.vlgmr.msra.gmra.mrb[56].mxu0 %vm50_vm0, %v6343_v63 }
0x4160   :  { %9724 = vmatpush3.bf16.msra.mxu0 %v9721_v1 }
0x4161   :  { %9726 = vmatprep.subr.bf16.mxu0 %v9725_v2 }
0x4164   :  { %9728 = vmatpush3.bf16.msra.mxu0 %v9725_v2 }
0x4165   :  { %9738 = vmatprep.subr.bf16.mxu0 %v9737_v16 }
0x4232   :  { %v9219_v17 = vpop.f32.mrb[56].mxu0 }
0x4233   :  { %6435 = vrot.lane.b32.xlu1 %v9219_v17, %s10452_s10  ;;  %v6422_v18 = vpop.f32.mrb[57].mxu0 }
0x4234   :  { %6433 = vrot.lane.b32.xlu0 %v6422_v18, %s10452_s10 }
0x42a5   :  { %v6436_v59 = vpop.permute.xlu1 %6435 }
0x42a6   :  { %6440 = vst.msk [vmem:[#allocation2 + $0x8] sm:$0xff] %vm1134_vm12, %v6436_v59  ;;  %v6434_v20 = vpop.permute.xlu0 %6433 }
0x42a7   :  { %6439 = vst.msk [vmem:[#allocation2] sm:$0xff] %vm1134_vm12, %v6434_v20 }
0x42ad   :  { %v6442_v24 = vld [vmem:[#allocation2 + $0x8] sm:$0xff] }
0x42ae   :  { %v6441_v62 = vld [vmem:[#allocation2] sm:$0xff] }
0x42af   :  { %9228 = vmatprep.mubr.msk.f32.mxu0 %vm138_vm3, %v6441_v62 }
0x42b0   :  { %9229 = vmatmul.mubr.msk.f32.vlgmr.msra.gmra.mrb[58].mxu0 %vm138_vm3, %v6442_v24  ;;  %v8326_v24 = vld [vmem:[#allocation3 + $0x450] ss:$0 sm:$0xff] }
0x42b1   :  { %9740 = vmatpush3.bf16.msra.mxu0 %v9737_v16  ;;  %9250 = vmatprep.mubr.msk.f32.mxu0 %vm138_vm3, %v10999_v3 }
0x42b2   :  { %9742 = vmatprep.subr.bf16.mxu0 %v9741_v23 }
0x42b5   :  { %9744 = vmatpush3.bf16.msra.mxu0 %v9741_v23 }
0x42b8   :  { %9251 = vmatmul.mubr.msk.f32.vlgmr.msra.gmra.mrb[60].mxu0 %vm138_vm3, %v11001_v19 }
0x4383   :  { %v9230_v43 = vpop.f32.mrb[58].mxu0 }
0x4384   :  { %v6525_v37 = vadd.f32 %v9230_v43, %v8321_v29  ;;  %v6519_v57 = vpop.f32.mrb[59].mxu0 }
0x4385   :  { %v6520_v3 = vadd.f32 %v8321_v29, %v6519_v57 }
0x4386   :  { %v11286_v38 = vadd.f32 %v6525_v37, %v11146_v15 }
0x4387   :  { %v11289_v19 = vadd.f32 %v6520_v3, %v11149_v41  ;;  %v11327_v3 = vld [vmem:[#allocation3 + $0x18] sm:$0xff] }
0x4388   :  { %v6535_v39 = vsel %vm138_vm3, %v11286_v38, 0.0 }
0x4389   :  { %6536 = vadd.xlane.f32.xlu1 %v6535_v39  ;;  %v6532_v30 = vsel %vm138_vm3, %v11289_v19, 0.0 }
0x438a   :  { %6533 = vadd.xlane.f32.xlu0 %v6532_v30 }
0x438b   :  { %v9252_v13 = vpop.f32.mrb[60].mxu0 }
0x438c   :  { %v6755_v34 = vadd.f32 %v9252_v13, %v8329_v40  ;;  %v6749_v25 = vpop.f32.mrb[61].mxu0 }
0x438d   :  { %v6750_v60 = vadd.f32 %v8329_v40, %v6749_v25  ;;  %v11330_v40 = vld [vmem:[#allocation3 + $0x10] sm:$0xff] }
0x438f   :  { %v9745_v42 = vpack.c.bf16 %v6755_v34, %v6750_v60  ;;  %v11295_v33 = vpack.i.bf16 %v6755_v34, %v6750_v60 }
0x4391   :  { %9747 = vmatprep.subr.msk.bf16.mxu1 %vm10531_vm9, %v9745_v42 }
0x439a   :  { %10044 = vrot.lane.b32.xlu1 %v11295_v33, %s10442_s28 }
0x4416   :  { %v6537_v15 = vpop.xlane.xlu1 %6536 }
0x4417   :  { %v6539_v41 = vmul.f32 0.03125, %v6537_v15  ;;  %v6534_v61 = vpop.xlane.xlu0 %6533 }
0x4418   :  { %v6538_v45 = vmul.f32 0.03125, %v6534_v61 }
0x4419   :  { %v6541_v46 = vsub.f32 %v11286_v38, %v6539_v41 }
0x441a   :  { %v6540_v49 = vsub.f32 %v11289_v19, %v6538_v45  ;;  %v10045_v16 = vpop.permute.xlu1 %10044 }
0x441b   :  { %v6543_v35 = vmul.f32 %v6541_v46, %v6541_v46  ;;  %v6575_v17 = vmul.f32 %v8324_v32, %v6541_v46  ;;  %v10047_v20 = vunpack.i.h.bf16 %v10045_v16  ;;  %v10046_v9 = vunpack.i.l.bf16 %v10045_v16 }
0x441c   :  { %v6542_v36 = vmul.f32 %v6540_v49, %v6540_v49  ;;  %v6574_v22 = vmul.f32 %v8324_v32, %v6540_v49 }
0x441d   :  { %v6547_v8 = vsel %vm138_vm3, %v6543_v35, 0.0  ;;  %v9755_v23 = vpack.c.bf16 %v10047_v20, %v10046_v9 }
0x441e   :  { %v6544_v44 = vsel %vm138_vm3, %v6542_v36, 0.0 }
0x441f   :  { %6545 = vadd.xlane.f32.xlu0 %v6544_v44 }
0x4423   :  { %6548 = vadd.xlane.f32.xlu0 %v6547_v8 }
0x44ac   :  { %v6546_v50 = vpop.xlane.xlu0 %6545 }
0x44ad   :  { %v6550_v53 = vmul.f32 0.032258064, %v6546_v50 }
0x44af   :  { %10310 = vrsqrt.f32 %v6550_v53  ;;  %vm6554_vm15 = vcmp.eq.f32.partialorder %v6550_v53, inf  ;;  %v6557_v47 = vand.u32 2147483648, %v6550_v53  ;;  %vm6556_vm1 = vcmp.eq.f32.partialorder %v6550_v53, 0.0 }
0x44b0   :  { %v6549_v10 = vpop.xlane.xlu0 %6548 }
0x44b1   :  { %v6551_v54 = vmul.f32 0.032258064, %v6549_v10 }
0x44b3   :  { %10312 = vrsqrt.f32 %v6551_v54  ;;  %vm6561_vm4 = vcmp.eq.f32.partialorder %v6551_v54, inf  ;;  %v6564_v63 = vand.u32 2147483648, %v6551_v54  ;;  %vm6563_vm5 = vcmp.eq.f32.partialorder %v6551_v54, 0.0 }
0x44b9   :  { %v10311_v5 = vpop.eup %10310 }
0x44ba   :  { %v6553_v52 = vmul.f32 %v10311_v5, %v6550_v53 }
0x44bc   :  { %v6555_v51 = vsel %vm6554_vm15, %v6550_v53, %v6553_v52 }
0x44bd   :  { %v10313_v6 = vpop.eup %10312  ;;  %v6558_v31 = vsel %vm6556_vm1, %v6557_v47, %v6555_v51 }
0x44be   :  { %v6560_v58 = vmul.f32 %v10313_v6, %v6551_v54  ;;  %v6566_v48 = vadd.f32 1e-06, %v6558_v31 }
0x44c0   :  { %v6562_v55 = vsel %vm6561_vm4, %v6551_v54, %v6560_v58  ;;  %10314 = vrcp.f32 %v6566_v48 }
0x44c1   :  { %v6565_v0 = vsel %vm6563_vm5, %v6564_v63, %v6562_v55 }
0x44c2   :  { %v6567_v1 = vadd.f32 1e-06, %v6565_v0 }
0x44c4   :  { %10316 = vrcp.f32 %v6567_v1 }
0x44ca   :  { %v10315_v2 = vpop.eup %10314 }
0x44cb   :  { %v6576_v12 = vmul.f32 %v10315_v2, %v6574_v22 }
0x44cd   :  { %v6582_v18 = vadd.f32 %v8325_v7, %v6576_v12 }
0x44ce   :  { %v10317_v59 = vpop.eup %10316 }
0x44cf   :  { %v6577_v21 = vmul.f32 %v10317_v59, %v6575_v17  ;;  %9239 = vmatprep.mubr.msk.f32.mxu1 %vm138_vm3, %v6582_v18 }
0x44d1   :  { %v6583_v62 = vadd.f32 %v8325_v7, %v6577_v21 }
0x44d3   :  { %9240 = vmatmul.mubr.msk.f32.vlgmr.msra.gmra.mrb[58].mxu1 %vm138_vm3, %v6583_v62 }
0x44d4   :  { %9750 = vmatpush3.bf16.xpose.msk.msra.mxu1 %vm10531_vm9, %v9745_v42 }
0x44d5   :  { %9757 = vmatprep.subr.msk.bf16.mxu1 %vm10531_vm9, %v9755_v23 }
0x45a6   :  { %v9241_v14 = vpop.f32.mrb[58].mxu1 }
0x45a7   :  { %v11311_v56 = vadd.f32 %v9241_v14, %v8326_v24  ;;  %v6665_v26 = vpop.f32.mrb[59].mxu1 }
0x45a8   :  { %v11313_v28 = vadd.f32 %v8326_v24, %v6665_v26 }
0x45a9   :  { %6967 = vrot.lane.b32.xlu1 %v11311_v56, %s10442_s28 }
0x45aa   :  { %6965 = vrot.lane.b32.xlu0 %v11313_v28, %s10442_s28  ;;  %9257 = vmatprep.mubr.msk.f32.mxu1 %vm293_vm8, %v11313_v28 }
0x45ab   :  { %9258 = vmatmul.mubr.msk.f32.vlgmr.msra.gmra.mrb[60].mxu1 %vm293_vm8, %v11311_v56 }
0x45ac   :  { %9760 = vmatpush3.bf16.xpose.msk.msra.mxu1 %vm10531_vm9, %v9755_v23 }
0x461b   :  { %v6968_v27 = vpop.permute.xlu1 %6967 }
0x461c   :  { %v6966_v4 = vpop.permute.xlu0 %6965 }
0x461d   :  { %9271 = vmatprep.mubr.msk.f32.mxu1 %vm293_vm8, %v6966_v4 }
0x461e   :  { %9272 = vmatmul.mubr.msk.f32.vlgmr.msra.gmra.mrb[62].mxu1 %vm293_vm8, %v6968_v27 }
0x467e   :  { %v9259_v29 = vpop.f32.mrb[60].mxu1 }
0x467f   :  { %v6851_v43 = vmul.f32 0.35355338, %v9259_v29  ;;  %v6841_v37 = vpop.f32.mrb[61].mxu1 }
0x4680   :  { %v6850_v57 = vmul.f32 0.35355338, %v6841_v37 }
0x4681   :  { %v6853_v39 = vadd.f32 %v11327_v3, %v6851_v43 }
0x4682   :  { %v6852_v30 = vadd.f32 %v11330_v40, %v6850_v57 }
0x4683   :  { %v6857_v13 = vsel %vm50_vm0, %v6853_v39, -inf }
0x4684   :  { %6858 = vmax.xlane.f32.xlu0 %v6857_v13  ;;  %v6854_v34 = vsel %vm50_vm0, %v6852_v30, -inf }
0x4685   :  { %6855 = vmax.xlane.f32.xlu1 %v6854_v34 }
0x46f1   :  { %v9273_v25 = vpop.f32.mrb[62].mxu1 }
0x46f2   :  { %v7057_v60 = vmul.f32 0.35355338, %v9273_v25  ;;  %v7047_v42 = vpop.f32.mrb[63].mxu1 }
0x46f3   :  { %v7056_v15 = vmul.f32 0.35355338, %v7047_v42 }
0x46f4   :  { %v7059_v41 = vadd.f32 %v11327_v3, %v7057_v60 }
0x46f5   :  { %v7058_v61 = vadd.f32 %v11330_v40, %v7056_v15 }
0x46f6   :  { %v7063_v45 = vsel %vm50_vm0, %v7059_v41, -inf }
0x46f7   :  { %7064 = vmax.xlane.f32.xlu1 %v7063_v45  ;;  %v7060_v46 = vsel %vm50_vm0, %v7058_v61, -inf }
0x46f8   :  { %7061 = vmax.xlane.f32.xlu0 %v7060_v46 }
0x4711   :  { %v6859_v49 = vpop.xlane.xlu0 %6858 }
0x4712   :  { %v6861_v36 = vsub.f32 %v6853_v39, %v6859_v49  ;;  %v6856_v44 = vpop.xlane.xlu1 %6855 }
0x4713   :  { %v6860_v35 = vsub.f32 %v6852_v30, %v6856_v44 }
0x4714   :  { %v6864_v8 = vmul.f32 1.442695, %v6861_v36 }
0x4715   :  { %v6862_v50 = vmul.f32 1.442695, %v6860_v35 }
0x4716   :  { %10318 = vpow2.f32 %v6864_v8 }
0x4717   :  { %10320 = vpow2.f32 %v6862_v50 }
0x4720   :  { %v10319_v53 = vpop.eup %10318 }
0x4721   :  { %v10321_v10 = vpop.eup %10320  ;;  %v6869_v54 = vsel %vm50_vm0, %v10319_v53, 0.0 }
0x4722   :  { %6870 = vadd.xlane.f32.xlu1 %v6869_v54  ;;  %v6866_v5 = vsel %vm50_vm0, %v10321_v10, 0.0 }
0x4723   :  { %6867 = vadd.xlane.f32.xlu0 %v6866_v5 }
0x4784   :  { %v7065_v52 = vpop.xlane.xlu1 %7064 }
0x4785   :  { %v7067_v47 = vsub.f32 %v7059_v41, %v7065_v52  ;;  %v7062_v51 = vpop.xlane.xlu0 %7061 }
0x4786   :  { %v7066_v6 = vsub.f32 %v7058_v61, %v7062_v51 }
0x4787   :  { %v7070_v31 = vmul.f32 1.442695, %v7067_v47 }
0x4788   :  { %v7068_v58 = vmul.f32 1.442695, %v7066_v6 }
0x4789   :  { %10322 = vpow2.f32 %v7070_v31 }
0x478a   :  { %10324 = vpow2.f32 %v7068_v58 }
0x4793   :  { %v10323_v48 = vpop.eup %10322 }
0x4794   :  { %v10325_v63 = vpop.eup %10324  ;;  %v7075_v55 = vsel %vm50_vm0, %v10323_v48, 0.0 }
0x4795   :  { %7076 = vadd.xlane.f32.xlu1 %v7075_v55  ;;  %v7072_v0 = vsel %vm50_vm0, %v10325_v63, 0.0 }
0x4796   :  { %7073 = vadd.xlane.f32.xlu0 %v7072_v0 }
0x47a6   :  { %10054 = vrot.lane.b32.xlu1 %v11295_v33, %s10441_s27 }
0x47aa   :  { %10059 = vrot.lane.b32.xlu1 %v11295_v33, %s10444_s30 }
0x47ac   :  { %10049 = vrot.lane.b32.xlu0 %v11295_v33, %s10440_s1 }
0x47ae   :  { %7181 = vrot.lane.b32.xlu1 %v11311_v56, %s10444_s30 }
0x47af   :  { %v6871_v2 = vpop.xlane.xlu1 %6870 }
0x47b0   :  { %7179 = vrot.lane.b32.xlu0 %v11313_v28, %s10444_s30  ;;  %v6868_v1 = vpop.xlane.xlu0 %6867 }
0x47b1   :  { %10326 = vrcp.f32 %v6868_v1 }
0x47b2   :  { %10328 = vrcp.f32 %v6871_v2 }
0x47bb   :  { %v10327_v32 = vpop.eup %10326 }
0x47bc   :  { %v6874_v22 = vmul.f32 %v10327_v32, %v10321_v10  ;;  %v10329_v23 = vpop.eup %10328 }
0x47bd   :  { %v6875_v27 = vmul.f32 %v10329_v23, %v10319_v53 }
0x47be   :  { %9264 = vmatprep.mubr.msk.f32.mxu0 %vm50_vm0, %v6874_v22 }
0x4822   :  { %v7077_v7 = vpop.xlane.xlu1 %7076 }
0x4823   :  { %v7074_v12 = vpop.xlane.xlu0 %7073 }
0x4824   :  { %10330 = vrcp.f32 %v7074_v12 }
0x4825   :  { %10332 = vrcp.f32 %v7077_v7 }
0x4826   :  { %v10055_v16 = vpop.permute.xlu1 %10054 }
0x4827   :  { %v10050_v17 = vpop.permute.xlu0 %10049  ;;  %v10057_v18 = vunpack.i.h.bf16 %v10055_v16  ;;  %v10056_v59 = vunpack.i.l.bf16 %v10055_v16 }
0x4828   :  { %v10052_v20 = vunpack.i.h.bf16 %v10050_v17  ;;  %v10051_v9 = vunpack.i.l.bf16 %v10050_v17 }
0x4829   :  { %v9761_v24 = vpack.c.bf16 %v10057_v18, %v10056_v59 }
0x482a   :  { %v9751_v21 = vpack.c.bf16 %v10052_v20, %v10051_v9  ;;  %v10060_v62 = vpop.permute.xlu1 %10059 }
0x482b   :  { %v10062_v14 = vunpack.i.h.bf16 %v10060_v62  ;;  %v10061_v26 = vunpack.i.l.bf16 %v10060_v62  ;;  %v7180_v39 = vpop.permute.xlu0 %7179 }
0x482c   :  { %9752 = vmatprep.subr.bf16.mxu0 %v9751_v21 }
0x482d   :  { %9754 = vmatpush3.bf16.msra.mxu0 %v9751_v21  ;;  %v9765_v37 = vpack.c.bf16 %v10062_v14, %v10061_v26 }
0x482e   :  { %v10331_v4 = vpop.eup %10330  ;;  %9762 = vmatprep.subr.bf16.mxu0 %v9761_v24  ;;  %v7182_v30 = vpop.permute.xlu1 %7181 }
0x482f   :  { %v10333_v29 = vpop.eup %10332  ;;  %v7080_v43 = vmul.f32 %v10331_v4, %v10325_v63 }
0x4830   :  { %9265 = vmatmul.mubr.msk.f32.vlgmr.msra.gmra.mrb[62].mxu0 %vm50_vm0, %v6875_v27  ;;  %v7081_v57 = vmul.f32 %v10333_v29, %v10323_v48 }
0x4831   :  { %9764 = vmatpush3.bf16.msra.mxu0 %v9761_v24  ;;  %9278 = vmatprep.mubr.msk.f32.mxu0 %vm50_vm0, %v7080_v43 }
0x4832   :  { %9767 = vmatprep.subr.msk.bf16.mxu0 %vm10531_vm9, %v9765_v37 }
0x4834   :  { %9279 = vmatmul.mubr.msk.f32.vlgmr.msra.gmra.mrb[64].mxu0 %vm50_vm0, %v7081_v57 }
0x4835   :  { %9285 = vmatprep.mubr.msk.f32.mxu0 %vm293_vm8, %v7180_v39 }
0x483a   :  { %9770 = vmatpush3.bf16.xpose.msk.msra.mxu0 %vm10531_vm9, %v9765_v37 }
0x4841   :  { %9286 = vmatmul.mubr.msk.f32.vlgmr.msra.gmra.mrb[66].mxu0 %vm293_vm8, %v7182_v30 }
0x4903   :  { %v9266_v13 = vpop.f32.mrb[62].mxu0 }
0x4904   :  { %6964 = vst.msk [vmem:[#allocation2 + $0x8] sm:$0xff] %vm293_vm8, %v9266_v13  ;;  %v6954_v34 = vpop.f32.mrb[63].mxu0 }
0x4905   :  { %6963 = vst.msk [vmem:[#allocation2] sm:$0xff] %vm293_vm8, %v6954_v34 }
0x4907   :  { %v11365_v25 = vpop.f32.mrb[64].mxu0 }
0x4908   :  { %v11367_v60 = vpop.f32.mrb[65].mxu0 }
0x4914   :  { %v9287_v42 = vpop.f32.mrb[66].mxu0 }
0x4915   :  { %v7271_v15 = vmul.f32 0.35355338, %v9287_v42  ;;  %v7261_v41 = vpop.f32.mrb[67].mxu0 }
0x4916   :  { %v7270_v61 = vmul.f32 0.35355338, %v7261_v41 }
0x4917   :  { %v7273_v45 = vadd.f32 %v11327_v3, %v7271_v15 }
0x4918   :  { %v7272_v46 = vadd.f32 %v11330_v40, %v7270_v61 }
0x4919   :  { %v7277_v49 = vsel %vm50_vm0, %v7273_v45, -inf }
0x491a   :  { %7278 = vmax.xlane.f32.xlu1 %v7277_v49  ;;  %v7274_v36 = vsel %vm50_vm0, %v7272_v46, -inf  ;;  %v6758_v49 = vld [vmem:[#allocation3 + $0x480] sm:$0xff] }
0x491b   :  { %7275 = vmax.xlane.f32.xlu0 %v7274_v36  ;;  %v6759_v36 = vld [vmem:[#allocation3 + $0x488] sm:$0xff] }
0x492b   :  { %10064 = vrot.lane.b32.xlu1 %v11295_v33, %s10446_s4 }
0x492f   :  { %7393 = vrot.lane.b32.xlu1 %v11313_v28, %s10448_s6 }
0x4933   :  { %7395 = vrot.lane.b32.xlu1 %v11311_v56, %s10448_s6 }
0x49a7   :  { %v7279_v44 = vpop.xlane.xlu1 %7278 }
0x49a8   :  { %v7281_v35 = vsub.f32 %v7273_v45, %v7279_v44  ;;  %v7276_v8 = vpop.xlane.xlu0 %7275  ;;  %v9785_v44 = vpack.c.bf16 %v6759_v36, %v6758_v49 }
0x49a9   :  { %v7280_v50 = vsub.f32 %v7272_v46, %v7276_v8  ;;  %v6761_v8 = vld [vmem:[#allocation3 + $0x498] sm:$0xff] }
0x49aa   :  { %v7284_v53 = vmul.f32 1.442695, %v7281_v35  ;;  %v6760_v35 = vld [vmem:[#allocation3 + $0x490] sm:$0xff] }
0x49ab   :  { %v7282_v10 = vmul.f32 1.442695, %v7280_v50  ;;  %v10065_v54 = vpop.permute.xlu1 %10064  ;;  %v9789_v50 = vpack.c.bf16 %v6761_v8, %v6760_v35  ;;  %v8360_v35 = vld [vmem:[#allocation3 + $0x4b0] ss:$0 sm:$0xff] }
0x49ac   :  { %10334 = vpow2.f32 %v7284_v53  ;;  %v10067_v5 = vunpack.i.h.bf16 %v10065_v54  ;;  %v10066_v52 = vunpack.i.l.bf16 %v10065_v54 }
0x49ad   :  { %10336 = vpow2.f32 %v7282_v10 }
0x49ae   :  { %v9771_v47 = vpack.c.bf16 %v10067_v5, %v10066_v52 }
0x49af   :  { %v7394_v7 = vpop.permute.xlu1 %7393 }
0x49b0   :  { %9772 = vmatprep.subr.bf16.mxu1 %v9771_v47 }
0x49b1   :  { %9774 = vmatpush3.bf16.msra.mxu1 %v9771_v47 }
0x49b3   :  { %v7396_v12 = vpop.permute.xlu1 %7395 }
0x49b6   :  { %v10335_v51 = vpop.eup %10334 }
0x49b7   :  { %v7289_v28 = vsel %vm50_vm0, %v10335_v51, 0.0  ;;  %v10337_v6 = vpop.eup %10336 }
0x49b8   :  { %7290 = vadd.xlane.f32.xlu0 %v7289_v28  ;;  %v7286_v56 = vsel %vm50_vm0, %v10337_v6, 0.0 }
0x49bc   :  { %7287 = vadd.xlane.f32.xlu0 %v7286_v56 }
0x49d2   :  { %10069 = vrot.lane.b32.xlu0 %v11295_v33, %s10448_s6 }
0x4a45   :  { %v7291_v31 = vpop.xlane.xlu0 %7290 }
0x4a46   :  { %10338 = vrcp.f32 %v7291_v31 }
0x4a49   :  { %v7288_v58 = vpop.xlane.xlu0 %7287 }
0x4a4a   :  { %10340 = vrcp.f32 %v7288_v58 }
0x4a4d   :  { %v10070_v48 = vpop.permute.xlu0 %10069 }
0x4a4e   :  { %v10072_v63 = vunpack.i.h.bf16 %v10070_v48  ;;  %v10071_v55 = vunpack.i.l.bf16 %v10070_v48 }
0x4a50   :  { %v9775_v0 = vpack.c.bf16 %v10072_v63, %v10071_v55  ;;  %v10339_v1 = vpop.eup %10338 }
0x4a51   :  { %v7295_v2 = vmul.f32 %v10339_v1, %v10335_v51  ;;  %v8356_v51 = vld [vmem:[#allocation3 + $0x4a0] ss:$0 sm:$0xff] }
0x4a52   :  { %9777 = vmatprep.subr.msk.bf16.mxu1 %vm10531_vm9, %v9775_v0 }
0x4a54   :  { %v10341_v32 = vpop.eup %10340 }
0x4a55   :  { %v7294_v22 = vmul.f32 %v10341_v32, %v10337_v6 }
0x4a57   :  { %9292 = vmatprep.mubr.msk.f32.mxu1 %vm50_vm0, %v7294_v22 }
0x4a58   :  { %9293 = vmatmul.mubr.msk.f32.vlgmr.msra.gmra.mrb[64].mxu1 %vm50_vm0, %v7295_v2 }
0x4a59   :  { %9780 = vmatpush3.bf16.xpose.msk.msra.mxu1 %vm10531_vm9, %v9775_v0  ;;  %9299 = vmatprep.mubr.msk.f32.mxu1 %vm293_vm8, %v7394_v7 }
0x4a60   :  { %9300 = vmatmul.mubr.msk.f32.vlgmr.msra.gmra.mrb[66].mxu1 %vm293_vm8, %v7396_v12 }
0x4b2b   :  { %v9294_v16 = vpop.f32.mrb[64].mxu1 }
0x4b2c   :  { %v7374_v17 = vpop.f32.mrb[65].mxu1 }
0x4b33   :  { %v9301_v18 = vpop.f32.mrb[66].mxu1 }
0x4b34   :  { %v7485_v59 = vmul.f32 0.35355338, %v9301_v18  ;;  %v7475_v20 = vpop.f32.mrb[67].mxu1  ;;  %v7751_v18 = vld [vmem:[#allocation3 + $0x4c0] sm:$0xff] }
0x4b35   :  { %v7484_v9 = vmul.f32 0.35355338, %v7475_v20 }
0x4b36   :  { %v7487_v21 = vadd.f32 %v11327_v3, %v7485_v59  ;;  %v7752_v59 = vld [vmem:[#allocation3 + $0x4c8] sm:$0xff] }
0x4b37   :  { %v7486_v62 = vadd.f32 %v11330_v40, %v7484_v9  ;;  %v7753_v9 = vld [vmem:[#allocation3 + $0x4d0] sm:$0xff] }
0x4b38   :  { %v7491_v23 = vsel %vm50_vm0, %v7487_v21, -inf }
0x4b39   :  { %7492 = vmax.xlane.f32.xlu1 %v7491_v23  ;;  %v7488_v11 = vsel %vm50_vm0, %v7486_v62, -inf  ;;  %v7756_v23 = vld [vmem:[#allocation3 + $0x4e8] sm:$0xff] }
0x4b3a   :  { %7489 = vmax.xlane.f32.xlu0 %v7488_v11  ;;  %v7757_v11 = vld [vmem:[#allocation3 + $0x4f0] sm:$0xff] }
0x4b4a   :  { %10074 = vrot.lane.b32.xlu1 %v11295_v33, %s10449_s7 }
0x4b4e   :  { %7173 = vrot.lane.b32.xlu1 %v11365_v25, %s10437_s20 }
0x4b52   :  { %7385 = vrot.lane.b32.xlu1 %v7374_v17, %s10451_s9  ;;  %v7750_v17 = vld [vmem:[#allocation3 + $0x4b8] sm:$0xff] }
0x4b53   :  { %v9793_v20 = vpack.c.bf16 %v7751_v18, %v7750_v17 }
0x4b55   :  { %9794 = vmatprep.subr.bf16.mxu1 %v9793_v20 }
0x4b56   :  { %9796 = vmatpush3.bf16.msra.mxu1 %v9793_v20 }
0x4bc6   :  { %v7493_v24 = vpop.xlane.xlu1 %7492 }
0x4bc7   :  { %v7495_v14 = vsub.f32 %v7487_v21, %v7493_v24  ;;  %v7490_v26 = vpop.xlane.xlu0 %7489  ;;  %v9797_v21 = vpack.c.bf16 %v7753_v9, %v7752_v59 }
0x4bc8   :  { %v7494_v3 = vsub.f32 %v7486_v62, %v7490_v26  ;;  %v7755_v62 = vld [vmem:[#allocation3 + $0x4e0] sm:$0xff] }
0x4bc9   :  { %v7498_v4 = vmul.f32 1.442695, %v7495_v14  ;;  %9798 = vmatprep.subr.bf16.mxu1 %v9797_v21  ;;  %v9801_v24 = vpack.c.bf16 %v7756_v23, %v7755_v62  ;;  %v7758_v14 = vld [vmem:[#allocation3 + $0x4f8] sm:$0xff] }
0x4bca   :  { %v7496_v40 = vmul.f32 1.442695, %v7494_v3  ;;  %v10075_v27 = vpop.permute.xlu1 %10074  ;;  %9800 = vmatpush3.bf16.msra.mxu1 %v9797_v21  ;;  %v9805_v26 = vpack.c.bf16 %v7758_v14, %v7757_v11  ;;  %v7759_v3 = vld [vmem:[#allocation3 + $0x500] sm:$0xff]  ;;  %v7993_v23 = vld [vmem:[#allocation3 + $0x78] sm:$0xff]  ;;  %v7995_v14 = vld [vmem:[#allocation3 + $0x88] sm:$0xff] }
0x4bcb   :  { %v10077_v29 = vunpack.i.h.bf16 %v10075_v27  ;;  %v10076_v43 = vunpack.i.l.bf16 %v10075_v27  ;;  %v7994_v11 = vld [vmem:[#allocation3 + $0x80] sm:$0xff] }
0x4bcc   :  { %10342 = vpow2.f32 %v7496_v40 }
0x4bcd   :  { %v9781_v37 = vpack.c.bf16 %v10077_v29, %v10076_v43  ;;  %10344 = vpow2.f32 %v7498_v4  ;;  %v7760_v4 = vld [vmem:[#allocation3 + $0x508] sm:$0xff] }
0x4bce   :  { %v7174_v57 = vpop.permute.xlu1 %7173  ;;  %v9809_v40 = vpack.c.bf16 %v7760_v4, %v7759_v3 }
0x4bcf   :  { %7178 = vst.msk [vmem:[#allocation2 + $0x8] sm:$0xff] %vm704_vm10, %v7174_v57  ;;  %9782 = vmatprep.subr.bf16.mxu0 %v9781_v37 }
0x4bd0   :  { %9784 = vmatpush3.bf16.msra.mxu0 %v9781_v37 }
0x4bd1   :  { %9786 = vmatprep.subr.bf16.mxu0 %v9785_v44 }
0x4bd2   :  { %v7386_v15 = vpop.permute.xlu1 %7385 }
0x4bd6   :  { %v10343_v33 = vpop.eup %10342 }
0x4bd7   :  { %v7500_v39 = vsel %vm50_vm0, %v10343_v33, 0.0  ;;  %v10345_v30 = vpop.eup %10344 }
0x4bd8   :  { %7501 = vadd.xlane.f32.xlu0 %v7500_v39  ;;  %v7503_v13 = vsel %vm50_vm0, %v10345_v30, 0.0 }
0x4bdc   :  { %7504 = vadd.xlane.f32.xlu0 %v7503_v13 }
0x4bf2   :  { %7171 = vrot.lane.b32.xlu0 %v11367_v60, %s10437_s20 }
0x4bf6   :  { %7387 = vrot.lane.b32.xlu0 %v9294_v16, %s10451_s9 }
0x4c65   :  { %v7502_v34 = vpop.xlane.xlu0 %7501 }
0x4c66   :  { %10346 = vrcp.f32 %v7502_v34 }
0x4c69   :  { %v7505_v25 = vpop.xlane.xlu0 %7504 }
0x4c6a   :  { %10348 = vrcp.f32 %v7505_v25 }
0x4c6d   :  { %v7172_v42 = vpop.permute.xlu0 %7171 }
0x4c6e   :  { %7177 = vst.msk [vmem:[#allocation2] sm:$0xff] %vm704_vm10, %v7172_v42 }
0x4c6f   :  { %7391 = vst.msk [vmem:[#allocation2] sm:$0xff] %vm919_vm11, %v7386_v15 }
0x4c70   :  { %v10347_v41 = vpop.eup %10346 }
0x4c71   :  { %v7388_v61 = vpop.permute.xlu0 %7387  ;;  %v7508_v45 = vmul.f32 %v10347_v41, %v10343_v33 }
0x4c72   :  { %7392 = vst.msk [vmem:[#allocation2 + $0x8] sm:$0xff] %vm919_vm11, %v7388_v61 }
0x4c73   :  { %9306 = vmatprep.mubr.msk.f32.mxu0 %vm50_vm0, %v7508_v45 }
0x4c74   :  { %v10349_v60 = vpop.eup %10348 }
0x4c75   :  { %v7509_v46 = vmul.f32 %v10349_v60, %v10345_v30  ;;  %v8359_v60 = vld [vmem:[#allocation3 + $0x4a8] ss:$0 sm:$0xff] }
0x4c77   :  { %9307 = vmatmul.mubr.msk.f32.vlgmr.msra.gmra.mrb[68].mxu0 %vm50_vm0, %v7509_v46 }
0x4c78   :  { %9788 = vmatpush3.bf16.msra.mxu0 %v9785_v44 }
0x4c79   :  { %9790 = vmatprep.subr.bf16.mxu0 %v9789_v50 }
0x4c7c   :  { %9792 = vmatpush3.bf16.msra.mxu0 %v9789_v50 }
0x4c7d   :  { %9802 = vmatprep.subr.bf16.mxu0 %v9801_v24 }
0x4d4a   :  { %v9308_v53 = vpop.f32.mrb[68].mxu0 }
0x4d4b   :  { %7601 = vrot.lane.b32.xlu0 %v9308_v53, %s10452_s10  ;;  %v7588_v10 = vpop.f32.mrb[69].mxu0 }
0x4d4c   :  { %7599 = vrot.lane.b32.xlu1 %v7588_v10, %s10452_s10 }
0x4dbd   :  { %v7602_v54 = vpop.permute.xlu0 %7601 }
0x4dbe   :  { %7606 = vst.msk [vmem:[#allocation2 + $0x8] sm:$0xff] %vm1134_vm12, %v7602_v54  ;;  %v7600_v5 = vpop.permute.xlu1 %7599  ;;  %v7761_v54 = vld [vmem:[#allocation3 + $0x510] sm:$0xff] }
0x4dbf   :  { %7605 = vst.msk [vmem:[#allocation2] sm:$0xff] %vm1134_vm12, %v7600_v5  ;;  %v7762_v5 = vld [vmem:[#allocation3 + $0x518] sm:$0xff] }
0x4dc5   :  { %v7608_v47 = vld [vmem:[#allocation2 + $0x8] sm:$0xff] }
0x4dc6   :  { %v7607_v52 = vld [vmem:[#allocation2] sm:$0xff] }
0x4dc7   :  { %9317 = vmatprep.mubr.msk.f32.mxu0 %vm138_vm3, %v7607_v52  ;;  %v9813_v52 = vpack.c.bf16 %v7762_v5, %v7761_v54 }
0x4dc8   :  { %9318 = vmatmul.mubr.msk.f32.vlgmr.msra.gmra.mrb[70].mxu0 %vm138_vm3, %v7608_v47  ;;  %v8361_v47 = vld [vmem:[#allocation3 + $0x4d8] ss:$0 sm:$0xff] }
0x4dc9   :  { %9804 = vmatpush3.bf16.msra.mxu0 %v9801_v24 }
0x4dca   :  { %9806 = vmatprep.subr.bf16.mxu0 %v9805_v26 }
0x4dcd   :  { %9808 = vmatpush3.bf16.msra.mxu0 %v9805_v26  ;;  %v9821_v26 = vpack.c.bf16 %v7995_v14, %v7994_v11 }
0x4dce   :  { %9810 = vmatprep.subr.bf16.mxu0 %v9809_v40 }
0x4dd1   :  { %9812 = vmatpush3.bf16.msra.mxu0 %v9809_v40 }
0x4dd2   :  { %9814 = vmatprep.subr.bf16.mxu0 %v9813_v52 }
0x4dd5   :  { %9816 = vmatpush3.bf16.msra.mxu0 %v9813_v52 }
0x4e9b   :  { %v9319_v28 = vpop.f32.mrb[70].mxu0 }
0x4e9c   :  { %v7691_v6 = vadd.f32 %v9319_v28, %v8356_v51  ;;  %v7685_v56 = vpop.f32.mrb[71].mxu0 }
0x4e9d   :  { %v7686_v31 = vadd.f32 %v8356_v51, %v7685_v56 }
0x4e9e   :  { %v11418_v58 = vadd.f32 %v7691_v6, %v11286_v38 }
0x4e9f   :  { %v11421_v48 = vadd.f32 %v7686_v31, %v11289_v19 }
0x4ea0   :  { %v7701_v63 = vsel %vm138_vm3, %v11418_v58, 0.0 }
0x4ea1   :  { %7702 = vadd.xlane.f32.xlu0 %v7701_v63  ;;  %v7698_v55 = vsel %vm138_vm3, %v11421_v48, 0.0 }
0x4ea2   :  { %7699 = vadd.xlane.f32.xlu1 %v7698_v55  ;;  %v8364_v55 = vld [vmem:[#allocation3 + $0x520] ss:$0 sm:$0xff] }
0x4f2e   :  { %v7703_v0 = vpop.xlane.xlu0 %7702 }
0x4f2f   :  { %v7705_v1 = vmul.f32 0.03125, %v7703_v0  ;;  %v7700_v32 = vpop.xlane.xlu1 %7699 }
0x4f30   :  { %v7704_v22 = vmul.f32 0.03125, %v7700_v32 }
0x4f31   :  { %v7707_v2 = vsub.f32 %v11418_v58, %v7705_v1 }
0x4f32   :  { %v7706_v38 = vsub.f32 %v11421_v48, %v7704_v22 }
0x4f33   :  { %v7709_v7 = vmul.f32 %v7707_v2, %v7707_v2  ;;  %v7741_v46 = vmul.f32 %v8359_v60, %v7707_v2 }
0x4f34   :  { %v7708_v12 = vmul.f32 %v7706_v38, %v7706_v38  ;;  %v7740_v36 = vmul.f32 %v8359_v60, %v7706_v38 }
0x4f35   :  { %v7713_v19 = vsel %vm138_vm3, %v7709_v7, 0.0 }
0x4f36   :  { %7714 = vadd.xlane.f32.xlu1 %v7713_v19  ;;  %v7710_v16 = vsel %vm138_vm3, %v7708_v12, 0.0 }
0x4f37   :  { %7711 = vadd.xlane.f32.xlu0 %v7710_v16 }
0x4fc3   :  { %v7715_v27 = vpop.xlane.xlu1 %7714 }
0x4fc4   :  { %v7717_v29 = vmul.f32 0.032258064, %v7715_v27  ;;  %v7712_v43 = vpop.xlane.xlu0 %7711 }
0x4fc5   :  { %v7716_v37 = vmul.f32 0.032258064, %v7712_v43 }
0x4fc6   :  { %10350 = vrsqrt.f32 %v7717_v29  ;;  %vm7727_vm8 = vcmp.eq.f32.partialorder %v7717_v29, inf  ;;  %v7730_v30 = vand.u32 2147483648, %v7717_v29  ;;  %vm7729_vm9 = vcmp.eq.f32.partialorder %v7717_v29, 0.0 }
0x4fc7   :  { %10352 = vrsqrt.f32 %v7716_v37  ;;  %vm7720_vm10 = vcmp.eq.f32.partialorder %v7716_v37, inf  ;;  %v7723_v25 = vand.u32 2147483648, %v7716_v37  ;;  %vm7722_vm11 = vcmp.eq.f32.partialorder %v7716_v37, 0.0 }
0x4fd0   :  { %v10351_v57 = vpop.eup %10350 }
0x4fd1   :  { %v10353_v33 = vpop.eup %10352  ;;  %v7726_v39 = vmul.f32 %v10351_v57, %v7717_v29 }
0x4fd2   :  { %v7719_v13 = vmul.f32 %v10353_v33, %v7716_v37 }
0x4fd3   :  { %v7728_v34 = vsel %vm7727_vm8, %v7717_v29, %v7726_v39 }
0x4fd4   :  { %v7731_v42 = vsel %vm7729_vm9, %v7730_v30, %v7728_v34  ;;  %v7721_v15 = vsel %vm7720_vm10, %v7716_v37, %v7719_v13 }
0x4fd5   :  { %v7733_v41 = vadd.f32 1e-06, %v7731_v42  ;;  %v7724_v61 = vsel %vm7722_vm11, %v7723_v25, %v7721_v15 }
0x4fd6   :  { %v7732_v45 = vadd.f32 1e-06, %v7724_v61 }
0x4fd7   :  { %10354 = vrcp.f32 %v7733_v41  ;;  %v8367_v41 = vld [vmem:[#allocation3 + $0x60] ss:$0 sm:$0xff] }
0x4fd8   :  { %10356 = vrcp.f32 %v7732_v45 }
0x4fe1   :  { %v10355_v49 = vpop.eup %10354 }
0x4fe2   :  { %v10357_v44 = vpop.eup %10356  ;;  %v7743_v8 = vmul.f32 %v10355_v49, %v7741_v46  ;;  %v8368_v49 = vld [vmem:[#allocation3 + $0x68] ss:$0 sm:$0xff] }
0x4fe3   :  { %v7742_v50 = vmul.f32 %v10357_v44, %v7740_v36 }
0x4fe4   :  { %v7749_v10 = vadd.f32 %v8360_v35, %v7743_v8 }
0x4fe5   :  { %v7748_v53 = vadd.f32 %v8360_v35, %v7742_v50  ;;  %v8369_v50 = vld [vmem:[#allocation3 + $0x90] ss:$0 sm:$0xff] }
0x4fe7   :  { %9328 = vmatprep.mubr.msk.f32.mxu1 %vm138_vm3, %v7748_v53 }
0x4fe8   :  { %9329 = vmatmul.mubr.msk.f32.vlgmr.msra.gmra.mrb[68].mxu1 %vm138_vm3, %v7749_v10 }
0x50bb   :  { %v9330_v51 = vpop.f32.mrb[68].mxu1 }
0x50bc   :  { %v7846_v28 = vadd.f32 %v9330_v51, %v8361_v47  ;;  %v7840_v6 = vpop.f32.mrb[69].mxu1 }
0x50bd   :  { %v7841_v56 = vadd.f32 %v8361_v47, %v7840_v6 }
0x50be   :  { %v7850_v63 = vmax.f32 %v7846_v28, 0.0 }
0x50bf   :  { %v7849_v31 = vmax.f32 %v7841_v56, 0.0 }
0x50c1   :  { %9347 = vmatprep.mubr.msk.f32.mxu0 %vm1385_vm2, %v7849_v31 }
0x50c2   :  { %9348 = vmatmul.mubr.msk.f32.vlgmr.msra.gmra.mrb[72].mxu0 %vm1385_vm2, %v7850_v63 }
0x5195   :  { %v9349_v0 = vpop.f32.mrb[72].mxu0 }
0x5196   :  { %v7933_v1 = vadd.f32 %v9349_v0, %v8364_v55  ;;  %v7927_v32 = vpop.f32.mrb[73].mxu0 }
0x5197   :  { %v7928_v22 = vadd.f32 %v8364_v55, %v7927_v32 }
0x5198   :  { %v7937_v2 = vadd.f32 %v7933_v1, %v11418_v58 }
0x5199   :  { %v7936_v38 = vadd.f32 %v7928_v22, %v11421_v48  ;;  %v7992_v48 = vld [vmem:[#allocation3 + $0x70] sm:$0xff] }
0x519a   :  { %v7943_v7 = vsel %vm138_vm3, %v7937_v2, 0.0  ;;  %v9817_v24 = vpack.c.bf16 %v7993_v23, %v7992_v48 }
0x519b   :  { %7944 = vadd.xlane.f32.xlu1 %v7943_v7  ;;  %v7940_v12 = vsel %vm138_vm3, %v7936_v38, 0.0 }
0x519c   :  { %7941 = vadd.xlane.f32.xlu0 %v7940_v12  ;;  %9818 = vmatprep.subr.bf16.mxu1 %v9817_v24 }
0x519d   :  { %9820 = vmatpush3.bf16.msra.mxu1 %v9817_v24 }
0x519e   :  { %9822 = vmatprep.subr.bf16.mxu1 %v9821_v26 }
0x51a1   :  { %9824 = vmatpush3.bf16.msra.mxu1 %v9821_v26 }
0x5228   :  { %v7945_v19 = vpop.xlane.xlu1 %7944 }
0x5229   :  { %v7947_v16 = vmul.f32 0.03125, %v7945_v19  ;;  %v7942_v17 = vpop.xlane.xlu0 %7941 }
0x522a   :  { %v7946_v18 = vmul.f32 0.03125, %v7942_v17 }
0x522b   :  { %v7949_v59 = vsub.f32 %v7937_v2, %v7947_v16 }
0x522c   :  { %v7948_v20 = vsub.f32 %v7936_v38, %v7946_v18 }
0x522d   :  { %v7951_v9 = vmul.f32 %v7949_v59, %v7949_v59  ;;  %v7983_v61 = vmul.f32 %v8367_v41, %v7949_v59 }
0x522e   :  { %v7950_v21 = vmul.f32 %v7948_v20, %v7948_v20  ;;  %v7982_v60 = vmul.f32 %v8367_v41, %v7948_v20 }
0x522f   :  { %v7955_v62 = vsel %vm138_vm3, %v7951_v9, 0.0 }
0x5230   :  { %7956 = vadd.xlane.f32.xlu1 %v7955_v62  ;;  %v7952_v58 = vsel %vm138_vm3, %v7950_v21, 0.0 }
0x5231   :  { %7953 = vadd.xlane.f32.xlu0 %v7952_v58 }
0x52bd   :  { %v7957_v3 = vpop.xlane.xlu1 %7956 }
0x52be   :  { %v7959_v4 = vmul.f32 0.032258064, %v7957_v3  ;;  %v7954_v40 = vpop.xlane.xlu0 %7953 }
0x52bf   :  { %v7958_v27 = vmul.f32 0.032258064, %v7954_v40 }
0x52c0   :  { %10358 = vrsqrt.f32 %v7959_v4  ;;  %vm7969_vm12 = vcmp.eq.f32.partialorder %v7959_v4, inf  ;;  %v7972_v57 = vand.u32 2147483648, %v7959_v4  ;;  %vm7971_vm2 = vcmp.eq.f32.partialorder %v7959_v4, 0.0 }
0x52c1   :  { %10360 = vrsqrt.f32 %v7958_v27  ;;  %vm7962_vm6 = vcmp.eq.f32.partialorder %v7958_v27, inf  ;;  %v7965_v30 = vand.u32 2147483648, %v7958_v27  ;;  %vm7964_vm7 = vcmp.eq.f32.partialorder %v7958_v27, 0.0 }
0x52ca   :  { %v10359_v29 = vpop.eup %10358 }
0x52cb   :  { %v10361_v43 = vpop.eup %10360  ;;  %v7968_v37 = vmul.f32 %v10359_v29, %v7959_v4 }
0x52cc   :  { %v7961_v33 = vmul.f32 %v10361_v43, %v7958_v27 }
0x52cd   :  { %v7970_v39 = vsel %vm7969_vm12, %v7959_v4, %v7968_v37 }
0x52ce   :  { %v7973_v13 = vsel %vm7971_vm2, %v7972_v57, %v7970_v39  ;;  %v7963_v34 = vsel %vm7962_vm6, %v7958_v27, %v7961_v33 }
0x52cf   :  { %v7975_v25 = vadd.f32 1e-06, %v7973_v13  ;;  %v7966_v42 = vsel %vm7964_vm7, %v7965_v30, %v7963_v34 }
0x52d0   :  { %v7974_v15 = vadd.f32 1e-06, %v7966_v42 }
0x52d1   :  { %10362 = vrcp.f32 %v7975_v25 }
0x52d2   :  { %10364 = vrcp.f32 %v7974_v15 }
0x52db   :  { %v10363_v45 = vpop.eup %10362 }
0x52dc   :  { %v10365_v46 = vpop.eup %10364  ;;  %v7985_v36 = vmul.f32 %v10363_v45, %v7983_v61 }
0x52dd   :  { %v7984_v44 = vmul.f32 %v10365_v46, %v7982_v60 }
0x52de   :  { %v7991_v8 = vadd.f32 %v8368_v49, %v7985_v36 }
0x52df   :  { %v7990_v35 = vadd.f32 %v8368_v49, %v7984_v44 }
0x52e1   :  { %9358 = vmatprep.mubr.msk.f32.mxu1 %vm138_vm3, %v7990_v35 }
0x52e2   :  { %9359 = vmatmul.mubr.msk.f32.vlgmr.msra.gmra.mrb[70].mxu1 %vm138_vm3, %v7991_v8 }
0x53b5   :  { %v9360_v53 = vpop.f32.mrb[70].mxu1 }
0x53b6   :  { %v8079_v10 = vadd.f32 %v9360_v53, %v8369_v50  ;;  %v8073_v54 = vpop.f32.mrb[71].mxu1 }
0x53b7   :  { %v8074_v5 = vadd.f32 %v8369_v50, %v8073_v54 }
0x53b8   :  { %v8085_v52 = vsel %vm50_vm0, %v8079_v10, -inf }
0x53b9   :  { %8086 = vmax.xlane.f32.xlu1 %v8085_v52  ;;  %v8082_v47 = vsel %vm50_vm0, %v8074_v5, -inf }
0x53ba   :  { %8083 = vmax.xlane.f32.xlu0 %v8082_v47 }
0x5446   :  { %v8087_v51 = vpop.xlane.xlu1 %8086 }
0x5447   :  { %v8089_v28 = vsub.f32 %v8079_v10, %v8087_v51  ;;  %v8084_v6 = vpop.xlane.xlu0 %8083 }
0x5448   :  { %v8088_v56 = vsub.f32 %v8074_v5, %v8084_v6 }
0x5449   :  { %v8092_v31 = vmul.f32 1.442695, %v8089_v28 }
0x544a   :  { %v8090_v63 = vmul.f32 1.442695, %v8088_v56 }
0x544b   :  { %10366 = vpow2.f32 %v8092_v31 }
0x544c   :  { %10368 = vpow2.f32 %v8090_v63 }
0x5455   :  { %v10367_v55 = vpop.eup %10366 }
0x5456   :  { %v10369_v0 = vpop.eup %10368  ;;  %v8097_v1 = vsel %vm50_vm0, %v10367_v55, 0.0 }
0x5457   :  { %8098 = vadd.xlane.f32.xlu1 %v8097_v1  ;;  %v8094_v32 = vsel %vm50_vm0, %v10369_v0, 0.0 }
0x5458   :  { %8095 = vadd.xlane.f32.xlu0 %v8094_v32 }
0x54e4   :  { %v8099_v22 = vpop.xlane.xlu1 %8098 }
0x54e5   :  { %10370 = vlog2.f32 %v8099_v22  ;;  %v8096_v2 = vpop.xlane.xlu0 %8095 }
0x54e6   :  { %10372 = vlog2.f32 %v8096_v2 }
0x54ef   :  { %v10371_v38 = vpop.eup %10370 }
0x54f0   :  { %v10373_v7 = vpop.eup %10372  ;;  %v8103_v12 = vmul.f32 0.6931472, %v10371_v38 }
0x54f1   :  { %v8101_v19 = vmul.f32 0.6931472, %v10373_v7 }
0x54f2   :  { %v8105_v16 = vsub.f32 %v8089_v28, %v8103_v12 }
0x54f3   :  { %v8104_v17 = vsub.f32 %v8088_v56, %v8101_v19 }
0x54f4   :  { %8109 = vst.msk [vmem:[#allocation6 + $0x8] sm:$0xff] %vm50_vm0, %v8105_v16 }
0x54f5   :  { %8108 = vst.msk [vmem:[#allocation6] sm:$0xff] %vm50_vm0, %v8104_v17 }
0x54f6   :  { %10420 = shalt.err (!%p10417_p12)
}
0x54f7   :  { %s10421_s21 = scalar_lea.hbm %s11466_s2, 256 }
0x54f8   :  { %p10422_p13 = scmp.ne.s32.totalorder %s11466_s2, %s10421_s21  ;;  %p10425_p0 = scmp.lt.u32.totalorder %s10421_s21, %s11466_s2 }
0x54fa   :  { %p10427_p1 = pnand %p10425_p0, %p10422_p13 }
0x54fc   :  { %10430 = shalt.err (!%p10427_p1)
}
0x54fd   :  { %8121 = dma.vmem_to_hbm [thread:$0]  %s8116_s15, 256, %s11466_s2, [#allocation5], %s10436_s19, %s10436_s19, %s10437_s20  }
0x54fe   :  { %10433 = dma.done.wait [#allocation5], 256  }
0x54ff   :  { %10434 = vsyncadd [#allocation5], 4294967040 }
0x5500   :  { %8125 = vsyncpa [#allocation4], 1 }
0x5501   :  { %8126 = vsyncpa [#allocation5], 1 }

</bundles_post_ra>
